<compile_context>
chip_gen: v5e
topology: v5e:2x2
jax: 0.10.0
libtpu: 0.0.40
codegen_flags: <defaults>
</compile_context>

<pallas_src>
import functools

import jax
import jax.numpy as jnp
from jax.experimental import pallas as pl
from jax.experimental.pallas import tpu as pltpu


_ALPHA = 0.2  # LeakyReLU negative slope


def _recon_kernel(x_ref, w1_ref, b1_ref, w2_ref, b2_ref, w3_ref, b3_ref,
                  w4_ref, b4_ref, o_ref, xp1, xp2, xp3, xp4, *, H, W, alpha):
    """Fused 4-layer 3x3 'same' conv + LeakyReLU for one batch image.

    x_ref  : (1, H, W, 64)     input tile (NHWC), f32
    wN_ref : (9*Cin, Cout)     layer-N weights (bf16), 9 taps stacked along K
             (w4_ref is (3, 3, 1, 16) f32: the Cout=1 layer is a VPU epilogue)
    bN_ref : (1, Cout) f32     (b4_ref is (1, 1))
    o_ref  : (1, H, W)         output tile (C_out == 1 dim dropped)
    xpN    : (H+2, W+2, C) f32 VMEM scratch = zero-padded input of layer N
    """
    # Zero the padded scratches ONCE.  The interior [1:H+1, 1:W+1] is fully
    # overwritten every grid step and the 1-px border is never written again,
    # so the zero border persists across the (sequential) batch grid.
    @pl.when(pl.program_id(0) == 0)
    def _zero_scratch():
        xp1[...] = jnp.zeros_like(xp1)
        xp2[...] = jnp.zeros_like(xp2)
        xp3[...] = jnp.zeros_like(xp3)
        xp4[...] = jnp.zeros_like(xp4)

    # Layer-1 input: copy the (unpadded) block into the interior (in-kernel pad).
    xp1[1:H + 1, 1:W + 1, :] = x_ref[0]

    def conv3x3_leaky(xp_ref, wr_ref, b_ref, cin):
        """(H+2, W+2, cin) padded act -> (H*W, cout), one bf16 matmul, K=9*cin."""
        # Full 9-tap im2col slab, taps stacked along channels (dy-major,
        # dx, cin-minor — matches the wrapper's weight reshape).
        slab = jnp.concatenate(
            [xp_ref[dy:dy + H, dx:dx + W, :]
             for dy in range(3) for dx in range(3)],
            axis=-1).reshape(H * W, 9 * cin).astype(jnp.bfloat16)
        acc = jnp.dot(slab, wr_ref[...],            # bf16 x bf16 -> f32 acc
                      preferred_element_type=jnp.float32)
        acc = acc + b_ref[...]                      # (1, cout) f32 broadcasts
        return jnp.where(acc >= 0, acc, alpha * acc)

    y1 = conv3x3_leaky(xp1, w1_ref, b1_ref, 64)          # (H*W, 64)
    xp2[1:H + 1, 1:W + 1, :] = y1.reshape(H, W, 64)

    y2 = conv3x3_leaky(xp2, w2_ref, b2_ref, 64)          # (H*W, 32)
    xp3[1:H + 1, 1:W + 1, :] = y2.reshape(H, W, 32)

    y3 = conv3x3_leaky(xp3, w3_ref, b3_ref, 32)          # (H*W, 16)
    xp4[1:H + 1, 1:W + 1, :] = y3.reshape(H, W, 16)

    # Layer 4 (Cout = 1): f32 VPU multiply-accumulate epilogue + lane reduce
    # (an N=1 MXU matmul would use 1/128..1/256 of the MXU).
    acc4 = jnp.zeros((H, W, 16), jnp.float32)
    for dy in range(3):
        for dx in range(3):
            acc4 = acc4 + xp4[dy:dy + H, dx:dx + W, :] * w4_ref[dy, dx]
    out = jnp.sum(acc4, axis=-1) + b4_ref[...]           # (H, W)
    out = jnp.where(out >= 0, out, alpha * out)
    o_ref[...] = out.reshape(1, H, W).astype(o_ref.dtype)


def recon_forward(x_nchw, params):
    """Full Recon forward.  x_nchw: (B, 64, H, W) -> (B, 1, H, W)."""
    B, C, H, W = x_nchw.shape
    assert C == 64, C
    (w1, b1), (w2, b2), (w3, b3), (w4, b4) = params

    x = jnp.transpose(x_nchw, (0, 2, 3, 1))  # NCHW -> NHWC (one-time)

    # Reshape weights so all 9 taps stack along the contraction dim:
    # (3, 3, Cin, Cout) -> (9*Cin, Cout), dy-major / dx / cin-minor — matches
    # the in-kernel concat order.  Cast to bf16 for the MXU (acc stays f32).
    w1r = w1.reshape(9 * 64, 64).astype(jnp.bfloat16)
    w2r = w2.reshape(9 * 64, 32).astype(jnp.bfloat16)
    w3r = w3.reshape(9 * 32, 16).astype(jnp.bfloat16)
    w4r = w4.reshape(3, 3, 1, 16)            # Cout=1 layer -> f32 VPU epilogue

    kernel = functools.partial(_recon_kernel, H=H, W=W, alpha=_ALPHA)

    out = pl.pallas_call(
        kernel,
        out_shape=jax.ShapeDtypeStruct((B, H, W), x.dtype),
        grid=(B,),
        in_specs=[
            pl.BlockSpec((1, H, W, 64), lambda i: (i, 0, 0, 0)),
            pl.BlockSpec((9 * 64, 64), lambda i: (0, 0)),
            pl.BlockSpec((1, 64), lambda i: (0, 0)),
            pl.BlockSpec((9 * 64, 32), lambda i: (0, 0)),
            pl.BlockSpec((1, 32), lambda i: (0, 0)),
            pl.BlockSpec((9 * 32, 16), lambda i: (0, 0)),
            pl.BlockSpec((1, 16), lambda i: (0, 0)),
            pl.BlockSpec((3, 3, 1, 16), lambda i: (0, 0, 0, 0)),
            pl.BlockSpec((1, 1), lambda i: (0, 0)),
        ],
        out_specs=pl.BlockSpec((1, H, W), lambda i: (i, 0, 0)),
        scratch_shapes=[
            pltpu.VMEM((H + 2, W + 2, 64), jnp.float32),   # padded layer-1 in
            pltpu.VMEM((H + 2, W + 2, 64), jnp.float32),   # padded layer-2 in
            pltpu.VMEM((H + 2, W + 2, 32), jnp.float32),   # padded layer-3 in
            pltpu.VMEM((H + 2, W + 2, 16), jnp.float32),   # padded layer-4 in
        ],
        compiler_params=pltpu.CompilerParams(
            # Sequential batch axis: the zero-once scratch-border trick needs
            # the whole grid on one core (a megacore "parallel" split would
            # leave the second core's border uninitialized).  Neutral on
            # 1-TC chips; for v7x add an H-tile parallel axis instead.
            dimension_semantics=("arbitrary",),
            vmem_limit_bytes=64 * 1024 * 1024),
    )(x, w1r, b1.reshape(1, 64), w2r, b2.reshape(1, 32),
      w3r, b3.reshape(1, 16), w4r, b4.reshape(1, 1))

    # C_out == 1, so the (B, H, W) result is already in NCHW element order.
    return out.reshape(B, 1, H, W)


def init_recon_params(key):
    """Deterministic synthetic parameters matching the PyTorch module shapes."""
    chans = [(64, 64), (64, 32), (32, 16), (16, 1)]
    params = []
    for (cin, cout) in chans:
        key, kw, kb = jax.random.split(key, 3)
        fan_in = cin * 9
        bound = 1.0 / jnp.sqrt(fan_in)
        # weights stored as (3, 3, Cin, Cout) for the NHWC kernel
        w = jax.random.uniform(kw, (3, 3, cin, cout), jnp.float32, -bound, bound)
        b = jax.random.uniform(kb, (cout,), jnp.float32, -bound, bound)
        params.append((w, b))
    return params


def _reference_forward(x_nchw, params):
    """Pure-JAX f32 reference (lax.conv) for correctness checking."""
    x = x_nchw
    for (w, b) in params:
        w_oihw = jnp.transpose(w, (3, 2, 0, 1))   # (3,3,Cin,Cout) -> OIHW
        y = jax.lax.conv_general_dilated(
            x, w_oihw, window_strides=(1, 1), padding="SAME",
            dimension_numbers=("NCHW", "OIHW", "NCHW"))
        y = y + b.reshape(1, -1, 1, 1)
        x = jnp.where(y >= 0, y, _ALPHA * y)
    return x


if __name__ == "__main__":
    key = jax.random.PRNGKey(0)
    kx, kp = jax.random.split(key)

    B, C, H, W = 2, 64, 16, 16
    x = jax.random.normal(kx, (B, C, H, W), jnp.float32)
    params = init_recon_params(kp)

    out = jax.block_until_ready(recon_forward(x, params))

    ref = _reference_forward(x, params)
    assert out.shape == (B, 1, H, W), out.shape
    max_err = float(jnp.max(jnp.abs(out - ref)))
    # bf16 MXU operands (f32 accumulation) vs. an all-f32 reference: loosened
    # tolerance per the performance review.
    assert jnp.allclose(out, ref, atol=2e-2, rtol=2e-2), max_err

    print("KERNEL_OK")
</pallas_src>

<mosaic_0001>
module attributes {stable_mosaic.version = 11 : i64} {
  func.func @_recon_kernel(%arg0: i32, %arg1: memref<1x16x16x64xf32, #tpu.memory_space<vmem>>, %arg2: memref<576x64xbf16, #tpu.memory_space<vmem>>, %arg3: memref<1x64xf32, #tpu.memory_space<vmem>>, %arg4: memref<576x32xbf16, #tpu.memory_space<vmem>>, %arg5: memref<1x32xf32, #tpu.memory_space<vmem>>, %arg6: memref<288x16xbf16, #tpu.memory_space<vmem>>, %arg7: memref<1x16xf32, #tpu.memory_space<vmem>>, %arg8: memref<3x3x1x16xf32, #tpu.memory_space<vmem>>, %arg9: memref<1x1xf32, #tpu.memory_space<vmem>>, %arg10: memref<1x16x16xf32, #tpu.memory_space<vmem>>, %arg11: memref<18x18x64xf32, #tpu.memory_space<vmem>>, %arg12: memref<18x18x64xf32, #tpu.memory_space<vmem>>, %arg13: memref<18x18x32xf32, #tpu.memory_space<vmem>>, %arg14: memref<18x18x16xf32, #tpu.memory_space<vmem>>) attributes {dimension_semantics = [#tpu.dimension_semantics<arbitrary>], iteration_bounds = array<i64: 2>, scalar_prefetch = 0 : i64, scratch_operands = 4 : i64, tpu.core_type = #tpu.core_type<tc>, window_params = [{transform_indices = @transform_0, window_bounds = array<i64: 1, 16, 16, 64>}, {pipeline_mode = #tpu.pipeline_mode<synchronous>, transform_indices = @transform_1, window_bounds = array<i64: 576, 64>}, {pipeline_mode = #tpu.pipeline_mode<synchronous>, transform_indices = @transform_2, window_bounds = array<i64: 1, 64>}, {pipeline_mode = #tpu.pipeline_mode<synchronous>, transform_indices = @transform_3, window_bounds = array<i64: 576, 32>}, {pipeline_mode = #tpu.pipeline_mode<synchronous>, transform_indices = @transform_4, window_bounds = array<i64: 1, 32>}, {pipeline_mode = #tpu.pipeline_mode<synchronous>, transform_indices = @transform_5, window_bounds = array<i64: 288, 16>}, {pipeline_mode = #tpu.pipeline_mode<synchronous>, transform_indices = @transform_6, window_bounds = array<i64: 1, 16>}, {pipeline_mode = #tpu.pipeline_mode<synchronous>, transform_indices = @transform_7, window_bounds = array<i64: 3, 3, 1, 16>}, {pipeline_mode = #tpu.pipeline_mode<synchronous>, transform_indices = @transform_8, window_bounds = array<i64: 1, 1>}, {transform_indices = @transform_9, window_bounds = array<i64: 1, 16, 16>}]} {
    %c0_i32 = arith.constant 0 : i32
    %0 = arith.cmpi eq, %arg0, %c0_i32 : i32
    %1 = arith.extui %0 : i1 to i32
    %c0_i32_0 = arith.constant 0 : i32
    %2 = arith.cmpi ne, %1, %c0_i32_0 : i32
    scf.if %2 {
      %cst_187 = arith.constant 0.000000e+00 : f32
      %153 = vector.broadcast %cst_187 : f32 to vector<18x18x64xf32>
      %c0_188 = arith.constant 0 : index
      %c0_189 = arith.constant 0 : index
      %c0_190 = arith.constant 0 : index
      %154 = vector.load %arg11[%c0_188, %c0_189, %c0_190] : memref<18x18x64xf32, #tpu.memory_space<vmem>>, vector<18x18x64xf32>
      tpu.vector_store %arg11[%c0_188, %c0_189, %c0_190], %153 {strides = array<i32>} : memref<18x18x64xf32, #tpu.memory_space<vmem>>, vector<18x18x64xf32>,
      %cst_191 = arith.constant 0.000000e+00 : f32
      %155 = vector.broadcast %cst_191 : f32 to vector<18x18x64xf32>
      %c0_192 = arith.constant 0 : index
      %c0_193 = arith.constant 0 : index
      %c0_194 = arith.constant 0 : index
      %156 = vector.load %arg12[%c0_192, %c0_193, %c0_194] : memref<18x18x64xf32, #tpu.memory_space<vmem>>, vector<18x18x64xf32>
      tpu.vector_store %arg12[%c0_192, %c0_193, %c0_194], %155 {strides = array<i32>} : memref<18x18x64xf32, #tpu.memory_space<vmem>>, vector<18x18x64xf32>,
      %cst_195 = arith.constant 0.000000e+00 : f32
      %157 = vector.broadcast %cst_195 : f32 to vector<18x18x32xf32>
      %c0_196 = arith.constant 0 : index
      %c0_197 = arith.constant 0 : index
      %c0_198 = arith.constant 0 : index
      %158 = vector.load %arg13[%c0_196, %c0_197, %c0_198] : memref<18x18x32xf32, #tpu.memory_space<vmem>>, vector<18x18x32xf32>
      tpu.vector_store %arg13[%c0_196, %c0_197, %c0_198], %157 {strides = array<i32>} : memref<18x18x32xf32, #tpu.memory_space<vmem>>, vector<18x18x32xf32>,
      %cst_199 = arith.constant 0.000000e+00 : f32
      %159 = vector.broadcast %cst_199 : f32 to vector<18x18x16xf32>
      %c0_200 = arith.constant 0 : index
      %c0_201 = arith.constant 0 : index
      %c0_202 = arith.constant 0 : index
      %160 = vector.load %arg14[%c0_200, %c0_201, %c0_202] : memref<18x18x16xf32, #tpu.memory_space<vmem>>, vector<18x18x16xf32>
      tpu.vector_store %arg14[%c0_200, %c0_201, %c0_202], %159 {strides = array<i32>} : memref<18x18x16xf32, #tpu.memory_space<vmem>>, vector<18x18x16xf32>,
    } else {
    }
    %c0 = arith.constant 0 : index
    %c0_1 = arith.constant 0 : index
    %c0_2 = arith.constant 0 : index
    %c0_3 = arith.constant 0 : index
    %3 = vector.load %arg1[%c0, %c0_1, %c0_2, %c0_3] : memref<1x16x16x64xf32, #tpu.memory_space<vmem>>, vector<1x16x16x64xf32>
    %4 = vector.shape_cast %3 : vector<1x16x16x64xf32> to vector<16x16x64xf32>
    %c1 = arith.constant 1 : index
    %c1_4 = arith.constant 1 : index
    %c0_5 = arith.constant 0 : index
    %5 = vector.load %arg11[%c1, %c1_4, %c0_5] : memref<18x18x64xf32, #tpu.memory_space<vmem>>, vector<16x16x64xf32>
    tpu.vector_store %arg11[%c1, %c1_4, %c0_5], %4 {strides = array<i32>} : memref<18x18x64xf32, #tpu.memory_space<vmem>>, vector<16x16x64xf32>,
    %c0_6 = arith.constant 0 : index
    %c0_7 = arith.constant 0 : index
    %c0_8 = arith.constant 0 : index
    %6 = vector.load %arg11[%c0_6, %c0_7, %c0_8] : memref<18x18x64xf32, #tpu.memory_space<vmem>>, vector<16x16x64xf32>
    %c0_9 = arith.constant 0 : index
    %c1_10 = arith.constant 1 : index
    %c0_11 = arith.constant 0 : index
    %7 = vector.load %arg11[%c0_9, %c1_10, %c0_11] : memref<18x18x64xf32, #tpu.memory_space<vmem>>, vector<16x16x64xf32>
    %c0_12 = arith.constant 0 : index
    %c2 = arith.constant 2 : index
    %c0_13 = arith.constant 0 : index
    %8 = vector.load %arg11[%c0_12, %c2, %c0_13] : memref<18x18x64xf32, #tpu.memory_space<vmem>>, vector<16x16x64xf32>
    %c1_14 = arith.constant 1 : index
    %c0_15 = arith.constant 0 : index
    %c0_16 = arith.constant 0 : index
    %9 = vector.load %arg11[%c1_14, %c0_15, %c0_16] : memref<18x18x64xf32, #tpu.memory_space<vmem>>, vector<16x16x64xf32>
    %c1_17 = arith.constant 1 : index
    %c1_18 = arith.constant 1 : index
    %c0_19 = arith.constant 0 : index
    %10 = vector.load %arg11[%c1_17, %c1_18, %c0_19] : memref<18x18x64xf32, #tpu.memory_space<vmem>>, vector<16x16x64xf32>
    %c1_20 = arith.constant 1 : index
    %c2_21 = arith.constant 2 : index
    %c0_22 = arith.constant 0 : index
    %11 = vector.load %arg11[%c1_20, %c2_21, %c0_22] : memref<18x18x64xf32, #tpu.memory_space<vmem>>, vector<16x16x64xf32>
    %c2_23 = arith.constant 2 : index
    %c0_24 = arith.constant 0 : index
    %c0_25 = arith.constant 0 : index
    %12 = vector.load %arg11[%c2_23, %c0_24, %c0_25] : memref<18x18x64xf32, #tpu.memory_space<vmem>>, vector<16x16x64xf32>
    %c2_26 = arith.constant 2 : index
    %c1_27 = arith.constant 1 : index
    %c0_28 = arith.constant 0 : index
    %13 = vector.load %arg11[%c2_26, %c1_27, %c0_28] : memref<18x18x64xf32, #tpu.memory_space<vmem>>, vector<16x16x64xf32>
    %c2_29 = arith.constant 2 : index
    %c2_30 = arith.constant 2 : index
    %c0_31 = arith.constant 0 : index
    %14 = vector.load %arg11[%c2_29, %c2_30, %c0_31] : memref<18x18x64xf32, #tpu.memory_space<vmem>>, vector<16x16x64xf32>
    %15 = tpu.concatenate %6, %7, %8, %9, %10, %11, %12, %13, %14 in 2 : vector<16x16x64xf32>, vector<16x16x64xf32>, vector<16x16x64xf32>, vector<16x16x64xf32>, vector<16x16x64xf32>, vector<16x16x64xf32>, vector<16x16x64xf32>, vector<16x16x64xf32>, vector<16x16x64xf32> -> vector<16x16x576xf32>
    %16 = vector.shape_cast %15 : vector<16x16x576xf32> to vector<256x576xf32>
    %17 = arith.truncf %16 : vector<256x576xf32> to vector<256x576xbf16>
    %c0_32 = arith.constant 0 : index
    %c0_33 = arith.constant 0 : index
    %18 = vector.load %arg2[%c0_32, %c0_33] : memref<576x64xbf16, #tpu.memory_space<vmem>>, vector<576x64xbf16>
    %cst = arith.constant dense<0.000000e+00> : vector<256x64xf32>
    %19 = tpu.matmul %17, %18, %cst {dimension_numbers = #tpu.dot_dimension_numbers<[1], [0], [0], [1], [0, 0, 1, 1], [], []>} : vector<256x576xbf16>, vector<576x64xbf16>, vector<256x64xf32> -> vector<256x64xf32>
    %c0_34 = arith.constant 0 : index
    %c0_35 = arith.constant 0 : index
    %20 = vector.load %arg3[%c0_34, %c0_35] : memref<1x64xf32, #tpu.memory_space<vmem>>, vector<1x64xf32>
    %21 = vector.broadcast %20 : vector<1x64xf32> to vector<256x64xf32>
    %22 = arith.addf %19, %21 : vector<256x64xf32>
    %cst_36 = arith.constant 0.000000e+00 : f32
    %23 = vector.broadcast %cst_36 : f32 to vector<256x64xf32>
    %24 = arith.cmpf oge, %22, %23 : vector<256x64xf32>
    %cst_37 = arith.constant 2.000000e-01 : f32
    %25 = vector.broadcast %cst_37 : f32 to vector<256x64xf32>
    %26 = arith.mulf %25, %22 : vector<256x64xf32>
    %27 = arith.select %24, %22, %26 : vector<256x64xi1>, vector<256x64xf32>
    %28 = vector.shape_cast %27 : vector<256x64xf32> to vector<16x16x64xf32>
    %c1_38 = arith.constant 1 : index
    %c1_39 = arith.constant 1 : index
    %c0_40 = arith.constant 0 : index
    %29 = vector.load %arg12[%c1_38, %c1_39, %c0_40] : memref<18x18x64xf32, #tpu.memory_space<vmem>>, vector<16x16x64xf32>
    tpu.vector_store %arg12[%c1_38, %c1_39, %c0_40], %28 {strides = array<i32>} : memref<18x18x64xf32, #tpu.memory_space<vmem>>, vector<16x16x64xf32>,
    %c0_41 = arith.constant 0 : index
    %c0_42 = arith.constant 0 : index
    %c0_43 = arith.constant 0 : index
    %30 = vector.load %arg12[%c0_41, %c0_42, %c0_43] : memref<18x18x64xf32, #tpu.memory_space<vmem>>, vector<16x16x64xf32>
    %c0_44 = arith.constant 0 : index
    %c1_45 = arith.constant 1 : index
    %c0_46 = arith.constant 0 : index
    %31 = vector.load %arg12[%c0_44, %c1_45, %c0_46] : memref<18x18x64xf32, #tpu.memory_space<vmem>>, vector<16x16x64xf32>
    %c0_47 = arith.constant 0 : index
    %c2_48 = arith.constant 2 : index
    %c0_49 = arith.constant 0 : index
    %32 = vector.load %arg12[%c0_47, %c2_48, %c0_49] : memref<18x18x64xf32, #tpu.memory_space<vmem>>, vector<16x16x64xf32>
    %c1_50 = arith.constant 1 : index
    %c0_51 = arith.constant 0 : index
    %c0_52 = arith.constant 0 : index
    %33 = vector.load %arg12[%c1_50, %c0_51, %c0_52] : memref<18x18x64xf32, #tpu.memory_space<vmem>>, vector<16x16x64xf32>
    %c1_53 = arith.constant 1 : index
    %c1_54 = arith.constant 1 : index
    %c0_55 = arith.constant 0 : index
    %34 = vector.load %arg12[%c1_53, %c1_54, %c0_55] : memref<18x18x64xf32, #tpu.memory_space<vmem>>, vector<16x16x64xf32>
    %c1_56 = arith.constant 1 : index
    %c2_57 = arith.constant 2 : index
    %c0_58 = arith.constant 0 : index
    %35 = vector.load %arg12[%c1_56, %c2_57, %c0_58] : memref<18x18x64xf32, #tpu.memory_space<vmem>>, vector<16x16x64xf32>
    %c2_59 = arith.constant 2 : index
    %c0_60 = arith.constant 0 : index
    %c0_61 = arith.constant 0 : index
    %36 = vector.load %arg12[%c2_59, %c0_60, %c0_61] : memref<18x18x64xf32, #tpu.memory_space<vmem>>, vector<16x16x64xf32>
    %c2_62 = arith.constant 2 : index
    %c1_63 = arith.constant 1 : index
    %c0_64 = arith.constant 0 : index
    %37 = vector.load %arg12[%c2_62, %c1_63, %c0_64] : memref<18x18x64xf32, #tpu.memory_space<vmem>>, vector<16x16x64xf32>
    %c2_65 = arith.constant 2 : index
    %c2_66 = arith.constant 2 : index
    %c0_67 = arith.constant 0 : index
    %38 = vector.load %arg12[%c2_65, %c2_66, %c0_67] : memref<18x18x64xf32, #tpu.memory_space<vmem>>, vector<16x16x64xf32>
    %39 = tpu.concatenate %30, %31, %32, %33, %34, %35, %36, %37, %38 in 2 : vector<16x16x64xf32>, vector<16x16x64xf32>, vector<16x16x64xf32>, vector<16x16x64xf32>, vector<16x16x64xf32>, vector<16x16x64xf32>, vector<16x16x64xf32>, vector<16x16x64xf32>, vector<16x16x64xf32> -> vector<16x16x576xf32>
    %40 = vector.shape_cast %39 : vector<16x16x576xf32> to vector<256x576xf32>
    %41 = arith.truncf %40 : vector<256x576xf32> to vector<256x576xbf16>
    %c0_68 = arith.constant 0 : index
    %c0_69 = arith.constant 0 : index
    %42 = vector.load %arg4[%c0_68, %c0_69] : memref<576x32xbf16, #tpu.memory_space<vmem>>, vector<576x32xbf16>
    %cst_70 = arith.constant dense<0.000000e+00> : vector<256x32xf32>
    %43 = tpu.matmul %41, %42, %cst_70 {dimension_numbers = #tpu.dot_dimension_numbers<[1], [0], [0], [1], [0, 0, 1, 1], [], []>} : vector<256x576xbf16>, vector<576x32xbf16>, vector<256x32xf32> -> vector<256x32xf32>
    %c0_71 = arith.constant 0 : index
    %c0_72 = arith.constant 0 : index
    %44 = vector.load %arg5[%c0_71, %c0_72] : memref<1x32xf32, #tpu.memory_space<vmem>>, vector<1x32xf32>
    %45 = vector.broadcast %44 : vector<1x32xf32> to vector<256x32xf32>
    %46 = arith.addf %43, %45 : vector<256x32xf32>
    %cst_73 = arith.constant 0.000000e+00 : f32
    %47 = vector.broadcast %cst_73 : f32 to vector<256x32xf32>
    %48 = arith.cmpf oge, %46, %47 : vector<256x32xf32>
    %cst_74 = arith.constant 2.000000e-01 : f32
    %49 = vector.broadcast %cst_74 : f32 to vector<256x32xf32>
    %50 = arith.mulf %49, %46 : vector<256x32xf32>
    %51 = arith.select %48, %46, %50 : vector<256x32xi1>, vector<256x32xf32>
    %52 = vector.shape_cast %51 : vector<256x32xf32> to vector<16x16x32xf32>
    %c1_75 = arith.constant 1 : index
    %c1_76 = arith.constant 1 : index
    %c0_77 = arith.constant 0 : index
    %53 = vector.load %arg13[%c1_75, %c1_76, %c0_77] : memref<18x18x32xf32, #tpu.memory_space<vmem>>, vector<16x16x32xf32>
    tpu.vector_store %arg13[%c1_75, %c1_76, %c0_77], %52 {strides = array<i32>} : memref<18x18x32xf32, #tpu.memory_space<vmem>>, vector<16x16x32xf32>,
    %c0_78 = arith.constant 0 : index
    %c0_79 = arith.constant 0 : index
    %c0_80 = arith.constant 0 : index
    %54 = vector.load %arg13[%c0_78, %c0_79, %c0_80] : memref<18x18x32xf32, #tpu.memory_space<vmem>>, vector<16x16x32xf32>
    %c0_81 = arith.constant 0 : index
    %c1_82 = arith.constant 1 : index
    %c0_83 = arith.constant 0 : index
    %55 = vector.load %arg13[%c0_81, %c1_82, %c0_83] : memref<18x18x32xf32, #tpu.memory_space<vmem>>, vector<16x16x32xf32>
    %c0_84 = arith.constant 0 : index
    %c2_85 = arith.constant 2 : index
    %c0_86 = arith.constant 0 : index
    %56 = vector.load %arg13[%c0_84, %c2_85, %c0_86] : memref<18x18x32xf32, #tpu.memory_space<vmem>>, vector<16x16x32xf32>
    %c1_87 = arith.constant 1 : index
    %c0_88 = arith.constant 0 : index
    %c0_89 = arith.constant 0 : index
    %57 = vector.load %arg13[%c1_87, %c0_88, %c0_89] : memref<18x18x32xf32, #tpu.memory_space<vmem>>, vector<16x16x32xf32>
    %c1_90 = arith.constant 1 : index
    %c1_91 = arith.constant 1 : index
    %c0_92 = arith.constant 0 : index
    %58 = vector.load %arg13[%c1_90, %c1_91, %c0_92] : memref<18x18x32xf32, #tpu.memory_space<vmem>>, vector<16x16x32xf32>
    %c1_93 = arith.constant 1 : index
    %c2_94 = arith.constant 2 : index
    %c0_95 = arith.constant 0 : index
    %59 = vector.load %arg13[%c1_93, %c2_94, %c0_95] : memref<18x18x32xf32, #tpu.memory_space<vmem>>, vector<16x16x32xf32>
    %c2_96 = arith.constant 2 : index
    %c0_97 = arith.constant 0 : index
    %c0_98 = arith.constant 0 : index
    %60 = vector.load %arg13[%c2_96, %c0_97, %c0_98] : memref<18x18x32xf32, #tpu.memory_space<vmem>>, vector<16x16x32xf32>
    %c2_99 = arith.constant 2 : index
    %c1_100 = arith.constant 1 : index
    %c0_101 = arith.constant 0 : index
    %61 = vector.load %arg13[%c2_99, %c1_100, %c0_101] : memref<18x18x32xf32, #tpu.memory_space<vmem>>, vector<16x16x32xf32>
    %c2_102 = arith.constant 2 : index
    %c2_103 = arith.constant 2 : index
    %c0_104 = arith.constant 0 : index
    %62 = vector.load %arg13[%c2_102, %c2_103, %c0_104] : memref<18x18x32xf32, #tpu.memory_space<vmem>>, vector<16x16x32xf32>
    %63 = tpu.concatenate %54, %55, %56, %57, %58, %59, %60, %61, %62 in 2 : vector<16x16x32xf32>, vector<16x16x32xf32>, vector<16x16x32xf32>, vector<16x16x32xf32>, vector<16x16x32xf32>, vector<16x16x32xf32>, vector<16x16x32xf32>, vector<16x16x32xf32>, vector<16x16x32xf32> -> vector<16x16x288xf32>
    %64 = vector.shape_cast %63 : vector<16x16x288xf32> to vector<256x288xf32>
    %65 = arith.truncf %64 : vector<256x288xf32> to vector<256x288xbf16>
    %c0_105 = arith.constant 0 : index
    %c0_106 = arith.constant 0 : index
    %66 = vector.load %arg6[%c0_105, %c0_106] : memref<288x16xbf16, #tpu.memory_space<vmem>>, vector<288x16xbf16>
    %cst_107 = arith.constant dense<0.000000e+00> : vector<256x16xf32>
    %67 = tpu.matmul %65, %66, %cst_107 {dimension_numbers = #tpu.dot_dimension_numbers<[1], [0], [0], [1], [0, 0, 1, 1], [], []>} : vector<256x288xbf16>, vector<288x16xbf16>, vector<256x16xf32> -> vector<256x16xf32>
    %c0_108 = arith.constant 0 : index
    %c0_109 = arith.constant 0 : index
    %68 = vector.load %arg7[%c0_108, %c0_109] : memref<1x16xf32, #tpu.memory_space<vmem>>, vector<1x16xf32>
    %69 = vector.broadcast %68 : vector<1x16xf32> to vector<256x16xf32>
    %70 = arith.addf %67, %69 : vector<256x16xf32>
    %cst_110 = arith.constant 0.000000e+00 : f32
    %71 = vector.broadcast %cst_110 : f32 to vector<256x16xf32>
    %72 = arith.cmpf oge, %70, %71 : vector<256x16xf32>
    %cst_111 = arith.constant 2.000000e-01 : f32
    %73 = vector.broadcast %cst_111 : f32 to vector<256x16xf32>
    %74 = arith.mulf %73, %70 : vector<256x16xf32>
    %75 = arith.select %72, %70, %74 : vector<256x16xi1>, vector<256x16xf32>
    %76 = vector.shape_cast %75 : vector<256x16xf32> to vector<16x16x16xf32>
    %c1_112 = arith.constant 1 : index
    %c1_113 = arith.constant 1 : index
    %c0_114 = arith.constant 0 : index
    %77 = vector.load %arg14[%c1_112, %c1_113, %c0_114] : memref<18x18x16xf32, #tpu.memory_space<vmem>>, vector<16x16x16xf32>
    tpu.vector_store %arg14[%c1_112, %c1_113, %c0_114], %76 {strides = array<i32>} : memref<18x18x16xf32, #tpu.memory_space<vmem>>, vector<16x16x16xf32>,
    %cst_115 = arith.constant 0.000000e+00 : f32
    %78 = vector.broadcast %cst_115 : f32 to vector<16x16x16xf32>
    %c0_116 = arith.constant 0 : index
    %c0_117 = arith.constant 0 : index
    %c0_118 = arith.constant 0 : index
    %79 = vector.load %arg14[%c0_116, %c0_117, %c0_118] : memref<18x18x16xf32, #tpu.memory_space<vmem>>, vector<16x16x16xf32>
    %c0_119 = arith.constant 0 : index
    %c0_120 = arith.constant 0 : index
    %c0_121 = arith.constant 0 : index
    %c0_122 = arith.constant 0 : index
    %80 = vector.load %arg8[%c0_119, %c0_120, %c0_121, %c0_122] : memref<3x3x1x16xf32, #tpu.memory_space<vmem>>, vector<1x1x1x16xf32>
    %81 = vector.shape_cast %80 : vector<1x1x1x16xf32> to vector<1x16xf32>
    %82 = vector.shape_cast %81 : vector<1x16xf32> to vector<1x1x16xf32>
    %83 = vector.broadcast %82 : vector<1x1x16xf32> to vector<16x16x16xf32>
    %84 = arith.mulf %79, %83 : vector<16x16x16xf32>
    %85 = arith.addf %78, %84 : vector<16x16x16xf32>
    %c0_123 = arith.constant 0 : index
    %c1_124 = arith.constant 1 : index
    %c0_125 = arith.constant 0 : index
    %86 = vector.load %arg14[%c0_123, %c1_124, %c0_125] : memref<18x18x16xf32, #tpu.memory_space<vmem>>, vector<16x16x16xf32>
    %c0_126 = arith.constant 0 : index
    %c1_127 = arith.constant 1 : index
    %c0_128 = arith.constant 0 : index
    %c0_129 = arith.constant 0 : index
    %87 = vector.load %arg8[%c0_126, %c1_127, %c0_128, %c0_129] : memref<3x3x1x16xf32, #tpu.memory_space<vmem>>, vector<1x1x1x16xf32>
    %88 = vector.shape_cast %87 : vector<1x1x1x16xf32> to vector<1x16xf32>
    %89 = vector.shape_cast %88 : vector<1x16xf32> to vector<1x1x16xf32>
    %90 = vector.broadcast %89 : vector<1x1x16xf32> to vector<16x16x16xf32>
    %91 = arith.mulf %86, %90 : vector<16x16x16xf32>
    %92 = arith.addf %85, %91 : vector<16x16x16xf32>
    %c0_130 = arith.constant 0 : index
    %c2_131 = arith.constant 2 : index
    %c0_132 = arith.constant 0 : index
    %93 = vector.load %arg14[%c0_130, %c2_131, %c0_132] : memref<18x18x16xf32, #tpu.memory_space<vmem>>, vector<16x16x16xf32>
    %c0_133 = arith.constant 0 : index
    %c2_134 = arith.constant 2 : index
    %c0_135 = arith.constant 0 : index
    %c0_136 = arith.constant 0 : index
    %94 = vector.load %arg8[%c0_133, %c2_134, %c0_135, %c0_136] : memref<3x3x1x16xf32, #tpu.memory_space<vmem>>, vector<1x1x1x16xf32>
    %95 = vector.shape_cast %94 : vector<1x1x1x16xf32> to vector<1x16xf32>
    %96 = vector.shape_cast %95 : vector<1x16xf32> to vector<1x1x16xf32>
    %97 = vector.broadcast %96 : vector<1x1x16xf32> to vector<16x16x16xf32>
    %98 = arith.mulf %93, %97 : vector<16x16x16xf32>
    %99 = arith.addf %92, %98 : vector<16x16x16xf32>
    %c1_137 = arith.constant 1 : index
    %c0_138 = arith.constant 0 : index
    %c0_139 = arith.constant 0 : index
    %100 = vector.load %arg14[%c1_137, %c0_138, %c0_139] : memref<18x18x16xf32, #tpu.memory_space<vmem>>, vector<16x16x16xf32>
    %c1_140 = arith.constant 1 : index
    %c0_141 = arith.constant 0 : index
    %c0_142 = arith.constant 0 : index
    %c0_143 = arith.constant 0 : index
    %101 = vector.load %arg8[%c1_140, %c0_141, %c0_142, %c0_143] : memref<3x3x1x16xf32, #tpu.memory_space<vmem>>, vector<1x1x1x16xf32>
    %102 = vector.shape_cast %101 : vector<1x1x1x16xf32> to vector<1x16xf32>
    %103 = vector.shape_cast %102 : vector<1x16xf32> to vector<1x1x16xf32>
    %104 = vector.broadcast %103 : vector<1x1x16xf32> to vector<16x16x16xf32>
    %105 = arith.mulf %100, %104 : vector<16x16x16xf32>
    %106 = arith.addf %99, %105 : vector<16x16x16xf32>
    %c1_144 = arith.constant 1 : index
    %c1_145 = arith.constant 1 : index
    %c0_146 = arith.constant 0 : index
    %107 = vector.load %arg14[%c1_144, %c1_145, %c0_146] : memref<18x18x16xf32, #tpu.memory_space<vmem>>, vector<16x16x16xf32>
    %c1_147 = arith.constant 1 : index
    %c1_148 = arith.constant 1 : index
    %c0_149 = arith.constant 0 : index
    %c0_150 = arith.constant 0 : index
    %108 = vector.load %arg8[%c1_147, %c1_148, %c0_149, %c0_150] : memref<3x3x1x16xf32, #tpu.memory_space<vmem>>, vector<1x1x1x16xf32>
    %109 = vector.shape_cast %108 : vector<1x1x1x16xf32> to vector<1x16xf32>
    %110 = vector.shape_cast %109 : vector<1x16xf32> to vector<1x1x16xf32>
    %111 = vector.broadcast %110 : vector<1x1x16xf32> to vector<16x16x16xf32>
    %112 = arith.mulf %107, %111 : vector<16x16x16xf32>
    %113 = arith.addf %106, %112 : vector<16x16x16xf32>
    %c1_151 = arith.constant 1 : index
    %c2_152 = arith.constant 2 : index
    %c0_153 = arith.constant 0 : index
    %114 = vector.load %arg14[%c1_151, %c2_152, %c0_153] : memref<18x18x16xf32, #tpu.memory_space<vmem>>, vector<16x16x16xf32>
    %c1_154 = arith.constant 1 : index
    %c2_155 = arith.constant 2 : index
    %c0_156 = arith.constant 0 : index
    %c0_157 = arith.constant 0 : index
    %115 = vector.load %arg8[%c1_154, %c2_155, %c0_156, %c0_157] : memref<3x3x1x16xf32, #tpu.memory_space<vmem>>, vector<1x1x1x16xf32>
    %116 = vector.shape_cast %115 : vector<1x1x1x16xf32> to vector<1x16xf32>
    %117 = vector.shape_cast %116 : vector<1x16xf32> to vector<1x1x16xf32>
    %118 = vector.broadcast %117 : vector<1x1x16xf32> to vector<16x16x16xf32>
    %119 = arith.mulf %114, %118 : vector<16x16x16xf32>
    %120 = arith.addf %113, %119 : vector<16x16x16xf32>
    %c2_158 = arith.constant 2 : index
    %c0_159 = arith.constant 0 : index
    %c0_160 = arith.constant 0 : index
    %121 = vector.load %arg14[%c2_158, %c0_159, %c0_160] : memref<18x18x16xf32, #tpu.memory_space<vmem>>, vector<16x16x16xf32>
    %c2_161 = arith.constant 2 : index
    %c0_162 = arith.constant 0 : index
    %c0_163 = arith.constant 0 : index
    %c0_164 = arith.constant 0 : index
    %122 = vector.load %arg8[%c2_161, %c0_162, %c0_163, %c0_164] : memref<3x3x1x16xf32, #tpu.memory_space<vmem>>, vector<1x1x1x16xf32>
    %123 = vector.shape_cast %122 : vector<1x1x1x16xf32> to vector<1x16xf32>
    %124 = vector.shape_cast %123 : vector<1x16xf32> to vector<1x1x16xf32>
    %125 = vector.broadcast %124 : vector<1x1x16xf32> to vector<16x16x16xf32>
    %126 = arith.mulf %121, %125 : vector<16x16x16xf32>
    %127 = arith.addf %120, %126 : vector<16x16x16xf32>
    %c2_165 = arith.constant 2 : index
    %c1_166 = arith.constant 1 : index
    %c0_167 = arith.constant 0 : index
    %128 = vector.load %arg14[%c2_165, %c1_166, %c0_167] : memref<18x18x16xf32, #tpu.memory_space<vmem>>, vector<16x16x16xf32>
    %c2_168 = arith.constant 2 : index
    %c1_169 = arith.constant 1 : index
    %c0_170 = arith.constant 0 : index
    %c0_171 = arith.constant 0 : index
    %129 = vector.load %arg8[%c2_168, %c1_169, %c0_170, %c0_171] : memref<3x3x1x16xf32, #tpu.memory_space<vmem>>, vector<1x1x1x16xf32>
    %130 = vector.shape_cast %129 : vector<1x1x1x16xf32> to vector<1x16xf32>
    %131 = vector.shape_cast %130 : vector<1x16xf32> to vector<1x1x16xf32>
    %132 = vector.broadcast %131 : vector<1x1x16xf32> to vector<16x16x16xf32>
    %133 = arith.mulf %128, %132 : vector<16x16x16xf32>
    %134 = arith.addf %127, %133 : vector<16x16x16xf32>
    %c2_172 = arith.constant 2 : index
    %c2_173 = arith.constant 2 : index
    %c0_174 = arith.constant 0 : index
    %135 = vector.load %arg14[%c2_172, %c2_173, %c0_174] : memref<18x18x16xf32, #tpu.memory_space<vmem>>, vector<16x16x16xf32>
    %c2_175 = arith.constant 2 : index
    %c2_176 = arith.constant 2 : index
    %c0_177 = arith.constant 0 : index
    %c0_178 = arith.constant 0 : index
    %136 = vector.load %arg8[%c2_175, %c2_176, %c0_177, %c0_178] : memref<3x3x1x16xf32, #tpu.memory_space<vmem>>, vector<1x1x1x16xf32>
    %137 = vector.shape_cast %136 : vector<1x1x1x16xf32> to vector<1x16xf32>
    %138 = vector.shape_cast %137 : vector<1x16xf32> to vector<1x1x16xf32>
    %139 = vector.broadcast %138 : vector<1x1x16xf32> to vector<16x16x16xf32>
    %140 = arith.mulf %135, %139 : vector<16x16x16xf32>
    %141 = arith.addf %134, %140 : vector<16x16x16xf32>
    %cst_179 = arith.constant dense<0.000000e+00> : vector<16x16xf32>
    %142 = vector.multi_reduction <add>, %141, %cst_179 [2] : vector<16x16x16xf32> to vector<16x16xf32>
    %c0_180 = arith.constant 0 : index
    %c0_181 = arith.constant 0 : index
    %143 = vector.load %arg9[%c0_180, %c0_181] : memref<1x1xf32, #tpu.memory_space<vmem>>, vector<1x1xf32>
    %144 = vector.broadcast %143 : vector<1x1xf32> to vector<16x16xf32>
    %145 = arith.addf %142, %144 : vector<16x16xf32>
    %cst_182 = arith.constant 0.000000e+00 : f32
    %146 = vector.broadcast %cst_182 : f32 to vector<16x16xf32>
    %147 = arith.cmpf oge, %145, %146 : vector<16x16xf32>
    %cst_183 = arith.constant 2.000000e-01 : f32
    %148 = vector.broadcast %cst_183 : f32 to vector<16x16xf32>
    %149 = arith.mulf %148, %145 : vector<16x16xf32>
    %150 = arith.select %147, %145, %149 : vector<16x16xi1>, vector<16x16xf32>
    %151 = vector.shape_cast %150 : vector<16x16xf32> to vector<1x16x16xf32>
    %c0_184 = arith.constant 0 : index
    %c0_185 = arith.constant 0 : index
    %c0_186 = arith.constant 0 : index
    %152 = vector.load %arg10[%c0_184, %c0_185, %c0_186] : memref<1x16x16xf32, #tpu.memory_space<vmem>>, vector<1x16x16xf32>
    tpu.vector_store %arg10[%c0_184, %c0_185, %c0_186], %151 {strides = array<i32>} : memref<1x16x16xf32, #tpu.memory_space<vmem>>, vector<1x16x16xf32>,
    return
  }
  func.func @transform_0(%arg0: i32) -> (i32, i32, i32, i32) {
    %c0_i32 = arith.constant 0 : i32
    %c0_i32_0 = arith.constant 0 : i32
    %c0_i32_1 = arith.constant 0 : i32
    %c0_i32_2 = arith.constant 0 : i32
    return %arg0, %c0_i32, %c0_i32_0, %c0_i32_1 : i32, i32, i32, i32
  }
  func.func @transform_1(%arg0: i32) -> (i32, i32) {
    %c0_i32 = arith.constant 0 : i32
    %c0_i32_0 = arith.constant 0 : i32
    %c0_i32_1 = arith.constant 0 : i32
    return %c0_i32, %c0_i32_0 : i32, i32
  }
  func.func @transform_2(%arg0: i32) -> (i32, i32) {
    %c0_i32 = arith.constant 0 : i32
    %c0_i32_0 = arith.constant 0 : i32
    %c0_i32_1 = arith.constant 0 : i32
    return %c0_i32, %c0_i32_0 : i32, i32
  }
  func.func @transform_3(%arg0: i32) -> (i32, i32) {
    %c0_i32 = arith.constant 0 : i32
    %c0_i32_0 = arith.constant 0 : i32
    %c0_i32_1 = arith.constant 0 : i32
    return %c0_i32, %c0_i32_0 : i32, i32
  }
  func.func @transform_4(%arg0: i32) -> (i32, i32) {
    %c0_i32 = arith.constant 0 : i32
    %c0_i32_0 = arith.constant 0 : i32
    %c0_i32_1 = arith.constant 0 : i32
    return %c0_i32, %c0_i32_0 : i32, i32
  }
  func.func @transform_5(%arg0: i32) -> (i32, i32) {
    %c0_i32 = arith.constant 0 : i32
    %c0_i32_0 = arith.constant 0 : i32
    %c0_i32_1 = arith.constant 0 : i32
    return %c0_i32, %c0_i32_0 : i32, i32
  }
  func.func @transform_6(%arg0: i32) -> (i32, i32) {
    %c0_i32 = arith.constant 0 : i32
    %c0_i32_0 = arith.constant 0 : i32
    %c0_i32_1 = arith.constant 0 : i32
    return %c0_i32, %c0_i32_0 : i32, i32
  }
  func.func @transform_7(%arg0: i32) -> (i32, i32, i32, i32) {
    %c0_i32 = arith.constant 0 : i32
    %c0_i32_0 = arith.constant 0 : i32
    %c0_i32_1 = arith.constant 0 : i32
    %c0_i32_2 = arith.constant 0 : i32
    %c0_i32_3 = arith.constant 0 : i32
    return %c0_i32, %c0_i32_0, %c0_i32_1, %c0_i32_2 : i32, i32, i32, i32
  }
  func.func @transform_8(%arg0: i32) -> (i32, i32) {
    %c0_i32 = arith.constant 0 : i32
    %c0_i32_0 = arith.constant 0 : i32
    %c0_i32_1 = arith.constant 0 : i32
    return %c0_i32, %c0_i32_0 : i32, i32
  }
  func.func @transform_9(%arg0: i32) -> (i32, i32, i32) {
    %c0_i32 = arith.constant 0 : i32
    %c0_i32_0 = arith.constant 0 : i32
    %c0_i32_1 = arith.constant 0 : i32
    return %arg0, %c0_i32, %c0_i32_0 : i32, i32, i32
  }
}

</mosaic_0001>

<bundles_post_ra>
// kernel: tpu_custom_call.1
= control target key start
LH: loop header
LB: loop body
LE: loop exit
PB: predicated region body
PF: predicated region fallthrough
CT: control target
= control target key end

     0   :  { %s14501_s0 = inlined_call_operand.vmem [shape: f32[2,16,16,64], index: 0, kind: input, shape index: {}]   ;;  %s14502_s1 = inlined_call_operand.vmem [shape: bf16[576,64], index: 1, kind: input, shape index: {}]   ;;  %s14503_s2 = inlined_call_operand.vmem [shape: f32[1,64], index: 2, kind: input, shape index: {}]   ;;  %s14504_s3 = inlined_call_operand.vmem [shape: bf16[576,32], index: 3, kind: input, shape index: {}]   ;;  %s14505_s4 = inlined_call_operand.vmem [shape: f32[1,32], index: 4, kind: input, shape index: {}]   ;;  %s14506_s5 = inlined_call_operand.vmem [shape: bf16[288,16], index: 5, kind: input, shape index: {}]   ;;  %s14507_s6 = inlined_call_operand.vmem [shape: f32[1,16], index: 6, kind: input, shape index: {}]   ;;  %s14508_s7 = inlined_call_operand.vmem [shape: f32[3,3,1,16], index: 7, kind: input, shape index: {}]   ;;  %s14509_s8 = inlined_call_operand.<no memory space> [shape: f32[1,1], index: 8, kind: input, shape index: {}]   ;;  %s14510_s9 = inlined_call_operand.hbm [shape: f32[2,16,16], index: 9, kind: output, shape index: {}]  }
   0x1   :  { %v14_v0 = vstv %s14509_s8 }
   0x2   :  { %15 = vst [vmem:[#allocation6] sm:$0x1] %v14_v0 }
   0x3   :  { %16 = vsyncpa [#allocation8], 0 }
   0x4   :  { %18 = vsyncpa [#allocation8 + $0x1], 0  ;;  %s9582_s11 = smov 0   ;;  %s9584_s12 = smov 0  }
   0x5   :  { %s9586_s13 = smov 0   ;;  %s9588_s14 = smov 0  }
   0x6 LB: > { %s9603_s8 = sadd.s32 4294967295, %s9520_s14   ;;  %s7691_s15 = sadd.s32 4294967294, %s9520_s14   ;;  %s9520_s14 = sphi %s9588_s14, %s14593_s14   ;;  %s9516_s13 = sphi %s9586_s13, %s14592_s13   ;;  %s9512_s12 = sphi %s9584_s12, %s14591_s12   ;;  %s9508_s11 = sphi %s9582_s11, %s14590_s11  }
   0x7   : > { %s9607_s16 = sadd.s32 1, %s9520_s14   ;;  %s225_s17 = sadd.s32 1, %s9516_s13 }
   0x8   : > { %s222_s18 = ssub.s32 %s9520_s14, %s9607_s16  ;;  %p235_p0 = scmp.ne.s32.totalorder %s9516_s13, %s9512_s12 }
   0x9   : > { %p223_p1 = scmp.eq.s32.totalorder %s222_s18, 0  ;;  %p236_p2 = scmp.eq.s32.totalorder %s9603_s8, 1 }
   0xa   : > { %p241_p3 = scmp.ne.s32.totalorder %s9512_s12, %s9508_s11  ;;  %p242_p4 = scmp.eq.s32.totalorder %s7691_s15, 1 }
   0xb   : > { %s9618_s19 = scalar_select %p223_p1, %s9516_s13, %s225_s17  }
   0xc   : > { %p9620_p5 = por %p236_p2, %p235_p0  ;;  %p9624_p6 = por %p242_p4, %p241_p3 }
   0xd   : > { %p7694_p7 = scmp.ge.s32.totalorder %s9520_s14, 1  ;;  %p292_p8 = scmp.lt.s32.totalorder %s9520_s14, 3 }
   0xf   : > { %p293_p9 = pnand %p7694_p7, %p292_p8 }
  0x11   : > { %296 = sbr.rel (%p293_p9) target bundleno = 1859 (0x743), region = 56 }
  0x16   : > { %s325_s22 = sand.u32 1, %s9512_s12   ;;  %p328_p10 = scmp.lt.s32.totalorder %s9603_s8, 1 }
  0x17   : > { %s7695_s23 = sshll.u32 %s325_s22, 4  ;;  %p7698_p11 = scmp.ne.s32.totalorder %s9603_s8, 0 }
  0x18   : > { %s329_s24 = scalar_select %p328_p10, %s9603_s8, 1 }
  0x19   : > { %s9640_s29 = scalar_lea.vmem [#allocation7], %s7695_s23  ;;  %337 = sbr.rel (%p7698_p11) target bundleno = 247 (0xf7), region = 60 }
  0x1a   : > { %s8120_s25 = sshll.u32 %s329_s24, 8 }
  0x1b   : > { %s9638_s28 = scalar_lea.vmem %s14501_s0, %s8120_s25 }
  0x1e   : > { %vm338_vm0 = vcmask 523264   ;;  %v9522_v1 = vmov 0.0   ;;  %vm341_vm1 = vcmask 517120   ;;  %vm448_vm2 = vcmask 261120  }
  0x1f   : > { %339 = vst.msk [vmem:[#allocation2] sm:$0xff] %vm338_vm0, %v9522_v1  ;;  %vm451_vm3 = vcmask 254976   ;;  %vm504_vm4 = vcmask 130048   ;;  %vm507_vm5 = vcmask 123904  }
  0x20   : > { %340 = vst.msk [vmem:[#allocation2 + $0x8] sm:$0xff] %vm338_vm0, %v9522_v1 }
  0x21   : > { %343 = vst.msk [vmem:[#allocation2 + $0x18] sm:$0xff] %vm338_vm0, %v9522_v1 }
  0x22   : > { %344 = vst.msk [vmem:[#allocation2 + $0x20] sm:$0xff] %vm338_vm0, %v9522_v1 }
  0x23   : > { %346 = vst.msk [vmem:[#allocation2 + $0x30] sm:$0xff] %vm338_vm0, %v9522_v1 }
  0x24   : > { %347 = vst.msk [vmem:[#allocation2 + $0x38] sm:$0xff] %vm338_vm0, %v9522_v1 }
  0x25   : > { %349 = vst.msk [vmem:[#allocation2 + $0x48] sm:$0xff] %vm338_vm0, %v9522_v1 }
  0x26   : > { %350 = vst.msk [vmem:[#allocation2 + $0x50] sm:$0xff] %vm338_vm0, %v9522_v1 }
  0x27   : > { %352 = vst.msk [vmem:[#allocation2 + $0x60] sm:$0xff] %vm338_vm0, %v9522_v1 }
  0x28   : > { %353 = vst.msk [vmem:[#allocation2 + $0x68] sm:$0xff] %vm338_vm0, %v9522_v1 }
  0x29   : > { %355 = vst.msk [vmem:[#allocation2 + $0x78] sm:$0xff] %vm338_vm0, %v9522_v1 }
  0x2a   : > { %356 = vst.msk [vmem:[#allocation2 + $0x80] sm:$0xff] %vm338_vm0, %v9522_v1 }
  0x2b   : > { %358 = vst.msk [vmem:[#allocation2 + $0x90] sm:$0xff] %vm338_vm0, %v9522_v1 }
  0x2c   : > { %359 = vst.msk [vmem:[#allocation2 + $0x98] sm:$0xff] %vm338_vm0, %v9522_v1 }
  0x2d   : > { %361 = vst.msk [vmem:[#allocation2 + $0xa8] sm:$0xff] %vm338_vm0, %v9522_v1 }
  0x2e   : > { %362 = vst.msk [vmem:[#allocation2 + $0xb0] sm:$0xff] %vm338_vm0, %v9522_v1 }
  0x2f   : > { %364 = vst.msk [vmem:[#allocation2 + $0xc0] sm:$0xff] %vm338_vm0, %v9522_v1 }
  0x30   : > { %365 = vst.msk [vmem:[#allocation2 + $0xc8] sm:$0xff] %vm338_vm0, %v9522_v1 }
  0x31   : > { %367 = vst.msk [vmem:[#allocation2 + $0xd8] sm:$0xff] %vm338_vm0, %v9522_v1 }
  0x32   : > { %368 = vst.msk [vmem:[#allocation2 + $0xe0] sm:$0xff] %vm338_vm0, %v9522_v1 }
  0x33   : > { %370 = vst.msk [vmem:[#allocation2 + $0xf0] sm:$0xff] %vm338_vm0, %v9522_v1 }
  0x34   : > { %371 = vst.msk [vmem:[#allocation2 + $0xf8] sm:$0xff] %vm338_vm0, %v9522_v1 }
  0x35   : > { %373 = vst.msk [vmem:[#allocation2 + $0x108] sm:$0xff] %vm338_vm0, %v9522_v1 }
  0x36   : > { %374 = vst.msk [vmem:[#allocation2 + $0x110] sm:$0xff] %vm338_vm0, %v9522_v1 }
  0x37   : > { %376 = vst.msk [vmem:[#allocation2 + $0x120] sm:$0xff] %vm338_vm0, %v9522_v1 }
  0x38   : > { %377 = vst.msk [vmem:[#allocation2 + $0x128] sm:$0xff] %vm338_vm0, %v9522_v1 }
  0x39   : > { %379 = vst.msk [vmem:[#allocation2 + $0x138] sm:$0xff] %vm338_vm0, %v9522_v1 }
  0x3a   : > { %380 = vst.msk [vmem:[#allocation2 + $0x140] sm:$0xff] %vm338_vm0, %v9522_v1 }
  0x3b   : > { %382 = vst.msk [vmem:[#allocation2 + $0x150] sm:$0xff] %vm338_vm0, %v9522_v1 }
  0x3c   : > { %383 = vst.msk [vmem:[#allocation2 + $0x158] sm:$0xff] %vm338_vm0, %v9522_v1 }
  0x3d   : > { %385 = vst.msk [vmem:[#allocation2 + $0x168] sm:$0xff] %vm338_vm0, %v9522_v1 }
  0x3e   : > { %386 = vst.msk [vmem:[#allocation2 + $0x170] sm:$0xff] %vm338_vm0, %v9522_v1 }
  0x3f   : > { %388 = vst.msk [vmem:[#allocation2 + $0x180] sm:$0xff] %vm338_vm0, %v9522_v1 }
  0x40   : > { %389 = vst.msk [vmem:[#allocation2 + $0x188] sm:$0xff] %vm338_vm0, %v9522_v1 }
  0x41   : > { %391 = vst.msk [vmem:[#allocation2 + $0x198] sm:$0xff] %vm338_vm0, %v9522_v1 }
  0x42   : > { %392 = vst.msk [vmem:[#allocation2 + $0x1a0] sm:$0xff] %vm338_vm0, %v9522_v1 }
  0x43   : > { %394 = vst.msk [vmem:[#allocation3] sm:$0xff] %vm338_vm0, %v9522_v1 }
  0x44   : > { %395 = vst.msk [vmem:[#allocation3 + $0x8] sm:$0xff] %vm338_vm0, %v9522_v1 }
  0x45   : > { %397 = vst.msk [vmem:[#allocation3 + $0x18] sm:$0xff] %vm338_vm0, %v9522_v1 }
  0x46   : > { %398 = vst.msk [vmem:[#allocation3 + $0x20] sm:$0xff] %vm338_vm0, %v9522_v1 }
  0x47   : > { %400 = vst.msk [vmem:[#allocation3 + $0x30] sm:$0xff] %vm338_vm0, %v9522_v1 }
  0x48   : > { %401 = vst.msk [vmem:[#allocation3 + $0x38] sm:$0xff] %vm338_vm0, %v9522_v1 }
  0x49   : > { %403 = vst.msk [vmem:[#allocation3 + $0x48] sm:$0xff] %vm338_vm0, %v9522_v1 }
  0x4a   : > { %404 = vst.msk [vmem:[#allocation3 + $0x50] sm:$0xff] %vm338_vm0, %v9522_v1 }
  0x4b   : > { %406 = vst.msk [vmem:[#allocation3 + $0x60] sm:$0xff] %vm338_vm0, %v9522_v1 }
  0x4c   : > { %407 = vst.msk [vmem:[#allocation3 + $0x68] sm:$0xff] %vm338_vm0, %v9522_v1 }
  0x4d   : > { %409 = vst.msk [vmem:[#allocation3 + $0x78] sm:$0xff] %vm338_vm0, %v9522_v1 }
  0x4e   : > { %410 = vst.msk [vmem:[#allocation3 + $0x80] sm:$0xff] %vm338_vm0, %v9522_v1 }
  0x4f   : > { %412 = vst.msk [vmem:[#allocation3 + $0x90] sm:$0xff] %vm338_vm0, %v9522_v1 }
  0x50   : > { %413 = vst.msk [vmem:[#allocation3 + $0x98] sm:$0xff] %vm338_vm0, %v9522_v1 }
  0x51   : > { %415 = vst.msk [vmem:[#allocation3 + $0xa8] sm:$0xff] %vm338_vm0, %v9522_v1 }
  0x52   : > { %416 = vst.msk [vmem:[#allocation3 + $0xb0] sm:$0xff] %vm338_vm0, %v9522_v1 }
  0x53   : > { %418 = vst.msk [vmem:[#allocation3 + $0xc0] sm:$0xff] %vm338_vm0, %v9522_v1 }
  0x54   : > { %419 = vst.msk [vmem:[#allocation3 + $0xc8] sm:$0xff] %vm338_vm0, %v9522_v1 }
  0x55   : > { %421 = vst.msk [vmem:[#allocation3 + $0xd8] sm:$0xff] %vm338_vm0, %v9522_v1 }
  0x56   : > { %422 = vst.msk [vmem:[#allocation3 + $0xe0] sm:$0xff] %vm338_vm0, %v9522_v1 }
  0x57   : > { %424 = vst.msk [vmem:[#allocation3 + $0xf0] sm:$0xff] %vm338_vm0, %v9522_v1 }
  0x58   : > { %425 = vst.msk [vmem:[#allocation3 + $0xf8] sm:$0xff] %vm338_vm0, %v9522_v1 }
  0x59   : > { %427 = vst.msk [vmem:[#allocation3 + $0x108] sm:$0xff] %vm338_vm0, %v9522_v1 }
  0x5a   : > { %428 = vst.msk [vmem:[#allocation3 + $0x110] sm:$0xff] %vm338_vm0, %v9522_v1 }
  0x5b   : > { %430 = vst.msk [vmem:[#allocation3 + $0x120] sm:$0xff] %vm338_vm0, %v9522_v1 }
  0x5c   : > { %431 = vst.msk [vmem:[#allocation3 + $0x128] sm:$0xff] %vm338_vm0, %v9522_v1 }
  0x5d   : > { %433 = vst.msk [vmem:[#allocation3 + $0x138] sm:$0xff] %vm338_vm0, %v9522_v1 }
  0x5e   : > { %434 = vst.msk [vmem:[#allocation3 + $0x140] sm:$0xff] %vm338_vm0, %v9522_v1 }
  0x5f   : > { %436 = vst.msk [vmem:[#allocation3 + $0x150] sm:$0xff] %vm338_vm0, %v9522_v1 }
  0x60   : > { %437 = vst.msk [vmem:[#allocation3 + $0x158] sm:$0xff] %vm338_vm0, %v9522_v1 }
  0x61   : > { %439 = vst.msk [vmem:[#allocation3 + $0x168] sm:$0xff] %vm338_vm0, %v9522_v1 }
  0x62   : > { %440 = vst.msk [vmem:[#allocation3 + $0x170] sm:$0xff] %vm338_vm0, %v9522_v1 }
  0x63   : > { %442 = vst.msk [vmem:[#allocation3 + $0x180] sm:$0xff] %vm338_vm0, %v9522_v1 }
  0x64   : > { %443 = vst.msk [vmem:[#allocation3 + $0x188] sm:$0xff] %vm338_vm0, %v9522_v1 }
  0x65   : > { %445 = vst.msk [vmem:[#allocation3 + $0x198] sm:$0xff] %vm338_vm0, %v9522_v1 }
  0x66   : > { %446 = vst.msk [vmem:[#allocation3 + $0x1a0] sm:$0xff] %vm338_vm0, %v9522_v1 }
  0x67   : > { %342 = vst.msk [vmem:[#allocation2 + $0x10] sm:$0x3] %vm341_vm1, %v9522_v1 }
  0x68   : > { %345 = vst.msk [vmem:[#allocation2 + $0x28] sm:$0x3] %vm341_vm1, %v9522_v1 }
  0x69   : > { %348 = vst.msk [vmem:[#allocation2 + $0x40] sm:$0x3] %vm341_vm1, %v9522_v1 }
  0x6a   : > { %351 = vst.msk [vmem:[#allocation2 + $0x58] sm:$0x3] %vm341_vm1, %v9522_v1 }
  0x6b   : > { %354 = vst.msk [vmem:[#allocation2 + $0x70] sm:$0x3] %vm341_vm1, %v9522_v1 }
  0x6c   : > { %357 = vst.msk [vmem:[#allocation2 + $0x88] sm:$0x3] %vm341_vm1, %v9522_v1 }
  0x6d   : > { %360 = vst.msk [vmem:[#allocation2 + $0xa0] sm:$0x3] %vm341_vm1, %v9522_v1 }
  0x6e   : > { %363 = vst.msk [vmem:[#allocation2 + $0xb8] sm:$0x3] %vm341_vm1, %v9522_v1 }
  0x6f   : > { %366 = vst.msk [vmem:[#allocation2 + $0xd0] sm:$0x3] %vm341_vm1, %v9522_v1 }
  0x70   : > { %369 = vst.msk [vmem:[#allocation2 + $0xe8] sm:$0x3] %vm341_vm1, %v9522_v1 }
  0x71   : > { %372 = vst.msk [vmem:[#allocation2 + $0x100] sm:$0x3] %vm341_vm1, %v9522_v1 }
  0x72   : > { %375 = vst.msk [vmem:[#allocation2 + $0x118] sm:$0x3] %vm341_vm1, %v9522_v1 }
  0x73   : > { %378 = vst.msk [vmem:[#allocation2 + $0x130] sm:$0x3] %vm341_vm1, %v9522_v1 }
  0x74   : > { %381 = vst.msk [vmem:[#allocation2 + $0x148] sm:$0x3] %vm341_vm1, %v9522_v1 }
  0x75   : > { %384 = vst.msk [vmem:[#allocation2 + $0x160] sm:$0x3] %vm341_vm1, %v9522_v1 }
  0x76   : > { %387 = vst.msk [vmem:[#allocation2 + $0x178] sm:$0x3] %vm341_vm1, %v9522_v1 }
  0x77   : > { %390 = vst.msk [vmem:[#allocation2 + $0x190] sm:$0x3] %vm341_vm1, %v9522_v1 }
  0x78   : > { %393 = vst.msk [vmem:[#allocation2 + $0x1a8] sm:$0x3] %vm341_vm1, %v9522_v1 }
  0x79   : > { %396 = vst.msk [vmem:[#allocation3 + $0x10] sm:$0x3] %vm341_vm1, %v9522_v1 }
  0x7a   : > { %399 = vst.msk [vmem:[#allocation3 + $0x28] sm:$0x3] %vm341_vm1, %v9522_v1 }
  0x7b   : > { %402 = vst.msk [vmem:[#allocation3 + $0x40] sm:$0x3] %vm341_vm1, %v9522_v1 }
  0x7c   : > { %405 = vst.msk [vmem:[#allocation3 + $0x58] sm:$0x3] %vm341_vm1, %v9522_v1 }
  0x7d   : > { %408 = vst.msk [vmem:[#allocation3 + $0x70] sm:$0x3] %vm341_vm1, %v9522_v1 }
  0x7e   : > { %411 = vst.msk [vmem:[#allocation3 + $0x88] sm:$0x3] %vm341_vm1, %v9522_v1 }
  0x7f   : > { %414 = vst.msk [vmem:[#allocation3 + $0xa0] sm:$0x3] %vm341_vm1, %v9522_v1 }
  0x80   : > { %417 = vst.msk [vmem:[#allocation3 + $0xb8] sm:$0x3] %vm341_vm1, %v9522_v1 }
  0x81   : > { %420 = vst.msk [vmem:[#allocation3 + $0xd0] sm:$0x3] %vm341_vm1, %v9522_v1 }
  0x82   : > { %423 = vst.msk [vmem:[#allocation3 + $0xe8] sm:$0x3] %vm341_vm1, %v9522_v1 }
  0x83   : > { %426 = vst.msk [vmem:[#allocation3 + $0x100] sm:$0x3] %vm341_vm1, %v9522_v1 }
  0x84   : > { %429 = vst.msk [vmem:[#allocation3 + $0x118] sm:$0x3] %vm341_vm1, %v9522_v1 }
  0x85   : > { %432 = vst.msk [vmem:[#allocation3 + $0x130] sm:$0x3] %vm341_vm1, %v9522_v1 }
  0x86   : > { %435 = vst.msk [vmem:[#allocation3 + $0x148] sm:$0x3] %vm341_vm1, %v9522_v1 }
  0x87   : > { %438 = vst.msk [vmem:[#allocation3 + $0x160] sm:$0x3] %vm341_vm1, %v9522_v1 }
  0x88   : > { %441 = vst.msk [vmem:[#allocation3 + $0x178] sm:$0x3] %vm341_vm1, %v9522_v1 }
  0x89   : > { %444 = vst.msk [vmem:[#allocation3 + $0x190] sm:$0x3] %vm341_vm1, %v9522_v1 }
  0x8a   : > { %447 = vst.msk [vmem:[#allocation3 + $0x1a8] sm:$0x3] %vm341_vm1, %v9522_v1 }
  0x8b   : > { %449 = vst.msk [vmem:[#allocation4] sm:$0xff] %vm448_vm2, %v9522_v1 }
  0x8c   : > { %450 = vst.msk [vmem:[#allocation4 + $0x8] sm:$0xff] %vm448_vm2, %v9522_v1 }
  0x8d   : > { %453 = vst.msk [vmem:[#allocation4 + $0x18] sm:$0xff] %vm448_vm2, %v9522_v1 }
  0x8e   : > { %454 = vst.msk [vmem:[#allocation4 + $0x20] sm:$0xff] %vm448_vm2, %v9522_v1 }
  0x8f   : > { %456 = vst.msk [vmem:[#allocation4 + $0x30] sm:$0xff] %vm448_vm2, %v9522_v1 }
  0x90   : > { %457 = vst.msk [vmem:[#allocation4 + $0x38] sm:$0xff] %vm448_vm2, %v9522_v1 }
  0x91   : > { %459 = vst.msk [vmem:[#allocation4 + $0x48] sm:$0xff] %vm448_vm2, %v9522_v1 }
  0x92   : > { %460 = vst.msk [vmem:[#allocation4 + $0x50] sm:$0xff] %vm448_vm2, %v9522_v1 }
  0x93   : > { %462 = vst.msk [vmem:[#allocation4 + $0x60] sm:$0xff] %vm448_vm2, %v9522_v1 }
  0x94   : > { %463 = vst.msk [vmem:[#allocation4 + $0x68] sm:$0xff] %vm448_vm2, %v9522_v1 }
  0x95   : > { %465 = vst.msk [vmem:[#allocation4 + $0x78] sm:$0xff] %vm448_vm2, %v9522_v1 }
  0x96   : > { %466 = vst.msk [vmem:[#allocation4 + $0x80] sm:$0xff] %vm448_vm2, %v9522_v1 }
  0x97   : > { %468 = vst.msk [vmem:[#allocation4 + $0x90] sm:$0xff] %vm448_vm2, %v9522_v1 }
  0x98   : > { %469 = vst.msk [vmem:[#allocation4 + $0x98] sm:$0xff] %vm448_vm2, %v9522_v1 }
  0x99   : > { %471 = vst.msk [vmem:[#allocation4 + $0xa8] sm:$0xff] %vm448_vm2, %v9522_v1 }
  0x9a   : > { %472 = vst.msk [vmem:[#allocation4 + $0xb0] sm:$0xff] %vm448_vm2, %v9522_v1 }
  0x9b   : > { %474 = vst.msk [vmem:[#allocation4 + $0xc0] sm:$0xff] %vm448_vm2, %v9522_v1 }
  0x9c   : > { %475 = vst.msk [vmem:[#allocation4 + $0xc8] sm:$0xff] %vm448_vm2, %v9522_v1 }
  0x9d   : > { %477 = vst.msk [vmem:[#allocation4 + $0xd8] sm:$0xff] %vm448_vm2, %v9522_v1 }
  0x9e   : > { %478 = vst.msk [vmem:[#allocation4 + $0xe0] sm:$0xff] %vm448_vm2, %v9522_v1 }
  0x9f   : > { %480 = vst.msk [vmem:[#allocation4 + $0xf0] sm:$0xff] %vm448_vm2, %v9522_v1 }
  0xa0   : > { %481 = vst.msk [vmem:[#allocation4 + $0xf8] sm:$0xff] %vm448_vm2, %v9522_v1 }
  0xa1   : > { %483 = vst.msk [vmem:[#allocation4 + $0x108] sm:$0xff] %vm448_vm2, %v9522_v1 }
  0xa2   : > { %484 = vst.msk [vmem:[#allocation4 + $0x110] sm:$0xff] %vm448_vm2, %v9522_v1 }
  0xa3   : > { %486 = vst.msk [vmem:[#allocation4 + $0x120] sm:$0xff] %vm448_vm2, %v9522_v1 }
  0xa4   : > { %487 = vst.msk [vmem:[#allocation4 + $0x128] sm:$0xff] %vm448_vm2, %v9522_v1 }
  0xa5   : > { %489 = vst.msk [vmem:[#allocation4 + $0x138] sm:$0xff] %vm448_vm2, %v9522_v1 }
  0xa6   : > { %490 = vst.msk [vmem:[#allocation4 + $0x140] sm:$0xff] %vm448_vm2, %v9522_v1 }
  0xa7   : > { %492 = vst.msk [vmem:[#allocation4 + $0x150] sm:$0xff] %vm448_vm2, %v9522_v1 }
  0xa8   : > { %493 = vst.msk [vmem:[#allocation4 + $0x158] sm:$0xff] %vm448_vm2, %v9522_v1 }
  0xa9   : > { %495 = vst.msk [vmem:[#allocation4 + $0x168] sm:$0xff] %vm448_vm2, %v9522_v1 }
  0xaa   : > { %496 = vst.msk [vmem:[#allocation4 + $0x170] sm:$0xff] %vm448_vm2, %v9522_v1 }
  0xab   : > { %498 = vst.msk [vmem:[#allocation4 + $0x180] sm:$0xff] %vm448_vm2, %v9522_v1 }
  0xac   : > { %499 = vst.msk [vmem:[#allocation4 + $0x188] sm:$0xff] %vm448_vm2, %v9522_v1 }
  0xad   : > { %501 = vst.msk [vmem:[#allocation4 + $0x198] sm:$0xff] %vm448_vm2, %v9522_v1 }
  0xae   : > { %502 = vst.msk [vmem:[#allocation4 + $0x1a0] sm:$0xff] %vm448_vm2, %v9522_v1 }
  0xaf   : > { %452 = vst.msk [vmem:[#allocation4 + $0x10] sm:$0x3] %vm451_vm3, %v9522_v1 }
  0xb0   : > { %455 = vst.msk [vmem:[#allocation4 + $0x28] sm:$0x3] %vm451_vm3, %v9522_v1 }
  0xb1   : > { %458 = vst.msk [vmem:[#allocation4 + $0x40] sm:$0x3] %vm451_vm3, %v9522_v1 }
  0xb2   : > { %461 = vst.msk [vmem:[#allocation4 + $0x58] sm:$0x3] %vm451_vm3, %v9522_v1 }
  0xb3   : > { %464 = vst.msk [vmem:[#allocation4 + $0x70] sm:$0x3] %vm451_vm3, %v9522_v1 }
  0xb4   : > { %467 = vst.msk [vmem:[#allocation4 + $0x88] sm:$0x3] %vm451_vm3, %v9522_v1 }
  0xb5   : > { %470 = vst.msk [vmem:[#allocation4 + $0xa0] sm:$0x3] %vm451_vm3, %v9522_v1 }
  0xb6   : > { %473 = vst.msk [vmem:[#allocation4 + $0xb8] sm:$0x3] %vm451_vm3, %v9522_v1 }
  0xb7   : > { %476 = vst.msk [vmem:[#allocation4 + $0xd0] sm:$0x3] %vm451_vm3, %v9522_v1 }
  0xb8   : > { %479 = vst.msk [vmem:[#allocation4 + $0xe8] sm:$0x3] %vm451_vm3, %v9522_v1 }
  0xb9   : > { %482 = vst.msk [vmem:[#allocation4 + $0x100] sm:$0x3] %vm451_vm3, %v9522_v1 }
  0xba   : > { %485 = vst.msk [vmem:[#allocation4 + $0x118] sm:$0x3] %vm451_vm3, %v9522_v1 }
  0xbb   : > { %488 = vst.msk [vmem:[#allocation4 + $0x130] sm:$0x3] %vm451_vm3, %v9522_v1 }
  0xbc   : > { %491 = vst.msk [vmem:[#allocation4 + $0x148] sm:$0x3] %vm451_vm3, %v9522_v1 }
  0xbd   : > { %494 = vst.msk [vmem:[#allocation4 + $0x160] sm:$0x3] %vm451_vm3, %v9522_v1 }
  0xbe   : > { %497 = vst.msk [vmem:[#allocation4 + $0x178] sm:$0x3] %vm451_vm3, %v9522_v1 }
  0xbf   : > { %500 = vst.msk [vmem:[#allocation4 + $0x190] sm:$0x3] %vm451_vm3, %v9522_v1 }
  0xc0   : > { %503 = vst.msk [vmem:[#allocation4 + $0x1a8] sm:$0x3] %vm451_vm3, %v9522_v1 }
  0xc1   : > { %505 = vst.msk [vmem:[#allocation5] sm:$0xff] %vm504_vm4, %v9522_v1 }
  0xc2   : > { %506 = vst.msk [vmem:[#allocation5 + $0x8] sm:$0xff] %vm504_vm4, %v9522_v1 }
  0xc3   : > { %509 = vst.msk [vmem:[#allocation5 + $0x18] sm:$0xff] %vm504_vm4, %v9522_v1 }
  0xc4   : > { %510 = vst.msk [vmem:[#allocation5 + $0x20] sm:$0xff] %vm504_vm4, %v9522_v1 }
  0xc5   : > { %512 = vst.msk [vmem:[#allocation5 + $0x30] sm:$0xff] %vm504_vm4, %v9522_v1 }
  0xc6   : > { %513 = vst.msk [vmem:[#allocation5 + $0x38] sm:$0xff] %vm504_vm4, %v9522_v1 }
  0xc7   : > { %515 = vst.msk [vmem:[#allocation5 + $0x48] sm:$0xff] %vm504_vm4, %v9522_v1 }
  0xc8   : > { %516 = vst.msk [vmem:[#allocation5 + $0x50] sm:$0xff] %vm504_vm4, %v9522_v1 }
  0xc9   : > { %518 = vst.msk [vmem:[#allocation5 + $0x60] sm:$0xff] %vm504_vm4, %v9522_v1 }
  0xca   : > { %519 = vst.msk [vmem:[#allocation5 + $0x68] sm:$0xff] %vm504_vm4, %v9522_v1 }
  0xcb   : > { %521 = vst.msk [vmem:[#allocation5 + $0x78] sm:$0xff] %vm504_vm4, %v9522_v1 }
  0xcc   : > { %522 = vst.msk [vmem:[#allocation5 + $0x80] sm:$0xff] %vm504_vm4, %v9522_v1 }
  0xcd   : > { %524 = vst.msk [vmem:[#allocation5 + $0x90] sm:$0xff] %vm504_vm4, %v9522_v1 }
  0xce   : > { %525 = vst.msk [vmem:[#allocation5 + $0x98] sm:$0xff] %vm504_vm4, %v9522_v1 }
  0xcf   : > { %527 = vst.msk [vmem:[#allocation5 + $0xa8] sm:$0xff] %vm504_vm4, %v9522_v1 }
  0xd0   : > { %528 = vst.msk [vmem:[#allocation5 + $0xb0] sm:$0xff] %vm504_vm4, %v9522_v1 }
  0xd1   : > { %530 = vst.msk [vmem:[#allocation5 + $0xc0] sm:$0xff] %vm504_vm4, %v9522_v1 }
  0xd2   : > { %531 = vst.msk [vmem:[#allocation5 + $0xc8] sm:$0xff] %vm504_vm4, %v9522_v1 }
  0xd3   : > { %533 = vst.msk [vmem:[#allocation5 + $0xd8] sm:$0xff] %vm504_vm4, %v9522_v1 }
  0xd4   : > { %534 = vst.msk [vmem:[#allocation5 + $0xe0] sm:$0xff] %vm504_vm4, %v9522_v1 }
  0xd5   : > { %536 = vst.msk [vmem:[#allocation5 + $0xf0] sm:$0xff] %vm504_vm4, %v9522_v1 }
  0xd6   : > { %537 = vst.msk [vmem:[#allocation5 + $0xf8] sm:$0xff] %vm504_vm4, %v9522_v1 }
  0xd7   : > { %539 = vst.msk [vmem:[#allocation5 + $0x108] sm:$0xff] %vm504_vm4, %v9522_v1 }
  0xd8   : > { %540 = vst.msk [vmem:[#allocation5 + $0x110] sm:$0xff] %vm504_vm4, %v9522_v1 }
  0xd9   : > { %542 = vst.msk [vmem:[#allocation5 + $0x120] sm:$0xff] %vm504_vm4, %v9522_v1 }
  0xda   : > { %543 = vst.msk [vmem:[#allocation5 + $0x128] sm:$0xff] %vm504_vm4, %v9522_v1 }
  0xdb   : > { %545 = vst.msk [vmem:[#allocation5 + $0x138] sm:$0xff] %vm504_vm4, %v9522_v1 }
  0xdc   : > { %546 = vst.msk [vmem:[#allocation5 + $0x140] sm:$0xff] %vm504_vm4, %v9522_v1 }
  0xdd   : > { %548 = vst.msk [vmem:[#allocation5 + $0x150] sm:$0xff] %vm504_vm4, %v9522_v1 }
  0xde   : > { %549 = vst.msk [vmem:[#allocation5 + $0x158] sm:$0xff] %vm504_vm4, %v9522_v1 }
  0xdf   : > { %551 = vst.msk [vmem:[#allocation5 + $0x168] sm:$0xff] %vm504_vm4, %v9522_v1 }
  0xe0   : > { %552 = vst.msk [vmem:[#allocation5 + $0x170] sm:$0xff] %vm504_vm4, %v9522_v1 }
  0xe1   : > { %554 = vst.msk [vmem:[#allocation5 + $0x180] sm:$0xff] %vm504_vm4, %v9522_v1 }
  0xe2   : > { %555 = vst.msk [vmem:[#allocation5 + $0x188] sm:$0xff] %vm504_vm4, %v9522_v1 }
  0xe3   : > { %557 = vst.msk [vmem:[#allocation5 + $0x198] sm:$0xff] %vm504_vm4, %v9522_v1 }
  0xe4   : > { %558 = vst.msk [vmem:[#allocation5 + $0x1a0] sm:$0xff] %vm504_vm4, %v9522_v1 }
  0xe5   : > { %508 = vst.msk [vmem:[#allocation5 + $0x10] sm:$0x3] %vm507_vm5, %v9522_v1 }
  0xe6   : > { %511 = vst.msk [vmem:[#allocation5 + $0x28] sm:$0x3] %vm507_vm5, %v9522_v1 }
  0xe7   : > { %514 = vst.msk [vmem:[#allocation5 + $0x40] sm:$0x3] %vm507_vm5, %v9522_v1 }
  0xe8   : > { %517 = vst.msk [vmem:[#allocation5 + $0x58] sm:$0x3] %vm507_vm5, %v9522_v1 }
  0xe9   : > { %520 = vst.msk [vmem:[#allocation5 + $0x70] sm:$0x3] %vm507_vm5, %v9522_v1 }
  0xea   : > { %523 = vst.msk [vmem:[#allocation5 + $0x88] sm:$0x3] %vm507_vm5, %v9522_v1 }
  0xeb   : > { %526 = vst.msk [vmem:[#allocation5 + $0xa0] sm:$0x3] %vm507_vm5, %v9522_v1 }
  0xec   : > { %529 = vst.msk [vmem:[#allocation5 + $0xb8] sm:$0x3] %vm507_vm5, %v9522_v1 }
  0xed   : > { %532 = vst.msk [vmem:[#allocation5 + $0xd0] sm:$0x3] %vm507_vm5, %v9522_v1 }
  0xee   : > { %535 = vst.msk [vmem:[#allocation5 + $0xe8] sm:$0x3] %vm507_vm5, %v9522_v1 }
  0xef   : > { %538 = vst.msk [vmem:[#allocation5 + $0x100] sm:$0x3] %vm507_vm5, %v9522_v1 }
  0xf0   : > { %541 = vst.msk [vmem:[#allocation5 + $0x118] sm:$0x3] %vm507_vm5, %v9522_v1 }
  0xf1   : > { %544 = vst.msk [vmem:[#allocation5 + $0x130] sm:$0x3] %vm507_vm5, %v9522_v1 }
  0xf2   : > { %547 = vst.msk [vmem:[#allocation5 + $0x148] sm:$0x3] %vm507_vm5, %v9522_v1 }
  0xf3   : > { %550 = vst.msk [vmem:[#allocation5 + $0x160] sm:$0x3] %vm507_vm5, %v9522_v1 }
  0xf4   : > { %553 = vst.msk [vmem:[#allocation5 + $0x178] sm:$0x3] %vm507_vm5, %v9522_v1 }
  0xf5   : > { %556 = vst.msk [vmem:[#allocation5 + $0x190] sm:$0x3] %vm507_vm5, %v9522_v1 }
  0xf6   : > { %559 = vst.msk [vmem:[#allocation5 + $0x1a8] sm:$0x3] %vm507_vm5, %v9522_v1 }
  0xf7 PF: > { %v658_v2 = vld [vmem:[#allocation2 + $0x1] sm:$0xff]  ;;  %v659_v3 = vld [vmem:[#allocation2 + $0x9] sm:$0xff]  ;;  %vm593_vm6 = vcmask 523264   ;;  %v567_v6 = vld [vmem:[%s9638_s28 + $0x38] sm:$0xff]  ;;  %s9523_s30 = smov 64   ;;  %s9524_s23 = smov 32  }
  0xf8   : > { %v566_v4 = vld [vmem:[%s9638_s28 + $0x30] sm:$0xff]  ;;  %v8282_v5 = vpack.i.bf16 %v659_v3, %v658_v2  ;;  %v563_v8 = vld [vmem:[%s9638_s28 + $0x18] sm:$0xff]  ;;  %601 = vst.msk [vmem:[#allocation2 + $0x69] sm:$0xff] %vm593_vm6, %v567_v6  ;;  %v560_v9 = vld [vmem:[%s9638_s28] sm:$0xff]  ;;  %s9525_s27 = smov 96   ;;  %s8211_s15 = sshll.u32 %s9603_s8, 4 }
  0xf9   : > { %600 = vst.msk [vmem:[#allocation2 + $0x61] sm:$0xff] %vm593_vm6, %v566_v4  ;;  %v562_v7 = vld [vmem:[%s9638_s28 + $0x10] sm:$0xff]  ;;  %v561_v10 = vld [vmem:[%s9638_s28 + $0x8] sm:$0xff]  ;;  %v564_v11 = vld [vmem:[%s9638_s28 + $0x20] sm:$0xff]  ;;  %s7625_s18 = scalar_lea.hbm %s14510_s9, %s8211_s15  ;;  %s7626_s24 = sshll.u32 %s9640_s29, 4  ;;  %s7627_s24 = int_to_ptr.vmem [resolvable:$true] %s7626_s24 }
  0xfa   : > { %8283 = vrot.lane.b32.xlu0 %v8282_v5, %s9523_s30  ;;  %596 = vst.msk [vmem:[#allocation2 + $0x31] sm:$0xff] %vm593_vm6, %v562_v7  ;;  %v565_v12 = vld [vmem:[%s9638_s28 + $0x28] sm:$0xff]  ;;  %v570_v13 = vld [vmem:[%s9638_s28 + $0x50] sm:$0xff]  ;;  %v571_v14 = vld [vmem:[%s9638_s28 + $0x58] sm:$0xff]  ;;  %s7628_s25 = sshll.u32 %s7625_s18, 4  ;;  %s7614_s26 = scalar_lea.sflag [#allocation8], %s325_s22  ;;  %s7629_s25 = int_to_ptr.hbm [resolvable:$true] %s7628_s25 }
  0xfb   : > { %597 = vst.msk [vmem:[#allocation2 + $0x39] sm:$0xff] %vm593_vm6, %v563_v8  ;;  %v568_v16 = vld [vmem:[%s9638_s28 + $0x40] sm:$0xff]  ;;  %v569_v18 = vld [vmem:[%s9638_s28 + $0x48] sm:$0xff]  ;;  %v574_v29 = vld [vmem:[%s9638_s28 + $0x70] sm:$0xff] }
  0xfc   : > { %594 = vst.msk [vmem:[#allocation2 + $0x19] sm:$0xff] %vm593_vm6, %v560_v9  ;;  %v572_v19 = vld [vmem:[%s9638_s28 + $0x60] sm:$0xff]  ;;  %v573_v22 = vld [vmem:[%s9638_s28 + $0x68] sm:$0xff]  ;;  %v575_v30 = vld [vmem:[%s9638_s28 + $0x78] sm:$0xff] }
  0xfd   : > { %595 = vst.msk [vmem:[#allocation2 + $0x21] sm:$0xff] %vm593_vm6, %v561_v10  ;;  %v576_v23 = vld [vmem:[%s9638_s28 + $0x80] sm:$0xff]  ;;  %v577_v25 = vld [vmem:[%s9638_s28 + $0x88] sm:$0xff]  ;;  %v578_v33 = vld [vmem:[%s9638_s28 + $0x90] sm:$0xff] }
  0xfe   : > { %598 = vst.msk [vmem:[#allocation2 + $0x49] sm:$0xff] %vm593_vm6, %v564_v11  ;;  %v579_v36 = vld [vmem:[%s9638_s28 + $0x98] sm:$0xff]  ;;  %v582_v37 = vld [vmem:[%s9638_s28 + $0xb0] sm:$0xff]  ;;  %v580_v45 = vld [vmem:[%s9638_s28 + $0xa0] sm:$0xff] }
  0xff   : > { %599 = vst.msk [vmem:[#allocation2 + $0x51] sm:$0xff] %vm593_vm6, %v565_v12  ;;  %v667_v17 = vld [vmem:[#allocation2 + $0x69] sm:$0xff]  ;;  %v583_v42 = vld [vmem:[%s9638_s28 + $0xb8] sm:$0xff]  ;;  %v584_v47 = vld [vmem:[%s9638_s28 + $0xc0] sm:$0xff] }
 0x100   : > { %v666_v15 = vld [vmem:[#allocation2 + $0x61] sm:$0xff]  ;;  %604 = vst.msk [vmem:[#allocation2 + $0x91] sm:$0xff] %vm593_vm6, %v570_v13  ;;  %v586_v59 = vld [vmem:[%s9638_s28 + $0xd0] sm:$0xff]  ;;  %v587_v60 = vld [vmem:[%s9638_s28 + $0xd8] sm:$0xff] }
 0x101   : > { %v8302_v20 = vpack.i.bf16 %v667_v17, %v666_v15  ;;  %v662_v21 = vld [vmem:[#allocation2 + $0x31] sm:$0xff]  ;;  %605 = vst.msk [vmem:[#allocation2 + $0x99] sm:$0xff] %vm593_vm6, %v571_v14  ;;  %v581_v46 = vld [vmem:[%s9638_s28 + $0xa8] sm:$0xff]  ;;  %v588_v52 = vld [vmem:[%s9638_s28 + $0xe0] sm:$0xff] }
 0x102   : > { %v663_v24 = vld [vmem:[#allocation2 + $0x39] sm:$0xff]  ;;  %602 = vst.msk [vmem:[#allocation2 + $0x79] sm:$0xff] %vm593_vm6, %v568_v16  ;;  %v585_v50 = vld [vmem:[%s9638_s28 + $0xc8] sm:$0xff] }
 0x103   : > { %8303 = vrot.lane.b32.xlu2 %v8302_v20, %s9523_s30  ;;  %v10104_v26 = vpack.i.bf16 %v663_v24, %v662_v21  ;;  %v660_v27 = vld [vmem:[#allocation2 + $0x19] sm:$0xff]  ;;  %603 = vst.msk [vmem:[#allocation2 + $0x81] sm:$0xff] %vm593_vm6, %v569_v18  ;;  %v589_v53 = vld [vmem:[%s9638_s28 + $0xe8] sm:$0xff]  ;;  %v10163_v18 = vld [vmem:[#allocation2 + $0x30] sm:$0xff] }
 0x104   : > { %v661_v28 = vld [vmem:[#allocation2 + $0x21] sm:$0xff]  ;;  %606 = vst.msk [vmem:[#allocation2 + $0xa9] sm:$0xff] %vm593_vm6, %v572_v19  ;;  %v10159_v16 = vld [vmem:[#allocation2 + $0x18] sm:$0xff] }
 0x105   : > { %8293 = vrot.lane.b32.xlu1 %v10104_v26, %s9523_s30  ;;  %v8287_v31 = vpack.i.bf16 %v661_v28, %v660_v27  ;;  %v664_v32 = vld [vmem:[#allocation2 + $0x49] sm:$0xff]  ;;  %607 = vst.msk [vmem:[#allocation2 + $0xb1] sm:$0xff] %vm593_vm6, %v573_v22  ;;  %v10161_v17 = vld [vmem:[#allocation2 + $0x20] sm:$0xff]  ;;  %v10165_v19 = vld [vmem:[#allocation2 + $0x38] sm:$0xff] }
 0x106   : > { %v665_v34 = vld [vmem:[#allocation2 + $0x51] sm:$0xff]  ;;  %610 = vst.msk [vmem:[#allocation2 + $0xd9] sm:$0xff] %vm593_vm6, %v576_v23  ;;  %v10171_v21 = vld [vmem:[#allocation2 + $0x48] sm:$0xff]  ;;  %v8362_v24 = vpack.i.bf16 %v10161_v17, %v10159_v16 }
 0x107   : > { %8288 = vrot.lane.b32.xlu0 %v8287_v31, %s9523_s30  ;;  %v670_v35 = vld [vmem:[#allocation2 + $0x91] sm:$0xff]  ;;  %611 = vst.msk [vmem:[#allocation2 + $0xe1] sm:$0xff] %vm593_vm6, %v577_v25  ;;  %v10120_v39 = vpack.i.bf16 %v665_v34, %v664_v32  ;;  %v8367_v25 = vpack.i.bf16 %v10165_v19, %v10163_v18  ;;  %v10192_v31 = vld [vmem:[#allocation2 + $0x68] sm:$0xff] }
 0x108   : > { %v671_v38 = vld [vmem:[#allocation2 + $0x99] sm:$0xff]  ;;  %608 = vst.msk [vmem:[#allocation2 + $0xc1] sm:$0xff] %vm593_vm6, %v574_v29  ;;  %v10173_v22 = vld [vmem:[#allocation2 + $0x50] sm:$0xff]  ;;  %v8126_v32 = vld [vmem:[%s14502_s1 + $0x28] sm:$0xff] }
 0x109   : > { %v668_v40 = vld [vmem:[#allocation2 + $0x79] sm:$0xff]  ;;  %609 = vst.msk [vmem:[#allocation2 + $0xc9] sm:$0xff] %vm593_vm6, %v575_v30  ;;  %v8312_v43 = vpack.i.bf16 %v671_v38, %v670_v35  ;;  %v8127_v23 = vld [vmem:[%s14502_s1 + $0x30] sm:$0xff]  ;;  %v8372_v27 = vpack.i.bf16 %v10173_v22, %v10171_v21 }
 0x10a   : > { %v669_v41 = vld [vmem:[#allocation2 + $0x81] sm:$0xff]  ;;  %612 = vst.msk [vmem:[#allocation2 + $0xf1] sm:$0xff] %vm593_vm6, %v578_v33  ;;  %v8128_v20 = vld [vmem:[%s14502_s1 + $0x38] sm:$0xff]  ;;  %v10198_v33 = vld [vmem:[#allocation2 + $0x90] sm:$0xff] }
 0x10b   : > { %v10125_v44 = vpack.i.bf16 %v669_v41, %v668_v40  ;;  %613 = vst.msk [vmem:[#allocation2 + $0xf9] sm:$0xff] %vm593_vm6, %v579_v36  ;;  %v672_v48 = vld [vmem:[#allocation2 + $0xa9] sm:$0xff]  ;;  %8212 = vmatpush.bf16.msra.mxu1 %v8128_v20  ;;  %1975 = vmatpush.bf16.msra.mxu0 %v8128_v20  ;;  %v10186_v28 = vld [vmem:[#allocation2 + $0x78] sm:$0xff]  ;;  %v10188_v29 = vld [vmem:[#allocation2 + $0x80] sm:$0xff] }
 0x10c   : > { %616 = vst.msk [vmem:[#allocation2 + $0x121] sm:$0xff] %vm593_vm6, %v582_v37  ;;  %v673_v49 = vld [vmem:[#allocation2 + $0xb1] sm:$0xff]  ;;  %8213 = vmatpush.bf16.msra.mxu2 %v8128_v20  ;;  %8214 = vmatpush.bf16.msra.mxu3 %v8128_v20  ;;  %v10190_v30 = vld [vmem:[#allocation2 + $0x60] sm:$0xff]  ;;  %v8382_v36 = vpack.i.bf16 %v10188_v29, %v10186_v28 }
 0x10d   : > { %8298 = vrot.lane.b32.xlu1 %v10120_v39, %s9523_s30  ;;  %8308 = vrot.lane.b32.xlu2 %v10125_v44, %s9523_s30  ;;  %617 = vst.msk [vmem:[#allocation2 + $0x129] sm:$0xff] %vm593_vm6, %v583_v42  ;;  %v676_v54 = vld [vmem:[#allocation2 + $0xd9] sm:$0xff]  ;;  %v8317_v57 = vpack.i.bf16 %v673_v49, %v672_v48  ;;  %v8377_v37 = vpack.i.bf16 %v10192_v31, %v10190_v30  ;;  %v590_v40 = vld [vmem:[%s9638_s28 + $0xf0] sm:$0xff] }
 0x10e   : > { %614 = vst.msk [vmem:[#allocation2 + $0x109] sm:$0xff] %vm593_vm6, %v580_v45  ;;  %v677_v55 = vld [vmem:[#allocation2 + $0xe1] sm:$0xff]  ;;  %v10200_v34 = vld [vmem:[#allocation2 + $0x98] sm:$0xff] }
 0x10f   : > { %8313 = vrot.lane.b32.xlu0 %v8312_v43, %s9523_s30  ;;  %v674_v51 = vld [vmem:[#allocation2 + $0xc1] sm:$0xff]  ;;  %615 = vst.msk [vmem:[#allocation2 + $0x111] sm:$0xff] %vm593_vm6, %v581_v46  ;;  %v8327_v61 = vpack.i.bf16 %v677_v55, %v676_v54  ;;  %8215 = vmatpush.bf16.msra.mxu1 %v8127_v23  ;;  %v8387_v38 = vpack.i.bf16 %v10200_v34, %v10198_v33  ;;  %v591_v41 = vld [vmem:[%s9638_s28 + $0xf8] sm:$0xff]  ;;  %v10222_v46 = vld [vmem:[#allocation2 + $0xb0] sm:$0xff]  ;;  %s9478_s28 = scalar_lea.hbm %s14510_s9, 32 }
 0x110   : > { %v675_v56 = vld [vmem:[#allocation2 + $0xc9] sm:$0xff]  ;;  %618 = vst.msk [vmem:[#allocation2 + $0x139] sm:$0xff] %vm593_vm6, %v584_v47  ;;  %1976 = vmatpush.bf16.msra.mxu0 %v8127_v23  ;;  %8216 = vmatpush.bf16.msra.mxu2 %v8127_v23  ;;  %v8125_v35 = vld [vmem:[%s14502_s1 + $0x20] sm:$0xff]  ;;  %v8124_v47 = vld [vmem:[%s14502_s1 + $0x18] sm:$0xff] }
 0x111   : > { %v8322_v58 = vpack.i.bf16 %v675_v56, %v674_v51  ;;  %619 = vst.msk [vmem:[#allocation2 + $0x141] sm:$0xff] %vm593_vm6, %v585_v50  ;;  %v678_v62 = vld [vmem:[#allocation2 + $0xf1] sm:$0xff]  ;;  %8217 = vmatpush.bf16.msra.mxu3 %v8127_v23  ;;  %v10215_v42 = vld [vmem:[#allocation2 + $0xc0] sm:$0xff]  ;;  %v10217_v43 = vld [vmem:[#allocation2 + $0xc8] sm:$0xff] }
 0x112   : > { %622 = vst.msk [vmem:[#allocation2 + $0x169] sm:$0xff] %vm593_vm6, %v588_v52  ;;  %v679_v63 = vld [vmem:[#allocation2 + $0xf9] sm:$0xff]  ;;  %v10220_v45 = vld [vmem:[#allocation2 + $0xa8] sm:$0xff]  ;;  %v8123_v50 = vld [vmem:[%s14502_s1 + $0x10] sm:$0xff]  ;;  %v8397_v51 = vpack.i.bf16 %v10217_v43, %v10215_v42 }
 0x113   : > { %623 = vst.msk [vmem:[#allocation2 + $0x171] sm:$0xff] %vm593_vm6, %v589_v53  ;;  %v682_v2 = vld [vmem:[#allocation2 + $0x121] sm:$0xff]  ;;  %v8332_v4 = vpack.i.bf16 %v679_v63, %v678_v62  ;;  %8218 = vmatpush.bf16.msra.mxu1 %v8126_v32  ;;  %v10229_v48 = vld [vmem:[#allocation2 + $0xd8] sm:$0xff]  ;;  %v8392_v52 = vpack.i.bf16 %v10222_v46, %v10220_v45  ;;  %v10248_v56 = vld [vmem:[#allocation2 + $0xf0] sm:$0xff] }
 0x114   : > { %620 = vst.msk [vmem:[#allocation2 + $0x151] sm:$0xff] %vm593_vm6, %v586_v59  ;;  %v683_v3 = vld [vmem:[#allocation2 + $0x129] sm:$0xff]  ;;  %1977 = vmatpush.bf16.msra.mxu0 %v8126_v32  ;;  %8219 = vmatpush.bf16.msra.mxu2 %v8126_v32  ;;  %v10231_v49 = vld [vmem:[#allocation2 + $0xe0] sm:$0xff] }
 0x115   : > { %8318 = vrot.lane.b32.xlu1 %v8317_v57, %s9523_s30  ;;  %8323 = vrot.lane.b32.xlu2 %v8322_v58, %s9523_s30  ;;  %621 = vst.msk [vmem:[#allocation2 + $0x159] sm:$0xff] %vm593_vm6, %v587_v60  ;;  %v680_v0 = vld [vmem:[#allocation2 + $0x109] sm:$0xff]  ;;  %v8342_v6 = vpack.i.bf16 %v683_v3, %v682_v2  ;;  %v8402_v53 = vpack.i.bf16 %v10231_v49, %v10229_v48  ;;  %v10250_v57 = vld [vmem:[#allocation2 + $0xf8] sm:$0xff]  ;;  %v10256_v59 = vld [vmem:[#allocation2 + $0x120] sm:$0xff] }
 0x116   : > { %v681_v1 = vld [vmem:[#allocation2 + $0x111] sm:$0xff]  ;;  %8220 = vmatpush.bf16.msra.mxu3 %v8126_v32  ;;  %624 = vst.msk [vmem:[#allocation2 + $0x181] sm:$0xff] %vm593_vm6, %v590_v40  ;;  %v10244_v54 = vld [vmem:[#allocation2 + $0x108] sm:$0xff]  ;;  %v8407_v63 = vpack.i.bf16 %v10250_v57, %v10248_v56  ;;  %v794_v32 = vld [vmem:[#allocation2 + $0x7a] sm:$0xff] }
 0x117   : > { %8328 = vrot.lane.b32.xlu0 %v8327_v61, %s9523_s30  ;;  %v8337_v5 = vpack.i.bf16 %v681_v1, %v680_v0  ;;  %v684_v7 = vld [vmem:[#allocation2 + $0x139] sm:$0xff]  ;;  %8221 = vmatpush.bf16.msra.mxu1 %v8125_v35  ;;  %625 = vst.msk [vmem:[#allocation2 + $0x189] sm:$0xff] %vm593_vm6, %v591_v41  ;;  %v10246_v55 = vld [vmem:[#allocation2 + $0x110] sm:$0xff]  ;;  %v8122_v58 = vld [vmem:[%s14502_s1 + $0x8] sm:$0xff] }
 0x118   : > { %v685_v8 = vld [vmem:[#allocation2 + $0x141] sm:$0xff]  ;;  %1978 = vmatpush.bf16.msra.mxu0 %v8125_v35  ;;  %8222 = vmatpush.bf16.msra.mxu2 %v8125_v35  ;;  %v8412_v62 = vpack.i.bf16 %v10246_v55, %v10244_v54  ;;  %v10275_v3 = vld [vmem:[#allocation2 + $0x138] sm:$0xff] }
 0x119   : > { %v688_v11 = vld [vmem:[#allocation2 + $0x169] sm:$0xff]  ;;  %v8347_v13 = vpack.i.bf16 %v685_v8, %v684_v7  ;;  %v8121_v61 = vld [vmem:[%s14502_s1] sm:$0xff] }
 0x11a   : > { %v689_v12 = vld [vmem:[#allocation2 + $0x171] sm:$0xff]  ;;  %8223 = vmatpush.bf16.msra.mxu3 %v8125_v35  ;;  %v10258_v60 = vld [vmem:[#allocation2 + $0x128] sm:$0xff] }
 0x11b   : > { %v686_v9 = vld [vmem:[#allocation2 + $0x151] sm:$0xff]  ;;  %v8357_v15 = vpack.i.bf16 %v689_v12, %v688_v11  ;;  %8224 = vmatpush.bf16.msra.mxu1 %v8124_v47  ;;  %v8417_v0 = vpack.i.bf16 %v10258_v60, %v10256_v59  ;;  %v10294_v11 = vld [vmem:[#allocation2 + $0x22] sm:$0xff] }
 0x11c   : > { %v687_v10 = vld [vmem:[#allocation2 + $0x159] sm:$0xff]  ;;  %1979 = vmatpush.bf16.msra.mxu0 %v8124_v47  ;;  %8225 = vmatpush.bf16.msra.mxu2 %v8124_v47  ;;  %v10271_v1 = vld [vmem:[#allocation2 + $0x150] sm:$0xff]  ;;  %v795_v35 = vld [vmem:[#allocation2 + $0x82] sm:$0xff] }
 0x11d   : > { %8333 = vrot.lane.b32.xlu1 %v8332_v4, %s9523_s30  ;;  %8338 = vrot.lane.b32.xlu2 %v8337_v5, %s9523_s30  ;;  %v8352_v14 = vpack.i.bf16 %v687_v10, %v686_v9  ;;  %v10273_v2 = vld [vmem:[#allocation2 + $0x158] sm:$0xff]  ;;  %v10277_v4 = vld [vmem:[#allocation2 + $0x140] sm:$0xff]  ;;  %v10280_v5 = vld [vmem:[#allocation2 + $0x168] sm:$0xff] }
 0x11e   : > { %8226 = vmatpush.bf16.msra.mxu3 %v8124_v47  ;;  %v8427_v7 = vpack.i.bf16 %v10273_v2, %v10271_v1  ;;  %v8422_v8 = vpack.i.bf16 %v10277_v4, %v10275_v3  ;;  %v10292_v10 = vld [vmem:[#allocation2 + $0x1a] sm:$0xff]  ;;  %v796_v47 = vld [vmem:[#allocation2 + $0x92] sm:$0xff] }
 0x11f   : > { %8343 = vrot.lane.b32.xlu0 %v8342_v6, %s9523_s30  ;;  %8227 = vmatpush.bf16.msra.mxu1 %v8123_v50  ;;  %v10282_v6 = vld [vmem:[#allocation2 + $0x170] sm:$0xff]  ;;  %v752_v12 = vld [vmem:[#allocation2 + $0x180] sm:$0xff]  ;;  %v8442_v20 = vpack.i.bf16 %v10294_v11, %v10292_v10 }
 0x120   : > { %1980 = vmatpush.bf16.msra.mxu0 %v8123_v50  ;;  %8228 = vmatpush.bf16.msra.mxu2 %v8123_v50  ;;  %v8432_v9 = vpack.i.bf16 %v10282_v6, %v10280_v5 }
 0x122   : > { %8229 = vmatpush.bf16.msra.mxu3 %v8123_v50  ;;  %v797_v50 = vld [vmem:[#allocation2 + $0x9a] sm:$0xff] }
 0x123   : > { %8230 = vmatpush.bf16.msra.mxu1 %v8122_v58 }
 0x124   : > { %1981 = vmatpush.bf16.msra.mxu0 %v8122_v58  ;;  %8231 = vmatpush.bf16.msra.mxu2 %v8122_v58 }
 0x125   : > { %8348 = vrot.lane.b32.xlu1 %v8347_v13, %s9523_s30  ;;  %8353 = vrot.lane.b32.xlu2 %v8352_v14, %s9523_s30  ;;  %v753_v13 = vld [vmem:[#allocation2 + $0x188] sm:$0xff]  ;;  %v10297_v14 = vld [vmem:[#allocation2 + $0x32] sm:$0xff] }
 0x126   : > { %8232 = vmatpush.bf16.msra.mxu3 %v8122_v58  ;;  %v8437_v23 = vpack.i.bf16 %v753_v13, %v752_v12  ;;  %v801_v58 = vld [vmem:[#allocation2 + $0xca] sm:$0xff]  ;;  %v807_v12 = vld [vmem:[#allocation2 + $0x112] sm:$0xff] }
 0x127   : > { %8358 = vrot.lane.b32.xlu0 %v8357_v15, %s9523_s30  ;;  %8233 = vmatpush.bf16.msra.mxu1 %v8121_v61  ;;  %v10299_v15 = vld [vmem:[#allocation2 + $0x3a] sm:$0xff] }
 0x128   : > { %1982 = vmatpush.bf16.msra.mxu0 %v8121_v61  ;;  %8234 = vmatpush.bf16.msra.mxu2 %v8121_v61 }
 0x12a   : > { %8235 = vmatpush.bf16.msra.mxu3 %v8121_v61 }
 0x12d   : > { %8363 = vrot.lane.b32.xlu1 %v8362_v24, %s9523_s30  ;;  %8368 = vrot.lane.b32.xlu2 %v8367_v25, %s9523_s30  ;;  %v8447_v24 = vpack.i.bf16 %v10299_v15, %v10297_v14  ;;  %v10307_v25 = vld [vmem:[#allocation2 + $0x4a] sm:$0xff] }
 0x12f   : > { %8373 = vrot.lane.b32.xlu0 %v8372_v27, %s9523_s30  ;;  %v10309_v27 = vld [vmem:[#allocation2 + $0x52] sm:$0xff] }
 0x135   : > { %8383 = vrot.lane.b32.xlu2 %v8382_v36, %s9523_s30  ;;  %8378 = vrot.lane.b32.xlu1 %v8377_v37, %s9523_s30  ;;  %v8452_v36 = vpack.i.bf16 %v10309_v27, %v10307_v25  ;;  %v8462_v37 = vpack.i.bf16 %v795_v35, %v794_v32  ;;  %v10330_v32 = vld [vmem:[#allocation2 + $0x6a] sm:$0xff] }
 0x137   : > { %8388 = vrot.lane.b32.xlu0 %v8387_v38, %s9523_s30 }
 0x13d   : > { %8398 = vrot.lane.b32.xlu2 %v8397_v51, %s9523_s30  ;;  %8393 = vrot.lane.b32.xlu1 %v8392_v52, %s9523_s30 }
 0x13f   : > { %8403 = vrot.lane.b32.xlu0 %v8402_v53, %s9523_s30  ;;  %v800_v53 = vld [vmem:[#allocation2 + $0xc2] sm:$0xff] }
 0x145   : > { %8413 = vrot.lane.b32.xlu2 %v8412_v62, %s9523_s30  ;;  %8408 = vrot.lane.b32.xlu1 %v8407_v63, %s9523_s30  ;;  %v8467_v62 = vpack.i.bf16 %v797_v50, %v796_v47  ;;  %v8477_v63 = vpack.i.bf16 %v801_v58, %v800_v53  ;;  %v809_v53 = vld [vmem:[#allocation2 + $0x12a] sm:$0xff] }
 0x146   : > { %v8134_v58 = vld [vmem:[%s14502_s1 + $0x68] sm:$0xff] }
 0x147   : > { %8418 = vrot.lane.b32.xlu0 %v8417_v0, %s9523_s30  ;;  %v802_v0 = vld [vmem:[#allocation2 + $0xda] sm:$0xff] }
 0x14d   : > { %8428 = vrot.lane.b32.xlu2 %v8427_v7, %s9523_s30  ;;  %8423 = vrot.lane.b32.xlu1 %v8422_v8, %s9523_s30  ;;  %v803_v7 = vld [vmem:[#allocation2 + $0xe2] sm:$0xff]  ;;  %v8136_v8 = vld [vmem:[%s14502_s1 + $0x78] sm:$0xff] }
 0x14e   : > { %2064 = vmatpush.bf16.msrb.mxu1 %v8136_v8 }
 0x14f   : > { %8433 = vrot.lane.b32.xlu0 %v8432_v9, %s9523_s30  ;;  %v806_v9 = vld [vmem:[#allocation2 + $0x10a] sm:$0xff] }
 0x150   : > { %v8492_v35 = vpack.i.bf16 %v807_v12, %v806_v9 }
 0x155   : > { %8443 = vrot.lane.b32.xlu2 %v8442_v20, %s9523_s30  ;;  %8438 = vrot.lane.b32.xlu1 %v8437_v23, %s9523_s30  ;;  %v8482_v20 = vpack.i.bf16 %v803_v7, %v802_v0  ;;  %v8135_v23 = vld [vmem:[%s14502_s1 + $0x70] sm:$0xff]  ;;  %v813_v7 = vld [vmem:[#allocation2 + $0x15a] sm:$0xff] }
 0x156   : > { %2065 = vmatpush.bf16.msrb.mxu1 %v8135_v23  ;;  %v812_v0 = vld [vmem:[#allocation2 + $0x152] sm:$0xff] }
 0x157   : > { %8448 = vrot.lane.b32.xlu0 %v8447_v24, %s9523_s30  ;;  %v10328_v24 = vld [vmem:[#allocation2 + $0x62] sm:$0xff]  ;;  %v10355_v23 = vld [vmem:[#allocation2 + $0xb2] sm:$0xff] }
 0x15a   : > { %2066 = vmatpush.bf16.msrb.mxu1 %v8134_v58  ;;  %v804_v58 = vld [vmem:[#allocation2 + $0xf2] sm:$0xff] }
 0x15d   : > { %v8304_v38 = vpop.permute.xlu2 %8303  ;;  %8453 = vrot.lane.b32.xlu1 %v8452_v36, %s9523_s30  ;;  %v8457_v36 = vpack.i.bf16 %v10330_v32, %v10328_v24 }
 0x15e   : > { %v8306_v40 = vunpack.i.h.bf16 %v8304_v38  ;;  %v8305_v41 = vunpack.i.l.bf16 %v8304_v38  ;;  %v626_v38 = vld [vmem:[#allocation2] sm:$0xff] }
 0x15f   : > { %8463 = vrot.lane.b32.xlu0 %v8462_v37, %s9523_s30  ;;  %8458 = vrot.lane.b32.xlu2 %v8457_v36, %s9523_s30 }
 0x160   : > { %v1435_v51 = vsel %vm593_vm6, %v10190_v30, %v8305_v41  ;;  %v1436_v52 = vsel %vm593_vm6, %v10192_v31, %v8306_v40  ;;  %v627_v40 = vld [vmem:[#allocation2 + $0x8] sm:$0xff] }
 0x161   : > { %v1575_v61 = vpack.c.bf16 %v1436_v52, %v1435_v51  ;;  %v808_v52 = vld [vmem:[#allocation2 + $0x122] sm:$0xff] }
 0x162   : > { %v8497_v9 = vpack.i.bf16 %v809_v53, %v808_v52  ;;  %v8131_v53 = vld [vmem:[%s14502_s1 + $0x50] sm:$0xff] }
 0x163   : > { %2003 = vmatmul.bf16.vlgmr.msra.gmra.mxu1 %v1575_v61 }
 0x165   : > { %8468 = vrot.lane.b32.xlu1 %v8467_v62, %s9523_s30 }
 0x167   : > { %8478 = vrot.lane.b32.xlu0 %v8477_v63, %s9523_s30  ;;  %v8309_v30 = vpop.permute.xlu2 %8308 }
 0x168   : > { %v8311_v31 = vunpack.i.h.bf16 %v8309_v30  ;;  %v8310_v13 = vunpack.i.l.bf16 %v8309_v30 }
 0x16a   : > { %v1437_v41 = vsel %vm593_vm6, %v10186_v28, %v8310_v13  ;;  %v1438_v47 = vsel %vm593_vm6, %v10188_v29, %v8311_v31  ;;  %v8133_v13 = vld [vmem:[%s14502_s1 + $0x60] sm:$0xff] }
 0x16b   : > { %v1580_v29 = vpack.c.bf16 %v1438_v47, %v1437_v41  ;;  %2067 = vmatpush.bf16.msrb.mxu1 %v8133_v13  ;;  %v811_v13 = vld [vmem:[#allocation2 + $0x142] sm:$0xff] }
 0x16c   : > { %v8284_v37 = vpop.permute.xlu0 %8283 }
 0x16d   : > { %v8286_v50 = vunpack.i.h.bf16 %v8284_v37  ;;  %v8285_v51 = vunpack.i.l.bf16 %v8284_v37  ;;  %8483 = vrot.lane.b32.xlu1 %v8482_v20, %s9523_s30  ;;  %v10353_v20 = vld [vmem:[#allocation2 + $0xaa] sm:$0xff] }
 0x16e   : > { %v8472_v37 = vpack.i.bf16 %v10355_v23, %v10353_v20 }
 0x16f   : > { %8493 = vrot.lane.b32.xlu0 %v8492_v35, %s9523_s30  ;;  %v1427_v28 = vsel %vm593_vm6, %v626_v38, %v8285_v51  ;;  %v1428_v61 = vsel %vm593_vm6, %v627_v40, %v8286_v50  ;;  %v8324_v62 = vpop.permute.xlu2 %8323  ;;  %v8507_v35 = vpack.i.bf16 %v813_v7, %v812_v0  ;;  %v8132_v38 = vld [vmem:[%s14502_s1 + $0x58] sm:$0xff] }
 0x170   : > { %v1555_v63 = vpack.c.bf16 %v1428_v61, %v1427_v28  ;;  %v8326_v8 = vunpack.i.h.bf16 %v8324_v62  ;;  %v8325_v30 = vunpack.i.l.bf16 %v8324_v62  ;;  %8473 = vrot.lane.b32.xlu2 %v8472_v37, %s9523_s30  ;;  %2068 = vmatpush.bf16.msrb.mxu1 %v8132_v38  ;;  %v805_v28 = vld [vmem:[#allocation2 + $0xfa] sm:$0xff] }
 0x171   : > { %v8487_v61 = vpack.i.bf16 %v805_v28, %v804_v58  ;;  %v8144_v0 = vld [vmem:[%s14502_s1 + $0xb8] sm:$0xff]  ;;  %v817_v58 = vld [vmem:[#allocation2 + $0x18a] sm:$0xff] }
 0x172   : > { %1983 = vmatmul.bf16.vlgmr.msra.gmra.mxu0 %v1555_v63  ;;  %v1443_v12 = vsel %vm593_vm6, %v10215_v42, %v8325_v30  ;;  %v1444_v31 = vsel %vm593_vm6, %v10217_v43, %v8326_v8  ;;  %v814_v42 = vld [vmem:[#allocation2 + $0x16a] sm:$0xff]  ;;  %v815_v43 = vld [vmem:[#allocation2 + $0x172] sm:$0xff]  ;;  %2153 = vmatpush.bf16.msrb.mxu2 %v8144_v0 }
 0x173   : > { %2008 = vmatmul.bf16.gmra.mxu1 %v1580_v29  ;;  %v1595_v36 = vpack.c.bf16 %v1444_v31, %v1443_v12  ;;  %v8512_v50 = vpack.i.bf16 %v815_v43, %v814_v42  ;;  %v8130_v63 = vld [vmem:[%s14502_s1 + $0x48] sm:$0xff]  ;;  %v8129_v12 = vld [vmem:[%s14502_s1 + $0x40] sm:$0xff]  ;;  %v8143_v31 = vld [vmem:[%s14502_s1 + $0xb0] sm:$0xff] }
 0x174   : > { %2069 = vmatpush.bf16.msrb.mxu1 %v8131_v53  ;;  %v8142_v43 = vld [vmem:[%s14502_s1 + $0xa8] sm:$0xff] }
 0x175   : > { %2023 = vmatmul.bf16.vlgmr.msra.gmra.mxu2 %v1595_v36  ;;  %8498 = vrot.lane.b32.xlu1 %v8497_v9, %s9523_s30  ;;  %v816_v53 = vld [vmem:[#allocation2 + $0x182] sm:$0xff] }
 0x176   : > { %2154 = vmatpush.bf16.msrb.mxu2 %v8143_v31  ;;  %v8517_v28 = vpack.i.bf16 %v817_v58, %v816_v53  ;;  %v8139_v31 = vld [vmem:[%s14502_s1 + $0x90] sm:$0xff]  ;;  %v8137_v53 = vld [vmem:[%s14502_s1 + $0x80] sm:$0xff] }
 0x177   : > { %8508 = vrot.lane.b32.xlu0 %v8507_v35, %s9523_s30  ;;  %v10365_v40 = vpop.permute.xlu1 %8293  ;;  %v10367_v41 = vpop.permute.xlu2 %8338  ;;  %v8151_v58 = vld [vmem:[%s14502_s1 + $0xf0] sm:$0xff] }
 0x178   : > { %8488 = vrot.lane.b32.xlu2 %v8487_v61, %s9523_s30  ;;  %2070 = vmatpush.bf16.msrb.mxu1 %v8130_v63 }
 0x179   : > { %v8289_v47 = vpop.permute.xlu0 %8288 }
 0x17a   : > { %v8291_v51 = vunpack.i.h.bf16 %v8289_v47  ;;  %v8290_v52 = vunpack.i.l.bf16 %v8289_v47  ;;  %2155 = vmatpush.bf16.msrb.mxu2 %v8142_v43 }
 0x17c   : > { %v1429_v29 = vsel %vm593_vm6, %v10159_v16, %v8290_v52  ;;  %v1430_v62 = vsel %vm593_vm6, %v10161_v17, %v8291_v51  ;;  %2071 = vmatpush.bf16.msrb.mxu1 %v8129_v12  ;;  %v8141_v52 = vld [vmem:[%s14502_s1 + $0xa0] sm:$0xff] }
 0x17d   : > { %8513 = vrot.lane.b32.xlu1 %v8512_v50, %s9523_s30  ;;  %v1560_v16 = vpack.c.bf16 %v1430_v62, %v1429_v29 }
 0x17e   : > { %2156 = vmatpush.bf16.msrb.mxu2 %v8141_v52 }
 0x17f   : > { %8523 = vrot.lane.b32.xlu0 %v10104_v26, %s9523_s30  ;;  %v10386_v7 = vpop.permute.xlu1 %8298  ;;  %v10388_v8 = vpop.permute.xlu2 %8353  ;;  %v810_v26 = vld [vmem:[#allocation2 + $0x13a] sm:$0xff] }
 0x180   : > { %v8502_v37 = vpack.i.bf16 %v811_v13, %v810_v26  ;;  %v8152_v26 = vld [vmem:[%s14502_s1 + $0xf8] sm:$0xff]  ;;  %v10439_v13 = vld [vmem:[#allocation2 + $0x61] sm:$0xff] }
 0x181   : > { %v8314_v17 = vpop.permute.xlu0 %8313  ;;  %2242 = vmatpush.bf16.msrb.mxu3 %v8152_v26 }
 0x182   : > { %v8316_v30 = vunpack.i.h.bf16 %v8314_v17  ;;  %v8315_v9 = vunpack.i.l.bf16 %v8314_v17  ;;  %1988 = vmatmul.bf16.gmra.mxu0 %v1560_v16  ;;  %8503 = vrot.lane.b32.xlu2 %v8502_v37, %s9523_s30  ;;  %v8140_v16 = vld [vmem:[%s14502_s1 + $0x98] sm:$0xff] }
 0x183   : > { %2157 = vmatpush.bf16.msrb.mxu2 %v8140_v16  ;;  %v691_v16 = vld [vmem:[#allocation2 + $0xa] sm:$0xff] }
 0x184   : > { %v1439_v35 = vsel %vm593_vm6, %v10198_v33, %v8315_v9  ;;  %v1440_v36 = vsel %vm593_vm6, %v10200_v34, %v8316_v30  ;;  %v8296_v33 = vunpack.i.h.bf16 %v10365_v40  ;;  %v8295_v34 = vunpack.i.l.bf16 %v10365_v40 }
 0x185   : > { %v1585_v42 = vpack.c.bf16 %v1440_v36, %v1439_v35  ;;  %8528 = vrot.lane.b32.xlu1 %v10120_v39, %s9523_s30  ;;  %v10441_v36 = vld [vmem:[#allocation2 + $0x69] sm:$0xff]  ;;  %2243 = vmatpush.bf16.msrb.mxu3 %v8151_v58 }
 0x186   : > { %v1431_v63 = vsel %vm593_vm6, %v10163_v18, %v8295_v34  ;;  %v1432_v0 = vsel %vm593_vm6, %v10165_v19, %v8296_v33  ;;  %v8532_v43 = vpack.i.bf16 %v10441_v36, %v10439_v13  ;;  %v8138_v33 = vld [vmem:[%s14502_s1 + $0x88] sm:$0xff]  ;;  %v8300_v34 = vunpack.i.l.bf16 %v10386_v7 }
 0x187   : > { %2013 = vmatmul.bf16.gmra.mxu1 %v1585_v42  ;;  %v8319_v38 = vpop.permute.xlu1 %8318  ;;  %v10406_v47 = vpop.permute.xlu2 %8368  ;;  %8538 = vrot.lane.b32.xlu0 %v10125_v44, %s9523_s30  ;;  %v1565_v30 = vpack.c.bf16 %v1432_v0, %v1431_v63  ;;  %v690_v0 = vld [vmem:[#allocation2 + $0x2] sm:$0xff] }
 0x188   : > { %v8321_v61 = vunpack.i.h.bf16 %v8319_v38  ;;  %v8320_v29 = vunpack.i.l.bf16 %v8319_v38  ;;  %2158 = vmatpush.bf16.msrb.mxu2 %v8139_v31 }
 0x189   : > { %v8329_v50 = vpop.permute.xlu0 %8328 }
 0x18a   : > { %v8331_v39 = vunpack.i.h.bf16 %v8329_v50  ;;  %v8330_v51 = vunpack.i.l.bf16 %v8329_v50  ;;  %8518 = vrot.lane.b32.xlu2 %v8517_v28, %s9523_s30  ;;  %v1442_v18 = vsel %vm593_vm6, %v10222_v46, %v8321_v61  ;;  %v10474_v61 = vld [vmem:[#allocation2 + $0x99] sm:$0xff] }
 0x18c   : > { %v1445_v44 = vsel %vm593_vm6, %v10229_v48, %v8330_v51  ;;  %v1446_v62 = vsel %vm593_vm6, %v10231_v49, %v8331_v39  ;;  %v1441_v49 = vsel %vm593_vm6, %v10220_v45, %v8320_v29  ;;  %2159 = vmatpush.bf16.msrb.mxu2 %v8138_v33 }
 0x18d   : > { %v1600_v40 = vpack.c.bf16 %v1446_v62, %v1445_v44  ;;  %v1590_v45 = vpack.c.bf16 %v1442_v18, %v1441_v49 }
 0x18f   : > { %2028 = vmatmul.bf16.gmra.mxu2 %v1600_v40  ;;  %v8334_v17 = vpop.permute.xlu1 %8333  ;;  %v10427_v48 = vpop.permute.xlu2 %8383 }
 0x190   : > { %v8336_v35 = vunpack.i.h.bf16 %v8334_v17  ;;  %v8335_v46 = vunpack.i.l.bf16 %v8334_v17  ;;  %2160 = vmatpush.bf16.msrb.mxu2 %v8137_v53 }
 0x191   : > { %v8344_v9 = vpop.permute.xlu0 %8343 }
 0x192   : > { %v8346_v19 = vunpack.i.h.bf16 %v8344_v9  ;;  %v8345_v12 = vunpack.i.l.bf16 %v8344_v9  ;;  %1993 = vmatmul.bf16.gmra.mxu0 %v1565_v30  ;;  %8533 = vrot.lane.b32.xlu2 %v8532_v43, %s9523_s30  ;;  %v1447_v39 = vsel %vm593_vm6, %v10248_v56, %v8335_v46  ;;  %v1448_v51 = vsel %vm593_vm6, %v10250_v57, %v8336_v35  ;;  %v10472_v57 = vld [vmem:[#allocation2 + $0x91] sm:$0xff] }
 0x193   : > { %v1605_v28 = vpack.c.bf16 %v1448_v51, %v1447_v39  ;;  %v1433_v56 = vsel %vm593_vm6, %v10171_v21, %v8300_v34  ;;  %v8542_v40 = vpack.i.bf16 %v10474_v61, %v10472_v57  ;;  %v8341_v35 = vunpack.i.h.bf16 %v10367_v41 }
 0x194   : > { %v1451_v37 = vsel %vm593_vm6, %v10256_v59, %v8345_v12  ;;  %v1452_v42 = vsel %vm593_vm6, %v10258_v60, %v8346_v19  ;;  %v8301_v60 = vunpack.i.h.bf16 %v10386_v7  ;;  %v8156_v7 = vld [vmem:[%s14502_s1 + $0x118] sm:$0xff]  ;;  %v8355_v34 = vunpack.i.l.bf16 %v10388_v8 }
 0x195   : > { %v1615_v38 = vpack.c.bf16 %v1452_v42, %v1451_v37  ;;  %2335 = vmatpush.bf16.msrb.mxu0 %v8156_v7  ;;  %8543 = vrot.lane.b32.xlu1 %v8542_v40, %s9523_s30  ;;  %v8370_v39 = vunpack.i.l.bf16 %v10406_v47  ;;  %v754_v40 = vld [vmem:[#allocation2 + $0x19] sm:$0xff] }
 0x196   : > { %v1434_v62 = vsel %vm593_vm6, %v10173_v22, %v8301_v60  ;;  %v8371_v60 = vunpack.i.h.bf16 %v10406_v47  ;;  %v8155_v47 = vld [vmem:[%s14502_s1 + $0x110] sm:$0xff] }
 0x197   : > { %2018 = vmatmul.bf16.gmra.mxu1 %v1590_v45  ;;  %2043 = vmatmul.bf16.vlgmr.msra.gmra.mxu3 %v1615_v38  ;;  %v8349_v59 = vpop.permute.xlu1 %8348  ;;  %v8399_v50 = vpop.permute.xlu2 %8398  ;;  %v1570_v21 = vpack.c.bf16 %v1434_v62, %v1433_v56  ;;  %v8340_v45 = vunpack.i.l.bf16 %v10367_v41  ;;  %v1450_v38 = vsel %vm593_vm6, %v10246_v55, %v8341_v35  ;;  %v8356_v41 = vunpack.i.h.bf16 %v10388_v8  ;;  %v8149_v8 = vld [vmem:[%s14502_s1 + $0xe0] sm:$0xff] }
 0x198   : > { %v8351_v29 = vunpack.i.h.bf16 %v8349_v59  ;;  %v8350_v44 = vunpack.i.l.bf16 %v8349_v59  ;;  %v8401_v37 = vunpack.i.h.bf16 %v8399_v50  ;;  %v8400_v42 = vunpack.i.l.bf16 %v8399_v50 }
 0x199   : > { %v10459_v52 = vpop.permute.xlu0 %8358  ;;  %v1449_v43 = vsel %vm593_vm6, %v10244_v54, %v8340_v45  ;;  %v1461_v53 = vsel %vm593_vm6, %v10292_v10, %v8370_v39  ;;  %v1462_v58 = vsel %vm593_vm6, %v10294_v11, %v8371_v60  ;;  %2336 = vmatpush.bf16.msrb.mxu0 %v8155_v47  ;;  %v8148_v10 = vld [vmem:[%s14502_s1 + $0xd8] sm:$0xff] }
 0x19a   : > { %v1453_v22 = vsel %vm593_vm6, %v10275_v3, %v8350_v44  ;;  %v1454_v18 = vsel %vm593_vm6, %v10277_v4, %v8351_v29  ;;  %v8150_v4 = vld [vmem:[%s14502_s1 + $0xe8] sm:$0xff]  ;;  %v1610_v59 = vpack.c.bf16 %v1450_v38, %v1449_v43  ;;  %v10512_v50 = vsel %vm593_vm6, %v10353_v20, %v8400_v42  ;;  %v862_v38 = vld [vmem:[#allocation2 + $0xb1] sm:$0xff] }
 0x19b   : > { %v1620_v31 = vpack.c.bf16 %v1454_v18, %v1453_v22  ;;  %2244 = vmatpush.bf16.msrb.mxu3 %v8150_v4  ;;  %v10516_v54 = vsel %vm593_vm6, %v10355_v23, %v8401_v37  ;;  %v1455_v20 = vsel %vm593_vm6, %v10271_v1, %v8355_v34  ;;  %v1456_v23 = vsel %vm593_vm6, %v10273_v2, %v8356_v41  ;;  %v755_v1 = vld [vmem:[#allocation2 + $0x21] sm:$0xff]  ;;  %v10555_v22 = vld [vmem:[#allocation2 + $0xc9] sm:$0xff]  ;;  %v756_v39 = vld [vmem:[#allocation2 + $0x31] sm:$0xff] }
 0x19c   : > { %v1591_v55 = vpack.c.bf16 %v10516_v54, %v10512_v50  ;;  %v1625_v56 = vpack.c.bf16 %v1456_v23, %v1455_v20  ;;  %v1561_v29 = vpack.c.bf16 %v1462_v58, %v1461_v53  ;;  %v861_v43 = vld [vmem:[#allocation2 + $0xa9] sm:$0xff]  ;;  %v8145_v23 = vld [vmem:[%s14502_s1 + $0xc0] sm:$0xff] }
 0x19d   : > { %v8547_v41 = vpack.i.bf16 %v862_v38, %v861_v43  ;;  %v8153_v53 = vld [vmem:[%s14502_s1 + $0x100] sm:$0xff] }
 0x19e   : > { %v10588_v58 = vld [vmem:[#allocation2 + $0xd9] sm:$0xff] }
 0x19f   : > { %2033 = vmatmul.bf16.gmra.mxu2 %v1605_v28  ;;  %v8364_v63 = vpop.permute.xlu1 %8363  ;;  %v10481_v17 = vpop.permute.xlu2 %8413  ;;  %2245 = vmatpush.bf16.msrb.mxu3 %v8149_v8  ;;  %v757_v8 = vld [vmem:[#allocation2 + $0x39] sm:$0xff] }
 0x1a0   : > { %v8366_v30 = vunpack.i.h.bf16 %v8364_v63  ;;  %v8365_v49 = vunpack.i.l.bf16 %v8364_v63  ;;  %8548 = vrot.lane.b32.xlu2 %v8547_v41, %s9523_s30 }
 0x1a1   : > { %v10487_v9 = vpop.permute.xlu0 %8373 }
 0x1a2   : > { %1998 = vmatmul.bf16.gmra.mxu0 %v1570_v21  ;;  %v1459_v19 = vsel %vm593_vm6, %v690_v0, %v8365_v49  ;;  %v1460_v12 = vsel %vm593_vm6, %v691_v16, %v8366_v30  ;;  %v8147_v0 = vld [vmem:[%s14502_s1 + $0xd0] sm:$0xff]  ;;  %v8154_v16 = vld [vmem:[%s14502_s1 + $0x108] sm:$0xff] }
 0x1a3   : > { %v1556_v26 = vpack.c.bf16 %v1460_v12, %v1459_v19  ;;  %2246 = vmatpush.bf16.msrb.mxu3 %v8148_v10  ;;  %v10553_v30 = vld [vmem:[#allocation2 + $0xc1] sm:$0xff]  ;;  %2337 = vmatpush.bf16.msrb.mxu0 %v8154_v16  ;;  %v8361_v19 = vunpack.i.h.bf16 %v10459_v52  ;;  %v8360_v12 = vunpack.i.l.bf16 %v10459_v52 }
 0x1a4   : > { %v8552_v18 = vpack.i.bf16 %v10555_v22, %v10553_v30 }
 0x1a5   : > { %v1457_v4 = vsel %vm593_vm6, %v10280_v5, %v8360_v12  ;;  %v1458_v37 = vsel %vm593_vm6, %v10282_v6, %v8361_v19 }
 0x1a6   : > { %8553 = vrot.lane.b32.xlu0 %v8552_v18, %s9523_s30  ;;  %v1630_v34 = vpack.c.bf16 %v1458_v37, %v1457_v4  ;;  %v884_v4 = vld [vmem:[#allocation2 + $0x3a] sm:$0xff] }
 0x1a7   : > { %2048 = vmatmul.bf16.gmra.mxu3 %v1620_v31  ;;  %2072 = vmatmul.bf16.vlgmr.msrb.gmra.mxu1 %v1556_v26  ;;  %v10493_v46 = vpop.permute.xlu2 %8428  ;;  %v10495_v3 = vpop.permute.xlu1 %8378  ;;  %v8376_v31 = vunpack.i.h.bf16 %v10487_v9  ;;  %v8375_v26 = vunpack.i.l.bf16 %v10487_v9  ;;  %v8146_v9 = vld [vmem:[%s14502_s1 + $0xc8] sm:$0xff] }
 0x1a8   : > { %2247 = vmatpush.bf16.msrb.mxu3 %v8147_v0  ;;  %2338 = vmatpush.bf16.msrb.mxu0 %v8153_v53  ;;  %v8381_v10 = vunpack.i.h.bf16 %v10495_v3 }
 0x1a9   : > { %v10504_v33 = vpop.permute.xlu0 %8388  ;;  %v1463_v52 = vsel %vm593_vm6, %v10297_v14, %v8375_v26  ;;  %v1464_v42 = vsel %vm593_vm6, %v10299_v15, %v8376_v31  ;;  %v883_v26 = vld [vmem:[#allocation2 + $0x32] sm:$0xff] }
 0x1aa   : > { %v1466_v19 = vsel %vm593_vm6, %v10309_v27, %v8381_v10  ;;  %v1559_v41 = vpack.c.bf16 %v884_v4, %v883_v26  ;;  %v870_v26 = vld [vmem:[#allocation2 + $0x111] sm:$0xff] }
 0x1ac   : > { %2248 = vmatpush.bf16.msrb.mxu3 %v8146_v9  ;;  %v759_v9 = vld [vmem:[#allocation2 + $0x51] sm:$0xff] }
 0x1af   : > { %2038 = vmatmul.bf16.gmra.mxu2 %v1610_v59  ;;  %v10520_v51 = vpop.permute.xlu1 %8393  ;;  %v8444_v28 = vpop.permute.xlu2 %8443  ;;  %v1566_v59 = vpack.c.bf16 %v1464_v42, %v1463_v52  ;;  %v758_v42 = vld [vmem:[#allocation2 + $0x49] sm:$0xff] }
 0x1b0   : > { %v8446_v44 = vunpack.i.h.bf16 %v8444_v28  ;;  %v8445_v62 = vunpack.i.l.bf16 %v8444_v28  ;;  %2249 = vmatpush.bf16.msrb.mxu3 %v8145_v23 }
 0x1b1   : > { %v10536_v7 = vpop.permute.xlu0 %8403 }
 0x1b2   : > { %v1491_v11 = vsel %vm593_vm6, %v754_v40, %v8445_v62  ;;  %v1492_v63 = vsel %vm593_vm6, %v755_v1, %v8446_v44  ;;  %7843 = vmatmul.msk.bf16.vlgmr.msrb.gmra.mxu0 %vm593_vm6, %v1559_v41  ;;  %v885_v41 = vld [vmem:[#allocation2 + $0x4a] sm:$0xff]  ;;  %v8406_v54 = vunpack.i.h.bf16 %v10536_v7 }
 0x1b3   : > { %v1557_v49 = vpack.c.bf16 %v1492_v63, %v1491_v11 }
 0x1b7   : > { %2053 = vmatmul.bf16.gmra.mxu3 %v1625_v56  ;;  %2077 = vmatmul.bf16.gmra.mxu1 %v1561_v29  ;;  %v10538_v2 = vpop.permute.xlu1 %8408  ;;  %v10598_v29 = vld [vmem:[#allocation2 + $0xe1] sm:$0xff] }
 0x1b8   : > { %v8557_v1 = vpack.i.bf16 %v10598_v29, %v10588_v58 }
 0x1b9   : > { %v10545_v21 = vpop.permute.xlu0 %8418  ;;  %v8459_v6 = vpop.permute.xlu2 %8458 }
 0x1ba   : > { %v8461_v14 = vunpack.i.h.bf16 %v8459_v6  ;;  %v8460_v60 = vunpack.i.l.bf16 %v8459_v6  ;;  %8558 = vrot.lane.b32.xlu1 %v8557_v1, %s9523_s30  ;;  %v10641_v1 = vld [vmem:[#allocation2 + $0xf9] sm:$0xff] }
 0x1bc   : > { %v10592_v28 = vsel %vm593_vm6, %v10439_v13, %v8460_v60  ;;  %v10596_v56 = vsel %vm593_vm6, %v10441_v36, %v8461_v14  ;;  %v8380_v36 = vunpack.i.l.bf16 %v10495_v3 }
 0x1bd   : > { %v1572_v44 = vpack.c.bf16 %v10596_v56, %v10592_v28 }
 0x1be   : > { %v1465_v18 = vsel %vm593_vm6, %v10307_v25, %v8380_v36  ;;  %v8386_v36 = vunpack.i.h.bf16 %v10427_v48 }
 0x1bf   : > { %2161 = vmatmul.bf16.vlgmr.msrb.gmra.mxu2 %v1557_v49  ;;  %v10564_v35 = vpop.permute.xlu1 %8423  ;;  %v1571_v52 = vpack.c.bf16 %v1466_v19, %v1465_v18 }
 0x1c1   : > { %v10566_v45 = vpop.permute.xlu0 %8433 }
 0x1c7   : > { %2058 = vmatmul.bf16.gmra.mxu3 %v1630_v34  ;;  %2082 = vmatmul.bf16.gmra.mxu1 %v1566_v59  ;;  %v10580_v5 = vpop.permute.xlu1 %8438 }
 0x1c9   : > { %v8449_v15 = vpop.permute.xlu0 %8448 }
 0x1ca   : > { %v8451_v47 = vunpack.i.h.bf16 %v8449_v15  ;;  %v8450_v20 = vunpack.i.l.bf16 %v8449_v15  ;;  %v8474_v63 = vpop.permute.xlu2 %8473 }
 0x1cb   : > { %v8476_v16 = vunpack.i.h.bf16 %v8474_v63  ;;  %v8475_v49 = vunpack.i.l.bf16 %v8474_v63 }
 0x1cc   : > { %v1493_v62 = vsel %vm593_vm6, %v756_v39, %v8450_v20  ;;  %v1494_v40 = vsel %vm593_vm6, %v757_v8, %v8451_v47  ;;  %v8164_v39 = vld [vmem:[%s14504_s3 + $0x38] sm:$0xff] }
 0x1cd   : > { %v1562_v13 = vpack.c.bf16 %v1494_v40, %v1493_v62  ;;  %v10616_v3 = vsel %vm593_vm6, %v861_v43, %v8475_v49  ;;  %v10619_v37 = vsel %vm593_vm6, %v862_v38, %v8476_v16  ;;  %3898 = vmatpush.bf16.msra.mxu1 %v8164_v39  ;;  %v10639_v40 = vld [vmem:[#allocation2 + $0xf1] sm:$0xff] }
 0x1ce   : > { %v1587_v25 = vpack.c.bf16 %v10619_v37, %v10616_v3  ;;  %v10829_v3 = vld [vmem:[#allocation2 + $0x139] sm:$0xff] }
 0x1cf   : > { %2166 = vmatmul.bf16.gmra.mxu2 %v1562_v13  ;;  %v8454_v11 = vpop.permute.xlu1 %8453 }
 0x1d0   : > { %v8456_v12 = vunpack.i.h.bf16 %v8454_v11  ;;  %v8455_v31 = vunpack.i.l.bf16 %v8454_v11  ;;  %v8385_v11 = vunpack.i.l.bf16 %v10427_v48 }
 0x1d1   : > { %v10609_v0 = vpop.permute.xlu0 %8463 }
 0x1d2   : > { %v1495_v27 = vsel %vm593_vm6, %v758_v42, %v8455_v31  ;;  %v1496_v59 = vsel %vm593_vm6, %v759_v9, %v8456_v12  ;;  %v8489_v14 = vpop.permute.xlu2 %8488  ;;  %v1467_v19 = vsel %vm593_vm6, %v10328_v24, %v8385_v11  ;;  %v1468_v12 = vsel %vm593_vm6, %v10330_v32, %v8386_v36  ;;  %v869_v31 = vld [vmem:[#allocation2 + $0x109] sm:$0xff] }
 0x1d3   : > { %v8491_v60 = vunpack.i.h.bf16 %v8489_v14  ;;  %v8490_v15 = vunpack.i.l.bf16 %v8489_v14  ;;  %v1567_v53 = vpack.c.bf16 %v1496_v59, %v1495_v27  ;;  %v8465_v9 = vunpack.i.l.bf16 %v10609_v0 }
 0x1d5   : > { %v10657_v10 = vsel %vm593_vm6, %v10641_v1, %v8491_v60  ;;  %v10692_v60 = vld [vmem:[#allocation2 + $0x129] sm:$0xff] }
 0x1d7   : > { %2087 = vmatmul.bf16.gmra.mxu1 %v1571_v52  ;;  %v8469_v34 = vpop.permute.xlu1 %8468 }
 0x1d8   : > { %v8471_v43 = vunpack.i.h.bf16 %v8469_v34  ;;  %v8470_v6 = vunpack.i.l.bf16 %v8469_v34  ;;  %v886_v34 = vld [vmem:[#allocation2 + $0x52] sm:$0xff] }
 0x1d9   : > { %v8479_v38 = vpop.permute.xlu0 %8478 }
 0x1da   : > { %v8481_v8 = vunpack.i.h.bf16 %v8479_v38  ;;  %v8480_v47 = vunpack.i.l.bf16 %v8479_v38  ;;  %v10631_v20 = vsel %vm593_vm6, %v10472_v57, %v8470_v6  ;;  %v10635_v23 = vsel %vm593_vm6, %v10474_v61, %v8471_v43  ;;  %v10690_v38 = vld [vmem:[#allocation2 + $0x121] sm:$0xff] }
 0x1db   : > { %v1582_v62 = vpack.c.bf16 %v10635_v23, %v10631_v20  ;;  %v10653_v61 = vsel %vm593_vm6, %v10639_v40, %v8490_v15  ;;  %v1576_v6 = vpack.c.bf16 %v1468_v12, %v1467_v19  ;;  %v8391_v12 = vunpack.i.h.bf16 %v10504_v33 }
 0x1dc   : > { %v10645_v13 = vsel %vm593_vm6, %v10553_v30, %v8480_v47  ;;  %v10649_v57 = vsel %vm593_vm6, %v10555_v22, %v8481_v8  ;;  %v10694_v47 = vld [vmem:[#allocation2 + $0x151] sm:$0xff]  ;;  %v10750_v63 = vpop.permute.xlu2 %8503 }
 0x1dd   : > { %v1592_v30 = vpack.c.bf16 %v10649_v57, %v10645_v13 }
 0x1df   : > { %2171 = vmatmul.bf16.gmra.mxu2 %v1567_v53  ;;  %v8484_v22 = vpop.permute.xlu1 %8483  ;;  %v10696_v53 = vld [vmem:[#allocation2 + $0x159] sm:$0xff] }
 0x1e0   : > { %v8486_v16 = vunpack.i.h.bf16 %v8484_v22  ;;  %v8485_v49 = vunpack.i.l.bf16 %v8484_v22  ;;  %v10685_v43 = vpop.f32.mrf.mxu1  ;;  %v8582_v50 = vpack.i.bf16 %v10696_v53, %v10694_v47 }
 0x1e1   : > { %v8494_v18 = vpop.permute.xlu0 %8493 }
 0x1e2   : > { %v8496_v48 = vunpack.i.h.bf16 %v8494_v18  ;;  %v8495_v4 = vunpack.i.l.bf16 %v8494_v18  ;;  %v10671_v52 = vsel %vm593_vm6, %v10588_v58, %v8485_v49  ;;  %v10675_v42 = vsel %vm593_vm6, %v10598_v29, %v8486_v16 }
 0x1e3   : > { %v1564_v58 = vpack.c.bf16 %v886_v34, %v885_v41  ;;  %v10720_v34 = vld [vmem:[#allocation2 + $0x7a] sm:$0xff] }
 0x1e4   : > { %v10680_v27 = vsel %vm593_vm6, %v869_v31, %v8495_v4  ;;  %v10683_v59 = vsel %vm593_vm6, %v870_v26, %v8496_v48  ;;  %v8390_v48 = vunpack.i.l.bf16 %v10504_v33  ;;  %v8567_v4 = vpack.i.bf16 %v870_v26, %v869_v31  ;;  %v10732_v33 = vld [vmem:[#allocation2 + $0x171] sm:$0xff] }
 0x1e5   : > { %7844 = vmatmul.msk.bf16.gmra.mxu0 %vm593_vm6, %v1564_v58  ;;  %v820_v41 = vld [vmem:[#allocation2 + $0x38] sm:$0xff] }
 0x1e6   : > { %8568 = vrot.lane.b32.xlu0 %v8567_v4, %s9523_s30 }
 0x1e7   : > { %2092 = vmatmul.bf16.gmra.mxu1 %v1576_v6  ;;  %v8499_v29 = vpop.permute.xlu1 %8498  ;;  %v10722_v6 = vld [vmem:[#allocation2 + $0x82] sm:$0xff] }
 0x1e8   : > { %v8501_v15 = vunpack.i.h.bf16 %v8499_v29  ;;  %v8500_v39 = vunpack.i.l.bf16 %v8499_v29  ;;  %v10724_v58 = vpop.f32.mrf.mxu1 }
 0x1e9   : > { %v8509_v8 = vpop.permute.xlu0 %8508 }
 0x1ea   : > { %v8511_v36 = vunpack.i.h.bf16 %v8509_v8  ;;  %v8510_v11 = vunpack.i.l.bf16 %v8509_v8  ;;  %v10700_v22 = vsel %vm593_vm6, %v10690_v38, %v8500_v39  ;;  %v10704_v16 = vsel %vm593_vm6, %v10692_v60, %v8501_v15  ;;  %v10730_v15 = vld [vmem:[#allocation2 + $0x169] sm:$0xff] }
 0x1eb   : > { %v1469_v8 = vsel %vm593_vm6, %v10720_v34, %v8390_v48 }
 0x1ec   : > { %v10710_v18 = vsel %vm593_vm6, %v10694_v47, %v8510_v11  ;;  %v10714_v19 = vsel %vm593_vm6, %v10696_v53, %v8511_v36  ;;  %v1470_v36 = vsel %vm593_vm6, %v10722_v6, %v8391_v12  ;;  %v819_v11 = vld [vmem:[#allocation2 + $0x30] sm:$0xff] }
 0x1ed   : > { %v1581_v12 = vpack.c.bf16 %v1470_v36, %v1469_v8  ;;  %v821_v36 = vld [vmem:[#allocation2 + $0x48] sm:$0xff] }
 0x1ee   : > { %8583 = vrot.lane.b32.xlu0 %v8582_v50, %s9523_s30 }
 0x1ef   : > { %2176 = vmatmul.bf16.gmra.mxu2 %v1572_v44  ;;  %v8514_v29 = vpop.permute.xlu1 %8513 }
 0x1f0   : > { %v8516_v31 = vunpack.i.h.bf16 %v8514_v29  ;;  %v8515_v26 = vunpack.i.l.bf16 %v8514_v29  ;;  %v762_v29 = vld [vmem:[#allocation2 + $0x79] sm:$0xff] }
 0x1f1   : > { %v8524_v39 = vpop.permute.xlu0 %8523 }
 0x1f2   : > { %v8526_v28 = vunpack.i.h.bf16 %v8524_v39  ;;  %v8525_v56 = vunpack.i.l.bf16 %v8524_v39  ;;  %v10740_v44 = vsel %vm593_vm6, %v10730_v15, %v8515_v26  ;;  %v10744_v4 = vsel %vm593_vm6, %v10732_v33, %v8516_v31 }
 0x1f3   : > { %v8562_v39 = vpack.i.bf16 %v10641_v1, %v10639_v40  ;;  %v1569_v26 = vpack.c.bf16 %v10330_v32, %v10328_v24  ;;  %v8466_v31 = vunpack.i.h.bf16 %v10609_v0  ;;  %v1499_v40 = vsel %vm593_vm6, %v762_v29, %v8465_v9  ;;  %v822_v0 = vld [vmem:[#allocation2 + $0x50] sm:$0xff]  ;;  %v703_v29 = vld [vmem:[#allocation2 + $0x9a] sm:$0xff] }
 0x1f4   : > { %v1523_v48 = vsel %vm593_vm6, %v819_v11, %v8525_v56  ;;  %v1524_v49 = vsel %vm593_vm6, %v820_v41, %v8526_v28  ;;  %v763_v11 = vld [vmem:[#allocation2 + $0x81] sm:$0xff]  ;;  %v8572_v28 = vpack.i.bf16 %v10692_v60, %v10690_v38  ;;  %v8396_v56 = vunpack.i.h.bf16 %v10520_v51  ;;  %v702_v9 = vld [vmem:[#allocation2 + $0x92] sm:$0xff] }
 0x1f5   : > { %v1558_v14 = vpack.c.bf16 %v1524_v49, %v1523_v48  ;;  %8563 = vrot.lane.b32.xlu2 %v8562_v39, %s9523_s30  ;;  %7845 = vmatmul.msk.bf16.gmra.mxu0 %vm593_vm6, %v1569_v26  ;;  %v10760_v49 = vpop.f32.mrf.mxu1  ;;  %v1500_v1 = vsel %vm593_vm6, %v763_v11, %v8466_v31  ;;  %v8395_v48 = vunpack.i.l.bf16 %v10520_v51  ;;  %v10773_v39 = vpop.permute.xlu2 %8518 }
 0x1f6   : > { %v1577_v8 = vpack.c.bf16 %v1500_v1, %v1499_v40  ;;  %8573 = vrot.lane.b32.xlu1 %v8572_v28, %s9523_s30  ;;  %v1472_v60 = vsel %vm593_vm6, %v703_v29, %v8396_v56  ;;  %v1574_v40 = vpack.c.bf16 %v10722_v6, %v10720_v34  ;;  %v10784_v1 = vpop.f32.mrf.mxu0  ;;  %v824_v28 = vld [vmem:[#allocation2 + $0x68] sm:$0xff] }
 0x1f7   : > { %2097 = vmatmul.bf16.gmra.mxu1 %v1581_v12  ;;  %2250 = vmatmul.bf16.vlgmr.msrb.gmra.mxu3 %v1558_v14  ;;  %v8529_v41 = vpop.permute.xlu1 %8528  ;;  %v8163_v14 = vld [vmem:[%s14504_s3 + $0x30] sm:$0xff]  ;;  %v1471_v38 = vsel %vm593_vm6, %v702_v9, %v8395_v48 }
 0x1f8   : > { %v8531_v24 = vunpack.i.h.bf16 %v8529_v41  ;;  %v8530_v32 = vunpack.i.l.bf16 %v8529_v41  ;;  %v10771_v12 = vpop.f32.mrf.mxu2  ;;  %3899 = vmatpush.bf16.msra.mxu1 %v8163_v14  ;;  %v1586_v41 = vpack.c.bf16 %v1472_v60, %v1471_v38  ;;  %v823_v14 = vld [vmem:[#allocation2 + $0x60] sm:$0xff] }
 0x1f9   : > { %14514 = vst [vmem:[#allocation10_spill] sm:$0xff] %v10771_v12  ;;  %v8539_v20 = vpop.permute.xlu0 %8538  ;;  %v8506_v12 = vunpack.i.h.bf16 %v10750_v63 }
 0x1fa   : > { %v1525_v26 = vsel %vm593_vm6, %v821_v36, %v8530_v32  ;;  %v1526_v31 = vsel %vm593_vm6, %v822_v0, %v8531_v24  ;;  %v8541_v60 = vunpack.i.h.bf16 %v8539_v20 }
 0x1fb   : > { %v1563_v51 = vpack.c.bf16 %v1526_v31, %v1525_v26  ;;  %v1579_v31 = vpack.c.bf16 %v703_v29, %v702_v9  ;;  %v8162_v9 = vld [vmem:[%s14504_s3 + $0x28] sm:$0xff] }
 0x1fc   : > { %v706_v29 = vld [vmem:[#allocation2 + $0xc2] sm:$0xff]  ;;  %3900 = vmatpush.bf16.msra.mxu1 %v8162_v9 }
 0x1fd   : > { %v10780_v11 = vpop.f32.mrf.mxu1  ;;  %v8534_v24 = vpop.permute.xlu2 %8533 }
 0x1fe   : > { %v8535_v36 = vunpack.i.l.bf16 %v8534_v24  ;;  %v10794_v34 = vpop.f32.mrf.mxu0 }
 0x1ff   : > { %2181 = vmatmul.bf16.gmra.mxu2 %v1577_v8  ;;  %v8536_v8 = vunpack.i.h.bf16 %v8534_v24  ;;  %v707_v24 = vld [vmem:[#allocation2 + $0xca] sm:$0xff] }
 0x200   : > { %v10786_v32 = vpop.f32.mrf.mxu2  ;;  %v1527_v6 = vsel %vm593_vm6, %v823_v14, %v8535_v36  ;;  %v1589_v13 = vpack.c.bf16 %v707_v24, %v706_v29 }
 0x201   : > { %14515 = vst [vmem:[#allocation11_spill] sm:$0xff] %v10786_v32  ;;  %v1528_v56 = vsel %vm593_vm6, %v824_v28, %v8536_v8 }
 0x202   : > { %v1568_v26 = vpack.c.bf16 %v1528_v56, %v1527_v6  ;;  %v893_v6 = vld [vmem:[#allocation2 + $0xaa] sm:$0xff]  ;;  %v894_v56 = vld [vmem:[#allocation2 + $0xb2] sm:$0xff] }
 0x205   : > { %7846 = vmatmul.msk.bf16.gmra.mxu0 %vm593_vm6, %v1574_v40  ;;  %v10789_v0 = vpop.f32.mrf.mxu1  ;;  %v826_v40 = vld [vmem:[#allocation2 + $0x80] sm:$0xff] }
 0x206   : > { %v10806_v23 = vpop.f32.mrf.mxu0  ;;  %v1530_v36 = vsel %vm593_vm6, %v826_v40, %v8541_v60 }
 0x207   : > { %2102 = vmatmul.bf16.gmra.mxu1 %v1586_v41  ;;  %2255 = vmatmul.bf16.gmra.mxu3 %v1563_v51  ;;  %v8540_v51 = vunpack.i.l.bf16 %v8539_v20  ;;  %v825_v41 = vld [vmem:[#allocation2 + $0x78] sm:$0xff]  ;;  %v1584_v20 = vpack.c.bf16 %v894_v56, %v893_v6  ;;  %v8544_v60 = vpop.permute.xlu1 %8543  ;;  %v709_v6 = vld [vmem:[#allocation2 + $0xe2] sm:$0xff] }
 0x208   : > { %v8546_v9 = vunpack.i.h.bf16 %v8544_v60  ;;  %v8545_v50 = vunpack.i.l.bf16 %v8544_v60 }
 0x209   : > { %v1529_v8 = vsel %vm593_vm6, %v825_v41, %v8540_v51 }
 0x20a   : > { %v1573_v28 = vpack.c.bf16 %v1530_v36, %v1529_v8  ;;  %v8587_v8 = vpack.i.bf16 %v10732_v33, %v10730_v15  ;;  %v8411_v36 = vunpack.i.h.bf16 %v10538_v2 }
 0x20c   : > { %8588 = vrot.lane.b32.xlu1 %v8587_v8, %s9523_s30  ;;  %v829_v8 = vld [vmem:[#allocation2 + $0xa8] sm:$0xff] }
 0x20d   : > { %v10800_v38 = vpop.f32.mrf.mxu1 }
 0x20e   : > { %v10831_v37 = vpop.f32.mrf.mxu0 }
 0x20f   : > { %2186 = vmatmul.bf16.gmra.mxu2 %v1582_v62 }
 0x212   : > { %v10798_v48 = vpop.f32.mrf.mxu2 }
 0x213   : > { %14516 = vst [vmem:[#allocation12_spill] sm:$0xff] %v10798_v48 }
 0x215   : > { %7847 = vmatmul.msk.bf16.gmra.mxu0 %vm593_vm6, %v1579_v31  ;;  %v10823_v14 = vpop.f32.mrf.mxu1 }
 0x217   : > { %2107 = vmatmul.bf16.gmra.mxu1 %v1591_v55  ;;  %2260 = vmatmul.bf16.gmra.mxu3 %v1568_v26  ;;  %v8405_v55 = vunpack.i.l.bf16 %v10536_v7  ;;  %v1476_v7 = vsel %vm593_vm6, %v707_v24, %v8406_v54  ;;  %v827_v54 = vld [vmem:[#allocation2 + $0x90] sm:$0xff]  ;;  %v8415_v24 = vunpack.i.l.bf16 %v10481_v17 }
 0x218   : > { %v1531_v56 = vsel %vm593_vm6, %v827_v54, %v8545_v50 }
 0x219   : > { %v1475_v53 = vsel %vm593_vm6, %v706_v29, %v8405_v55  ;;  %v828_v55 = vld [vmem:[#allocation2 + $0x98] sm:$0xff]  ;;  %v8416_v29 = vunpack.i.h.bf16 %v10481_v17 }
 0x21a   : > { %v10808_v62 = vpop.f32.mrf.mxu2  ;;  %v1596_v26 = vpack.c.bf16 %v1476_v7, %v1475_v53  ;;  %v10843_v40 = vpop.f32.mrf.mxu3  ;;  %v8410_v53 = vunpack.i.l.bf16 %v10538_v2  ;;  %v1478_v2 = vsel %vm593_vm6, %v709_v6, %v8411_v36  ;;  %v830_v36 = vld [vmem:[#allocation2 + $0xb0] sm:$0xff] }
 0x21b   : > { %14517 = vst [vmem:[#allocation13_spill] sm:$0xff] %v10808_v62  ;;  %v10849_v7 = vpop.f32.mrf.mxu0 }
 0x21c   : > { %14521 = vst [vmem:[#allocation17_spill] sm:$0xff] %v10843_v40 }
 0x21d   : > { %v10841_v41 = vpop.f32.mrf.mxu1 }
 0x21e   : > { %14520 = vst [vmem:[#allocation16_spill] sm:$0xff] %v10841_v41 }
 0x21f   : > { %2191 = vmatmul.bf16.gmra.mxu2 %v1587_v25  ;;  %v10833_v25 = vld [vmem:[#allocation2 + $0x141] sm:$0xff] }
 0x220   : > { %v8577_v31 = vpack.i.bf16 %v10833_v25, %v10829_v3 }
 0x222   : > { %v10825_v47 = vpop.f32.mrf.mxu2  ;;  %8578 = vrot.lane.b32.xlu2 %v8577_v31, %s9523_s30  ;;  %v10863_v57 = vpop.f32.mrf.mxu3 }
 0x223   : > { %14518 = vst [vmem:[#allocation14_spill] sm:$0xff] %v10825_v47 }
 0x224   : > { %14523 = vst [vmem:[#allocation19_spill] sm:$0xff] %v10863_v57 }
 0x225   : > { %7848 = vmatmul.msk.bf16.gmra.mxu0 %vm593_vm6, %v1584_v20  ;;  %v10861_v20 = vpop.f32.mrf.mxu1 }
 0x227   : > { %2112 = vmatmul.bf16.gmra.mxu1 %v1596_v26  ;;  %2265 = vmatmul.bf16.gmra.mxu3 %v1573_v28  ;;  %v708_v28 = vld [vmem:[#allocation2 + $0xda] sm:$0xff]  ;;  %v1532_v26 = vsel %vm593_vm6, %v828_v55, %v8546_v9  ;;  %v8549_v9 = vpop.permute.xlu2 %8548 }
 0x228   : > { %v1477_v15 = vsel %vm593_vm6, %v708_v28, %v8410_v53  ;;  %v1578_v33 = vpack.c.bf16 %v1532_v26, %v1531_v56  ;;  %v8551_v54 = vunpack.i.h.bf16 %v8549_v9  ;;  %v8550_v55 = vunpack.i.l.bf16 %v8549_v9  ;;  %v8161_v53 = vld [vmem:[%s14504_s3 + $0x20] sm:$0xff] }
 0x229   : > { %v1601_v60 = vpack.c.bf16 %v1478_v2, %v1477_v15  ;;  %v14525_v26 = vpack.c.bf16 %v10675_v42, %v10671_v52  ;;  %v710_v15 = vld [vmem:[#allocation2 + $0xf2] sm:$0xff]  ;;  %v711_v2 = vld [vmem:[#allocation2 + $0xfa] sm:$0xff]  ;;  %3901 = vmatpush.bf16.msra.mxu1 %v8161_v53  ;;  %v1594_v42 = vpack.c.bf16 %v709_v6, %v708_v28 }
 0x22a   : > { %v10839_v51 = vpop.f32.mrf.mxu2  ;;  %v1479_v17 = vsel %vm593_vm6, %v710_v15, %v8415_v24  ;;  %v1480_v40 = vsel %vm593_vm6, %v711_v2, %v8416_v29  ;;  %v882_v28 = vld [vmem:[#allocation2 + $0x1a1] sm:$0xff] }
 0x22b   : > { %14519 = vst [vmem:[#allocation15_spill] sm:$0xff] %v10839_v51  ;;  %v1606_v52 = vpack.c.bf16 %v1480_v40, %v1479_v17  ;;  %v881_v40 = vld [vmem:[#allocation2 + $0x199] sm:$0xff]  ;;  %v8421_v17 = vunpack.i.h.bf16 %v10545_v21 }
 0x22c   : > { %v831_v6 = vld [vmem:[#allocation2 + $0xc0] sm:$0xff] }
 0x22d   : > { %v10875_v56 = vpop.f32.mrf.mxu1 }
 0x22f   : > { %2196 = vmatmul.bf16.gmra.mxu2 %v1592_v30  ;;  %v10865_v30 = vpop.f32.mrf.mxu0 }
 0x232   : > { %v10857_v31 = vpop.f32.mrf.mxu2 }
 0x233   : > { %14522 = vst [vmem:[#allocation18_spill] sm:$0xff] %v10857_v31 }
 0x235   : > { %7849 = vmatmul.msk.bf16.gmra.mxu0 %vm593_vm6, %v1589_v13  ;;  %v1534_v13 = vsel %vm593_vm6, %v830_v36, %v8551_v54  ;;  %v10891_v53 = vpop.f32.mrf.mxu1  ;;  %v2582_v54 = vld [vmem:[#allocation3 + $0x9] sm:$0xff] }
 0x237   : > { %2117 = vmatmul.bf16.gmra.mxu1 %v1601_v60  ;;  %2270 = vmatmul.bf16.gmra.mxu3 %v1578_v33  ;;  %v10880_v33 = vpop.f32.mrf.mxu3  ;;  %v1533_v60 = vsel %vm593_vm6, %v829_v8, %v8550_v55  ;;  %v10884_v9 = vpop.f32.mrf.mxu0  ;;  %v2581_v8 = vld [vmem:[#allocation3 + $0x1] sm:$0xff] }
 0x238   : > { %14526 = vst [vmem:[#allocation21_spill] sm:$0xff] %v10880_v33  ;;  %v8554_v55 = vpop.permute.xlu0 %8553  ;;  %v8602_v33 = vpack.i.bf16 %v2582_v54, %v2581_v8  ;;  %v712_v8 = vld [vmem:[#allocation2 + $0x10a] sm:$0xff]  ;;  %v713_v54 = vld [vmem:[#allocation2 + $0x112] sm:$0xff] }
 0x239   : > { %v8556_v29 = vunpack.i.h.bf16 %v8554_v55 }
 0x23a   : > { %v10868_v50 = vpop.f32.mrf.mxu2  ;;  %8603 = vrot.lane.b32.xlu1 %v8602_v33, %s9523_s30 }
 0x23b   : > { %14524 = vst [vmem:[#allocation20_spill] sm:$0xff] %v10868_v50  ;;  %v1583_v50 = vpack.c.bf16 %v1534_v13, %v1533_v60  ;;  %v8555_v60 = vunpack.i.l.bf16 %v8554_v55  ;;  %v8597_v13 = vpack.i.bf16 %v882_v28, %v881_v40  ;;  %v1482_v28 = vsel %vm593_vm6, %v713_v54, %v8421_v17 }
 0x23d   : > { %8598 = vrot.lane.b32.xlu0 %v8597_v13, %s9523_s30  ;;  %v1535_v55 = vsel %vm593_vm6, %v831_v6, %v8555_v60  ;;  %v10912_v31 = vpop.f32.mrf.mxu1  ;;  %v10920_v13 = vld [vmem:[#allocation2 + $0x189] sm:$0xff]  ;;  %v1599_v6 = vpack.c.bf16 %v711_v2, %v710_v15  ;;  %v8425_v15 = vunpack.i.l.bf16 %v10564_v35 }
 0x23f   : > { %2201 = vmatmul.bf16.gmra.mxu2 %v14525_v26  ;;  %v10893_v36 = vpop.f32.mrf.mxu3  ;;  %v10897_v24 = vpop.f32.mrf.mxu0 }
 0x240   : > { %14527 = vst [vmem:[#allocation22_spill] sm:$0xff] %v10893_v36 }
 0x242   : > { %v10886_v57 = vpop.f32.mrf.mxu2 }
 0x245   : > { %7850 = vmatmul.msk.bf16.gmra.mxu0 %vm593_vm6, %v1594_v42  ;;  %v14528_v42 = vpack.c.bf16 %v10657_v10, %v10653_v61  ;;  %v10918_v10 = vld [vmem:[#allocation2 + $0x181] sm:$0xff] }
 0x247   : > { %2122 = vmatmul.bf16.gmra.mxu1 %v1606_v52  ;;  %2275 = vmatmul.bf16.gmra.mxu3 %v1583_v50  ;;  %v832_v50 = vld [vmem:[#allocation2 + $0xc8] sm:$0xff]  ;;  %v8420_v52 = vunpack.i.l.bf16 %v10545_v21  ;;  %v10914_v51 = vpop.f32.mrf.mxu3  ;;  %v10916_v61 = vpop.f32.mrf.mxu0 }
 0x248   : > { %v1536_v33 = vsel %vm593_vm6, %v832_v50, %v8556_v29  ;;  %14529 = vst [vmem:[#allocation23_spill] sm:$0xff] %v10914_v51  ;;  %v8592_v29 = vpack.i.bf16 %v10920_v13, %v10918_v10  ;;  %v8559_v50 = vpop.permute.xlu1 %8558  ;;  %v8426_v51 = vunpack.i.h.bf16 %v10564_v35  ;;  %v8160_v35 = vld [vmem:[%s14504_s3 + $0x18] sm:$0xff] }
 0x249   : > { %v1481_v40 = vsel %vm593_vm6, %v712_v8, %v8420_v52  ;;  %v1588_v21 = vpack.c.bf16 %v1536_v33, %v1535_v55  ;;  %v8561_v52 = vunpack.i.h.bf16 %v8559_v50  ;;  %v10930_v33 = vpop.f32.mrf.mxu1  ;;  %3902 = vmatpush.bf16.msra.mxu1 %v8160_v35 }
 0x24a   : > { %v10895_v26 = vpop.f32.mrf.mxu2  ;;  %v1611_v60 = vpack.c.bf16 %v1482_v28, %v1481_v40  ;;  %8593 = vrot.lane.b32.xlu2 %v8592_v29, %s9523_s30  ;;  %v833_v40 = vld [vmem:[#allocation2 + $0xd8] sm:$0xff]  ;;  %v834_v28 = vld [vmem:[#allocation2 + $0xe0] sm:$0xff]  ;;  %v715_v29 = vld [vmem:[#allocation2 + $0x12a] sm:$0xff] }
 0x24b   : > { %v1484_v48 = vsel %vm593_vm6, %v715_v29, %v8426_v51 }
 0x24f   : > { %2206 = vmatmul.bf16.gmra.mxu2 %v14528_v42  ;;  %v8560_v42 = vunpack.i.l.bf16 %v8559_v50  ;;  %v10928_v55 = vpop.f32.mrf.mxu0  ;;  %v10934_v2 = vpop.f32.mrf.mxu3  ;;  %v1538_v50 = vsel %vm593_vm6, %v834_v28, %v8561_v52 }
 0x250   : > { %14530 = vst [vmem:[#allocation24_spill] sm:$0xff] %v10934_v2 }
 0x251   : > { %v10950_v32 = vpop.f32.mrf.mxu1 }
 0x252   : > { %v10908_v36 = vpop.f32.mrf.mxu2 }
 0x255   : > { %7851 = vmatmul.msk.bf16.gmra.mxu0 %vm593_vm6, %v1599_v6  ;;  %v1537_v6 = vsel %vm593_vm6, %v833_v40, %v8560_v42  ;;  %v8564_v42 = vpop.permute.xlu2 %8563 }
 0x256   : > { %v1593_v2 = vpack.c.bf16 %v1538_v50, %v1537_v6  ;;  %v8566_v40 = vunpack.i.h.bf16 %v8564_v42  ;;  %v8565_v28 = vunpack.i.l.bf16 %v8564_v42  ;;  %v835_v6 = vld [vmem:[#allocation2 + $0xf0] sm:$0xff]  ;;  %v836_v50 = vld [vmem:[#allocation2 + $0xf8] sm:$0xff] }
 0x257   : > { %2127 = vmatmul.bf16.gmra.mxu1 %v1611_v60  ;;  %2280 = vmatmul.bf16.gmra.mxu3 %v1588_v21  ;;  %v14531_v21 = vpack.c.bf16 %v10683_v59, %v10680_v27  ;;  %v714_v60 = vld [vmem:[#allocation2 + $0x122] sm:$0xff]  ;;  %v10952_v52 = vpop.f32.mrf.mxu3 }
 0x258   : > { %v1483_v62 = vsel %vm593_vm6, %v714_v60, %v8425_v15  ;;  %14532 = vst [vmem:[#allocation25_spill] sm:$0xff] %v10952_v52  ;;  %v1539_v35 = vsel %vm593_vm6, %v835_v6, %v8565_v28 }
 0x259   : > { %v1616_v59 = vpack.c.bf16 %v1484_v48, %v1483_v62  ;;  %v8431_v48 = vunpack.i.h.bf16 %v10493_v46  ;;  %v8430_v62 = vunpack.i.l.bf16 %v10493_v46  ;;  %v10975_v42 = vpop.f32.mrf.mxu1 }
 0x25a   : > { %v10926_v17 = vpop.f32.mrf.mxu2 }
 0x25f   : > { %2211 = vmatmul.bf16.gmra.mxu2 %v14531_v21  ;;  %v1604_v21 = vpack.c.bf16 %v713_v54, %v712_v8  ;;  %v14533_v8 = vpack.c.bf16 %v10704_v16, %v10700_v22  ;;  %v10964_v54 = vld [vmem:[#allocation2 + $0x13a] sm:$0xff]  ;;  %v10977_v46 = vpop.f32.mrf.mxu3 }
 0x260   : > { %14534 = vst [vmem:[#allocation26_spill] sm:$0xff] %v10977_v46  ;;  %v1485_v22 = vsel %vm593_vm6, %v10964_v54, %v8430_v62  ;;  %v8505_v46 = vunpack.i.l.bf16 %v10750_v63  ;;  %v8569_v62 = vpop.permute.xlu0 %8568 }
 0x261   : > { %v8571_v63 = vunpack.i.h.bf16 %v8569_v62 }
 0x262   : > { %v10941_v47 = vpop.f32.mrf.mxu2  ;;  %v10948_v27 = vpop.f32.mrf.mxu0 }
 0x265   : > { %7852 = vmatmul.msk.bf16.gmra.mxu0 %vm593_vm6, %v1604_v21  ;;  %v10973_v21 = vld [vmem:[%s14503_s2] ss:$0 sm:$0xff] }
 0x267   : > { %2132 = vmatmul.bf16.gmra.mxu1 %v1616_v59  ;;  %2285 = vmatmul.bf16.gmra.mxu3 %v1593_v2  ;;  %v10966_v2 = vld [vmem:[#allocation2 + $0x142] sm:$0xff]  ;;  %v1540_v59 = vsel %vm593_vm6, %v836_v50, %v8566_v40  ;;  %v1985_v40 = vadd.f32 %v10973_v21, %v10784_v1  ;;  %v1609_v50 = vpack.c.bf16 %v715_v29, %v714_v60  ;;  %v10998_v29 = vpop.f32.mrf.mxu1 }
 0x268   : > { %v1486_v16 = vsel %vm593_vm6, %v10966_v2, %v8431_v48  ;;  %v1515_v1 = vsel %vm593_vm6, %v10829_v3, %v8505_v46  ;;  %v1516_v60 = vsel %vm593_vm6, %v10833_v25, %v8506_v12  ;;  %v8436_v3 = vunpack.i.h.bf16 %v10566_v45 }
 0x269   : > { %v1621_v28 = vpack.c.bf16 %v1486_v16, %v1485_v22  ;;  %v2074_v41 = vadd.f32 %v10861_v20, %v1985_v40  ;;  %v8570_v22 = vunpack.i.l.bf16 %v8569_v62  ;;  %v1987_v20 = vadd.f32 %v10973_v21, %v10794_v34  ;;  %v11012_v34 = vld [vmem:[#allocation2 + $0x15a] sm:$0xff] }
 0x26a   : > { %v10955_v51 = vpop.f32.mrf.mxu2  ;;  %v10957_v15 = vpop.f32.mrf.mxu0  ;;  %v8435_v46 = vunpack.i.l.bf16 %v10566_v45 }
 0x26b   : > { %v2163_v48 = vadd.f32 %v10886_v57, %v2074_v41  ;;  %v837_v41 = vld [vmem:[#allocation2 + $0x108] sm:$0xff]  ;;  %v838_v57 = vld [vmem:[#allocation2 + $0x110] sm:$0xff]  ;;  %v2076_v25 = vadd.f32 %v10875_v56, %v1987_v20 }
 0x26d   : > { %v2165_v62 = vadd.f32 %v10895_v26, %v2076_v25  ;;  %v1990_v26 = vadd.f32 %v10973_v21, %v10806_v23 }
 0x26f   : > { %2216 = vmatmul.bf16.gmra.mxu2 %v14533_v8  ;;  %v1598_v8 = vpack.c.bf16 %v1540_v59, %v1539_v35 }
 0x272   : > { %v10983_v52 = vpop.f32.mrf.mxu2  ;;  %v10987_v6 = vpop.f32.mrf.mxu0 }
 0x275   : > { %7853 = vmatmul.msk.bf16.gmra.mxu0 %vm593_vm6, %v1609_v50  ;;  %v11010_v50 = vld [vmem:[#allocation2 + $0x152] sm:$0xff] }
 0x276   : > { %v1487_v56 = vsel %vm593_vm6, %v11010_v50, %v8435_v46 }
 0x277   : > { %2137 = vmatmul.bf16.gmra.mxu1 %v1621_v28  ;;  %2290 = vmatmul.bf16.gmra.mxu3 %v1598_v8  ;;  %v1617_v8 = vpack.c.bf16 %v1516_v60, %v1515_v1  ;;  %v1488_v1 = vsel %vm593_vm6, %v11012_v34, %v8436_v3  ;;  %v8159_v60 = vld [vmem:[%s14504_s3 + $0x10] sm:$0xff] }
 0x278   : > { %3903 = vmatpush.bf16.msra.mxu1 %v8159_v60 }
 0x27a   : > { %v2251_v35 = vpop.f32.mrf.mxu3  ;;  %v11003_v40 = vpop.f32.mrf.mxu0 }
 0x27b   : > { %v2252_v59 = vadd.f32 %v2251_v35, %v2163_v48  ;;  %v11007_v12 = vpop.f32.mrf.mxu2  ;;  %v1542_v48 = vsel %vm593_vm6, %v838_v57, %v8571_v63  ;;  %v11027_v63 = vpop.f32.mrf.mxu1  ;;  %v2079_v57 = vadd.f32 %v10891_v53, %v1990_v26  ;;  %v1992_v53 = vadd.f32 %v10973_v21, %v10831_v37  ;;  %v11053_v37 = vld [vmem:[#allocation2 + $0x16a] sm:$0xff] }
 0x27d   : > { %v2341_v16 = vadd.f32 %v10916_v61, %v2252_v59  ;;  %v1541_v61 = vsel %vm593_vm6, %v837_v41, %v8570_v22  ;;  %v1614_v41 = vpack.c.bf16 %v10966_v2, %v10964_v54  ;;  %v2168_v23 = vadd.f32 %v10908_v36, %v2079_v57 }
 0x27e   : > { %v1603_v22 = vpack.c.bf16 %v1542_v48, %v1541_v61  ;;  %v8440_v36 = vunpack.i.l.bf16 %v10580_v5 }
 0x27f   : > { %vm2420_vm7 = vcmp.ge.f32.partialorder %v2341_v16, 0.0  ;;  %v2452_v28 = vmul.f32 0.2, %v2341_v16  ;;  %2221 = vmatmul.bf16.gmra.mxu2 %v1617_v8 }
 0x281   : > { %v2484_v35 = vsel %vm2420_vm7, %v2341_v16, %v2452_v28  ;;  %v1626_v16 = vpack.c.bf16 %v1488_v1, %v1487_v56  ;;  %v8441_v56 = vunpack.i.h.bf16 %v10580_v5  ;;  %v2081_v1 = vadd.f32 %v10912_v31, %v1992_v53 }
 0x282   : > { %2517 = vst.msk [vmem:[#allocation3 + $0x19] sm:$0xff] %vm593_vm6, %v2484_v35  ;;  %v2253_v45 = vpop.f32.mrf.mxu3  ;;  %v11030_v8 = vpop.f32.mrf.mxu0  ;;  %v840_v35 = vld [vmem:[#allocation2 + $0x128] sm:$0xff] }
 0x283   : > { %v2254_v59 = vadd.f32 %v2253_v45, %v2165_v62  ;;  %v11035_v46 = vpop.f32.mrf.mxu2  ;;  %v839_v62 = vld [vmem:[#allocation2 + $0x120] sm:$0xff]  ;;  %v11048_v60 = vpop.f32.mrf.mxu1  ;;  %v2170_v5 = vadd.f32 %v10926_v17, %v2081_v1  ;;  %v1995_v17 = vadd.f32 %v10973_v21, %v10849_v7 }
 0x285   : > { %v2343_v20 = vadd.f32 %v10928_v55, %v2254_v59  ;;  %7854 = vmatmul.msk.bf16.gmra.mxu0 %vm593_vm6, %v1614_v41  ;;  %v8574_v55 = vpop.permute.xlu1 %8573  ;;  %v2084_v53 = vadd.f32 %v10930_v33, %v1995_v17 }
 0x286   : > { %v8576_v48 = vunpack.i.h.bf16 %v8574_v55  ;;  %v8575_v54 = vunpack.i.l.bf16 %v8574_v55 }
 0x287   : > { %vm2421_vm8 = vcmp.ge.f32.partialorder %v2343_v20, 0.0  ;;  %v2453_v3 = vmul.f32 0.2, %v2343_v20  ;;  %2142 = vmatmul.bf16.gmra.mxu1 %v1626_v16  ;;  %2295 = vmatmul.bf16.gmra.mxu3 %v1603_v22  ;;  %v14535_v22 = vpack.c.bf16 %v10714_v19, %v10710_v18  ;;  %v1489_v19 = vsel %vm593_vm6, %v11053_v37, %v8440_v36 }
 0x288   : > { %v1543_v26 = vsel %vm593_vm6, %v839_v62, %v8575_v54  ;;  %v1619_v54 = vpack.c.bf16 %v11012_v34, %v11010_v50  ;;  %v2173_v62 = vadd.f32 %v10941_v47, %v2084_v53  ;;  %v1997_v34 = vadd.f32 %v10973_v21, %v10865_v30 }
 0x289   : > { %v2485_v25 = vsel %vm2421_vm8, %v2343_v20, %v2453_v3  ;;  %v1544_v20 = vsel %vm593_vm6, %v840_v35, %v8576_v48  ;;  %v2583_v31 = vld [vmem:[#allocation3 + $0x19] sm:$0xff] }
 0x28a   : > { %2518 = vst.msk [vmem:[#allocation3 + $0x21] sm:$0xff] %vm593_vm6, %v2485_v25  ;;  %v2256_v28 = vpop.f32.mrf.mxu3  ;;  %v11043_v45 = vpop.f32.mrf.mxu0  ;;  %v1608_v55 = vpack.c.bf16 %v1544_v20, %v1543_v26  ;;  %v842_v26 = vld [vmem:[#allocation2 + $0x140] sm:$0xff]  ;;  %v2086_v20 = vadd.f32 %v10950_v32, %v1997_v34  ;;  %v8158_v32 = vld [vmem:[%s14504_s3 + $0x8] sm:$0xff]  ;;  %v843_v34 = vld [vmem:[#allocation2 + $0x150] sm:$0xff] }
 0x28b   : > { %v2257_v61 = vadd.f32 %v2256_v28, %v2168_v23  ;;  %v11060_v57 = vpop.f32.mrf.mxu2  ;;  %v11078_v35 = vpop.f32.mrf.mxu1  ;;  %3904 = vmatpush.bf16.msra.mxu1 %v8158_v32 }
 0x28c   : > { %v2175_v30 = vadd.f32 %v10955_v51, %v2086_v20  ;;  %v2000_v51 = vadd.f32 %v10973_v21, %v10884_v9 }
 0x28d   : > { %v2346_v2 = vadd.f32 %v10948_v27, %v2257_v61  ;;  %v11055_v27 = vld [vmem:[#allocation2 + $0x172] sm:$0xff] }
 0x28e   : > { %v1490_v23 = vsel %vm593_vm6, %v11055_v27, %v8441_v56 }
 0x28f   : > { %vm2422_vm9 = vcmp.ge.f32.partialorder %v2346_v2, 0.0  ;;  %v2454_v59 = vmul.f32 0.2, %v2346_v2  ;;  %2226 = vmatmul.bf16.gmra.mxu2 %v14535_v22  ;;  %v1631_v61 = vpack.c.bf16 %v1490_v23, %v1489_v19  ;;  %v841_v22 = vld [vmem:[#allocation2 + $0x138] sm:$0xff] }
 0x291   : > { %v2486_v16 = vsel %vm2422_vm9, %v2346_v2, %v2454_v59  ;;  %v2584_v41 = vld [vmem:[#allocation3 + $0x21] sm:$0xff] }
 0x292   : > { %2519 = vst.msk [vmem:[#allocation3 + $0x31] sm:$0xff] %vm593_vm6, %v2486_v16  ;;  %v2258_v3 = vpop.f32.mrf.mxu3  ;;  %v8607_v18 = vpack.i.bf16 %v2584_v41, %v2583_v31  ;;  %v11071_v48 = vpop.f32.mrf.mxu0  ;;  %v14536_v16 = vpack.c.bf16 %v10744_v4, %v10740_v44 }
 0x293   : > { %v2259_v25 = vadd.f32 %v2258_v3, %v2170_v5  ;;  %v11081_v1 = vpop.f32.mrf.mxu2 }
 0x294   : > { %8608 = vrot.lane.b32.xlu2 %v8607_v18, %s9523_s30 }
 0x295   : > { %v2348_v28 = vadd.f32 %v10957_v15, %v2259_v25  ;;  %7855 = vmatmul.msk.bf16.gmra.mxu0 %vm593_vm6, %v1619_v54  ;;  %v8579_v15 = vpop.permute.xlu2 %8578  ;;  %v11099_v25 = vpop.f32.mrf.mxu1  ;;  %v8520_v54 = vunpack.i.l.bf16 %v10773_v39 }
 0x296   : > { %v8581_v50 = vunpack.i.h.bf16 %v8579_v15  ;;  %v8580_v33 = vunpack.i.l.bf16 %v8579_v15 }
 0x297   : > { %vm2423_vm10 = vcmp.ge.f32.partialorder %v2348_v28, 0.0  ;;  %v2455_v2 = vmul.f32 0.2, %v2348_v28  ;;  %2147 = vmatmul.bf16.gmra.mxu1 %v1631_v61  ;;  %2300 = vmatmul.bf16.gmra.mxu3 %v1608_v55  ;;  %v8521_v61 = vunpack.i.h.bf16 %v10773_v39 }
 0x298   : > { %v1545_v31 = vsel %vm593_vm6, %v841_v22, %v8580_v33  ;;  %v1546_v41 = vsel %vm593_vm6, %v842_v26, %v8581_v50 }
 0x299   : > { %v2487_v7 = vsel %vm2423_vm10, %v2348_v28, %v2455_v2  ;;  %v1613_v4 = vpack.c.bf16 %v1546_v41, %v1545_v31  ;;  %v1624_v28 = vpack.c.bf16 %v11055_v27, %v11053_v37  ;;  %v2089_v2 = vadd.f32 %v10975_v42, %v2000_v51 }
 0x29a   : > { %2520 = vst.msk [vmem:[#allocation3 + $0x39] sm:$0xff] %vm593_vm6, %v2487_v7  ;;  %v2261_v56 = vpop.f32.mrf.mxu3  ;;  %v11086_v47 = vpop.f32.mrf.mxu0  ;;  %v1521_v27 = vsel %vm593_vm6, %v10918_v10, %v8520_v54  ;;  %v1522_v39 = vsel %vm593_vm6, %v10920_v13, %v8521_v61 }
 0x29b   : > { %v2262_v36 = vadd.f32 %v2261_v56, %v2173_v62  ;;  %v11111_v53 = vpop.f32.mrf.mxu2  ;;  %v2178_v9 = vadd.f32 %v10983_v52, %v2089_v2  ;;  %v8584_v7 = vpop.permute.xlu0 %8583  ;;  %v1632_v33 = vpack.c.bf16 %v1522_v39, %v1521_v27  ;;  %v2007_v2 = vadd.f32 %v10973_v21, %v10724_v58 }
 0x29c   : > { %v8586_v42 = vunpack.i.h.bf16 %v8584_v7  ;;  %v8585_v56 = vunpack.i.l.bf16 %v8584_v7  ;;  %v846_v7 = vld [vmem:[#allocation2 + $0x170] sm:$0xff] }
 0x29d   : > { %v2351_v59 = vadd.f32 %v10987_v6, %v2262_v36  ;;  %v2585_v6 = vld [vmem:[#allocation3 + $0x31] sm:$0xff]  ;;  %v2002_v36 = vadd.f32 %v10973_v21, %v10897_v24  ;;  %v11123_v50 = vpop.f32.mrf.mxu1 }
 0x29e   : > { %v1547_v20 = vsel %vm593_vm6, %v843_v34, %v8585_v56 }
 0x29f   : > { %vm2424_vm11 = vcmp.ge.f32.partialorder %v2351_v59, 0.0  ;;  %v2456_v5 = vmul.f32 0.2, %v2351_v59  ;;  %2231 = vmatmul.bf16.gmra.mxu2 %v14536_v16  ;;  %v2091_v10 = vadd.f32 %v10998_v29, %v2002_v36 }
 0x2a1   : > { %v2488_v3 = vsel %vm2424_vm11, %v2351_v59, %v2456_v5  ;;  %v2586_v18 = vld [vmem:[#allocation3 + $0x39] sm:$0xff]  ;;  %v844_v59 = vld [vmem:[#allocation2 + $0x158] sm:$0xff]  ;;  %v2180_v5 = vadd.f32 %v11007_v12, %v2091_v10 }
 0x2a2   : > { %2521 = vst.msk [vmem:[#allocation3 + $0x49] sm:$0xff] %vm593_vm6, %v2488_v3  ;;  %v2263_v19 = vpop.f32.mrf.mxu3  ;;  %v8612_v23 = vpack.i.bf16 %v2586_v18, %v2585_v6  ;;  %v11105_v17 = vpop.f32.mrf.mxu0  ;;  %v1548_v24 = vsel %vm593_vm6, %v844_v59, %v8586_v42  ;;  %v911_v6 = vld [vmem:[#allocation2 + $0x182] sm:$0xff]  ;;  %v912_v18 = vld [vmem:[#allocation2 + $0x18a] sm:$0xff] }
 0x2a3   : > { %v2264_v44 = vadd.f32 %v2263_v19, %v2175_v30  ;;  %v11129_v13 = vpop.f32.mrf.mxu2  ;;  %v1618_v29 = vpack.c.bf16 %v1548_v24, %v1547_v20  ;;  %v2005_v19 = vadd.f32 %v10973_v21, %v10685_v43  ;;  %v1629_v12 = vpack.c.bf16 %v912_v18, %v911_v6 }
 0x2a4   : > { %8613 = vrot.lane.b32.xlu0 %v8612_v23, %s9523_s30 }
 0x2a5   : > { %v2353_v55 = vadd.f32 %v11003_v40, %v2264_v44  ;;  %7856 = vmatmul.msk.bf16.gmra.mxu0 %vm593_vm6, %v1624_v28  ;;  %v8589_v44 = vpop.permute.xlu1 %8588  ;;  %v11142_v51 = vpop.f32.mrf.mxu1 }
 0x2a7   : > { %vm2425_vm12 = vcmp.ge.f32.partialorder %v2353_v55, 0.0  ;;  %v2457_v62 = vmul.f32 0.2, %v2353_v55  ;;  %2305 = vmatmul.bf16.gmra.mxu3 %v1613_v4  ;;  %v2094_v4 = vadd.f32 %v11027_v63, %v2005_v19  ;;  %v8591_v63 = vunpack.i.h.bf16 %v8589_v44  ;;  %v8594_v19 = vpop.permute.xlu2 %8593 }
 0x2a9   : > { %v2489_v40 = vsel %vm2425_vm12, %v2353_v55, %v2457_v62  ;;  %v2183_v28 = vadd.f32 %v11035_v46, %v2094_v4  ;;  %v8590_v62 = vunpack.i.l.bf16 %v8589_v44  ;;  %v1550_v36 = vsel %vm593_vm6, %v846_v7, %v8591_v63 }
 0x2aa   : > { %2522 = vst.msk [vmem:[#allocation3 + $0x51] sm:$0xff] %vm593_vm6, %v2489_v40  ;;  %v2266_v37 = vpop.f32.mrf.mxu3  ;;  %v11126_v22 = vpop.f32.mrf.mxu0  ;;  %v845_v40 = vld [vmem:[#allocation2 + $0x168] sm:$0xff] }
 0x2ab   : > { %v2267_v15 = vadd.f32 %v2266_v37, %v2178_v9  ;;  %v11146_v54 = vpop.f32.mrf.mxu2  ;;  %v2096_v37 = vadd.f32 %v11048_v60, %v2007_v2  ;;  %v1549_v58 = vsel %vm593_vm6, %v845_v40, %v8590_v62 }
 0x2ad   : > { %v2356_v52 = vadd.f32 %v11030_v8, %v2267_v15  ;;  %v2587_v8 = vld [vmem:[#allocation3 + $0x49] sm:$0xff]  ;;  %v8604_v27 = vpop.permute.xlu1 %8603  ;;  %v11161_v60 = vpop.f32.mrf.mxu1 }
 0x2ae   : > { %v8157_v15 = vld [vmem:[%s14504_s3] sm:$0xff]  ;;  %v8606_v42 = vunpack.i.h.bf16 %v8604_v27  ;;  %v8605_v56 = vunpack.i.l.bf16 %v8604_v27 }
 0x2af   : > { %vm2426_vm13 = vcmp.ge.f32.partialorder %v2356_v52, 0.0  ;;  %v2458_v26 = vmul.f32 0.2, %v2356_v52  ;;  %2236 = vmatmul.bf16.gmra.mxu2 %v1632_v33  ;;  %v2185_v33 = vadd.f32 %v11060_v57, %v2096_v37  ;;  %3905 = vmatpush.bf16.msra.mxu1 %v8157_v15  ;;  %v2010_v57 = vadd.f32 %v10973_v21, %v10760_v49 }
 0x2b0   : > { %v8596_v49 = vunpack.i.h.bf16 %v8594_v19 }
 0x2b1   : > { %v2490_v16 = vsel %vm2426_vm13, %v2356_v52, %v2458_v26  ;;  %v2588_v31 = vld [vmem:[#allocation3 + $0x51] sm:$0xff]  ;;  %v2550_v52 = vld [vmem:[#allocation3 + $0x8] sm:$0xff] }
 0x2b2   : > { %2523 = vst.msk [vmem:[#allocation3 + $0x61] sm:$0xff] %vm593_vm6, %v2490_v16  ;;  %v2268_v41 = vpop.f32.mrf.mxu3  ;;  %v8617_v30 = vpack.i.bf16 %v2588_v31, %v2587_v8  ;;  %v11139_v32 = vpop.f32.mrf.mxu0  ;;  %v3351_v26 = vsel %vm593_vm6, %v2550_v52, %v8606_v42  ;;  %v1623_v31 = vpack.c.bf16 %v1550_v36, %v1549_v58 }
 0x2b3   : > { %v2269_v3 = vadd.f32 %v2268_v41, %v2180_v5  ;;  %v11166_v41 = vpop.f32.mrf.mxu2 }
 0x2b4   : > { %8618 = vrot.lane.b32.xlu1 %v8617_v30, %s9523_s30 }
 0x2b5   : > { %v2358_v23 = vadd.f32 %v11043_v45, %v2269_v3  ;;  %7857 = vmatmul.msk.bf16.gmra.mxu0 %vm593_vm6, %v1629_v12  ;;  %v2099_v3 = vadd.f32 %v11078_v35, %v2010_v57  ;;  %v11177_v44 = vpop.f32.mrf.mxu1  ;;  %v2012_v35 = vadd.f32 %v10973_v21, %v10780_v11 }
 0x2b7   : > { %vm2427_vm14 = vcmp.ge.f32.partialorder %v2358_v23, 0.0  ;;  %v2459_v55 = vmul.f32 0.2, %v2358_v23  ;;  %2310 = vmatmul.bf16.gmra.mxu3 %v1618_v29  ;;  %v2188_v6 = vadd.f32 %v11081_v1, %v2099_v3  ;;  %v847_v1 = vld [vmem:[#allocation2 + $0x180] sm:$0xff]  ;;  %v2101_v63 = vadd.f32 %v11099_v25, %v2012_v35  ;;  %v8172_v25 = vld [vmem:[%s14504_s3 + $0x78] sm:$0xff] }
 0x2b8   : > { %3987 = vmatpush.bf16.msra.mxu2 %v8172_v25 }
 0x2b9   : > { %v2491_v61 = vsel %vm2427_vm14, %v2358_v23, %v2459_v55  ;;  %v2589_v59 = vld [vmem:[#allocation3 + $0x61] sm:$0xff]  ;;  %v8595_v55 = vunpack.i.l.bf16 %v8594_v19  ;;  %v2190_v7 = vadd.f32 %v11111_v53, %v2101_v63  ;;  %v2015_v53 = vadd.f32 %v10973_v21, %v10789_v0 }
 0x2ba   : > { %2524 = vst.msk [vmem:[#allocation3 + $0x69] sm:$0xff] %vm593_vm6, %v2491_v61  ;;  %v2271_v43 = vpop.f32.mrf.mxu3  ;;  %v11153_v39 = vpop.f32.mrf.mxu0  ;;  %v8180_v0 = vld [vmem:[%s14504_s3 + $0xb8] sm:$0xff] }
 0x2bb   : > { %v2272_v45 = vadd.f32 %v2271_v43, %v2183_v28  ;;  %v914_v28 = vld [vmem:[#allocation2 + $0x1a2] sm:$0xff]  ;;  %v11182_v2 = vpop.f32.mrf.mxu2  ;;  %4076 = vmatpush.bf16.msra.mxu3 %v8180_v0 }
 0x2bc   : > { %v848_v43 = vld [vmem:[#allocation2 + $0x188] sm:$0xff] }
 0x2bd   : > { %v2361_v9 = vadd.f32 %v11071_v48, %v2272_v45  ;;  %v2549_v48 = vld [vmem:[#allocation3] sm:$0xff]  ;;  %v1552_v40 = vsel %vm593_vm6, %v848_v43, %v8596_v49  ;;  %v11198_v58 = vpop.f32.mrf.mxu1  ;;  %v8192_v49 = vld [vmem:[%s14504_s3 + $0x118] sm:$0xff] }
 0x2be   : > { %v3350_v20 = vsel %vm593_vm6, %v2549_v48, %v8605_v56  ;;  %v2104_v48 = vadd.f32 %v11123_v50, %v2015_v53  ;;  %v2017_v50 = vadd.f32 %v10973_v21, %v10800_v38  ;;  %4258 = vmatpush.bf16.msrb.mxu1 %v8192_v49 }
 0x2bf   : > { %vm2428_vm15 = vcmp.ge.f32.partialorder %v2361_v9, 0.0  ;;  %v2460_v46 = vmul.f32 0.2, %v2361_v9  ;;  %v3478_v16 = vpack.c.bf16 %v3351_v26, %v3350_v20 }
 0x2c1   : > { %v2492_v34 = vsel %vm2428_vm15, %v2361_v9, %v2460_v46  ;;  %v2590_v10 = vld [vmem:[#allocation3 + $0x69] sm:$0xff]  ;;  %3906 = vmatmul.bf16.vlgmr.msra.gmra.mxu1 %v3478_v16  ;;  %v1551_v9 = vsel %vm593_vm6, %v847_v1, %v8595_v55 }
 0x2c2   : > { %2525 = vst.msk [vmem:[#allocation3 + $0x79] sm:$0xff] %vm593_vm6, %v2492_v34  ;;  %v2273_v24 = vpop.f32.mrf.mxu3  ;;  %v8622_v5 = vpack.i.bf16 %v2590_v10, %v2589_v59  ;;  %v11174_v23 = vpop.f32.mrf.mxu0  ;;  %v1628_v42 = vpack.c.bf16 %v1552_v40, %v1551_v9  ;;  %v2193_v34 = vadd.f32 %v11129_v13, %v2104_v48  ;;  %v849_v16 = vld [vmem:[#allocation2 + $0x198] sm:$0xff]  ;;  %v850_v13 = vld [vmem:[#allocation2 + $0x1a0] sm:$0xff] }
 0x2c3   : > { %v2274_v8 = vadd.f32 %v2273_v24, %v2185_v33  ;;  %v11202_v33 = vpop.f32.mrf.mxu2  ;;  %v8599_v10 = vpop.permute.xlu0 %8598  ;;  %v11237_v1 = vld [vmem:[#allocation3 + $0x50] sm:$0xff]  ;;  %v11244_v9 = vld [vmem:[#allocation3 + $0x48] sm:$0xff] }
 0x2c4   : > { %8623 = vrot.lane.b32.xlu2 %v8622_v5, %s9523_s30  ;;  %v8600_v24 = vunpack.i.l.bf16 %v8599_v10  ;;  %v14537_v40 = vld [vmem:[#allocation16_spill] sm:$0xff] }
 0x2c5   : > { %v2363_v30 = vadd.f32 %v11086_v47, %v2274_v8  ;;  %v913_v47 = vld [vmem:[#allocation2 + $0x19a] sm:$0xff]  ;;  %v11215_v57 = vpop.f32.mrf.mxu1 }
 0x2c6   : > { %v1634_v45 = vpack.c.bf16 %v914_v28, %v913_v47  ;;  %v1553_v3 = vsel %vm593_vm6, %v849_v16, %v8600_v24  ;;  %v2020_v47 = vadd.f32 %v10973_v21, %v10823_v14 }
 0x2c7   : > { %vm2429_vm0 = vcmp.ge.f32.partialorder %v2363_v30, 0.0  ;;  %v2461_v29 = vmul.f32 0.2, %v2363_v30  ;;  %2315 = vmatmul.bf16.gmra.mxu3 %v1623_v31  ;;  %v2106_v31 = vadd.f32 %v11142_v51, %v2017_v50  ;;  %v8188_v51 = vld [vmem:[%s14504_s3 + $0xf8] sm:$0xff] }
 0x2c8   : > { %7858 = vmatmul.msk.bf16.gmra.mxu0 %vm593_vm6, %v1634_v45  ;;  %v2109_v35 = vadd.f32 %v11161_v60, %v2020_v47  ;;  %v11296_v47 = vld [vmem:[#allocation3 + $0x68] sm:$0xff] }
 0x2c9   : > { %v2493_v18 = vsel %vm2429_vm0, %v2363_v30, %v2461_v29  ;;  %v2591_v37 = vld [vmem:[#allocation3 + $0x79] sm:$0xff]  ;;  %4165 = vmatpush.bf16.msra.mxu0 %v8188_v51 }
 0x2ca   : > { %2526 = vst.msk [vmem:[#allocation3 + $0x81] sm:$0xff] %vm593_vm6, %v2493_v18  ;;  %v2276_v12 = vpop.f32.mrf.mxu3  ;;  %v11193_v56 = vpop.f32.mrf.mxu0  ;;  %v2198_v45 = vadd.f32 %v11166_v41, %v2109_v35 }
 0x2cb   : > { %v2277_v4 = vadd.f32 %v2276_v12, %v2188_v6  ;;  %v2195_v6 = vadd.f32 %v11146_v54, %v2106_v31 }
 0x2cd   : > { %v2366_v61 = vadd.f32 %v11105_v17, %v2277_v4  ;;  %v11242_v63 = vpop.f32.mrf.mxu1 }
 0x2cf   : > { %vm2430_vm1 = vcmp.ge.f32.partialorder %v2366_v61, 0.0  ;;  %v2462_v62 = vmul.f32 0.2, %v2366_v61 }
 0x2d1   : > { %v2494_v11 = vsel %vm2430_vm1, %v2366_v61, %v2462_v62  ;;  %v2592_v17 = vld [vmem:[#allocation3 + $0x81] sm:$0xff] }
 0x2d2   : > { %2527 = vst.msk [vmem:[#allocation3 + $0x91] sm:$0xff] %vm593_vm6, %v2494_v11  ;;  %v2278_v27 = vpop.f32.mrf.mxu3  ;;  %v8627_v46 = vpack.i.bf16 %v2592_v17, %v2591_v37  ;;  %v11212_v8 = vpop.f32.mrf.mxu0 }
 0x2d3   : > { %v2279_v15 = vadd.f32 %v2278_v27, %v2190_v7  ;;  %v2022_v7 = vadd.f32 %v10973_v21, %v14537_v40 }
 0x2d4   : > { %8628 = vrot.lane.b32.xlu0 %v8627_v46, %s9523_s30 }
 0x2d5   : > { %v2368_v36 = vadd.f32 %v11126_v22, %v2279_v15  ;;  %v8601_v22 = vunpack.i.h.bf16 %v8599_v10  ;;  %v2111_v37 = vadd.f32 %v11177_v44, %v2022_v7  ;;  %v2551_v15 = vld [vmem:[#allocation3 + $0x18] sm:$0xff] }
 0x2d7   : > { %vm2431_vm2 = vcmp.ge.f32.partialorder %v2368_v36, 0.0  ;;  %v2463_v52 = vmul.f32 0.2, %v2368_v36  ;;  %2320 = vmatmul.bf16.gmra.mxu3 %v1628_v42  ;;  %v1554_v29 = vsel %vm593_vm6, %v850_v13, %v8601_v22  ;;  %v2552_v42 = vld [vmem:[#allocation3 + $0x20] sm:$0xff]  ;;  %v11271_v22 = vpop.f32.mrf.mxu1 }
 0x2d8   : > { %v1633_v54 = vpack.c.bf16 %v1554_v29, %v1553_v3 }
 0x2d9   : > { %v2495_v59 = vsel %vm2431_vm2, %v2368_v36, %v2463_v52  ;;  %v2593_v38 = vld [vmem:[#allocation3 + $0x91] sm:$0xff]  ;;  %v2200_v36 = vadd.f32 %v11182_v2, %v2111_v37  ;;  %v8171_v2 = vld [vmem:[%s14504_s3 + $0x70] sm:$0xff] }
 0x2da   : > { %2528 = vst.msk [vmem:[#allocation3 + $0x99] sm:$0xff] %vm593_vm6, %v2495_v59  ;;  %v2281_v26 = vpop.f32.mrf.mxu3  ;;  %v11239_v43 = vpop.f32.mrf.mxu0  ;;  %3988 = vmatpush.bf16.msra.mxu2 %v8171_v2 }
 0x2db   : > { %v2282_v20 = vadd.f32 %v2281_v26, %v2193_v34 }
 0x2dd   : > { %v2371_v5 = vadd.f32 %v11139_v32, %v2282_v20  ;;  %v11220_v32 = vpop.f32.mrf.mxu2  ;;  %v11266_v20 = vld [vmem:[#allocation3 + $0x90] sm:$0xff] }
 0x2df   : > { %vm2432_vm3 = vcmp.ge.f32.partialorder %v2371_v5, 0.0  ;;  %v2464_v30 = vmul.f32 0.2, %v2371_v5  ;;  %v11292_v49 = vpop.f32.mrf.mxu1 }
 0x2e1   : > { %v2496_v18 = vsel %vm2432_vm3, %v2371_v5, %v2464_v30  ;;  %v2594_v19 = vld [vmem:[#allocation3 + $0x99] sm:$0xff]  ;;  %v14538_v5 = vld [vmem:[#allocation10_spill] sm:$0xff] }
 0x2e2   : > { %2529 = vst.msk [vmem:[#allocation3 + $0xa9] sm:$0xff] %vm593_vm6, %v2496_v18  ;;  %v2283_v12 = vpop.f32.mrf.mxu3  ;;  %v11223_v4 = vpack.i.bf16 %v2594_v19, %v2593_v38  ;;  %v11256_v53 = vld [vmem:[#allocation3 + $0x98] sm:$0xff]  ;;  %v11261_v10 = vpop.f32.mrf.mxu0  ;;  %v2025_v16 = vadd.f32 %v10973_v21, %v14538_v5  ;;  %v8647_v38 = vpack.i.bf16 %v2552_v42, %v2551_v15  ;;  %v8179_v19 = vld [vmem:[%s14504_s3 + $0xb0] sm:$0xff] }
 0x2e3   : > { %v2284_v55 = vadd.f32 %v2283_v12, %v2195_v6  ;;  %v8672_v50 = vpack.i.bf16 %v11256_v53, %v11266_v20  ;;  %4077 = vmatpush.bf16.msra.mxu3 %v8179_v19 }
 0x2e4   : > { %8633 = vrot.lane.b32.xlu1 %v11223_v4, %s9523_s30  ;;  %v2114_v30 = vadd.f32 %v11198_v58, %v2025_v16  ;;  %v14539_v58 = vld [vmem:[#allocation11_spill] sm:$0xff] }
 0x2e5   : > { %v2373_v28 = vadd.f32 %v11153_v39, %v2284_v55  ;;  %v8657_v39 = vpack.i.bf16 %v11237_v1, %v11244_v9  ;;  %v11251_v11 = vpop.f32.mrf.mxu2  ;;  %v2027_v51 = vadd.f32 %v10973_v21, %v14539_v58 }
 0x2e6   : > { %v2203_v29 = vadd.f32 %v11202_v33, %v2114_v30  ;;  %v11337_v30 = vld [vmem:[#allocation3 + $0x78] sm:$0xff] }
 0x2e7   : > { %vm2433_vm4 = vcmp.ge.f32.partialorder %v2373_v28, 0.0  ;;  %v2465_v61 = vmul.f32 0.2, %v2373_v28  ;;  %2325 = vmatmul.bf16.gmra.mxu3 %v1633_v54  ;;  %v2116_v55 = vadd.f32 %v11215_v57, %v2027_v51 }
 0x2e9   : > { %v2497_v62 = vsel %vm2433_vm4, %v2373_v28, %v2465_v61  ;;  %v2595_v59 = vld [vmem:[#allocation3 + $0xa9] sm:$0xff]  ;;  %v2205_v35 = vadd.f32 %v11220_v32, %v2116_v55  ;;  %v14540_v32 = vld [vmem:[#allocation12_spill] sm:$0xff] }
 0x2ea   : > { %2530 = vst.msk [vmem:[#allocation3 + $0xb1] sm:$0xff] %vm593_vm6, %v2497_v62  ;;  %v2286_v14 = vpop.f32.mrf.mxu3  ;;  %v11287_v12 = vpop.f32.mrf.mxu0  ;;  %v2030_v7 = vadd.f32 %v10973_v21, %v14540_v32 }
 0x2eb   : > { %v2287_v60 = vadd.f32 %v2286_v14, %v2198_v45  ;;  %v11301_v45 = vld [vmem:[#allocation3 + $0x60] sm:$0xff] }
 0x2ec   : > { %8658 = vrot.lane.b32.xlu1 %v8657_v39, %s9523_s30 }
 0x2ed   : > { %v2376_v41 = vadd.f32 %v11174_v23, %v2287_v60  ;;  %v2209_v31 = vpop.f32.mrf.mxu2  ;;  %v8187_v60 = vld [vmem:[%s14504_s3 + $0xf0] sm:$0xff] }
 0x2ee   : > { %v8609_v17 = vpop.permute.xlu2 %8608  ;;  %4166 = vmatpush.bf16.msra.mxu0 %v8187_v60 }
 0x2ef   : > { %vm2434_vm5 = vcmp.ge.f32.partialorder %v2376_v41, 0.0  ;;  %v2466_v27 = vmul.f32 0.2, %v2376_v41  ;;  %v8611_v46 = vunpack.i.h.bf16 %v8609_v17  ;;  %v8610_v25 = vunpack.i.l.bf16 %v8609_v17 }
 0x2f0   : > { %v2119_v17 = vadd.f32 %v11242_v63, %v2030_v7  ;;  %v8178_v7 = vld [vmem:[%s14504_s3 + $0xa8] sm:$0xff] }
 0x2f1   : > { %v2498_v48 = vsel %vm2434_vm5, %v2376_v41, %v2466_v27  ;;  %v3352_v52 = vsel %vm593_vm6, %v2551_v15, %v8610_v25  ;;  %v3353_v34 = vsel %vm593_vm6, %v2552_v42, %v8611_v46  ;;  %v2596_v23 = vld [vmem:[#allocation3 + $0xb1] sm:$0xff]  ;;  %v11320_v27 = vpop.f32.mrf.mxu1  ;;  %4078 = vmatpush.bf16.msra.mxu3 %v8178_v7 }
 0x2f2   : > { %2531 = vst.msk [vmem:[#allocation3 + $0xc1] sm:$0xff] %vm593_vm6, %v2498_v48  ;;  %v2288_v44 = vpop.f32.mrf.mxu3  ;;  %v3483_v26 = vpack.c.bf16 %v3353_v34, %v3352_v52  ;;  %v11264_v0 = vpack.i.bf16 %v2596_v23, %v2595_v59  ;;  %v11317_v37 = vpop.f32.mrf.mxu0  ;;  %v2648_v25 = vld [vmem:[#allocation3 + $0x38] sm:$0xff]  ;;  %v2208_v15 = vadd.f32 %v11251_v11, %v2119_v17  ;;  %v14541_v59 = vld [vmem:[#allocation13_spill] sm:$0xff] }
 0x2f3   : > { %v2289_v24 = vadd.f32 %v2288_v44, %v2200_v36  ;;  %v2647_v36 = vld [vmem:[#allocation3 + $0x30] sm:$0xff]  ;;  %v2032_v63 = vadd.f32 %v10973_v21, %v14541_v59 }
 0x2f4   : > { %3911 = vmatmul.bf16.gmra.mxu1 %v3483_v26  ;;  %8638 = vrot.lane.b32.xlu2 %v11264_v0, %s9523_s30  ;;  %v11331_v26 = vld [vmem:[#allocation3 + $0x80] sm:$0xff] }
 0x2f5   : > { %v2378_v13 = vadd.f32 %v11193_v56, %v2289_v24  ;;  %8673 = vrot.lane.b32.xlu1 %v8672_v50, %s9523_s30  ;;  %v11298_v28 = vpop.f32.mrf.mxu2  ;;  %v2121_v44 = vadd.f32 %v11271_v22, %v2032_v63  ;;  %v8667_v22 = vpack.i.bf16 %v11331_v26, %v11337_v30 }
 0x2f7   : > { %vm2435_vm7 = vcmp.ge.f32.partialorder %v2378_v13, 0.0  ;;  %v2467_v3 = vmul.f32 0.2, %v2378_v13  ;;  %v2210_v50 = vadd.f32 %v2209_v31, %v2121_v44 }
 0x2f9   : > { %v2499_v6 = vsel %vm2435_vm7, %v2378_v13, %v2467_v3  ;;  %v2597_v62 = vld [vmem:[#allocation3 + $0xc1] sm:$0xff]  ;;  %v11335_v24 = vpop.f32.mrf.mxu1 }
 0x2fa   : > { %2532 = vst.msk [vmem:[#allocation3 + $0xc9] sm:$0xff] %vm593_vm6, %v2499_v6  ;;  %v2291_v18 = vpop.f32.mrf.mxu3  ;;  %v11333_v2 = vpop.f32.mrf.mxu0 }
 0x2fb   : > { %v2292_v56 = vadd.f32 %v2291_v18, %v2203_v29  ;;  %v8170_v29 = vld [vmem:[%s14504_s3 + $0x68] sm:$0xff] }
 0x2fc   : > { %8648 = vrot.lane.b32.xlu2 %v8647_v38, %s9523_s30  ;;  %v14542_v18 = vld [vmem:[#allocation14_spill] sm:$0xff]  ;;  %3989 = vmatpush.bf16.msra.mxu2 %v8170_v29 }
 0x2fd   : > { %v2381_v33 = vadd.f32 %v11212_v8, %v2292_v56  ;;  %v8662_v8 = vpack.i.bf16 %v11296_v47, %v11301_v45  ;;  %v11323_v48 = vpop.f32.mrf.mxu2  ;;  %v2035_v31 = vadd.f32 %v10973_v21, %v14542_v18 }
 0x2ff   : > { %vm2436_vm8 = vcmp.ge.f32.partialorder %v2381_v33, 0.0  ;;  %v2468_v54 = vmul.f32 0.2, %v2381_v33  ;;  %v2124_v56 = vadd.f32 %v11292_v49, %v2035_v31 }
 0x301   : > { %v2500_v61 = vsel %vm2436_vm8, %v2381_v33, %v2468_v54  ;;  %v2598_v14 = vld [vmem:[#allocation3 + $0xc9] sm:$0xff] }
 0x302   : > { %2533 = vst.msk [vmem:[#allocation3 + $0xd9] sm:$0xff] %vm593_vm6, %v2500_v61  ;;  %v2293_v39 = vpop.f32.mrf.mxu3  ;;  %v11306_v57 = vpack.i.bf16 %v2598_v14, %v2597_v62  ;;  %v2213_v61 = vadd.f32 %v11298_v28, %v2124_v56 }
 0x303   : > { %v2294_v40 = vadd.f32 %v2293_v39, %v2205_v35  ;;  %v11358_v35 = vld [vmem:[#allocation3 + $0xc8] sm:$0xff]  ;;  %v11363_v39 = vld [vmem:[#allocation3 + $0xc0] sm:$0xff] }
 0x304   : > { %8663 = vrot.lane.b32.xlu2 %v8662_v8, %s9523_s30  ;;  %8643 = vrot.lane.b32.xlu0 %v11306_v57, %s9523_s30  ;;  %v11367_v8 = vpop.f32.mrf.mxu0  ;;  %v8692_v28 = vpack.i.bf16 %v11358_v35, %v11363_v39 }
 0x305   : > { %v2383_v41 = vadd.f32 %v11239_v43, %v2294_v40  ;;  %v8652_v43 = vpack.i.bf16 %v2648_v25, %v2647_v36  ;;  %v11349_v38 = vpop.f32.mrf.mxu2 }
 0x307   : > { %vm2437_vm9 = vcmp.ge.f32.partialorder %v2383_v41, 0.0  ;;  %v2469_v46 = vmul.f32 0.2, %v2383_v41 }
 0x309   : > { %v2501_v42 = vsel %vm2437_vm9, %v2383_v41, %v2469_v46  ;;  %v2599_v16 = vld [vmem:[#allocation3 + $0xd9] sm:$0xff]  ;;  %v11377_v41 = vpop.f32.mrf.mxu1  ;;  %vm4440_vm9 = vcmask 261120  }
 0x30a   : > { %2534 = vst.msk [vmem:[#allocation3 + $0xe1] sm:$0xff] %vm593_vm6, %v2501_v42  ;;  %v2296_v52 = vpop.f32.mrf.mxu3  ;;  %v11361_v14 = vld [vmem:[#allocation3 + $0xd8] sm:$0xff] }
 0x30b   : > { %v2297_v34 = vadd.f32 %v2296_v52, %v2208_v15  ;;  %v14543_v46 = vld [vmem:[#allocation15_spill] sm:$0xff] }
 0x30c   : > { %8653 = vrot.lane.b32.xlu0 %v8652_v43, %s9523_s30  ;;  %v11387_v43 = vld [vmem:[#allocation3 + $0x32] sm:$0xff] }
 0x30d   : > { %v2386_v23 = vadd.f32 %v11261_v10, %v2297_v34  ;;  %v11384_v42 = vpop.f32.mrf.mxu2  ;;  %v11389_v34 = vld [vmem:[#allocation3 + $0x3a] sm:$0xff] }
 0x30f   : > { %vm2438_vm10 = vcmp.ge.f32.partialorder %v2386_v23, 0.0  ;;  %v2470_v11 = vmul.f32 0.2, %v2386_v23 }
 0x311   : > { %v2502_v5 = vsel %vm2438_vm10, %v2386_v23, %v2470_v11  ;;  %v2600_v13 = vld [vmem:[#allocation3 + $0xe1] sm:$0xff] }
 0x312   : > { %2535 = vst.msk [vmem:[#allocation3 + $0xf1] sm:$0xff] %vm593_vm6, %v2502_v5  ;;  %v2298_v3 = vpop.f32.mrf.mxu3  ;;  %v11340_v10 = vpack.i.bf16 %v2600_v13, %v2599_v16  ;;  %v11356_v54 = vld [vmem:[#allocation3 + $0xe0] sm:$0xff]  ;;  %v11403_v16 = vpop.f32.mrf.mxu0  ;;  %v14544_v13 = vld [vmem:[#allocation18_spill] sm:$0xff] }
 0x313   : > { %v2299_v6 = vadd.f32 %v2298_v3, %v2210_v50  ;;  %v8697_v40 = vpack.i.bf16 %v11356_v54, %v11361_v14  ;;  %v8717_v50 = vpack.i.bf16 %v11389_v34, %v11387_v43  ;;  %v8191_v5 = vld [vmem:[%s14504_s3 + $0x110] sm:$0xff]  ;;  %v2040_v3 = vadd.f32 %v10973_v21, %v14544_v13 }
 0x314   : > { %8678 = vrot.lane.b32.xlu1 %v11340_v10, %s9523_s30  ;;  %8668 = vrot.lane.b32.xlu0 %v8667_v22, %s9523_s30  ;;  %v11410_v22 = vpop.f32.mrf.mxu1 }
 0x315   : > { %v2388_v19 = vadd.f32 %v11287_v12, %v2299_v6  ;;  %4259 = vmatpush.bf16.msrb.mxu1 %v8191_v5  ;;  %v2129_v6 = vadd.f32 %v11335_v24, %v2040_v3 }
 0x316   : > { %v8614_v58 = vpop.permute.xlu0 %8613 }
 0x317   : > { %vm2439_vm11 = vcmp.ge.f32.partialorder %v2388_v19, 0.0  ;;  %v2471_v51 = vmul.f32 0.2, %v2388_v19  ;;  %v8616_v33 = vunpack.i.h.bf16 %v8614_v58  ;;  %v8615_v55 = vunpack.i.l.bf16 %v8614_v58  ;;  %v11414_v58 = vld [vmem:[#allocation3 + $0xb0] sm:$0xff] }
 0x319   : > { %v2503_v62 = vsel %vm2439_vm11, %v2388_v19, %v2471_v51  ;;  %v3354_v12 = vsel %vm593_vm6, %v2647_v36, %v8615_v55  ;;  %v3355_v49 = vsel %vm593_vm6, %v2648_v25, %v8616_v33  ;;  %v2037_v25 = vadd.f32 %v10973_v21, %v14543_v46  ;;  %v2601_v23 = vld [vmem:[#allocation3 + $0xf1] sm:$0xff]  ;;  %v2717_v21 = vld [vmem:[#allocation3 + $0x7a] sm:$0xff]  ;;  %v2718_v51 = vld [vmem:[#allocation3 + $0x82] sm:$0xff]  ;;  %v11416_v33 = vpop.f32.mrf.mxu2 }
 0x31a   : > { %2536 = vst.msk [vmem:[#allocation3 + $0xf9] sm:$0xff] %vm593_vm6, %v2503_v62  ;;  %v2301_v60 = vpop.f32.mrf.mxu3  ;;  %v3488_v32 = vpack.c.bf16 %v3355_v49, %v3354_v12  ;;  %v8169_v55 = vld [vmem:[%s14504_s3 + $0x60] sm:$0xff]  ;;  %v11422_v62 = vld [vmem:[#allocation3 + $0xa8] sm:$0xff]  ;;  %v2400_v46 = vpop.f32.mrf.mxu0 }
 0x31b   : > { %v2302_v17 = vadd.f32 %v2301_v60, %v2213_v61  ;;  %v2126_v36 = vadd.f32 %v11320_v27, %v2037_v25  ;;  %v8186_v27 = vld [vmem:[%s14504_s3 + $0xe8] sm:$0xff]  ;;  %v8687_v60 = vpack.i.bf16 %v11414_v58, %v11422_v62  ;;  %3990 = vmatpush.bf16.msra.mxu2 %v8169_v55 }
 0x31c   : > { %8698 = vrot.lane.b32.xlu1 %v8697_v40, %s9523_s30  ;;  %8693 = vrot.lane.b32.xlu0 %v8692_v28, %s9523_s30  ;;  %v8732_v40 = vpack.i.bf16 %v2718_v51, %v2717_v21  ;;  %v11470_v51 = vld [vmem:[#allocation3 + $0x4a] sm:$0xff] }
 0x31d   : > { %v2391_v15 = vadd.f32 %v11317_v37, %v2302_v17  ;;  %3916 = vmatmul.bf16.gmra.mxu1 %v3488_v32  ;;  %v2215_v59 = vadd.f32 %v11323_v48, %v2126_v36  ;;  %4167 = vmatpush.bf16.msra.mxu0 %v8186_v27 }
 0x31f   : > { %vm2440_vm12 = vcmp.ge.f32.partialorder %v2391_v15, 0.0  ;;  %v2472_v52 = vmul.f32 0.2, %v2391_v15 }
 0x321   : > { %v2504_v63 = vsel %vm2440_vm12, %v2391_v15, %v2472_v52  ;;  %v2602_v44 = vld [vmem:[#allocation3 + $0xf9] sm:$0xff]  ;;  %v11445_v15 = vpop.f32.mrf.mxu1  ;;  %v2224_v5 = vpop.f32.mrf.mxu2 }
 0x322   : > { %2537 = vst.msk [vmem:[#allocation3 + $0x109] sm:$0xff] %vm593_vm6, %v2504_v63  ;;  %v2303_v37 = vpop.f32.mrf.mxu3  ;;  %v11393_v11 = vpack.i.bf16 %v2602_v44, %v2601_v23  ;;  %v11447_v52 = vld [vmem:[#allocation3 + $0xf8] sm:$0xff]  ;;  %v2724_v63 = vld [vmem:[#allocation3 + $0xca] sm:$0xff]  ;;  %v8167_v23 = vld [vmem:[%s14504_s3 + $0x50] sm:$0xff] }
 0x323   : > { %v2304_v48 = vadd.f32 %v2303_v37, %v2215_v59  ;;  %v2723_v59 = vld [vmem:[#allocation3 + $0xc2] sm:$0xff] }
 0x324   : > { %8683 = vrot.lane.b32.xlu2 %v11393_v11, %s9523_s30  ;;  %8718 = vrot.lane.b32.xlu1 %v8717_v50, %s9523_s30  ;;  %v11453_v50 = vld [vmem:[#allocation3 + $0xf0] sm:$0xff]  ;;  %v8747_v3 = vpack.i.bf16 %v2724_v63, %v2723_v59 }
 0x325   : > { %v2393_v29 = vadd.f32 %v11333_v2, %v2304_v48  ;;  %v2218_v2 = vadd.f32 %v11349_v38, %v2129_v6  ;;  %v14545_v38 = vld [vmem:[#allocation20_spill] sm:$0xff]  ;;  %v8702_v13 = vpack.i.bf16 %v11447_v52, %v11453_v50 }
 0x326   : > { %v8619_v18 = vpop.permute.xlu1 %8618 }
 0x327   : > { %vm2441_vm13 = vcmp.ge.f32.partialorder %v2393_v29, 0.0  ;;  %v2473_v31 = vmul.f32 0.2, %v2393_v29  ;;  %v8621_v19 = vunpack.i.h.bf16 %v8619_v18  ;;  %v8620_v56 = vunpack.i.l.bf16 %v8619_v18 }
 0x329   : > { %v2505_v61 = vsel %vm2441_vm13, %v2393_v29, %v2473_v31  ;;  %v3356_v24 = vsel %vm593_vm6, %v11244_v9, %v8620_v56  ;;  %v3357_v12 = vsel %vm593_vm6, %v11237_v1, %v8621_v19  ;;  %v8168_v9 = vld [vmem:[%s14504_s3 + $0x58] sm:$0xff]  ;;  %v11439_v1 = vld [vmem:[%s14503_s2] ss:$0 sm:$0xff]  ;;  %v8166_v31 = vld [vmem:[%s14504_s3 + $0x48] sm:$0xff]  ;;  %v2227_v63 = vpop.f32.mrf.mxu2 }
 0x32a   : > { %2538 = vst.msk [vmem:[#allocation3 + $0x111] sm:$0xff] %vm593_vm6, %v2505_v61  ;;  %v2306_v49 = vpop.f32.mrf.mxu3  ;;  %v3493_v28 = vpack.c.bf16 %v3357_v12, %v3356_v24  ;;  %v2042_v7 = vadd.f32 %v11439_v1, %v14545_v38  ;;  %3991 = vmatpush.bf16.msra.mxu2 %v8168_v9  ;;  %v2603_v27 = vld [vmem:[#allocation3 + $0x109] sm:$0xff]  ;;  %v2402_v61 = vpop.f32.mrf.mxu0  ;;  %v11473_v24 = vld [vmem:[#allocation3 + $0x52] sm:$0xff] }
 0x32b   : > { %v2307_v32 = vadd.f32 %v2306_v49, %v2218_v2  ;;  %v14546_v19 = vld [vmem:[#allocation17_spill] sm:$0xff] }
 0x32c   : > { %8688 = vrot.lane.b32.xlu2 %v8687_v60, %s9523_s30  ;;  %8733 = vrot.lane.b32.xlu1 %v8732_v40, %s9523_s30  ;;  %v2131_v25 = vadd.f32 %v11377_v41, %v2042_v7  ;;  %v2045_v56 = vadd.f32 %v11439_v1, %v14546_v19  ;;  %v11475_v60 = vld [vmem:[#allocation3 + $0x1a] sm:$0xff]  ;;  %v11477_v40 = vld [vmem:[#allocation3 + $0x22] sm:$0xff] }
 0x32d   : > { %v2396_v17 = vadd.f32 %v11367_v8, %v2307_v32  ;;  %3921 = vmatmul.bf16.gmra.mxu1 %v3493_v28  ;;  %v8624_v8 = vpop.permute.xlu2 %8623  ;;  %v2138_v32 = vpop.f32.mrf.mxu1 }
 0x32e   : > { %v2220_v44 = vadd.f32 %v11384_v42, %v2131_v25  ;;  %3992 = vmatpush.bf16.msra.mxu2 %v8167_v23  ;;  %v8626_v18 = vunpack.i.h.bf16 %v8624_v8  ;;  %v8625_v42 = vunpack.i.l.bf16 %v8624_v8  ;;  %v2134_v55 = vadd.f32 %v11410_v22, %v2045_v56  ;;  %v8165_v22 = vld [vmem:[%s14504_s3 + $0x40] sm:$0xff] }
 0x32f   : > { %vm2442_vm14 = vcmp.ge.f32.partialorder %v2396_v17, 0.0  ;;  %v2474_v36 = vmul.f32 0.2, %v2396_v17  ;;  %v8185_v56 = vld [vmem:[%s14504_s3 + $0xe0] sm:$0xff] }
 0x330   : > { %v3359_v28 = vsel %vm593_vm6, %v11296_v47, %v8626_v18  ;;  %v2223_v9 = vadd.f32 %v11416_v33, %v2134_v55  ;;  %v14547_v33 = vld [vmem:[#allocation19_spill] sm:$0xff]  ;;  %4168 = vmatpush.bf16.msra.mxu0 %v8185_v56 }
 0x331   : > { %v2506_v37 = vsel %vm2442_vm14, %v2396_v17, %v2474_v36  ;;  %v2604_v41 = vld [vmem:[#allocation3 + $0x111] sm:$0xff]  ;;  %v8722_v17 = vpack.i.bf16 %v11473_v24, %v11470_v51  ;;  %v8712_v36 = vpack.i.bf16 %v11477_v40, %v11475_v60  ;;  %v2047_v23 = vadd.f32 %v11439_v1, %v14547_v33 }
 0x332   : > { %2539 = vst.msk [vmem:[#allocation3 + $0x121] sm:$0xff] %vm593_vm6, %v2506_v37  ;;  %v2308_v48 = vpop.f32.mrf.mxu3  ;;  %v11458_v29 = vpack.i.bf16 %v2604_v41, %v2603_v27  ;;  %3993 = vmatpush.bf16.msra.mxu2 %v8166_v31  ;;  %v2729_v12 = vld [vmem:[#allocation3 + $0x10a] sm:$0xff]  ;;  %v2730_v49 = vld [vmem:[#allocation3 + $0x112] sm:$0xff]  ;;  %v11503_v41 = vld [vmem:[#allocation3 + $0x9a] sm:$0xff]  ;;  %v2405_v18 = vpop.f32.mrf.mxu0 }
 0x333   : > { %v2309_v6 = vadd.f32 %v2308_v48, %v2220_v44  ;;  %v8767_v25 = vpack.i.bf16 %v2730_v49, %v2729_v12  ;;  %v2136_v8 = vadd.f32 %v11445_v15, %v2047_v23  ;;  %v11501_v27 = vld [vmem:[#allocation3 + $0x92] sm:$0xff]  ;;  %v11505_v48 = vld [vmem:[#allocation3 + $0x62] sm:$0xff] }
 0x334   : > { %8703 = vrot.lane.b32.xlu2 %v8702_v13, %s9523_s30  ;;  %8748 = vrot.lane.b32.xlu1 %v8747_v3, %s9523_s30  ;;  %v11507_v13 = vld [vmem:[#allocation3 + $0x6a] sm:$0xff]  ;;  %v8737_v15 = vpack.i.bf16 %v11503_v41, %v11501_v27 }
 0x335   : > { %v2398_v21 = vadd.f32 %v11403_v16, %v2309_v6  ;;  %8708 = vrot.lane.b32.xlu0 %v11458_v29, %s9523_s30  ;;  %v3358_v16 = vsel %vm593_vm6, %v11301_v45, %v8625_v42  ;;  %v8177_v45 = vld [vmem:[%s14504_s3 + $0xa0] sm:$0xff]  ;;  %v2225_v3 = vadd.f32 %v2224_v5, %v2136_v8  ;;  %v8727_v5 = vpack.i.bf16 %v11507_v13, %v11505_v48 }
 0x336   : > { %3994 = vmatpush.bf16.msra.mxu2 %v8165_v22  ;;  %v3498_v59 = vpack.c.bf16 %v3359_v28, %v3358_v16  ;;  %4079 = vmatpush.bf16.msra.mxu3 %v8177_v45  ;;  %v2229_v28 = vpop.f32.mrf.mxu2 }
 0x337   : > { %vm2443_vm15 = vcmp.ge.f32.partialorder %v2398_v21, 0.0  ;;  %v2475_v2 = vmul.f32 0.2, %v2398_v21 }
 0x339   : > { %v2507_v38 = vsel %vm2443_vm15, %v2398_v21, %v2475_v2  ;;  %v2140_v21 = vpop.f32.mrf.mxu1  ;;  %v14548_v2 = vld [vmem:[#allocation21_spill] sm:$0xff]  ;;  %v11531_v33 = vld [vmem:[#allocation3 + $0x120] sm:$0xff] }
 0x33a   : > { %2540 = vst.msk [vmem:[#allocation3 + $0x129] sm:$0xff] %vm593_vm6, %v2507_v38  ;;  %v2311_v7 = vpop.f32.mrf.mxu3  ;;  %v2050_v12 = vadd.f32 %v11439_v1, %v14548_v2 }
 0x33b   : > { %v2312_v47 = vadd.f32 %v2311_v7, %v2223_v9 }
 0x33c   : > { %8723 = vrot.lane.b32.xlu2 %v8722_v17, %s9523_s30  ;;  %8768 = vrot.lane.b32.xlu1 %v8767_v25, %s9523_s30  ;;  %v2139_v16 = vadd.f32 %v2138_v32, %v2050_v12  ;;  %v2725_v17 = vld [vmem:[#allocation3 + $0xda] sm:$0xff]  ;;  %v2726_v25 = vld [vmem:[#allocation3 + $0xe2] sm:$0xff] }
 0x33d   : > { %v2401_v44 = vadd.f32 %v2400_v46, %v2312_v47  ;;  %8713 = vrot.lane.b32.xlu0 %v8712_v36, %s9523_s30  ;;  %3926 = vmatmul.bf16.gmra.mxu1 %v3498_v59  ;;  %v2605_v46 = vld [vmem:[#allocation3 + $0x121] sm:$0xff]  ;;  %v11527_v47 = vld [vmem:[#allocation3 + $0xaa] sm:$0xff]  ;;  %v11529_v36 = vld [vmem:[#allocation3 + $0xb2] sm:$0xff]  ;;  %v8752_v8 = vpack.i.bf16 %v2726_v25, %v2725_v17 }
 0x33e   : > { %v2228_v59 = vadd.f32 %v2227_v63, %v2139_v16  ;;  %v8742_v63 = vpack.i.bf16 %v11529_v36, %v11527_v47  ;;  %v2232_v12 = vpop.f32.mrf.mxu2  ;;  %v2728_v16 = vld [vmem:[#allocation3 + $0xfa] sm:$0xff] }
 0x33f   : > { %vm2444_vm0 = vcmp.ge.f32.partialorder %v2401_v44, 0.0  ;;  %v2476_v37 = vmul.f32 0.2, %v2401_v44 }
 0x341   : > { %v2508_v6 = vsel %vm2444_vm0, %v2401_v44, %v2476_v37  ;;  %v2606_v42 = vld [vmem:[#allocation3 + $0x129] sm:$0xff] }
 0x342   : > { %2541 = vst.msk [vmem:[#allocation3 + $0x139] sm:$0xff] %vm593_vm6, %v2508_v6  ;;  %v2313_v31 = vpop.f32.mrf.mxu3  ;;  %v11512_v19 = vpack.i.bf16 %v2606_v42, %v2605_v46  ;;  %v11525_v45 = vld [vmem:[#allocation3 + $0x128] sm:$0xff]  ;;  %v2407_v46 = vpop.f32.mrf.mxu0  ;;  %v14549_v42 = vld [vmem:[#allocation22_spill] sm:$0xff] }
 0x343   : > { %v2314_v55 = vadd.f32 %v2313_v31, %v2225_v3  ;;  %v8777_v37 = vpack.i.bf16 %v11525_v45, %v11531_v33  ;;  %v2052_v31 = vadd.f32 %v11439_v1, %v14549_v42 }
 0x344   : > { %8738 = vrot.lane.b32.xlu2 %v8737_v15, %s9523_s30  ;;  %8773 = vrot.lane.b32.xlu1 %v11512_v19, %s9523_s30 }
 0x345   : > { %v2403_v49 = vadd.f32 %v2402_v61, %v2314_v55  ;;  %8728 = vrot.lane.b32.xlu0 %v8727_v5, %s9523_s30  ;;  %v2141_v15 = vadd.f32 %v2140_v21, %v2052_v31 }
 0x346   : > { %v8629_v22 = vpop.permute.xlu0 %8628 }
 0x347   : > { %vm2445_vm1 = vcmp.ge.f32.partialorder %v2403_v49, 0.0  ;;  %v2477_v9 = vmul.f32 0.2, %v2403_v49  ;;  %v8631_v38 = vunpack.i.h.bf16 %v8629_v22  ;;  %v8630_v7 = vunpack.i.l.bf16 %v8629_v22 }
 0x348   : > { %v2230_v22 = vadd.f32 %v2229_v28, %v2141_v15 }
 0x349   : > { %v2509_v61 = vsel %vm2445_vm1, %v2403_v49, %v2477_v9  ;;  %v3360_v32 = vsel %vm593_vm6, %v11337_v30, %v8630_v7  ;;  %v3361_v23 = vsel %vm593_vm6, %v11331_v26, %v8631_v38  ;;  %v2143_v26 = vpop.f32.mrf.mxu1  ;;  %v2727_v49 = vld [vmem:[#allocation3 + $0xf2] sm:$0xff] }
 0x34a   : > { %2542 = vst.msk [vmem:[#allocation3 + $0x141] sm:$0xff] %vm593_vm6, %v2509_v61  ;;  %v2316_v44 = vpop.f32.mrf.mxu3  ;;  %v3503_v3 = vpack.c.bf16 %v3361_v23, %v3360_v32  ;;  %v2607_v38 = vld [vmem:[#allocation3 + $0x139] sm:$0xff]  ;;  %v8757_v61 = vpack.i.bf16 %v2728_v16, %v2727_v49  ;;  %v8176_v32 = vld [vmem:[%s14504_s3 + $0x98] sm:$0xff]  ;;  %v11568_v49 = vld [vmem:[#allocation3 + $0x110] sm:$0xff] }
 0x34b   : > { %v2317_v6 = vadd.f32 %v2316_v44, %v2228_v59  ;;  %v2410_v44 = vpop.f32.mrf.mxu0  ;;  %4080 = vmatpush.bf16.msra.mxu3 %v8176_v32 }
 0x34c   : > { %8753 = vrot.lane.b32.xlu2 %v8752_v8, %s9523_s30  ;;  %8778 = vrot.lane.b32.xlu1 %v8777_v37, %s9523_s30  ;;  %v2613_v37 = vld [vmem:[#allocation3 + $0x2] sm:$0xff] }
 0x34d   : > { %v2406_v30 = vadd.f32 %v2405_v18, %v2317_v6  ;;  %8743 = vrot.lane.b32.xlu0 %v8742_v63, %s9523_s30  ;;  %3931 = vmatmul.bf16.gmra.mxu1 %v3503_v3  ;;  %v2614_v3 = vld [vmem:[#allocation3 + $0xa] sm:$0xff] }
 0x34e   : > { %v8639_v56 = vpop.permute.xlu2 %8638 }
 0x34f   : > { %vm2446_vm2 = vcmp.ge.f32.partialorder %v2406_v30, 0.0  ;;  %v2478_v55 = vmul.f32 0.2, %v2406_v30  ;;  %v8641_v5 = vunpack.i.h.bf16 %v8639_v56  ;;  %v8640_v2 = vunpack.i.l.bf16 %v8639_v56  ;;  %v2731_v56 = vld [vmem:[#allocation3 + $0x122] sm:$0xff] }
 0x351   : > { %v2510_v9 = vsel %vm2446_vm2, %v2406_v30, %v2478_v55  ;;  %v2608_v7 = vld [vmem:[#allocation3 + $0x141] sm:$0xff]  ;;  %v11549_v17 = vsel %vm593_vm6, %v11422_v62, %v8640_v2  ;;  %v11553_v18 = vsel %vm593_vm6, %v11414_v58, %v8641_v5  ;;  %v14550_v62 = vld [vmem:[#allocation23_spill] sm:$0xff]  ;;  %v2145_v42 = vpop.f32.mrf.mxu1  ;;  %v2732_v55 = vld [vmem:[#allocation3 + $0x12a] sm:$0xff] }
 0x352   : > { %2543 = vst.msk [vmem:[#allocation3 + $0x151] sm:$0xff] %vm593_vm6, %v2510_v9  ;;  %v2318_v21 = vpop.f32.mrf.mxu3  ;;  %v11556_v25 = vpack.i.bf16 %v2608_v7, %v2607_v38  ;;  %v3513_v59 = vpack.c.bf16 %v11553_v18, %v11549_v17  ;;  %v2055_v23 = vadd.f32 %v11439_v1, %v14550_v62  ;;  %v2234_v9 = vpop.f32.mrf.mxu2  ;;  %v8190_v62 = vld [vmem:[%s14504_s3 + $0x108] sm:$0xff] }
 0x353   : > { %v2319_v28 = vadd.f32 %v2318_v21, %v2230_v22  ;;  %v8787_v21 = vpack.i.bf16 %v2732_v55, %v2731_v56  ;;  %4260 = vmatpush.bf16.msrb.mxu1 %v8190_v62  ;;  %v11606_v62 = vld [vmem:[#allocation3 + $0x51] sm:$0xff] }
 0x354   : > { %8783 = vrot.lane.b32.xlu2 %v11556_v25, %s9523_s30  ;;  %v2144_v8 = vadd.f32 %v2143_v26, %v2055_v23 }
 0x355   : > { %v2408_v58 = vadd.f32 %v2407_v46, %v2319_v28  ;;  %8758 = vrot.lane.b32.xlu0 %v8757_v61, %s9523_s30  ;;  %v11573_v28 = vld [vmem:[#allocation3 + $0x108] sm:$0xff] }
 0x356   : > { %v8649_v6 = vpop.permute.xlu2 %8648  ;;  %v8634_v63 = vpop.permute.xlu1 %8633  ;;  %v2233_v46 = vadd.f32 %v2232_v12, %v2144_v8  ;;  %v8184_v12 = vld [vmem:[%s14504_s3 + $0xd8] sm:$0xff] }
 0x357   : > { %vm2447_vm3 = vcmp.ge.f32.partialorder %v2408_v58, 0.0  ;;  %v2479_v31 = vmul.f32 0.2, %v2408_v58  ;;  %v8651_v30 = vunpack.i.h.bf16 %v8649_v6  ;;  %v8650_v15 = vunpack.i.l.bf16 %v8649_v6  ;;  %4169 = vmatpush.bf16.msra.mxu0 %v8184_v12 }
 0x358   : > { %v8636_v5 = vunpack.i.h.bf16 %v8634_v63  ;;  %v8635_v2 = vunpack.i.l.bf16 %v8634_v63  ;;  %v11591_v63 = vld [vmem:[#allocation3 + $0x140] sm:$0xff] }
 0x359   : > { %v2511_v16 = vsel %vm2447_vm3, %v2408_v58, %v2479_v31  ;;  %v3383_v22 = vsel %vm593_vm6, %v2614_v3, %v8651_v30  ;;  %v3382_v26 = vsel %vm593_vm6, %v2613_v37, %v8650_v15  ;;  %v8762_v58 = vpack.i.bf16 %v11568_v49, %v11573_v28  ;;  %v2412_v31 = vpop.f32.mrf.mxu0  ;;  %v11593_v30 = vld [vmem:[#allocation3 + $0x138] sm:$0xff]  ;;  %v2148_v56 = vpop.f32.mrf.mxu1  ;;  %v11628_v18 = vld [vmem:[#allocation3 + $0x150] sm:$0xff] }
 0x35a   : > { %2544 = vst.msk [vmem:[#allocation3 + $0x159] sm:$0xff] %vm593_vm6, %v2511_v16  ;;  %v3479_v38 = vpack.c.bf16 %v3383_v22, %v3382_v26  ;;  %v2321_v7 = vpop.f32.mrf.mxu3  ;;  %v3362_v61 = vsel %vm593_vm6, %v11266_v20, %v8635_v2  ;;  %v3363_v32 = vsel %vm593_vm6, %v11256_v53, %v8636_v5  ;;  %v14551_v20 = vld [vmem:[#allocation24_spill] sm:$0xff]  ;;  %v2609_v15 = vld [vmem:[#allocation3 + $0x151] sm:$0xff] }
 0x35b   : > { %v2322_v23 = vadd.f32 %v2321_v7, %v2233_v46  ;;  %v3508_v8 = vpack.c.bf16 %v3363_v32, %v3362_v61  ;;  %v2057_v37 = vadd.f32 %v11439_v1, %v14551_v20  ;;  %v2237_v7 = vpop.f32.mrf.mxu2 }
 0x35c   : > { %3995 = vmatmul.bf16.vlgmr.msra.gmra.mxu2 %v3479_v38  ;;  %8788 = vrot.lane.b32.xlu2 %v8787_v21, %s9523_s30 }
 0x35d   : > { %v2411_v53 = vadd.f32 %v2410_v44, %v2322_v23  ;;  %8763 = vrot.lane.b32.xlu0 %v8762_v58, %s9523_s30  ;;  %3936 = vmatmul.bf16.gmra.mxu1 %v3508_v8  ;;  %v2146_v3 = vadd.f32 %v2145_v42, %v2057_v37  ;;  %v8792_v42 = vpack.i.bf16 %v11591_v63, %v11593_v30  ;;  %v2733_v58 = vld [vmem:[#allocation3 + $0x13a] sm:$0xff]  ;;  %v2734_v8 = vld [vmem:[#allocation3 + $0x142] sm:$0xff] }
 0x35f   : > { %vm2448_vm4 = vcmp.ge.f32.partialorder %v2411_v53, 0.0  ;;  %v2480_v6 = vmul.f32 0.2, %v2411_v53  ;;  %v2235_v55 = vadd.f32 %v2234_v9, %v2146_v3  ;;  %v14552_v9 = vld [vmem:[#allocation25_spill] sm:$0xff] }
 0x360   : > { %v2060_v21 = vadd.f32 %v11439_v1, %v14552_v9 }
 0x361   : > { %v2512_v5 = vsel %vm2448_vm4, %v2411_v53, %v2480_v6  ;;  %v2735_v2 = vld [vmem:[#allocation3 + $0x152] sm:$0xff]  ;;  %v2736_v46 = vld [vmem:[#allocation3 + $0x15a] sm:$0xff]  ;;  %v2415_v23 = vpop.f32.mrf.mxu0  ;;  %v11608_v53 = vld [vmem:[#allocation3 + $0x49] sm:$0xff] }
 0x362   : > { %v2610_v44 = vld [vmem:[#allocation3 + $0x159] sm:$0xff]  ;;  %2545 = vst.msk [vmem:[#allocation3 + $0x169] sm:$0xff] %vm593_vm6, %v2512_v5  ;;  %v2323_v16 = vpop.f32.mrf.mxu3  ;;  %v8812_v22 = vpack.i.bf16 %v2736_v46, %v2735_v2  ;;  %v2149_v32 = vadd.f32 %v2148_v56, %v2060_v21  ;;  %v8827_v6 = vpack.i.bf16 %v11606_v62, %v11608_v53  ;;  %v8802_v56 = vpack.i.bf16 %v2734_v8, %v2733_v58  ;;  %v11641_v8 = vpop.permute.xlu2 %8663 }
 0x363   : > { %v11598_v26 = vpack.i.bf16 %v2610_v44, %v2609_v15  ;;  %v2324_v38 = vadd.f32 %v2323_v16, %v2235_v55  ;;  %v14553_v55 = vld [vmem:[#allocation26_spill] sm:$0xff]  ;;  %v2239_v46 = vpop.f32.mrf.mxu2 }
 0x364   : > { %8793 = vrot.lane.b32.xlu2 %v8792_v42, %s9523_s30  ;;  %8813 = vrot.lane.b32.xlu1 %v8812_v22, %s9523_s30  ;;  %v2238_v20 = vadd.f32 %v2237_v7, %v2149_v32  ;;  %v2062_v5 = vadd.f32 %v11439_v1, %v14553_v55  ;;  %v11620_v42 = vld [vmem:[#allocation3 + $0x158] sm:$0xff]  ;;  %v8175_v22 = vld [vmem:[%s14504_s3 + $0x90] sm:$0xff] }
 0x365   : > { %v2413_v61 = vadd.f32 %v2412_v31, %v2324_v38  ;;  %8798 = vrot.lane.b32.xlu0 %v11598_v26, %s9523_s30  ;;  %v2150_v31 = vpop.f32.mrf.mxu1  ;;  %4081 = vmatpush.bf16.msra.mxu3 %v8175_v22  ;;  %v11647_v55 = vld [vmem:[#allocation3 + $0x31] sm:$0xff]  ;;  %v8183_v22 = vld [vmem:[%s14504_s3 + $0xd0] sm:$0xff] }
 0x366   : > { %v2151_v44 = vadd.f32 %v2150_v31, %v2062_v5  ;;  %v11643_v31 = vld [vmem:[#allocation3 + $0x39] sm:$0xff]  ;;  %4170 = vmatpush.bf16.msra.mxu0 %v8183_v22 }
 0x367   : > { %vm2449_vm5 = vcmp.ge.f32.partialorder %v2413_v61, 0.0  ;;  %v2481_v12 = vmul.f32 0.2, %v2413_v61 }
 0x368   : > { %v2240_v38 = vadd.f32 %v2239_v46, %v2151_v44  ;;  %v11656_v46 = vld [vmem:[#allocation3 + $0x61] sm:$0xff] }
 0x369   : > { %v2513_v37 = vsel %vm2449_vm5, %v2413_v61, %v2481_v12  ;;  %v2611_v1 = vld [vmem:[#allocation3 + $0x169] sm:$0xff]  ;;  %v2417_v61 = vpop.f32.mrf.mxu0 }
 0x36a   : > { %2546 = vst.msk [vmem:[#allocation3 + $0x171] sm:$0xff] %vm593_vm6, %v2513_v37  ;;  %v2326_v3 = vpop.f32.mrf.mxu3 }
 0x36b   : > { %v2327_v15 = vadd.f32 %v2326_v3, %v2238_v20 }
 0x36c   : > { %8828 = vrot.lane.b32.xlu2 %v8827_v6, %s9523_s30 }
 0x36d   : > { %v2416_v2 = vadd.f32 %v2415_v23, %v2327_v15  ;;  %8803 = vrot.lane.b32.xlu0 %v8802_v56, %s9523_s30  ;;  %3941 = vmatmul.bf16.gmra.mxu1 %v3513_v59  ;;  %v11630_v59 = vpop.permute.xlu1 %8658  ;;  %v11632_v32 = vpop.f32.mrf.mxu1  ;;  %v8807_v23 = vpack.i.bf16 %v11620_v42, %v11628_v18  ;;  %v11645_v15 = vld [vmem:[#allocation3 + $0x69] sm:$0xff] }
 0x36f   : > { %vm2450_vm7 = vcmp.ge.f32.partialorder %v2416_v2, 0.0  ;;  %v2482_v16 = vmul.f32 0.2, %v2416_v2 }
 0x371   : > { %v2514_v7 = vsel %vm2450_vm7, %v2416_v2, %v2482_v16  ;;  %v2612_v9 = vld [vmem:[#allocation3 + $0x171] sm:$0xff]  ;;  %v8822_v2 = vpack.i.bf16 %v11643_v31, %v11647_v55  ;;  %v8832_v16 = vpack.i.bf16 %v11645_v15, %v11656_v46 }
 0x372   : > { %2547 = vst.msk [vmem:[#allocation3 + $0x181] sm:$0xff] %vm593_vm6, %v2514_v7  ;;  %v2328_v21 = vpop.f32.mrf.mxu3  ;;  %v11626_v17 = vpack.i.bf16 %v2612_v9, %v2611_v1 }
 0x373   : > { %v2329_v12 = vadd.f32 %v2328_v21, %v2240_v38  ;;  %v11671_v21 = vld [vmem:[#allocation3 + $0x81] sm:$0xff] }
 0x374   : > { %8843 = vrot.lane.b32.xlu2 %v11223_v4, %s9523_s30  ;;  %8818 = vrot.lane.b32.xlu1 %v11626_v17, %s9523_s30 }
 0x375   : > { %v2418_v58 = vadd.f32 %v2417_v61, %v2329_v12  ;;  %8808 = vrot.lane.b32.xlu0 %v8807_v23, %s9523_s30  ;;  %v11673_v61 = vld [vmem:[#allocation3 + $0x79] sm:$0xff] }
 0x376   : > { %v8644_v20 = vpop.permute.xlu0 %8643  ;;  %v8837_v23 = vpack.i.bf16 %v11671_v21, %v11673_v61 }
 0x377   : > { %vm2451_vm8 = vcmp.ge.f32.partialorder %v2418_v58, 0.0  ;;  %v2483_v37 = vmul.f32 0.2, %v2418_v58  ;;  %v8646_v3 = vunpack.i.h.bf16 %v8644_v20  ;;  %v8645_v6 = vunpack.i.l.bf16 %v8644_v20 }
 0x379   : > { %v2515_v56 = vsel %vm2451_vm8, %v2418_v58, %v2483_v37  ;;  %v3366_v4 = vsel %vm593_vm6, %v11363_v39, %v8645_v6  ;;  %v3367_v5 = vsel %vm593_vm6, %v11358_v35, %v8646_v3  ;;  %v11666_v35 = vpop.permute.xlu1 %8673  ;;  %v11668_v39 = vpop.f32.mrf.mxu1  ;;  %v2737_v6 = vld [vmem:[#allocation3 + $0x16a] sm:$0xff] }
 0x37a   : > { %2548 = vst.msk [vmem:[#allocation3 + $0x189] sm:$0xff] %vm593_vm6, %v2515_v56  ;;  %v3518_v44 = vpack.c.bf16 %v3367_v5, %v3366_v4 }
 0x37c   : > { %8858 = vrot.lane.b32.xlu2 %v11340_v10, %s9523_s30  ;;  %8823 = vrot.lane.b32.xlu1 %v8822_v2, %s9523_s30 }
 0x37d   : > { %8833 = vrot.lane.b32.xlu0 %v8832_v16, %s9523_s30  ;;  %3946 = vmatmul.bf16.gmra.mxu1 %v3518_v44  ;;  %v8660_v44 = vunpack.i.l.bf16 %v11630_v59 }
 0x37e   : > { %v8684_v38 = vpop.permute.xlu2 %8683  ;;  %v8654_v7 = vpop.permute.xlu0 %8653 }
 0x37f   : > { %v8656_v1 = vunpack.i.h.bf16 %v8654_v7  ;;  %v8655_v9 = vunpack.i.l.bf16 %v8654_v7 }
 0x381   : > { %v3384_v10 = vsel %vm593_vm6, %v11475_v60, %v8655_v9  ;;  %v3385_v12 = vsel %vm593_vm6, %v11477_v40, %v8656_v1  ;;  %v2738_v40 = vld [vmem:[#allocation3 + $0x172] sm:$0xff]  ;;  %v11688_v56 = vpop.f32.mrf.mxu1  ;;  %v8686_v1 = vunpack.i.h.bf16 %v8684_v38  ;;  %v8685_v9 = vunpack.i.l.bf16 %v8684_v38  ;;  %v4538_v38 = vld [vmem:[#allocation4 + $0xa] sm:$0xff] }
 0x382   : > { %v3484_v58 = vpack.c.bf16 %v3385_v12, %v3384_v10  ;;  %v8897_v5 = vpack.i.bf16 %v2738_v40, %v2737_v6  ;;  %v4506_v10 = vld [vmem:[#allocation4 + $0x9] sm:$0xff]  ;;  %v8666_v40 = vunpack.i.h.bf16 %v11641_v8 }
 0x383   : > { %v8182_v6 = vld [vmem:[%s14504_s3 + $0xc8] sm:$0xff] }
 0x384   : > { %8873 = vrot.lane.b32.xlu2 %v11512_v19, %s9523_s30  ;;  %8838 = vrot.lane.b32.xlu1 %v8837_v23, %s9523_s30 }
 0x385   : > { %8848 = vrot.lane.b32.xlu0 %v11264_v0, %s9523_s30  ;;  %4000 = vmatmul.bf16.gmra.mxu2 %v3484_v58  ;;  %v8661_v0 = vunpack.i.h.bf16 %v11630_v59  ;;  %v3386_v59 = vsel %vm593_vm6, %v11387_v43, %v8660_v44  ;;  %v4537_v58 = vld [vmem:[#allocation4 + $0x2] sm:$0xff] }
 0x386   : > { %v11686_v20 = vpop.permute.xlu2 %8688  ;;  %v8679_v37 = vpop.permute.xlu1 %8678  ;;  %4171 = vmatpush.bf16.msra.mxu0 %v8182_v6 }
 0x387   : > { %v8681_v60 = vunpack.i.h.bf16 %v8679_v37  ;;  %v8680_v3 = vunpack.i.l.bf16 %v8679_v37  ;;  %v3387_v22 = vsel %vm593_vm6, %v11389_v34, %v8661_v0  ;;  %v11721_v43 = vpop.permute.xlu0 %8668  ;;  %v4505_v34 = vld [vmem:[#allocation4 + $0x1] sm:$0xff]  ;;  %v2739_v0 = vld [vmem:[#allocation3 + $0x182] sm:$0xff] }
 0x388   : > { %v3489_v7 = vpack.c.bf16 %v3387_v22, %v3386_v59  ;;  %v8907_v37 = vpack.i.bf16 %v4506_v10, %v4505_v34  ;;  %v2675_v59 = vld [vmem:[#allocation3 + $0x180] sm:$0xff]  ;;  %v11759_v22 = vld [vmem:[#allocation3 + $0x168] sm:$0xff] }
 0x389   : > { %v3368_v4 = vsel %vm593_vm6, %v11361_v14, %v8680_v3  ;;  %v3369_v19 = vsel %vm593_vm6, %v11356_v54, %v8681_v60  ;;  %v8174_v14 = vld [vmem:[%s14504_s3 + $0x88] sm:$0xff]  ;;  %v8912_v60 = vpack.i.bf16 %v4538_v38, %v4537_v58 }
 0x38a   : > { %v3523_v2 = vpack.c.bf16 %v3369_v19, %v3368_v4  ;;  %4082 = vmatpush.bf16.msra.mxu3 %v8174_v14  ;;  %v8665_v4 = vunpack.i.l.bf16 %v11641_v8  ;;  %v2676_v8 = vld [vmem:[#allocation3 + $0x188] sm:$0xff]  ;;  %v3389_v14 = vsel %vm593_vm6, %v11473_v24, %v8666_v40 }
 0x38c   : > { %8898 = vrot.lane.b32.xlu2 %v8897_v5, %s9523_s30  ;;  %8853 = vrot.lane.b32.xlu1 %v11306_v57, %s9523_s30  ;;  %v8173_v57 = vld [vmem:[%s14504_s3 + $0x80] sm:$0xff]  ;;  %v3388_v44 = vsel %vm593_vm6, %v11470_v51, %v8665_v4  ;;  %v8671_v4 = vunpack.i.h.bf16 %v11721_v43 }
 0x38d   : > { %8863 = vrot.lane.b32.xlu0 %v11393_v11, %s9523_s30  ;;  %3951 = vmatmul.bf16.gmra.mxu1 %v3523_v2  ;;  %v11715_v11 = vpop.f32.mrf.mxu1  ;;  %v11753_v2 = vld [vmem:[#allocation3 + $0x170] sm:$0xff]  ;;  %v3494_v34 = vpack.c.bf16 %v3389_v14, %v3388_v44 }
 0x38e   : > { %v11704_v54 = vpop.permute.xlu2 %8703  ;;  %v11706_v16 = vpop.permute.xlu1 %8698  ;;  %4083 = vmatpush.bf16.msra.mxu3 %v8173_v57 }
 0x38f   : > { %v11751_v5 = vpop.permute.xlu0 %8693 }
 0x394   : > { %8903 = vrot.lane.b32.xlu2 %v11626_v17, %s9523_s30  ;;  %8868 = vrot.lane.b32.xlu1 %v11458_v29, %s9523_s30  ;;  %v3370_v17 = vsel %vm593_vm6, %v11453_v50, %v8685_v9  ;;  %v3371_v29 = vsel %vm593_vm6, %v11447_v52, %v8686_v1  ;;  %v8189_v52 = vld [vmem:[%s14504_s3 + $0x100] sm:$0xff]  ;;  %v8887_v1 = vpack.i.bf16 %v11753_v2, %v11759_v22 }
 0x395   : > { %8878 = vrot.lane.b32.xlu0 %v11556_v25, %s9523_s30  ;;  %4005 = vmatmul.bf16.gmra.mxu2 %v3489_v7  ;;  %v3528_v25 = vpack.c.bf16 %v3371_v29, %v3370_v17  ;;  %v8917_v7 = vpack.i.bf16 %v2676_v8, %v2675_v59  ;;  %v2802_v29 = vld [vmem:[#allocation3 + $0x181] sm:$0xff]  ;;  %v2677_v59 = vld [vmem:[#allocation3 + $0x19] sm:$0xff] }
 0x396   : > { %v11725_v12 = vpop.permute.xlu2 %8723  ;;  %v11727_v23 = vpop.permute.xlu1 %8718  ;;  %4261 = vmatpush.bf16.msrb.mxu1 %v8189_v52  ;;  %v8670_v52 = vunpack.i.l.bf16 %v11721_v43 }
 0x39a   : > { %v11733_v3 = vpop.f32.mrf.mxu1 }
 0x39c   : > { %8908 = vrot.lane.b32.xlu2 %v8907_v37, %s9524_s23  ;;  %8883 = vrot.lane.b32.xlu1 %v11598_v26, %s9523_s30  ;;  %v2740_v26 = vld [vmem:[#allocation3 + $0x18a] sm:$0xff] }
 0x39d   : > { %8913 = vrot.lane.b32.xlu0 %v8912_v60, %s9523_s30  ;;  %3956 = vmatmul.bf16.gmra.mxu1 %v3528_v25  ;;  %v8922_v9 = vpack.i.bf16 %v2740_v26, %v2739_v0  ;;  %v2803_v37 = vld [vmem:[#allocation3 + $0x189] sm:$0xff] }
 0x39e   : > { %v11747_v50 = vpop.permute.xlu2 %8738  ;;  %v11749_v19 = vpop.permute.xlu1 %8733  ;;  %v8927_v6 = vpack.i.bf16 %v2803_v37, %v2802_v29 }
 0x3a2   : > { %v11761_v57 = vpop.f32.mrf.mxu1 }
 0x3a4   : > { %8918 = vrot.lane.b32.xlu2 %v8917_v7, %s9523_s30  ;;  %8888 = vrot.lane.b32.xlu1 %v8887_v1, %s9523_s30  ;;  %v2678_v7 = vld [vmem:[#allocation3 + $0x21] sm:$0xff] }
 0x3a5   : > { %8923 = vrot.lane.b32.xlu0 %v8922_v9, %s9523_s30  ;;  %4010 = vmatmul.bf16.gmra.mxu2 %v3494_v34 }
 0x3a6   : > { %v11768_v51 = vpop.permute.xlu2 %8753  ;;  %v11770_v24 = vpop.permute.xlu1 %8748 }
 0x3a7   : > { %v8709_v10 = vpop.permute.xlu0 %8708 }
 0x3a8   : > { %v8711_v58 = vunpack.i.h.bf16 %v8709_v10  ;;  %v8710_v38 = vunpack.i.l.bf16 %v8709_v10 }
 0x3aa   : > { %v11772_v17 = vpop.f32.mrf.mxu1  ;;  %v3372_v60 = vsel %vm593_vm6, %v11573_v28, %v8710_v38  ;;  %v3373_v25 = vsel %vm593_vm6, %v11568_v49, %v8711_v58  ;;  %v3390_v28 = vsel %vm593_vm6, %v11505_v48, %v8670_v52  ;;  %v3391_v49 = vsel %vm593_vm6, %v11507_v13, %v8671_v4 }
 0x3ab   : > { %v3533_v40 = vpack.c.bf16 %v3373_v25, %v3372_v60  ;;  %v3499_v10 = vpack.c.bf16 %v3391_v49, %v3390_v28  ;;  %v8676_v4 = vunpack.i.h.bf16 %v11666_v35  ;;  %v8675_v52 = vunpack.i.l.bf16 %v11666_v35 }
 0x3ad   : > { %8928 = vrot.lane.b32.xlu0 %v8927_v6, %s9523_s30  ;;  %3961 = vmatmul.bf16.gmra.mxu1 %v3533_v40  ;;  %v8181_v40 = vld [vmem:[%s14504_s3 + $0xc0] sm:$0xff] }
 0x3ae   : > { %v11781_v8 = vpop.permute.xlu1 %8768  ;;  %v8784_v26 = vpop.permute.xlu2 %8783  ;;  %4172 = vmatpush.bf16.msra.mxu0 %v8181_v40 }
 0x3af   : > { %v8714_v0 = vpop.permute.xlu0 %8713 }
 0x3b0   : > { %v8716_v44 = vunpack.i.h.bf16 %v8714_v0  ;;  %v8715_v14 = vunpack.i.l.bf16 %v8714_v0  ;;  %v8721_v0 = vunpack.i.h.bf16 %v11727_v23 }
 0x3b2   : > { %v3415_v1 = vsel %vm593_vm6, %v2678_v7, %v8716_v44  ;;  %v3414_v43 = vsel %vm593_vm6, %v2677_v59, %v8715_v14  ;;  %v11789_v9 = vpop.f32.mrf.mxu1  ;;  %v11810_v44 = vld [vmem:[#allocation3 + $0x7a] sm:$0xff]  ;;  %v11812_v14 = vld [vmem:[#allocation3 + $0x82] sm:$0xff] }
 0x3b3   : > { %v3480_v34 = vpack.c.bf16 %v3415_v1, %v3414_v43  ;;  %v3392_v28 = vsel %vm593_vm6, %v11810_v44, %v8675_v52  ;;  %v3393_v49 = vsel %vm593_vm6, %v11812_v14, %v8676_v4  ;;  %v8786_v43 = vunpack.i.h.bf16 %v8784_v26 }
 0x3b4   : > { %v3504_v7 = vpack.c.bf16 %v3393_v49, %v3392_v28 }
 0x3b5   : > { %4015 = vmatmul.bf16.gmra.mxu2 %v3499_v10  ;;  %4084 = vmatmul.bf16.vlgmr.msra.gmra.mxu3 %v3480_v34  ;;  %v8785_v34 = vunpack.i.l.bf16 %v8784_v26  ;;  %v8726_v26 = vunpack.i.h.bf16 %v11725_v12 }
 0x3b6   : > { %v8774_v58 = vpop.permute.xlu1 %8773  ;;  %v11797_v60 = vpop.permute.xlu2 %8788 }
 0x3b7   : > { %v8776_v38 = vunpack.i.h.bf16 %v8774_v58  ;;  %v8775_v37 = vunpack.i.l.bf16 %v8774_v58  ;;  %v11791_v29 = vpop.permute.xlu0 %8728 }
 0x3b9   : > { %v3374_v48 = vsel %vm593_vm6, %v11531_v33, %v8775_v37  ;;  %v3375_v13 = vsel %vm593_vm6, %v11525_v45, %v8776_v38  ;;  %v8720_v33 = vunpack.i.l.bf16 %v11727_v23  ;;  %v3417_v23 = vsel %vm593_vm6, %v11643_v31, %v8721_v0 }
 0x3ba   : > { %v11799_v25 = vpop.f32.mrf.mxu1  ;;  %v3538_v6 = vpack.c.bf16 %v3375_v13, %v3374_v48  ;;  %v3376_v38 = vsel %vm593_vm6, %v11593_v30, %v8785_v34  ;;  %v8691_v48 = vunpack.i.h.bf16 %v11686_v20  ;;  %v8690_v13 = vunpack.i.l.bf16 %v11686_v20 }
 0x3bb   : > { %v3416_v35 = vsel %vm593_vm6, %v11647_v55, %v8720_v33  ;;  %v3377_v55 = vsel %vm593_vm6, %v11591_v63, %v8786_v43  ;;  %v3419_v20 = vsel %vm593_vm6, %v11606_v62, %v8726_v26  ;;  %v11866_v43 = vld [vmem:[%s14505_s4] ss:$0 sm:$0xff]  ;;  %v8696_v34 = vunpack.i.h.bf16 %v11751_v5 }
 0x3bc   : > { %v3485_v1 = vpack.c.bf16 %v3417_v23, %v3416_v35  ;;  %v3543_v31 = vpack.c.bf16 %v3377_v55, %v3376_v38  ;;  %v3394_v30 = vsel %vm593_vm6, %v11501_v27, %v8690_v13  ;;  %v3395_v63 = vsel %vm593_vm6, %v11503_v41, %v8691_v48 }
 0x3bd   : > { %3966 = vmatmul.bf16.gmra.mxu1 %v3538_v6  ;;  %v8725_v6 = vunpack.i.l.bf16 %v11725_v12  ;;  %v3509_v12 = vpack.c.bf16 %v3395_v63, %v3394_v30  ;;  %v8731_v38 = vunpack.i.h.bf16 %v11791_v29  ;;  %v8730_v55 = vunpack.i.l.bf16 %v11791_v29 }
 0x3be   : > { %v11824_v10 = vpop.permute.xlu2 %8793  ;;  %v11852_v28 = vpop.permute.xlu1 %8778 }
 0x3bf   : > { %v11808_v45 = vpop.permute.xlu0 %8743  ;;  %v3418_v52 = vsel %vm593_vm6, %v11608_v53, %v8725_v6  ;;  %v3420_v29 = vsel %vm593_vm6, %v11656_v46, %v8730_v55  ;;  %v3421_v6 = vsel %vm593_vm6, %v11645_v15, %v8731_v38  ;;  %v11909_v55 = vld [vmem:[#allocation3 + $0xca] sm:$0xff] }
 0x3c0   : > { %v3490_v33 = vpack.c.bf16 %v3419_v20, %v3418_v52  ;;  %v3495_v52 = vpack.c.bf16 %v3421_v6, %v3420_v29 }
 0x3c2   : > { %v11822_v59 = vpop.f32.mrf.mxu1 }
 0x3c5   : > { %4020 = vmatmul.bf16.gmra.mxu2 %v3504_v7  ;;  %4089 = vmatmul.bf16.gmra.mxu3 %v3485_v1  ;;  %v8695_v7 = vunpack.i.l.bf16 %v11751_v5  ;;  %v3397_v5 = vsel %vm593_vm6, %v11529_v36, %v8696_v34 }
 0x3c6   : > { %v11838_v40 = vpop.permute.xlu2 %8828 }
 0x3c7   : > { %v11826_v58 = vpop.permute.xlu0 %8758  ;;  %v3396_v13 = vsel %vm593_vm6, %v11527_v47, %v8695_v7 }
 0x3c8   : > { %v3514_v63 = vpack.c.bf16 %v3397_v5, %v3396_v13 }
 0x3ca   : > { %v11832_v37 = vpop.f32.mrf.mxu1 }
 0x3cd   : > { %3971 = vmatmul.bf16.gmra.mxu1 %v3543_v31 }
 0x3ce   : > { %v11854_v35 = vpop.permute.xlu2 %8843 }
 0x3cf   : > { %v11840_v4 = vpop.permute.xlu0 %8763 }
 0x3d2   : > { %v11850_v0 = vpop.f32.mrf.mxu1 }
 0x3d5   : > { %4025 = vmatmul.bf16.gmra.mxu2 %v3509_v12  ;;  %4094 = vmatmul.bf16.gmra.mxu3 %v3490_v33 }
 0x3d6   : > { %v11873_v31 = vpop.permute.xlu1 %8813 }
 0x3d7   : > { %v8799_v49 = vpop.permute.xlu0 %8798 }
 0x3d8   : > { %v8801_v27 = vunpack.i.h.bf16 %v8799_v49  ;;  %v8800_v23 = vunpack.i.l.bf16 %v8799_v49 }
 0x3da   : > { %v11856_v41 = vpop.f32.mrf.mxu1  ;;  %v3378_v53 = vsel %vm593_vm6, %v11628_v18, %v8800_v23  ;;  %v3379_v62 = vsel %vm593_vm6, %v11620_v42, %v8801_v27  ;;  %v3908_v18 = vadd.f32 %v11866_v43, %v11632_v32  ;;  %v11887_v32 = vpop.permute.xlu2 %8858  ;;  %v8701_v27 = vunpack.i.h.bf16 %v11706_v16 }
 0x3db   : > { %14554 = vst [vmem:[#allocation16_spill] sm:$0xff] %v11856_v41  ;;  %v3548_v1 = vpack.c.bf16 %v3379_v62, %v3378_v53  ;;  %v8700_v23 = vunpack.i.l.bf16 %v11706_v16  ;;  %v8736_v53 = vunpack.i.h.bf16 %v11749_v19  ;;  %v8735_v62 = vunpack.i.l.bf16 %v11749_v19 }
 0x3dc   : > { %v3399_v19 = vsel %vm593_vm6, %v11909_v55, %v8701_v27  ;;  %v8830_v27 = vunpack.i.l.bf16 %v11838_v40 }
 0x3dd   : > { %3976 = vmatmul.bf16.gmra.mxu1 %v3548_v1  ;;  %v3422_v13 = vsel %vm593_vm6, %v11673_v61, %v8735_v62  ;;  %v3423_v5 = vsel %vm593_vm6, %v11671_v21, %v8736_v53  ;;  %v2806_v61 = vld [vmem:[#allocation3 + $0x32] sm:$0xff]  ;;  %v8831_v21 = vunpack.i.h.bf16 %v11838_v40  ;;  %v8706_v53 = vunpack.i.h.bf16 %v11704_v54 }
 0x3de   : > { %v8705_v62 = vunpack.i.l.bf16 %v11704_v54  ;;  %v2688_v40 = vld [vmem:[#allocation3 + $0x99] sm:$0xff] }
 0x3df   : > { %v11875_v42 = vpop.permute.xlu0 %8803  ;;  %v3996_v48 = vpop.f32.mrf.mxu2 }
 0x3e0   : > { %v11879_v26 = vadd.f32 %v3996_v48, %v3908_v18  ;;  %v2742_v18 = vld [vmem:[#allocation3 + $0x30] sm:$0xff]  ;;  %v2743_v48 = vld [vmem:[#allocation3 + $0x38] sm:$0xff] }
 0x3e2   : > { %v11889_v30 = vpop.f32.mrf.mxu1  ;;  %v11903_v7 = vpop.permute.xlu2 %8873 }
 0x3e3   : > { %14555 = vst [vmem:[#allocation10_spill] sm:$0xff] %v11889_v30 }
 0x3e5   : > { %4030 = vmatmul.bf16.gmra.mxu2 %v3514_v63  ;;  %4099 = vmatmul.bf16.gmra.mxu3 %v3495_v52 }
 0x3e6   : > { %v8819_v47 = vpop.permute.xlu1 %8818 }
 0x3e7   : > { %v8821_v20 = vunpack.i.h.bf16 %v8819_v47  ;;  %v8820_v12 = vunpack.i.l.bf16 %v8819_v47  ;;  %v11891_v33 = vpop.permute.xlu0 %8808 }
 0x3e9   : > { %v3380_v36 = vsel %vm593_vm6, %v11759_v22, %v8820_v12  ;;  %v3381_v46 = vsel %vm593_vm6, %v11753_v2, %v8821_v20  ;;  %v11907_v2 = vld [vmem:[#allocation3 + $0xc2] sm:$0xff]  ;;  %v3500_v20 = vpack.c.bf16 %v3423_v5, %v3422_v13 }
 0x3ea   : > { %v11897_v15 = vpop.f32.mrf.mxu1  ;;  %v3553_v49 = vpack.c.bf16 %v3381_v46, %v3380_v36  ;;  %v3398_v16 = vsel %vm593_vm6, %v11907_v2, %v8700_v23  ;;  %v11923_v12 = vpop.permute.xlu2 %8898  ;;  %v2807_v46 = vld [vmem:[#allocation3 + $0x3a] sm:$0xff]  ;;  %v11940_v13 = vld [vmem:[#allocation3 + $0xe2] sm:$0xff] }
 0x3eb   : > { %14556 = vst [vmem:[#allocation11_spill] sm:$0xff] %v11897_v15  ;;  %v3519_v47 = vpack.c.bf16 %v3399_v19, %v3398_v16  ;;  %v3482_v23 = vpack.c.bf16 %v2807_v46, %v2806_v61  ;;  %v11938_v19 = vld [vmem:[#allocation3 + $0xda] sm:$0xff]  ;;  %v8200_v61 = vld [vmem:[%s14506_s5 + $0x38] sm:$0xff] }
 0x3ec   : > { %5967 = vmatpush.bf16.msrb.mxu2 %v8200_v61 }
 0x3ed   : > { %3981 = vmatmul.bf16.gmra.mxu1 %v3553_v49 }
 0x3ee   : > { %v8824_v1 = vpop.permute.xlu1 %8823 }
 0x3ef   : > { %v8826_v34 = vunpack.i.h.bf16 %v8824_v1  ;;  %v8825_v22 = vunpack.i.l.bf16 %v8824_v1  ;;  %v11905_v38 = vpop.permute.xlu0 %8833  ;;  %v8741_v1 = vunpack.i.h.bf16 %v11747_v50 }
 0x3f1   : > { %v3447_v29 = vsel %vm593_vm6, %v2743_v48, %v8826_v34  ;;  %v3446_v6 = vsel %vm593_vm6, %v2742_v18, %v8825_v22  ;;  %v8740_v34 = vunpack.i.l.bf16 %v11747_v50  ;;  %v2687_v22 = vld [vmem:[#allocation3 + $0x91] sm:$0xff]  ;;  %v2744_v18 = vld [vmem:[#allocation3 + $0x48] sm:$0xff]  ;;  %v3400_v50 = vsel %vm593_vm6, %v11938_v19, %v8705_v62 }
 0x3f2   : > { %v3481_v63 = vpack.c.bf16 %v3447_v29, %v3446_v6  ;;  %v11921_v52 = vpop.f32.mrf.mxu1  ;;  %v2745_v48 = vld [vmem:[#allocation3 + $0x50] sm:$0xff]  ;;  %v3448_v5 = vsel %vm593_vm6, %v2744_v18, %v8830_v27  ;;  %v11944_v29 = vpop.f32.mrf.mxu2  ;;  %v8208_v62 = vld [vmem:[%s14506_s5 + $0x78] sm:$0xff] }
 0x3f3   : > { %14557 = vst [vmem:[#allocation12_spill] sm:$0xff] %v11921_v52  ;;  %v3449_v54 = vsel %vm593_vm6, %v2745_v48, %v8831_v21  ;;  %v11946_v6 = vpop.permute.xlu2 %8903  ;;  %6056 = vmatpush.bf16.msrb.mxu3 %v8208_v62  ;;  %v4473_v62 = vld [vmem:[#allocation4] sm:$0xff]  ;;  %v11986_v52 = vld [vmem:[#allocation3 + $0xfa] sm:$0xff] }
 0x3f4   : > { %4173 = vmatmul.bf16.vlgmr.msra.gmra.mxu0 %v3481_v63  ;;  %v3401_v63 = vsel %vm593_vm6, %v11940_v13, %v8706_v53  ;;  %v3486_v21 = vpack.c.bf16 %v3449_v54, %v3448_v5  ;;  %v3913_v53 = vadd.f32 %v11866_v43, %v11688_v56  ;;  %v8745_v5 = vunpack.i.l.bf16 %v11808_v45 }
 0x3f5   : > { %4035 = vmatmul.bf16.gmra.mxu2 %v3519_v47  ;;  %4104 = vmatmul.bf16.gmra.mxu3 %v3500_v20  ;;  %v3424_v47 = vsel %vm593_vm6, %v2687_v22, %v8740_v34  ;;  %v3425_v20 = vsel %vm593_vm6, %v2688_v40, %v8741_v1  ;;  %v3524_v27 = vpack.c.bf16 %v3401_v63, %v3400_v50  ;;  %v2808_v34 = vld [vmem:[#allocation3 + $0x4a] sm:$0xff]  ;;  %v2809_v22 = vld [vmem:[#allocation3 + $0x52] sm:$0xff]  ;;  %v8746_v40 = vunpack.i.h.bf16 %v11808_v45 }
 0x3f6   : > { %v3487_v63 = vpack.c.bf16 %v2809_v22, %v2808_v34  ;;  %v4474_v45 = vld [vmem:[#allocation4 + $0x8] sm:$0xff] }
 0x3f7   : > { %v11925_v36 = vpop.permute.xlu0 %8848  ;;  %v2690_v34 = vld [vmem:[#allocation3 + $0xb1] sm:$0xff] }
 0x3f8   : > { %v3427_v22 = vsel %vm593_vm6, %v2690_v34, %v8746_v40 }
 0x3fa   : > { %v11927_v49 = vpop.f32.mrf.mxu1 }
 0x3fb   : > { %14558 = vst [vmem:[#allocation13_spill] sm:$0xff] %v11927_v49  ;;  %v8909_v54 = vpop.permute.xlu2 %8908 }
 0x3fc   : > { %v8911_v56 = vunpack.i.h.bf16 %v8909_v54  ;;  %v8910_v61 = vunpack.i.l.bf16 %v8909_v54  ;;  %v2747_v54 = vld [vmem:[#allocation3 + $0x68] sm:$0xff] }
 0x3fd   : > { %8003 = vmatmul.msk.bf16.vlgmr.msrb.gmra.mxu1 %vm593_vm6, %v3482_v23  ;;  %v3505_v23 = vpack.c.bf16 %v3425_v20, %v3424_v47  ;;  %v8836_v47 = vunpack.i.h.bf16 %v11905_v38  ;;  %v8835_v20 = vunpack.i.l.bf16 %v11905_v38 }
 0x3ff   : > { %v11936_v16 = vpop.permute.xlu0 %8863 }
 0x402   : > { %v11957_v46 = vpop.f32.mrf.mxu1 }
 0x403   : > { %14559 = vst [vmem:[#allocation14_spill] sm:$0xff] %v11957_v46  ;;  %v5530_v46 = vsel %vm4440_vm9, %v4473_v62, %v8910_v61 }
 0x404   : > { %4178 = vmatmul.bf16.gmra.mxu0 %v3486_v21  ;;  %v8210_v21 = vld [vmem:[%s14506_s5 + $0x88] sm:$0xff] }
 0x405   : > { %4040 = vmatmul.bf16.gmra.mxu2 %v3524_v27  ;;  %4109 = vmatmul.bf16.gmra.mxu3 %v3505_v23  ;;  %v8766_v27 = vunpack.i.h.bf16 %v11840_v4  ;;  %v8765_v23 = vunpack.i.l.bf16 %v11840_v4  ;;  %v11984_v4 = vld [vmem:[#allocation3 + $0xf2] sm:$0xff] }
 0x406   : > { %6151 = vmatpush.bf16.msrb.mxu0 %v8210_v21  ;;  %v3451_v21 = vsel %vm593_vm6, %v2747_v54, %v8836_v47 }
 0x407   : > { %v11964_v1 = vpop.permute.xlu0 %8878  ;;  %v3402_v40 = vsel %vm593_vm6, %v11984_v4, %v8765_v23  ;;  %v8839_v23 = vpop.permute.xlu1 %8838 }
 0x408   : > { %v4001_v18 = vpop.f32.mrf.mxu2 }
 0x409   : > { %v11966_v48 = vadd.f32 %v4001_v18, %v3913_v53  ;;  %v2689_v53 = vld [vmem:[#allocation3 + $0xa9] sm:$0xff]  ;;  %v2746_v18 = vld [vmem:[#allocation3 + $0x60] sm:$0xff] }
 0x40a   : > { %v11970_v50 = vpop.f32.mrf.mxu1  ;;  %v3426_v38 = vsel %vm593_vm6, %v2689_v53, %v8745_v5 }
 0x40b   : > { %14560 = vst [vmem:[#allocation15_spill] sm:$0xff] %v11970_v50  ;;  %v5531_v50 = vsel %vm4440_vm9, %v4474_v45, %v8911_v56  ;;  %v3403_v56 = vsel %vm593_vm6, %v11986_v52, %v8766_v27  ;;  %v3510_v53 = vpack.c.bf16 %v3427_v22, %v3426_v38  ;;  %v2810_v27 = vld [vmem:[#allocation3 + $0x62] sm:$0xff]  ;;  %v8750_v38 = vunpack.i.l.bf16 %v11770_v24 }
 0x40c   : > { %v3529_v47 = vpack.c.bf16 %v3403_v56, %v3402_v40  ;;  %v8781_v22 = vunpack.i.h.bf16 %v11852_v28  ;;  %v2748_v40 = vld [vmem:[#allocation3 + $0x78] sm:$0xff]  ;;  %v2749_v56 = vld [vmem:[#allocation3 + $0x80] sm:$0xff] }
 0x40d   : > { %8004 = vmatmul.msk.bf16.gmra.mxu1 %vm593_vm6, %v3487_v63  ;;  %v3450_v63 = vsel %vm593_vm6, %v2746_v18, %v8835_v20  ;;  %v2811_v18 = vld [vmem:[#allocation3 + $0x6a] sm:$0xff] }
 0x40e   : > { %v3491_v20 = vpack.c.bf16 %v3451_v21, %v3450_v63  ;;  %v3492_v54 = vpack.c.bf16 %v2811_v18, %v2810_v27  ;;  %v8751_v63 = vunpack.i.h.bf16 %v11770_v24  ;;  %v8780_v21 = vunpack.i.l.bf16 %v11852_v28 }
 0x40f   : > { %v8914_v49 = vpop.permute.xlu0 %8913 }
 0x410   : > { %v8916_v15 = vunpack.i.h.bf16 %v8914_v49  ;;  %v8915_v30 = vunpack.i.l.bf16 %v8914_v49  ;;  %v11990_v5 = vpop.f32.mrf.mxu2  ;;  %v3918_v49 = vadd.f32 %v11866_v43, %v11733_v3  ;;  %v2691_v3 = vld [vmem:[#allocation3 + $0xc1] sm:$0xff] }
 0x411   : > { %v3428_v18 = vsel %vm593_vm6, %v2691_v3, %v8750_v38 }
 0x412   : > { %v11997_v61 = vsel %vm593_vm6, %v5531_v50, %v8916_v15  ;;  %v12000_v62 = vsel %vm593_vm6, %v5530_v46, %v8915_v30  ;;  %v12002_v45 = vpop.f32.mrf.mxu1  ;;  %v8841_v30 = vunpack.i.h.bf16 %v8839_v23  ;;  %v8840_v46 = vunpack.i.l.bf16 %v8839_v23 }
 0x413   : > { %14561 = vst [vmem:[#allocation18_spill] sm:$0xff] %v11997_v61 }
 0x414   : > { %14562 = vst [vmem:[#allocation20_spill] sm:$0xff] %v12000_v62  ;;  %4183 = vmatmul.bf16.gmra.mxu0 %v3491_v20  ;;  %v3920_v20 = vadd.f32 %v11866_v43, %v11761_v57  ;;  %v3452_v23 = vsel %vm593_vm6, %v2748_v40, %v8840_v46  ;;  %v3453_v24 = vsel %vm593_vm6, %v2749_v56, %v8841_v30  ;;  %v12123_v62 = vld [vmem:[#allocation3 + $0x15a] sm:$0xff] }
 0x415   : > { %14563 = vst [vmem:[#allocation17_spill] sm:$0xff] %v12002_v45  ;;  %4045 = vmatmul.bf16.gmra.mxu2 %v3529_v47  ;;  %4114 = vmatmul.bf16.gmra.mxu3 %v3510_v53  ;;  %v12017_v47 = vld [vmem:[#allocation3 + $0x10a] sm:$0xff]  ;;  %v12019_v53 = vld [vmem:[#allocation3 + $0x112] sm:$0xff]  ;;  %v3496_v30 = vpack.c.bf16 %v3453_v24, %v3452_v23  ;;  %v3497_v23 = vpack.c.bf16 %v11812_v14, %v11810_v44  ;;  %v8756_v24 = vunpack.i.h.bf16 %v11768_v51  ;;  %v2694_v44 = vld [vmem:[#allocation3 + $0xe1] sm:$0xff] }
 0x416   : > { %v3404_v28 = vsel %vm593_vm6, %v12017_v47, %v8780_v21  ;;  %v3405_v27 = vsel %vm593_vm6, %v12019_v53, %v8781_v22  ;;  %v8207_v22 = vld [vmem:[%s14506_s5 + $0x70] sm:$0xff] }
 0x417   : > { %v3534_v40 = vpack.c.bf16 %v3405_v27, %v3404_v28  ;;  %6057 = vmatpush.bf16.msrb.mxu3 %v8207_v22  ;;  %v8795_v28 = vunpack.i.l.bf16 %v11824_v10  ;;  %v2693_v27 = vld [vmem:[#allocation3 + $0xd9] sm:$0xff] }
 0x418   : > { %v4006_v34 = vpop.f32.mrf.mxu2 }
 0x419   : > { %v12006_v15 = vadd.f32 %v4006_v34, %v3918_v49  ;;  %v2692_v49 = vld [vmem:[#allocation3 + $0xc9] sm:$0xff] }
 0x41a   : > { %v12008_v50 = vpop.f32.mrf.mxu1  ;;  %v3429_v57 = vsel %vm593_vm6, %v2692_v49, %v8751_v63  ;;  %v3923_v63 = vadd.f32 %v11866_v43, %v11772_v17  ;;  %v12047_v49 = vpop.permute.xlu1 %8853  ;;  %v8796_v17 = vunpack.i.h.bf16 %v11824_v10 }
 0x41b   : > { %14564 = vst [vmem:[#allocation19_spill] sm:$0xff] %v12008_v50  ;;  %v8199_v50 = vld [vmem:[%s14506_s5 + $0x30] sm:$0xff]  ;;  %v3515_v56 = vpack.c.bf16 %v3429_v57, %v3428_v18  ;;  %v2750_v18 = vld [vmem:[#allocation3 + $0x90] sm:$0xff]  ;;  %v2751_v57 = vld [vmem:[#allocation3 + $0x98] sm:$0xff] }
 0x41c   : > { %5968 = vmatpush.bf16.msrb.mxu2 %v8199_v50  ;;  %v8845_v50 = vunpack.i.l.bf16 %v11854_v35 }
 0x41d   : > { %8005 = vmatmul.msk.bf16.gmra.mxu1 %vm593_vm6, %v3492_v54 }
 0x41e   : > { %v3454_v14 = vsel %vm593_vm6, %v2750_v18, %v8845_v50  ;;  %v2814_v18 = vld [vmem:[#allocation3 + $0x92] sm:$0xff] }
 0x420   : > { %v4008_v34 = vpop.f32.mrf.mxu2 }
 0x421   : > { %v12029_v54 = vadd.f32 %v4008_v34, %v3920_v20  ;;  %v8846_v20 = vunpack.i.h.bf16 %v11854_v35  ;;  %v8755_v34 = vunpack.i.l.bf16 %v11768_v51  ;;  %v3925_v35 = vadd.f32 %v11866_v43, %v11789_v9 }
 0x422   : > { %v12034_v46 = vpop.f32.mrf.mxu1  ;;  %v3431_v9 = vsel %vm593_vm6, %v2694_v44, %v8756_v24  ;;  %v8851_v24 = vunpack.i.h.bf16 %v11925_v36  ;;  %v8760_v44 = vunpack.i.l.bf16 %v11826_v58 }
 0x423   : > { %14565 = vst [vmem:[#allocation21_spill] sm:$0xff] %v12034_v46  ;;  %v3455_v51 = vsel %vm593_vm6, %v2751_v57, %v8846_v20  ;;  %v12074_v20 = vpop.permute.xlu1 %8868 }
 0x424   : > { %4188 = vmatmul.bf16.gmra.mxu0 %v3496_v30  ;;  %v12058_v30 = vld [vmem:[#allocation3 + $0x122] sm:$0xff] }
 0x425   : > { %4050 = vmatmul.bf16.gmra.mxu2 %v3534_v40  ;;  %4119 = vmatmul.bf16.gmra.mxu3 %v3515_v56  ;;  %v12060_v40 = vld [vmem:[#allocation3 + $0x12a] sm:$0xff]  ;;  %v3406_v10 = vsel %vm593_vm6, %v12058_v30, %v8795_v28 }
 0x426   : > { %v3407_v22 = vsel %vm593_vm6, %v12060_v40, %v8796_v17  ;;  %v2815_v17 = vld [vmem:[#allocation3 + $0x9a] sm:$0xff] }
 0x427   : > { %v3539_v46 = vpack.c.bf16 %v3407_v22, %v3406_v10  ;;  %v12089_v22 = vld [vmem:[#allocation3 + $0x13a] sm:$0xff] }
 0x428   : > { %v4011_v38 = vpop.f32.mrf.mxu2 }
 0x429   : > { %v12041_v21 = vadd.f32 %v4011_v38, %v3923_v63  ;;  %v3430_v63 = vsel %vm593_vm6, %v2693_v27, %v8755_v34  ;;  %v8850_v34 = vunpack.i.l.bf16 %v11925_v36  ;;  %v3502_v27 = vpack.c.bf16 %v2815_v17, %v2814_v18  ;;  %v2696_v36 = vld [vmem:[#allocation3 + $0xf9] sm:$0xff] }
 0x42a   : > { %v12043_v3 = vpop.f32.mrf.mxu1  ;;  %v3520_v50 = vpack.c.bf16 %v3431_v9, %v3430_v63  ;;  %v12091_v63 = vld [vmem:[#allocation3 + $0x142] sm:$0xff] }
 0x42b   : > { %14566 = vst [vmem:[#allocation22_spill] sm:$0xff] %v12043_v3  ;;  %v3501_v3 = vpack.c.bf16 %v3455_v51, %v3454_v14  ;;  %v2695_v14 = vld [vmem:[#allocation3 + $0xf1] sm:$0xff]  ;;  %v2752_v51 = vld [vmem:[#allocation3 + $0xa8] sm:$0xff]  ;;  %v12087_v10 = vpop.permute.xlu1 %8883 }
 0x42c   : > { %v3456_v9 = vsel %vm593_vm6, %v2752_v51, %v8850_v34  ;;  %v3432_v17 = vsel %vm593_vm6, %v2695_v14, %v8760_v44 }
 0x42d   : > { %8006 = vmatmul.msk.bf16.gmra.mxu1 %vm593_vm6, %v3497_v23 }
 0x430   : > { %v4013_v56 = vpop.f32.mrf.mxu2 }
 0x431   : > { %v12070_v38 = vadd.f32 %v4013_v56, %v3925_v35  ;;  %v8761_v35 = vunpack.i.h.bf16 %v11826_v58  ;;  %v2753_v56 = vld [vmem:[#allocation3 + $0xb0] sm:$0xff] }
 0x432   : > { %v12072_v23 = vpop.f32.mrf.mxu1  ;;  %v3457_v58 = vsel %vm593_vm6, %v2753_v56, %v8851_v24 }
 0x433   : > { %14567 = vst [vmem:[#allocation23_spill] sm:$0xff] %v12072_v23  ;;  %v3506_v34 = vpack.c.bf16 %v3457_v58, %v3456_v9  ;;  %v8889_v14 = vpop.permute.xlu1 %8888  ;;  %v8856_v9 = vunpack.i.h.bf16 %v12047_v49 }
 0x434   : > { %4193 = vmatmul.bf16.gmra.mxu0 %v3501_v3  ;;  %v8811_v3 = vunpack.i.h.bf16 %v11891_v33 }
 0x435   : > { %4055 = vmatmul.bf16.gmra.mxu2 %v3539_v46  ;;  %4124 = vmatmul.bf16.gmra.mxu3 %v3520_v50  ;;  %v8810_v46 = vunpack.i.l.bf16 %v11891_v33 }
 0x436   : > { %v3409_v18 = vsel %vm593_vm6, %v12091_v63, %v8811_v3  ;;  %v2817_v3 = vld [vmem:[#allocation3 + $0xb2] sm:$0xff] }
 0x437   : > { %v3408_v33 = vsel %vm593_vm6, %v12089_v22, %v8810_v46  ;;  %v8206_v46 = vld [vmem:[%s14506_s5 + $0x68] sm:$0xff] }
 0x438   : > { %v12076_v28 = vpop.f32.mrf.mxu3  ;;  %v3544_v24 = vpack.c.bf16 %v3409_v18, %v3408_v33  ;;  %6058 = vmatpush.bf16.msrb.mxu3 %v8206_v46  ;;  %v2804_v33 = vld [vmem:[#allocation3 + $0x199] sm:$0xff]  ;;  %v2805_v18 = vld [vmem:[#allocation3 + $0x1a1] sm:$0xff] }
 0x439   : > { %v2754_v46 = vld [vmem:[#allocation3 + $0xc0] sm:$0xff] }
 0x43a   : > { %v12078_v57 = vpop.f32.mrf.mxu1 }
 0x43b   : > { %14568 = vst [vmem:[#allocation24_spill] sm:$0xff] %v12078_v57  ;;  %v8198_v57 = vld [vmem:[%s14506_s5 + $0x28] sm:$0xff] }
 0x43c   : > { %5969 = vmatpush.bf16.msrb.mxu2 %v8198_v57  ;;  %v8855_v57 = vunpack.i.l.bf16 %v12047_v49  ;;  %v2698_v49 = vld [vmem:[#allocation3 + $0x111] sm:$0xff] }
 0x43d   : > { %8007 = vmatmul.msk.bf16.gmra.mxu1 %vm593_vm6, %v3502_v27  ;;  %v3433_v27 = vsel %vm593_vm6, %v2696_v36, %v8761_v35  ;;  %v2816_v35 = vld [vmem:[#allocation3 + $0xaa] sm:$0xff]  ;;  %v8771_v36 = vunpack.i.h.bf16 %v11781_v8 }
 0x43e   : > { %v3525_v51 = vpack.c.bf16 %v3433_v27, %v3432_v17  ;;  %v3507_v58 = vpack.c.bf16 %v2817_v3, %v2816_v35  ;;  %v8770_v17 = vunpack.i.l.bf16 %v11781_v8  ;;  %v8891_v27 = vunpack.i.h.bf16 %v8889_v14 }
 0x43f   : > { %v3458_v35 = vsel %vm593_vm6, %v2754_v46, %v8855_v57 }
 0x440   : > { %v12095_v50 = vpop.f32.mrf.mxu3 }
 0x442   : > { %v12106_v23 = vpop.f32.mrf.mxu1 }
 0x443   : > { %14569 = vst [vmem:[#allocation25_spill] sm:$0xff] %v12106_v23  ;;  %v2755_v23 = vld [vmem:[#allocation3 + $0xc8] sm:$0xff] }
 0x444   : > { %4198 = vmatmul.bf16.gmra.mxu0 %v3506_v34  ;;  %v8890_v34 = vunpack.i.l.bf16 %v8889_v14  ;;  %v3459_v3 = vsel %vm593_vm6, %v2755_v23, %v8856_v9  ;;  %v8919_v9 = vpop.permute.xlu2 %8918 }
 0x445   : > { %4060 = vmatmul.bf16.gmra.mxu2 %v3544_v24  ;;  %4129 = vmatmul.bf16.gmra.mxu3 %v3525_v51  ;;  %v8892_v24 = vpack.i.bf16 %v2805_v18, %v2804_v33  ;;  %v2697_v51 = vld [vmem:[#allocation3 + $0x109] sm:$0xff]  ;;  %v3435_v18 = vsel %vm593_vm6, %v2698_v49, %v8771_v36  ;;  %v3511_v61 = vpack.c.bf16 %v3459_v3, %v3458_v35  ;;  %v8921_v46 = vunpack.i.h.bf16 %v8919_v9  ;;  %v2757_v49 = vld [vmem:[#allocation3 + $0xe0] sm:$0xff]  ;;  %v12150_v3 = vld [vmem:[#allocation3 + $0x172] sm:$0xff] }
 0x446   : > { %v3434_v33 = vsel %vm593_vm6, %v2697_v51, %v8770_v17  ;;  %v3512_v36 = vpack.c.bf16 %v11909_v55, %v11907_v2  ;;  %v8791_v17 = vunpack.i.h.bf16 %v11797_v60  ;;  %v8790_v51 = vunpack.i.l.bf16 %v11797_v60  ;;  %v12148_v35 = vld [vmem:[#allocation3 + $0x16a] sm:$0xff] }
 0x447   : > { %8893 = vrot.lane.b32.xlu1 %v8892_v24, %s9523_s30  ;;  %v3530_v41 = vpack.c.bf16 %v3435_v18, %v3434_v33  ;;  %v3413_v60 = vsel %vm593_vm6, %v12150_v3, %v8921_v46  ;;  %v8197_v18 = vld [vmem:[%s14506_s5 + $0x20] sm:$0xff]  ;;  %v8866_v46 = vunpack.i.h.bf16 %v11936_v16 }
 0x448   : > { %v12111_v44 = vpop.f32.mrf.mxu3  ;;  %5970 = vmatpush.bf16.msrb.mxu2 %v8197_v18 }
 0x44a   : > { %v12113_v56 = vpop.f32.mrf.mxu1 }
 0x44b   : > { %14570 = vst [vmem:[#allocation26_spill] sm:$0xff] %v12113_v56  ;;  %v12121_v56 = vld [vmem:[#allocation3 + $0x152] sm:$0xff] }
 0x44c   : > { %v3410_v14 = vsel %vm593_vm6, %v12121_v56, %v8890_v34  ;;  %v8861_v34 = vunpack.i.h.bf16 %v11887_v32 }
 0x44d   : > { %8008 = vmatmul.msk.bf16.gmra.mxu1 %vm593_vm6, %v3507_v58  ;;  %v3411_v58 = vsel %vm593_vm6, %v12123_v62, %v8891_v27  ;;  %v8860_v27 = vunpack.i.l.bf16 %v11887_v32 }
 0x44e   : > { %v3549_v45 = vpack.c.bf16 %v3411_v58, %v3410_v14  ;;  %v2700_v14 = vld [vmem:[#allocation3 + $0x129] sm:$0xff]  ;;  %v3461_v2 = vsel %vm593_vm6, %v2757_v49, %v8861_v34  ;;  %v8806_v49 = vunpack.i.h.bf16 %v11875_v42 }
 0x44f   : > { %v3437_v33 = vsel %vm593_vm6, %v2700_v14, %v8791_v17  ;;  %v8805_v14 = vunpack.i.l.bf16 %v11875_v42 }
 0x450   : > { %v12127_v8 = vpop.f32.mrf.mxu3 }
 0x452   : > { %v12135_v24 = vpop.f32.mrf.mxu1 }
 0x454   : > { %4203 = vmatmul.bf16.gmra.mxu0 %v3511_v61  ;;  %v8920_v61 = vunpack.i.l.bf16 %v8919_v9 }
 0x455   : > { %4065 = vmatmul.bf16.gmra.mxu2 %v3549_v45  ;;  %4134 = vmatmul.bf16.gmra.mxu3 %v3530_v41  ;;  %v2699_v41 = vld [vmem:[#allocation3 + $0x121] sm:$0xff]  ;;  %v2756_v45 = vld [vmem:[#allocation3 + $0xd8] sm:$0xff] }
 0x456   : > { %v3460_v32 = vsel %vm593_vm6, %v2756_v45, %v8860_v27  ;;  %v3412_v55 = vsel %vm593_vm6, %v12148_v35, %v8920_v61  ;;  %v3436_v58 = vsel %vm593_vm6, %v2699_v41, %v8790_v51  ;;  %v8205_v51 = vld [vmem:[%s14506_s5 + $0x60] sm:$0xff]  ;;  %v8865_v61 = vunpack.i.l.bf16 %v11936_v16 }
 0x457   : > { %v3516_v27 = vpack.c.bf16 %v3461_v2, %v3460_v32  ;;  %v3554_v34 = vpack.c.bf16 %v3413_v60, %v3412_v55  ;;  %v3535_v45 = vpack.c.bf16 %v3437_v33, %v3436_v58  ;;  %6059 = vmatpush.bf16.msrb.mxu3 %v8205_v51  ;;  %v3517_v41 = vpack.c.bf16 %v11940_v13, %v11938_v19  ;;  %v2758_v2 = vld [vmem:[#allocation3 + $0xf0] sm:$0xff]  ;;  %v2759_v55 = vld [vmem:[#allocation3 + $0xf8] sm:$0xff]  ;;  %v2702_v58 = vld [vmem:[#allocation3 + $0x141] sm:$0xff] }
 0x458   : > { %v12137_v23 = vpop.f32.mrf.mxu3  ;;  %v2701_v60 = vld [vmem:[#allocation3 + $0x139] sm:$0xff]  ;;  %v3462_v33 = vsel %vm593_vm6, %v2758_v2, %v8865_v61  ;;  %v3463_v18 = vsel %vm593_vm6, %v2759_v55, %v8866_v46  ;;  %v3439_v19 = vsel %vm593_vm6, %v2702_v58, %v8806_v49  ;;  %v4086_v51 = vadd.f32 %v12076_v28, %v11879_v26 }
 0x459   : > { %v3438_v16 = vsel %vm593_vm6, %v2701_v60, %v8805_v14  ;;  %v3521_v42 = vpack.c.bf16 %v3463_v18, %v3462_v33  ;;  %v3522_v46 = vpack.c.bf16 %v11986_v52, %v11984_v4  ;;  %v3910_v49 = vadd.f32 %v11866_v43, %v11668_v39  ;;  %v12201_v18 = vpop.f32.mrf.mxu2  ;;  %v2760_v52 = vld [vmem:[#allocation3 + $0x108] sm:$0xff]  ;;  %v2761_v4 = vld [vmem:[#allocation3 + $0x110] sm:$0xff] }
 0x45a   : > { %v12139_v57 = vpop.f32.mrf.mxu1  ;;  %v8871_v14 = vunpack.i.h.bf16 %v12074_v20  ;;  %v8870_v55 = vunpack.i.l.bf16 %v12074_v20  ;;  %v8816_v58 = vunpack.i.h.bf16 %v11873_v31  ;;  %v8815_v33 = vunpack.i.l.bf16 %v11873_v31  ;;  %v2704_v20 = vld [vmem:[#allocation3 + $0x159] sm:$0xff] }
 0x45b   : > { %v3999_v26 = vadd.f32 %v11944_v29, %v3910_v49 }
 0x45d   : > { %8009 = vmatmul.msk.bf16.gmra.mxu1 %vm593_vm6, %v3512_v36  ;;  %v4088_v39 = vadd.f32 %v12095_v50, %v3999_v26  ;;  %v8196_v50 = vld [vmem:[%s14506_s5 + $0x18] sm:$0xff] }
 0x45e   : > { %5971 = vmatpush.bf16.msrb.mxu2 %v8196_v50 }
 0x460   : > { %v12163_v9 = vpop.f32.mrf.mxu3 }
 0x462   : > { %v12165_v36 = vpop.f32.mrf.mxu1 }
 0x464   : > { %4208 = vmatmul.bf16.gmra.mxu0 %v3516_v27 }
 0x465   : > { %4070 = vmatmul.bf16.gmra.mxu2 %v3554_v34  ;;  %4139 = vmatmul.bf16.gmra.mxu3 %v3535_v45  ;;  %v3540_v34 = vpack.c.bf16 %v3439_v19, %v3438_v16  ;;  %v2703_v19 = vld [vmem:[#allocation3 + $0x151] sm:$0xff] }
 0x466   : > { %v3440_v29 = vsel %vm593_vm6, %v2703_v19, %v8815_v33 }
 0x468   : > { %v12178_v32 = vpop.f32.mrf.mxu3 }
 0x46a   : > { %v12170_v17 = vpop.f32.mrf.mxu1 }
 0x46d   : > { %8010 = vmatmul.msk.bf16.gmra.mxu1 %vm593_vm6, %v3517_v41 }
 0x470   : > { %v12187_v45 = vpop.f32.mrf.mxu3 }
 0x471   : > { %v4174_v13 = vpop.f32.mrf.mxu0 }
 0x472   : > { %v12185_v27 = vpop.f32.mrf.mxu1  ;;  %v4175_v41 = vadd.f32 %v4174_v13, %v4086_v51  ;;  %v3464_v13 = vsel %vm593_vm6, %v2760_v52, %v8870_v55 }
 0x474   : > { %4213 = vmatmul.bf16.gmra.mxu0 %v3521_v42  ;;  %v3465_v42 = vsel %vm593_vm6, %v2761_v4, %v8871_v14 }
 0x475   : > { %4144 = vmatmul.bf16.gmra.mxu3 %v3540_v34  ;;  %v3441_v34 = vsel %vm593_vm6, %v2704_v20, %v8816_v58  ;;  %v12216_v58 = vpop.f32.mrf.mxu2  ;;  %v8901_v20 = vunpack.i.h.bf16 %v11923_v12 }
 0x476   : > { %v3545_v55 = vpack.c.bf16 %v3441_v34, %v3440_v29 }
 0x478   : > { %v12206_v31 = vpop.f32.mrf.mxu3 }
 0x479   : > { %v4176_v61 = vpop.f32.mrf.mxu0 }
 0x47a   : > { %v4263_v2 = vpop.f32.mrf.mxu1  ;;  %v4177_v51 = vadd.f32 %v4176_v61, %v4088_v39  ;;  %v8204_v61 = vld [vmem:[%s14506_s5 + $0x58] sm:$0xff]  ;;  %v3527_v39 = vpack.c.bf16 %v12019_v53, %v12017_v47  ;;  %v2762_v47 = vld [vmem:[#allocation3 + $0x120] sm:$0xff] }
 0x47b   : > { %v4264_v60 = vadd.f32 %v4263_v2, %v4175_v41  ;;  %6060 = vmatpush.bf16.msrb.mxu3 %v8204_v61  ;;  %v2763_v53 = vld [vmem:[#allocation3 + $0x128] sm:$0xff] }
 0x47d   : > { %vm4343_vm10 = vcmp.ge.f32.partialorder %v4264_v60, 0.0  ;;  %v4375_v28 = vmul.f32 0.2, %v4264_v60  ;;  %8011 = vmatmul.msk.bf16.gmra.mxu1 %vm593_vm6, %v3522_v46  ;;  %v3526_v46 = vpack.c.bf16 %v3465_v42, %v3464_v13  ;;  %v8900_v13 = vunpack.i.l.bf16 %v11923_v12  ;;  %v12249_v61 = vpop.f32.mrf.mxu2 }
 0x47f   : > { %v4407_v16 = vsel %vm4343_vm10, %v4264_v60, %v4375_v28  ;;  %v4091_v60 = vadd.f32 %v12111_v44, %v11966_v48  ;;  %v3915_v48 = vadd.f32 %v11866_v43, %v11715_v11  ;;  %v8876_v44 = vunpack.i.h.bf16 %v11903_v7  ;;  %v2705_v11 = vld [vmem:[#allocation3 + $0x169] sm:$0xff]  ;;  %v2706_v43 = vld [vmem:[#allocation3 + $0x171] sm:$0xff] }
 0x480   : > { %4441 = vst.msk [vmem:[#allocation4 + $0x19] sm:$0xff] %vm4440_vm9, %v4407_v16  ;;  %v12222_v52 = vpop.f32.mrf.mxu3  ;;  %v8875_v16 = vunpack.i.l.bf16 %v11903_v7 }
 0x481   : > { %v4179_v41 = vpop.f32.mrf.mxu0  ;;  %v4004_v42 = vadd.f32 %v11990_v5, %v3915_v48  ;;  %v3467_v5 = vsel %vm593_vm6, %v2763_v53, %v8876_v44 }
 0x482   : > { %v4265_v2 = vpop.f32.mrf.mxu1  ;;  %v4180_v26 = vadd.f32 %v4179_v41, %v4091_v60  ;;  %v3466_v12 = vsel %vm593_vm6, %v2762_v47, %v8875_v16 }
 0x483   : > { %v4266_v49 = vadd.f32 %v4265_v2, %v4177_v51  ;;  %v4093_v51 = vadd.f32 %v12127_v8, %v4004_v42  ;;  %v8209_v8 = vld [vmem:[%s14506_s5 + $0x80] sm:$0xff]  ;;  %v8924_v42 = vpop.permute.xlu0 %8923 }
 0x484   : > { %4218 = vmatmul.bf16.gmra.mxu0 %v3526_v46 }
 0x485   : > { %vm4344_vm11 = vcmp.ge.f32.partialorder %v4266_v49, 0.0  ;;  %v4376_v14 = vmul.f32 0.2, %v4266_v49  ;;  %4149 = vmatmul.bf16.gmra.mxu3 %v3545_v55  ;;  %v3442_v55 = vsel %vm593_vm6, %v2705_v11, %v8900_v13  ;;  %6152 = vmatpush.bf16.msrb.mxu0 %v8209_v8  ;;  %v8880_v11 = vunpack.i.l.bf16 %v11964_v1  ;;  %v2708_v8 = vld [vmem:[#allocation3 + $0x189] sm:$0xff] }
 0x487   : > { %v4408_v33 = vsel %vm4344_vm11, %v4266_v49, %v4376_v14  ;;  %v12234_v34 = vld [vmem:[#allocation4 + $0x19] sm:$0xff]  ;;  %v3443_v14 = vsel %vm593_vm6, %v2706_v43, %v8901_v20 }
 0x488   : > { %4442 = vst.msk [vmem:[#allocation4 + $0x21] sm:$0xff] %vm4440_vm9, %v4408_v33  ;;  %v3550_v48 = vpack.c.bf16 %v3443_v14, %v3442_v55  ;;  %v12254_v44 = vpop.f32.mrf.mxu3  ;;  %v12260_v13 = vld [vmem:[#allocation4 + $0x18] sm:$0xff] }
 0x489   : > { %v4181_v28 = vpop.f32.mrf.mxu0  ;;  %v2707_v14 = vld [vmem:[#allocation3 + $0x181] sm:$0xff] }
 0x48a   : > { %v4268_v4 = vpop.f32.mrf.mxu1  ;;  %v4182_v60 = vadd.f32 %v4181_v28, %v4093_v51  ;;  %v8881_v51 = vunpack.i.h.bf16 %v11964_v1 }
 0x48b   : > { %v4269_v19 = vadd.f32 %v4268_v4, %v4180_v26  ;;  %v3531_v4 = vpack.c.bf16 %v3467_v5, %v3466_v12  ;;  %v2764_v5 = vld [vmem:[#allocation3 + $0x138] sm:$0xff] }
 0x48c   : > { %v3468_v1 = vsel %vm593_vm6, %v2764_v5, %v8880_v11  ;;  %v8195_v11 = vld [vmem:[%s14506_s5 + $0x10] sm:$0xff] }
 0x48d   : > { %vm4345_vm12 = vcmp.ge.f32.partialorder %v4269_v19, 0.0  ;;  %v4377_v29 = vmul.f32 0.2, %v4269_v19  ;;  %8012 = vmatmul.msk.bf16.gmra.mxu1 %vm593_vm6, %v3527_v39  ;;  %5972 = vmatpush.bf16.msrb.mxu2 %v8195_v11 }
 0x48f   : > { %v4409_v7 = vsel %vm4345_vm12, %v4269_v19, %v4377_v29  ;;  %v4633_v41 = vld [vmem:[#allocation4 + $0x1a] sm:$0xff]  ;;  %v4634_v50 = vld [vmem:[#allocation4 + $0x22] sm:$0xff]  ;;  %v4096_v19 = vadd.f32 %v12137_v23, %v12006_v15  ;;  %v8925_v15 = vunpack.i.l.bf16 %v8924_v42 }
 0x490   : > { %v12237_v2 = vld [vmem:[#allocation4 + $0x21] sm:$0xff]  ;;  %4443 = vst.msk [vmem:[#allocation4 + $0x31] sm:$0xff] %vm4440_vm9, %v4409_v7  ;;  %v8947_v46 = vpack.i.bf16 %v4634_v50, %v4633_v41  ;;  %v3532_v7 = vpack.c.bf16 %v12060_v40, %v12058_v30  ;;  %v8926_v41 = vunpack.i.h.bf16 %v8924_v42  ;;  %v12270_v50 = vpop.f32.mrf.mxu2 }
 0x491   : > { %v8932_v49 = vpack.i.bf16 %v12237_v2, %v12234_v34  ;;  %v4184_v33 = vpop.f32.mrf.mxu0  ;;  %v12256_v28 = vld [vmem:[#allocation4 + $0x20] sm:$0xff] }
 0x492   : > { %v4270_v26 = vpop.f32.mrf.mxu1  ;;  %8948 = vrot.lane.b32.xlu2 %v8947_v46, %s9524_s23  ;;  %8938 = vrot.lane.b32.xlu1 %v8947_v46, %s9523_s30  ;;  %v8942_v29 = vpack.i.bf16 %v12256_v28, %v12260_v13  ;;  %v4185_v47 = vadd.f32 %v4184_v33, %v4096_v19  ;;  %v2765_v46 = vld [vmem:[#allocation3 + $0x140] sm:$0xff] }
 0x493   : > { %v4271_v39 = vadd.f32 %v4270_v26, %v4182_v60  ;;  %8933 = vrot.lane.b32.xlu0 %v8932_v49, %s9524_s23  ;;  %v12273_v49 = vpop.f32.mrf.mxu3  ;;  %v4098_v60 = vadd.f32 %v12163_v9, %v12029_v54  ;;  %v3445_v54 = vsel %vm593_vm6, %v2708_v8, %v8926_v41  ;;  %v4101_v41 = vadd.f32 %v12178_v32, %v12041_v21 }
 0x494   : > { %4223 = vmatmul.bf16.gmra.mxu0 %v3531_v4  ;;  %v3444_v4 = vsel %vm593_vm6, %v2707_v14, %v8925_v15  ;;  %v8885_v21 = vunpack.i.l.bf16 %v12087_v10 }
 0x495   : > { %vm4346_vm13 = vcmp.ge.f32.partialorder %v4271_v39, 0.0  ;;  %v4378_v16 = vmul.f32 0.2, %v4271_v39  ;;  %4154 = vmatmul.bf16.gmra.mxu3 %v3550_v48 }
 0x497   : > { %v4410_v20 = vsel %vm4346_vm13, %v4271_v39, %v4378_v16  ;;  %v4509_v55 = vld [vmem:[#allocation4 + $0x31] sm:$0xff]  ;;  %v3469_v39 = vsel %vm593_vm6, %v2765_v46, %v8881_v51 }
 0x498   : > { %4444 = vst.msk [vmem:[#allocation4 + $0x39] sm:$0xff] %vm4440_vm9, %v4410_v20  ;;  %v12287_v19 = vld [vmem:[#allocation4 + $0x30] sm:$0xff]  ;;  %v3536_v51 = vpack.c.bf16 %v3469_v39, %v3468_v1  ;;  %v8886_v1 = vunpack.i.h.bf16 %v12087_v10  ;;  %v2767_v39 = vld [vmem:[#allocation3 + $0x158] sm:$0xff] }
 0x499   : > { %v4186_v53 = vpop.f32.mrf.mxu0  ;;  %v8203_v46 = vld [vmem:[%s14506_s5 + $0x50] sm:$0xff] }
 0x49a   : > { %v4273_v43 = vpop.f32.mrf.mxu1  ;;  %8943 = vrot.lane.b32.xlu1 %v8942_v29, %s9525_s27  ;;  %v4187_v42 = vadd.f32 %v4186_v53, %v4098_v60  ;;  %v3537_v60 = vpack.c.bf16 %v12091_v63, %v12089_v22  ;;  %6061 = vmatpush.bf16.msrb.mxu3 %v8203_v46  ;;  %v3471_v63 = vsel %vm593_vm6, %v2767_v39, %v8886_v1  ;;  %v12344_v46 = vld [vmem:[%s14505_s4] ss:$0 sm:$0xff]  ;;  %v8906_v39 = vunpack.i.h.bf16 %v11946_v6 }
 0x49b   : > { %v4274_v23 = vadd.f32 %v4273_v43, %v4185_v47  ;;  %v12306_v5 = vpop.f32.mrf.mxu3 }
 0x49d   : > { %vm4347_vm14 = vcmp.ge.f32.partialorder %v4274_v23, 0.0  ;;  %v4379_v12 = vmul.f32 0.2, %v4274_v23  ;;  %8013 = vmatmul.msk.bf16.gmra.mxu1 %vm593_vm6, %v3532_v7  ;;  %v12302_v7 = vpop.f32.mrf.mxu2 }
 0x49f   : > { %v4411_v30 = vsel %vm4347_vm14, %v4274_v23, %v4379_v12  ;;  %v12278_v40 = vld [vmem:[#allocation4 + $0x32] sm:$0xff]  ;;  %v12280_v33 = vld [vmem:[#allocation4 + $0x3a] sm:$0xff]  ;;  %v3555_v23 = vpack.c.bf16 %v3445_v54, %v3444_v4 }
 0x4a0   : > { %v4510_v26 = vld [vmem:[#allocation4 + $0x39] sm:$0xff]  ;;  %4445 = vst.msk [vmem:[#allocation4 + $0x49] sm:$0xff] %vm4440_vm9, %v4411_v30  ;;  %v8957_v48 = vpack.i.bf16 %v12280_v33, %v12278_v40  ;;  %v5725_v9 = vpack.c.bf16 %v12280_v33, %v12278_v40  ;;  %v14576_v40 = vld [vmem:[#allocation14_spill] sm:$0xff] }
 0x4a1   : > { %v8952_v16 = vpack.i.bf16 %v4510_v26, %v4509_v55  ;;  %v12289_v20 = vld [vmem:[#allocation4 + $0x38] sm:$0xff]  ;;  %v4189_v29 = vpop.f32.mrf.mxu0  ;;  %v2766_v4 = vld [vmem:[#allocation3 + $0x150] sm:$0xff]  ;;  %v3950_v33 = vadd.f32 %v12344_v46, %v14576_v40 }
 0x4a2   : > { %v8962_v47 = vpack.i.bf16 %v12289_v20, %v12287_v19  ;;  %v4275_v43 = vpop.f32.mrf.mxu1  ;;  %8958 = vrot.lane.b32.xlu2 %v8957_v48, %s9523_s30  ;;  %v4190_v55 = vadd.f32 %v4189_v29, %v4101_v41  ;;  %v3470_v22 = vsel %vm593_vm6, %v2766_v4, %v8885_v21  ;;  %v3542_v4 = vpack.c.bf16 %v12123_v62, %v12121_v56  ;;  %v2768_v56 = vld [vmem:[#allocation3 + $0x168] sm:$0xff] }
 0x4a3   : > { %8953 = vrot.lane.b32.xlu1 %v8952_v16, %s9524_s23  ;;  %v4276_v15 = vadd.f32 %v4275_v43, %v4187_v42 }
 0x4a4   : > { %8963 = vrot.lane.b32.xlu0 %v8962_v47, %s9523_s30  ;;  %4228 = vmatmul.bf16.gmra.mxu0 %v3536_v51 }
 0x4a5   : > { %vm4348_vm15 = vcmp.ge.f32.partialorder %v4276_v15, 0.0  ;;  %v4380_v53 = vmul.f32 0.2, %v4276_v15  ;;  %4159 = vmatmul.bf16.gmra.mxu3 %v3555_v23  ;;  %v12330_v29 = vpop.f32.mrf.mxu2 }
 0x4a7   : > { %v4412_v12 = vsel %vm4348_vm15, %v4276_v15, %v4380_v53  ;;  %v4668_v26 = vld [vmem:[#allocation4 + $0x48] sm:$0xff]  ;;  %v12338_v53 = vpop.f32.mrf.mxu3  ;;  %vm5594_vm15 = vcmask 785408  }
 0x4a8   : > { %4446 = vst.msk [vmem:[#allocation4 + $0x51] sm:$0xff] %vm4440_vm9, %v4412_v12  ;;  %v3541_v12 = vpack.c.bf16 %v3471_v63, %v3470_v22 }
 0x4a9   : > { %v4191_v14 = vpop.f32.mrf.mxu0 }
 0x4aa   : > { %v4278_v8 = vpop.f32.mrf.mxu1  ;;  %8973 = vrot.lane.b32.xlu2 %v8962_v47, %s9525_s27 }
 0x4ab   : > { %8968 = vrot.lane.b32.xlu1 %v8952_v16, %s9525_s27  ;;  %v4279_v32 = vadd.f32 %v4278_v8, %v4190_v55  ;;  %v4103_v16 = vadd.f32 %v12187_v45, %v12070_v38  ;;  %v4511_v45 = vld [vmem:[#allocation4 + $0x49] sm:$0xff]  ;;  %v3928_v55 = vadd.f32 %v12344_v46, %v11799_v25 }
 0x4ac   : > { %8978 = vrot.lane.b32.xlu0 %v8957_v48, %s9524_s23 }
 0x4ad   : > { %vm4349_vm0 = vcmp.ge.f32.partialorder %v4279_v32, 0.0  ;;  %v4381_v30 = vmul.f32 0.2, %v4279_v32  ;;  %8014 = vmatmul.msk.bf16.gmra.mxu1 %vm593_vm6, %v3537_v60  ;;  %v4192_v51 = vadd.f32 %v4191_v14, %v4103_v16  ;;  %v4017_v14 = vadd.f32 %v12201_v18, %v3928_v55 }
 0x4ae   : > { %v3930_v18 = vadd.f32 %v12344_v46, %v11822_v59  ;;  %v2769_v59 = vld [vmem:[#allocation3 + $0x170] sm:$0xff] }
 0x4af   : > { %v4413_v54 = vsel %vm4349_vm0, %v4279_v32, %v4381_v30  ;;  %v12322_v42 = vld [vmem:[#allocation4 + $0x50] sm:$0xff]  ;;  %v4106_v21 = vadd.f32 %v12206_v31, %v4017_v14  ;;  %v8905_v31 = vunpack.i.l.bf16 %v11946_v6 }
 0x4b0   : > { %v12324_v10 = vld [vmem:[#allocation4 + $0x4a] sm:$0xff]  ;;  %v12326_v48 = vld [vmem:[#allocation4 + $0x52] sm:$0xff]  ;;  %4447 = vst.msk [vmem:[#allocation4 + $0x61] sm:$0xff] %vm4440_vm9, %v4413_v54  ;;  %v8992_v47 = vpack.i.bf16 %v12322_v42, %v4668_v26  ;;  %v12353_v26 = vpop.f32.mrf.mxu2  ;;  %v12364_v54 = vpop.f32.mrf.mxu3  ;;  %v4019_v22 = vadd.f32 %v12216_v58, %v3930_v18 }
 0x4b1   : > { %v8987_v38 = vpack.i.bf16 %v12326_v48, %v12324_v10  ;;  %v4512_v11 = vld [vmem:[#allocation4 + $0x51] sm:$0xff]  ;;  %v5728_v43 = vpack.c.bf16 %v12326_v48, %v12324_v10  ;;  %v4194_v15 = vpop.f32.mrf.mxu0 }
 0x4b2   : > { %v8982_v23 = vpack.i.bf16 %v4512_v11, %v4511_v45  ;;  %v4280_v41 = vpop.f32.mrf.mxu1  ;;  %v4195_v60 = vadd.f32 %v4194_v15, %v4106_v21  ;;  %v3473_v15 = vsel %vm593_vm6, %v2769_v59, %v8906_v39 }
 0x4b3   : > { %8993 = vrot.lane.b32.xlu1 %v8992_v47, %s9523_s30  ;;  %v4281_v8 = vadd.f32 %v4280_v41, %v4192_v51  ;;  %v3472_v51 = vsel %vm593_vm6, %v2768_v56, %v8905_v31 }
 0x4b4   : > { %8988 = vrot.lane.b32.xlu0 %v8987_v38, %s9523_s30  ;;  %8983 = vrot.lane.b32.xlu2 %v8982_v23, %s9524_s23 }
 0x4b5   : > { %4233 = vmatmul.bf16.gmra.mxu0 %v3541_v12  ;;  %vm4350_vm1 = vcmp.ge.f32.partialorder %v4281_v8, 0.0  ;;  %v4382_v1 = vmul.f32 0.2, %v4281_v8 }
 0x4b7   : > { %v4414_v32 = vsel %vm4350_vm1, %v4281_v8, %v4382_v1  ;;  %v4513_v62 = vld [vmem:[#allocation4 + $0x61] sm:$0xff] }
 0x4b8   : > { %4448 = vst.msk [vmem:[#allocation4 + $0x69] sm:$0xff] %vm4440_vm9, %v4414_v32  ;;  %v4670_v41 = vld [vmem:[#allocation4 + $0x60] sm:$0xff]  ;;  %v8194_v1 = vld [vmem:[%s14506_s5 + $0x8] sm:$0xff]  ;;  %v3546_v32 = vpack.c.bf16 %v3473_v15, %v3472_v51  ;;  %v12391_v39 = vpop.f32.mrf.mxu3  ;;  %v2770_v15 = vld [vmem:[#allocation3 + $0x180] sm:$0xff] }
 0x4b9   : > { %v4196_v30 = vpop.f32.mrf.mxu0  ;;  %5973 = vmatpush.bf16.msrb.mxu2 %v8194_v1 }
 0x4ba   : > { %v4283_v25 = vpop.f32.mrf.mxu1 }
 0x4bb   : > { %9008 = vrot.lane.b32.xlu1 %v8987_v38, %s9524_s23  ;;  %v4284_v16 = vadd.f32 %v4283_v25, %v4195_v60  ;;  %v4108_v38 = vadd.f32 %v12222_v52, %v4019_v22  ;;  %v3933_v60 = vadd.f32 %v12344_v46, %v11832_v37  ;;  %v8929_v22 = vpop.permute.xlu0 %8928  ;;  %v8202_v37 = vld [vmem:[%s14506_s5 + $0x48] sm:$0xff] }
 0x4bc   : > { %9003 = vrot.lane.b32.xlu0 %v8992_v47, %s9525_s27  ;;  %8998 = vrot.lane.b32.xlu2 %v8982_v23, %s9525_s27  ;;  %v8931_v59 = vunpack.i.h.bf16 %v8929_v22 }
 0x4bd   : > { %vm4351_vm2 = vcmp.ge.f32.partialorder %v4284_v16, 0.0  ;;  %v4383_v63 = vmul.f32 0.2, %v4284_v16  ;;  %8015 = vmatmul.msk.bf16.gmra.mxu1 %vm593_vm6, %v3542_v4  ;;  %v4197_v55 = vadd.f32 %v4196_v30, %v4108_v38  ;;  %v12388_v4 = vpop.f32.mrf.mxu2  ;;  %v4022_v30 = vadd.f32 %v12249_v61, %v3933_v60  ;;  %6062 = vmatpush.bf16.msrb.mxu3 %v8202_v37 }
 0x4be   : > { %v3547_v61 = vpack.c.bf16 %v12150_v3, %v12148_v35  ;;  %v8930_v38 = vunpack.i.l.bf16 %v8929_v22  ;;  %v14571_v22 = vld [vmem:[#allocation16_spill] sm:$0xff] }
 0x4bf   : > { %v4415_v45 = vsel %vm4351_vm2, %v4284_v16, %v4383_v63  ;;  %v12369_v6 = vld [vmem:[#allocation4 + $0x62] sm:$0xff]  ;;  %v12371_v11 = vld [vmem:[#allocation4 + $0x6a] sm:$0xff]  ;;  %v4111_v31 = vadd.f32 %v12254_v44, %v4022_v30  ;;  %v3935_v44 = vadd.f32 %v12344_v46, %v11850_v0  ;;  %v3938_v37 = vadd.f32 %v12344_v46, %v14571_v22 }
 0x4c0   : > { %v4514_v47 = vld [vmem:[#allocation4 + $0x69] sm:$0xff]  ;;  %4449 = vst.msk [vmem:[#allocation4 + $0x79] sm:$0xff] %vm4440_vm9, %v4415_v45  ;;  %v9017_v58 = vpack.i.bf16 %v12371_v11, %v12369_v6  ;;  %v5731_v52 = vpack.c.bf16 %v12371_v11, %v12369_v6  ;;  %v12414_v1 = vpop.f32.mrf.mxu3 }
 0x4c1   : > { %v9012_v23 = vpack.i.bf16 %v4514_v47, %v4513_v62  ;;  %v4671_v12 = vld [vmem:[#allocation4 + $0x68] sm:$0xff]  ;;  %v4199_v8 = vpop.f32.mrf.mxu0  ;;  %v4024_v47 = vadd.f32 %v12270_v50, %v3935_v44 }
 0x4c2   : > { %v9022_v14 = vpack.i.bf16 %v4671_v12, %v4670_v41  ;;  %v4285_v21 = vpop.f32.mrf.mxu1  ;;  %v4200_v63 = vadd.f32 %v4199_v8, %v4111_v31  ;;  %v2771_v12 = vld [vmem:[#allocation3 + $0x188] sm:$0xff] }
 0x4c3   : > { %9018 = vrot.lane.b32.xlu1 %v9017_v58, %s9523_s30  ;;  %v4286_v25 = vadd.f32 %v4285_v21, %v4197_v55  ;;  %v4113_v0 = vadd.f32 %v12273_v49, %v4024_v47  ;;  %v3475_v50 = vsel %vm593_vm6, %v2771_v12, %v8931_v59  ;;  %v2835_v47 = vld [vmem:[#allocation3 + $0x18a] sm:$0xff] }
 0x4c4   : > { %9013 = vrot.lane.b32.xlu0 %v9012_v23, %s9524_s23  ;;  %9023 = vrot.lane.b32.xlu2 %v9022_v14, %s9523_s30  ;;  %v14572_v12 = vld [vmem:[#allocation10_spill] sm:$0xff] }
 0x4c5   : > { %4238 = vmatmul.bf16.gmra.mxu0 %v3546_v32  ;;  %vm4352_vm3 = vcmp.ge.f32.partialorder %v4286_v25, 0.0  ;;  %v4384_v18 = vmul.f32 0.2, %v4286_v25  ;;  %v12407_v41 = vpop.f32.mrf.mxu2 }
 0x4c7   : > { %v4416_v16 = vsel %vm4352_vm3, %v4286_v25, %v4384_v18  ;;  %v4515_v35 = vld [vmem:[#allocation4 + $0x79] sm:$0xff] }
 0x4c8   : > { %4450 = vst.msk [vmem:[#allocation4 + $0x81] sm:$0xff] %vm4440_vm9, %v4416_v16  ;;  %v4672_v3 = vld [vmem:[#allocation4 + $0x78] sm:$0xff] }
 0x4c9   : > { %v4201_v62 = vpop.f32.mrf.mxu0 }
 0x4ca   : > { %v4288_v56 = vpop.f32.mrf.mxu1  ;;  %v4202_v25 = vadd.f32 %v4201_v62, %v4113_v0  ;;  %v4027_v62 = vadd.f32 %v12302_v7, %v3938_v37  ;;  %v3940_v0 = vadd.f32 %v12344_v46, %v14572_v12  ;;  %v12435_v7 = vpop.f32.mrf.mxu3 }
 0x4cb   : > { %9033 = vrot.lane.b32.xlu1 %v9022_v14, %s9525_s27  ;;  %v4289_v45 = vadd.f32 %v4288_v56, %v4200_v63 }
 0x4cc   : > { %9028 = vrot.lane.b32.xlu0 %v9012_v23, %s9525_s27  ;;  %9038 = vrot.lane.b32.xlu2 %v9017_v58, %s9524_s23  ;;  %v3474_v58 = vsel %vm593_vm6, %v2770_v15, %v8930_v38  ;;  %v4116_v44 = vadd.f32 %v12306_v5, %v4027_v62  ;;  %v2772_v5 = vld [vmem:[#allocation3 + $0x198] sm:$0xff] }
 0x4cd   : > { %vm4353_vm4 = vcmp.ge.f32.partialorder %v4289_v45, 0.0  ;;  %v4385_v51 = vmul.f32 0.2, %v4289_v45  ;;  %8016 = vmatmul.msk.bf16.gmra.mxu1 %vm593_vm6, %v3547_v61  ;;  %v3551_v16 = vpack.c.bf16 %v3475_v50, %v3474_v58  ;;  %v8894_v61 = vpop.permute.xlu1 %8893  ;;  %v12430_v38 = vpop.f32.mrf.mxu2  ;;  %v4029_v50 = vadd.f32 %v12330_v29, %v3940_v0 }
 0x4cf   : > { %v4417_v55 = vsel %vm4353_vm4, %v4289_v45, %v4385_v51  ;;  %v4516_v8 = vld [vmem:[#allocation4 + $0x81] sm:$0xff]  ;;  %v2834_v45 = vld [vmem:[#allocation3 + $0x182] sm:$0xff] }
 0x4d0   : > { %v4673_v14 = vld [vmem:[#allocation4 + $0x80] sm:$0xff]  ;;  %4451 = vst.msk [vmem:[#allocation4 + $0x91] sm:$0xff] %vm4440_vm9, %v4417_v55  ;;  %v9042_v21 = vpack.i.bf16 %v4516_v8, %v4515_v35  ;;  %v8896_v35 = vunpack.i.h.bf16 %v8894_v61  ;;  %v2773_v8 = vld [vmem:[#allocation3 + $0x1a0] sm:$0xff]  ;;  %v3552_v58 = vpack.c.bf16 %v2835_v47, %v2834_v45 }
 0x4d1   : > { %v12410_v23 = vld [vmem:[#allocation4 + $0x7a] sm:$0xff]  ;;  %v9052_v32 = vpack.i.bf16 %v4673_v14, %v4672_v3  ;;  %v12417_v60 = vld [vmem:[#allocation4 + $0x82] sm:$0xff]  ;;  %v4204_v30 = vpop.f32.mrf.mxu0  ;;  %v8895_v3 = vunpack.i.l.bf16 %v8894_v61 }
 0x4d2   : > { %v9047_v49 = vpack.i.bf16 %v12417_v60, %v12410_v23  ;;  %v5734_v18 = vpack.c.bf16 %v12417_v60, %v12410_v23  ;;  %v4290_v31 = vpop.f32.mrf.mxu1  ;;  %v4205_v51 = vadd.f32 %v4204_v30, %v4116_v44  ;;  %v8193_v47 = vld [vmem:[%s14506_s5] sm:$0xff] }
 0x4d3   : > { %9043 = vrot.lane.b32.xlu1 %v9042_v21, %s9524_s23  ;;  %v4291_v63 = vadd.f32 %v4290_v31, %v4202_v25  ;;  %v3476_v30 = vsel %vm593_vm6, %v2772_v5, %v8895_v3  ;;  %v3477_v31 = vsel %vm593_vm6, %v2773_v8, %v8896_v35  ;;  %v14573_v3 = vld [vmem:[#allocation11_spill] sm:$0xff]  ;;  %5974 = vmatpush.bf16.msrb.mxu2 %v8193_v47 }
 0x4d4   : > { %9053 = vrot.lane.b32.xlu0 %v9052_v32, %s9523_s30  ;;  %9048 = vrot.lane.b32.xlu2 %v9047_v49, %s9523_s30  ;;  %v3556_v61 = vpack.c.bf16 %v3477_v31, %v3476_v30  ;;  %v3943_v12 = vadd.f32 %v12344_v46, %v14573_v3  ;;  %v2836_v8 = vld [vmem:[#allocation3 + $0x19a] sm:$0xff] }
 0x4d5   : > { %4243 = vmatmul.bf16.gmra.mxu0 %v3551_v16  ;;  %vm4354_vm5 = vcmp.ge.f32.partialorder %v4291_v63, 0.0  ;;  %v4386_v56 = vmul.f32 0.2, %v4291_v63 }
 0x4d7   : > { %v4418_v59 = vsel %vm4354_vm5, %v4291_v63, %v4386_v56  ;;  %v4674_v16 = vld [vmem:[#allocation4 + $0x90] sm:$0xff] }
 0x4d8   : > { %4452 = vst.msk [vmem:[#allocation4 + $0x99] sm:$0xff] %vm4440_vm9, %v4418_v59  ;;  %v4517_v62 = vld [vmem:[#allocation4 + $0x91] sm:$0xff] }
 0x4d9   : > { %v4206_v15 = vpop.f32.mrf.mxu0 }
 0x4da   : > { %v4293_v55 = vpop.f32.mrf.mxu1 }
 0x4db   : > { %9058 = vrot.lane.b32.xlu1 %v9042_v21, %s9525_s27  ;;  %v4294_v14 = vadd.f32 %v4293_v55, %v4205_v51  ;;  %v4118_v21 = vadd.f32 %v12338_v53, %v4029_v50  ;;  %v12457_v51 = vpop.f32.mrf.mxu2  ;;  %v4032_v55 = vadd.f32 %v12353_v26, %v3943_v12  ;;  %v14574_v26 = vld [vmem:[#allocation12_spill] sm:$0xff] }
 0x4dc   : > { %9068 = vrot.lane.b32.xlu0 %v9047_v49, %s9524_s23  ;;  %9063 = vrot.lane.b32.xlu2 %v9052_v32, %s9525_s27 }
 0x4dd   : > { %vm4355_vm7 = vcmp.ge.f32.partialorder %v4294_v14, 0.0  ;;  %v4387_v25 = vmul.f32 0.2, %v4294_v14  ;;  %8017 = vmatmul.msk.bf16.gmra.mxu1 %vm593_vm6, %v3552_v58  ;;  %v4207_v59 = vadd.f32 %v4206_v15, %v4118_v21  ;;  %v12464_v15 = vpop.f32.mrf.mxu3  ;;  %v4121_v58 = vadd.f32 %v12364_v54, %v4032_v55 }
 0x4df   : > { %v4419_v22 = vsel %vm4355_vm7, %v4294_v14, %v4387_v25  ;;  %v4675_v37 = vld [vmem:[#allocation4 + $0x98] sm:$0xff]  ;;  %v8201_v25 = vld [vmem:[%s14506_s5 + $0x40] sm:$0xff] }
 0x4e0   : > { %v12445_v63 = vld [vmem:[#allocation4 + $0x92] sm:$0xff]  ;;  %v12447_v49 = vld [vmem:[#allocation4 + $0x9a] sm:$0xff]  ;;  %4453 = vst.msk [vmem:[#allocation4 + $0xa9] sm:$0xff] %vm4440_vm9, %v4419_v22  ;;  %v9082_v29 = vpack.i.bf16 %v4675_v37, %v4674_v16  ;;  %6063 = vmatpush.bf16.msrb.mxu3 %v8201_v25  ;;  %v3945_v22 = vadd.f32 %v12344_v46, %v14574_v26 }
 0x4e1   : > { %v9077_v32 = vpack.i.bf16 %v12447_v49, %v12445_v63  ;;  %v4518_v56 = vld [vmem:[#allocation4 + $0x99] sm:$0xff]  ;;  %v5737_v44 = vpack.c.bf16 %v12447_v49, %v12445_v63  ;;  %v4209_v53 = vpop.f32.mrf.mxu0 }
 0x4e2   : > { %v9072_v45 = vpack.i.bf16 %v4518_v56, %v4517_v62  ;;  %v4295_v35 = vpop.f32.mrf.mxu1  ;;  %v2837_v14 = vld [vmem:[#allocation3 + $0x1a2] sm:$0xff]  ;;  %v4210_v30 = vadd.f32 %v4209_v53, %v4121_v58  ;;  %v4034_v62 = vadd.f32 %v12388_v4, %v3945_v22 }
 0x4e3   : > { %9083 = vrot.lane.b32.xlu1 %v9082_v29, %s9523_s30  ;;  %v4296_v0 = vadd.f32 %v4295_v35, %v4207_v59  ;;  %v3557_v16 = vpack.c.bf16 %v2837_v14, %v2836_v8  ;;  %v12477_v54 = vpop.f32.mrf.mxu2  ;;  %v14575_v14 = vld [vmem:[#allocation13_spill] sm:$0xff] }
 0x4e4   : > { %9078 = vrot.lane.b32.xlu0 %v9077_v32, %s9523_s30  ;;  %9073 = vrot.lane.b32.xlu2 %v9072_v45, %s9524_s23  ;;  %v4123_v59 = vadd.f32 %v12391_v39, %v4034_v62  ;;  %v3948_v58 = vadd.f32 %v12344_v46, %v14575_v14 }
 0x4e5   : > { %4248 = vmatmul.bf16.gmra.mxu0 %v3556_v61  ;;  %vm4356_vm8 = vcmp.ge.f32.partialorder %v4296_v0, 0.0  ;;  %v4388_v5 = vmul.f32 0.2, %v4296_v0  ;;  %v12481_v61 = vpop.f32.mrf.mxu3 }
 0x4e7   : > { %v4420_v50 = vsel %vm4356_vm8, %v4296_v0, %v4388_v5  ;;  %v4676_v3 = vld [vmem:[#allocation4 + $0xa8] sm:$0xff] }
 0x4e8   : > { %4454 = vst.msk [vmem:[#allocation4 + $0xb1] sm:$0xff] %vm4440_vm9, %v4420_v50 }
 0x4e9   : > { %v4211_v31 = vpop.f32.mrf.mxu0 }
 0x4ea   : > { %v4298_v21 = vpop.f32.mrf.mxu1  ;;  %v4212_v55 = vadd.f32 %v4211_v31, %v4123_v59 }
 0x4eb   : > { %9098 = vrot.lane.b32.xlu1 %v9077_v32, %s9524_s23  ;;  %v4299_v37 = vadd.f32 %v4298_v21, %v4210_v30  ;;  %v4519_v32 = vld [vmem:[#allocation4 + $0xa9] sm:$0xff]  ;;  %v4037_v30 = vadd.f32 %v12407_v41, %v3948_v58 }
 0x4ec   : > { %9093 = vrot.lane.b32.xlu0 %v9082_v29, %s9525_s27  ;;  %9088 = vrot.lane.b32.xlu2 %v9072_v45, %s9525_s27  ;;  %v12498_v25 = vpop.permute.xlu2 %8948 }
 0x4ed   : > { %vm4357_vm10 = vcmp.ge.f32.partialorder %v4299_v37, 0.0  ;;  %v4389_v56 = vmul.f32 0.2, %v4299_v37  ;;  %8018 = vmatmul.msk.bf16.gmra.mxu1 %vm593_vm6, %v3557_v16  ;;  %v12505_v16 = vpop.f32.mrf.mxu2  ;;  %v4126_v21 = vadd.f32 %v12414_v1, %v4037_v30  ;;  %v12508_v22 = vpop.f32.mrf.mxu3  ;;  %v4039_v1 = vadd.f32 %v12430_v38, %v3950_v33 }
 0x4ef   : > { %v4421_v53 = vsel %vm4357_vm10, %v4299_v37, %v4389_v56  ;;  %v12484_v47 = vld [vmem:[#allocation4 + $0xaa] sm:$0xff]  ;;  %v12486_v35 = vld [vmem:[#allocation4 + $0xb2] sm:$0xff] }
 0x4f0   : > { %v4520_v29 = vld [vmem:[#allocation4 + $0xb1] sm:$0xff]  ;;  %4455 = vst.msk [vmem:[#allocation4 + $0xc1] sm:$0xff] %vm4440_vm9, %v4421_v53  ;;  %v9107_v4 = vpack.i.bf16 %v12486_v35, %v12484_v47  ;;  %v5740_v0 = vpack.c.bf16 %v12486_v35, %v12484_v47  ;;  %v9421_v35 = vld [vmem:[#allocation4 + $0x60] sm:$0xff] }
 0x4f1   : > { %v9102_v45 = vpack.i.bf16 %v4520_v29, %v4519_v32  ;;  %v4677_v12 = vld [vmem:[#allocation4 + $0xb0] sm:$0xff]  ;;  %v4214_v5 = vpop.f32.mrf.mxu0  ;;  %v4128_v29 = vadd.f32 %v12435_v7, %v4039_v1 }
 0x4f2   : > { %v9112_v39 = vpack.i.bf16 %v4677_v12, %v4676_v3  ;;  %v4300_v8 = vpop.f32.mrf.mxu1  ;;  %v4215_v37 = vadd.f32 %v4214_v5, %v4126_v21 }
 0x4f3   : > { %9108 = vrot.lane.b32.xlu1 %v9107_v4, %s9523_s30  ;;  %v4301_v50 = vadd.f32 %v4300_v8, %v4212_v55 }
 0x4f4   : > { %9103 = vrot.lane.b32.xlu0 %v9102_v45, %s9524_s23  ;;  %9113 = vrot.lane.b32.xlu2 %v9112_v39, %s9523_s30 }
 0x4f5   : > { %8091 = vmatmul.msk.bf16.vlgmr.msrb.gmra.mxu0 %vm4440_vm9, %v5725_v9  ;;  %vm4358_vm11 = vcmp.ge.f32.partialorder %v4301_v50, 0.0  ;;  %v4390_v31 = vmul.f32 0.2, %v4301_v50 }
 0x4f7   : > { %v4422_v26 = vsel %vm4358_vm11, %v4301_v50, %v4390_v31  ;;  %v4521_v59 = vld [vmem:[#allocation4 + $0xc1] sm:$0xff]  ;;  %v12531_v50 = vpop.f32.mrf.mxu3  ;;  %v14577_v31 = vld [vmem:[#allocation15_spill] sm:$0xff] }
 0x4f8   : > { %4456 = vst.msk [vmem:[#allocation4 + $0xc9] sm:$0xff] %vm4440_vm9, %v4422_v26  ;;  %v4678_v53 = vld [vmem:[#allocation4 + $0xc0] sm:$0xff]  ;;  %v3953_v21 = vadd.f32 %v12344_v46, %v14577_v31 }
 0x4f9   : > { %v4216_v62 = vpop.f32.mrf.mxu0 }
 0x4fa   : > { %v4303_v56 = vpop.f32.mrf.mxu1  ;;  %v4217_v38 = vadd.f32 %v4216_v62, %v4128_v29 }
 0x4fb   : > { %9123 = vrot.lane.b32.xlu1 %v9112_v39, %s9525_s27  ;;  %v4304_v9 = vadd.f32 %v4303_v56, %v4215_v37  ;;  %v12522_v39 = vpop.f32.mrf.mxu2  ;;  %v4042_v56 = vadd.f32 %v12457_v51, %v3953_v21  ;;  %v14580_v21 = vld [vmem:[#allocation20_spill] sm:$0xff] }
 0x4fc   : > { %9118 = vrot.lane.b32.xlu0 %v9102_v45, %s9525_s27  ;;  %9128 = vrot.lane.b32.xlu2 %v9107_v4, %s9524_s23  ;;  %v12516_v41 = vpop.permute.xlu2 %8958 }
 0x4fd   : > { %vm4359_vm12 = vcmp.ge.f32.partialorder %v4304_v9, 0.0  ;;  %v4391_v32 = vmul.f32 0.2, %v4304_v9  ;;  %v4131_v33 = vadd.f32 %v12464_v15, %v4042_v56 }
 0x4ff   : > { %v4423_v3 = vsel %vm4359_vm12, %v4304_v9, %v4391_v32  ;;  %v4522_v12 = vld [vmem:[#allocation4 + $0xc9] sm:$0xff] }
 0x500   : > { %v4679_v55 = vld [vmem:[#allocation4 + $0xc8] sm:$0xff]  ;;  %4457 = vst.msk [vmem:[#allocation4 + $0xd9] sm:$0xff] %vm4440_vm9, %v4423_v3  ;;  %v9132_v4 = vpack.i.bf16 %v4522_v12, %v4521_v59  ;;  %v14578_v59 = vld [vmem:[#allocation17_spill] sm:$0xff] }
 0x501   : > { %v12520_v5 = vld [vmem:[#allocation4 + $0xc2] sm:$0xff]  ;;  %v9142_v45 = vpack.i.bf16 %v4679_v55, %v4678_v53  ;;  %v12525_v8 = vld [vmem:[#allocation4 + $0xca] sm:$0xff]  ;;  %v4219_v14 = vpop.f32.mrf.mxu0  ;;  %v3955_v53 = vadd.f32 %v12344_v46, %v14578_v59 }
 0x502   : > { %v9137_v58 = vpack.i.bf16 %v12525_v8, %v12520_v5  ;;  %v5743_v7 = vpack.c.bf16 %v12525_v8, %v12520_v5  ;;  %v4305_v30 = vpop.f32.mrf.mxu1  ;;  %v4220_v1 = vadd.f32 %v4219_v14, %v4131_v33  ;;  %v4483_v8 = vld [vmem:[#allocation4 + $0x78] sm:$0xff] }
 0x503   : > { %9133 = vrot.lane.b32.xlu1 %v9132_v4, %s9524_s23  ;;  %v4306_v26 = vadd.f32 %v4305_v30, %v4217_v38  ;;  %v12551_v29 = vpop.f32.mrf.mxu2  ;;  %v4044_v48 = vadd.f32 %v12477_v54, %v3955_v53 }
 0x504   : > { %9143 = vrot.lane.b32.xlu0 %v9142_v45, %s9523_s30  ;;  %9138 = vrot.lane.b32.xlu2 %v9137_v58, %s9523_s30  ;;  %v12538_v37 = vpop.permute.xlu2 %8973  ;;  %v12540_v62 = vpop.permute.xlu1 %8938 }
 0x505   : > { %8092 = vmatmul.msk.bf16.gmra.mxu0 %vm4440_vm9, %v5728_v43  ;;  %vm4360_vm13 = vcmp.ge.f32.partialorder %v4306_v26, 0.0  ;;  %v4392_v40 = vmul.f32 0.2, %v4306_v26  ;;  %v12557_v43 = vpop.f32.mrf.mxu3  ;;  %v8934_v15 = vpop.permute.xlu0 %8933 }
 0x507   : > { %v4424_v9 = vsel %vm4360_vm13, %v4306_v26, %v4392_v40  ;;  %v4680_v30 = vld [vmem:[#allocation4 + $0xd8] sm:$0xff] }
 0x508   : > { %4458 = vst.msk [vmem:[#allocation4 + $0xe1] sm:$0xff] %vm4440_vm9, %v4424_v9 }
 0x509   : > { %v4221_v32 = vpop.f32.mrf.mxu0 }
 0x50a   : > { %v4308_v3 = vpop.f32.mrf.mxu1 }
 0x50b   : > { %9148 = vrot.lane.b32.xlu1 %v9132_v4, %s9525_s27  ;;  %v4309_v10 = vadd.f32 %v4308_v3, %v4220_v1  ;;  %v4133_v4 = vadd.f32 %v12481_v61, %v4044_v48  ;;  %v4523_v1 = vld [vmem:[#allocation4 + $0xd9] sm:$0xff] }
 0x50c   : > { %9158 = vrot.lane.b32.xlu0 %v9137_v58, %s9524_s23  ;;  %9153 = vrot.lane.b32.xlu2 %v9142_v45, %s9525_s27  ;;  %v8944_v51 = vpop.permute.xlu1 %8943  ;;  %v14579_v58 = vld [vmem:[#allocation18_spill] sm:$0xff] }
 0x50d   : > { %vm4361_vm14 = vcmp.ge.f32.partialorder %v4309_v10, 0.0  ;;  %v4393_v12 = vmul.f32 0.2, %v4309_v10  ;;  %v8946_v55 = vunpack.i.h.bf16 %v8944_v51  ;;  %v8945_v38 = vunpack.i.l.bf16 %v8944_v51  ;;  %v14581_v51 = vld [vmem:[#allocation19_spill] sm:$0xff] }
 0x50e   : > { %v12559_v14 = vpop.permute.xlu2 %8983  ;;  %v4222_v53 = vadd.f32 %v4221_v32, %v4133_v4  ;;  %v12581_v4 = vpop.f32.mrf.mxu2 }
 0x50f   : > { %v4425_v31 = vsel %vm4361_vm14, %v4309_v10, %v4393_v12  ;;  %v5596_v45 = vsel %vm5594_vm15, %v14579_v58, %v8946_v55  ;;  %v5595_v54 = vsel %vm5594_vm15, %v14580_v21, %v8945_v38  ;;  %v4681_v26 = vld [vmem:[#allocation4 + $0xe0] sm:$0xff]  ;;  %v3958_v12 = vadd.f32 %v12344_v46, %v14581_v51 }
 0x510   : > { %v12566_v56 = vld [vmem:[#allocation4 + $0xda] sm:$0xff]  ;;  %v12568_v40 = vld [vmem:[#allocation4 + $0xe2] sm:$0xff]  ;;  %4459 = vst.msk [vmem:[#allocation4 + $0xf1] sm:$0xff] %vm4440_vm9, %v4425_v31  ;;  %v5723_v33 = vpack.c.bf16 %v5596_v45, %v5595_v54  ;;  %v9172_v9 = vpack.i.bf16 %v4681_v26, %v4680_v30  ;;  %v8936_v55 = vunpack.i.h.bf16 %v8934_v15  ;;  %v8935_v38 = vunpack.i.l.bf16 %v8934_v15 }
 0x511   : > { %v4524_v59 = vld [vmem:[#allocation4 + $0xe1] sm:$0xff]  ;;  %v4224_v61 = vpop.f32.mrf.mxu0  ;;  %v9167_v3 = vpack.i.bf16 %v12568_v40, %v12566_v56  ;;  %v5746_v48 = vpack.c.bf16 %v12568_v40, %v12566_v56  ;;  %v4047_v32 = vadd.f32 %v12505_v16, %v3958_v12  ;;  %v8941_v15 = vunpack.i.h.bf16 %v12540_v62 }
 0x512   : > { %v9162_v10 = vpack.i.bf16 %v4524_v59, %v4523_v1  ;;  %v4310_v58 = vpop.f32.mrf.mxu1  ;;  %5975 = vmatmul.bf16.vlgmr.msrb.gmra.mxu2 %v5723_v33  ;;  %v8940_v45 = vunpack.i.l.bf16 %v12540_v62  ;;  %v12593_v33 = vpop.f32.mrf.mxu3  ;;  %v5532_v16 = vsel %vm4440_vm9, %v12260_v13, %v8935_v38  ;;  %v5533_v1 = vsel %vm4440_vm9, %v12256_v28, %v8936_v55  ;;  %v14582_v59 = vld [vmem:[#allocation21_spill] sm:$0xff] }
 0x513   : > { %9173 = vrot.lane.b32.xlu1 %v9172_v9, %s9523_s30  ;;  %v4311_v30 = vadd.f32 %v4310_v58, %v4222_v53  ;;  %v4136_v6 = vadd.f32 %v12508_v22, %v4047_v32  ;;  %v8950_v62 = vunpack.i.l.bf16 %v12498_v25  ;;  %v3960_v53 = vadd.f32 %v12344_v46, %v14582_v59 }
 0x514   : > { %9168 = vrot.lane.b32.xlu0 %v9167_v3, %s9523_s30  ;;  %9163 = vrot.lane.b32.xlu2 %v9162_v10, %s9524_s23  ;;  %v5564_v58 = vsel %vm593_vm6, %v5532_v16, %v8940_v45  ;;  %v5565_v13 = vsel %vm593_vm6, %v5533_v1, %v8941_v15  ;;  %v8976_v28 = vunpack.i.h.bf16 %v12538_v37  ;;  %v8975_v22 = vunpack.i.l.bf16 %v12538_v37 }
 0x515   : > { %v12583_v31 = vpop.permute.xlu1 %8953  ;;  %8093 = vmatmul.msk.bf16.gmra.mxu0 %vm4440_vm9, %v5731_v52  ;;  %vm4362_vm0 = vcmp.ge.f32.partialorder %v4311_v30, 0.0  ;;  %v4394_v21 = vmul.f32 0.2, %v4311_v30  ;;  %v8951_v52 = vunpack.i.h.bf16 %v12498_v25  ;;  %v4225_v51 = vadd.f32 %v4224_v61, %v4136_v6 }
 0x516   : > { %v8964_v54 = vpop.permute.xlu0 %8963  ;;  %v12591_v26 = vpop.permute.xlu2 %8998  ;;  %v4049_v25 = vadd.f32 %v12522_v39, %v3960_v53  ;;  %v5627_v15 = vsel %vm4440_vm9, %v12234_v34, %v8950_v62  ;;  %v5597_v37 = vsel %vm5594_vm15, %v5564_v58, %v8975_v22  ;;  %v8955_v23 = vunpack.i.l.bf16 %v12583_v31 }
 0x517   : > { %v4426_v11 = vsel %vm4362_vm0, %v4311_v30, %v4394_v21  ;;  %v8966_v55 = vunpack.i.h.bf16 %v8964_v54  ;;  %v8965_v38 = vunpack.i.l.bf16 %v8964_v54  ;;  %v5628_v61 = vsel %vm4440_vm9, %v12237_v2, %v8951_v52  ;;  %v4682_v22 = vld [vmem:[#allocation4 + $0xf0] sm:$0xff] }
 0x518   : > { %4460 = vst.msk [vmem:[#allocation4 + $0xf9] sm:$0xff] %vm4440_vm9, %v4426_v11  ;;  %v5598_v21 = vsel %vm5594_vm15, %v5565_v13, %v8976_v28  ;;  %v4138_v34 = vadd.f32 %v12531_v50, %v4049_v25  ;;  %v4525_v50 = vld [vmem:[#allocation4 + $0xf1] sm:$0xff]  ;;  %vm14511_vm0 = vcmask 130048  }
 0x519   : > { %v4226_v12 = vpop.f32.mrf.mxu0  ;;  %v5659_v2 = vsel %vm593_vm6, %v5627_v15, %v8965_v38  ;;  %v5726_v13 = vpack.c.bf16 %v5598_v21, %v5597_v37  ;;  %v14583_v15 = vld [vmem:[#allocation22_spill] sm:$0xff] }
 0x51a   : > { %v4313_v30 = vpop.f32.mrf.mxu1  ;;  %v4227_v38 = vadd.f32 %v4226_v12, %v4138_v34 }
 0x51b   : > { %9188 = vrot.lane.b32.xlu1 %v9167_v3, %s9524_s23  ;;  %v4314_v32 = vadd.f32 %v4313_v30, %v4225_v51  ;;  %v12632_v51 = vpop.f32.mrf.mxu3 }
 0x51c   : > { %9183 = vrot.lane.b32.xlu0 %v9172_v9, %s9525_s27  ;;  %9178 = vrot.lane.b32.xlu2 %v9162_v10, %s9525_s27  ;;  %v12621_v9 = vpop.f32.mrf.mxu2  ;;  %v5660_v10 = vsel %vm593_vm6, %v5628_v61, %v8966_v55 }
 0x51d   : > { %v8969_v45 = vpop.permute.xlu1 %8968  ;;  %vm4363_vm1 = vcmp.ge.f32.partialorder %v4314_v32, 0.0  ;;  %v4395_v3 = vmul.f32 0.2, %v4314_v32 }
 0x51e   : > { %v8971_v54 = vunpack.i.h.bf16 %v8969_v45  ;;  %v8970_v39 = vunpack.i.l.bf16 %v8969_v45  ;;  %v8979_v16 = vpop.permute.xlu0 %8978  ;;  %v12619_v1 = vpop.permute.xlu2 %9023  ;;  %v3963_v45 = vadd.f32 %v12344_v46, %v14583_v15 }
 0x51f   : > { %v4427_v6 = vsel %vm4363_vm1, %v4314_v32, %v4395_v3  ;;  %v12628_v62 = vld [vmem:[#allocation4 + $0xf2] sm:$0xff]  ;;  %v12630_v59 = vld [vmem:[#allocation4 + $0xfa] sm:$0xff]  ;;  %v8981_v12 = vunpack.i.h.bf16 %v8979_v16 }
 0x520   : > { %v5691_v11 = vsel %vm5594_vm15, %v5659_v2, %v8970_v39  ;;  %v5692_v52 = vsel %vm5594_vm15, %v5660_v10, %v8971_v54  ;;  %v4526_v53 = vld [vmem:[#allocation4 + $0xf9] sm:$0xff]  ;;  %4461 = vst.msk [vmem:[#allocation4 + $0x109] sm:$0xff] %vm4440_vm9, %v4427_v6  ;;  %v9197_v28 = vpack.i.bf16 %v12630_v59, %v12628_v62  ;;  %v5749_v61 = vpack.c.bf16 %v12630_v59, %v12628_v62 }
 0x521   : > { %v5724_v58 = vpack.c.bf16 %v5692_v52, %v5691_v11  ;;  %v4683_v55 = vld [vmem:[#allocation4 + $0xf8] sm:$0xff]  ;;  %v4229_v30 = vpop.f32.mrf.mxu0  ;;  %v9192_v25 = vpack.i.bf16 %v4526_v53, %v4525_v50  ;;  %v4052_v21 = vadd.f32 %v12551_v29, %v3963_v45  ;;  %v8980_v54 = vunpack.i.l.bf16 %v8979_v16  ;;  %v14584_v50 = vld [vmem:[#allocation23_spill] sm:$0xff] }
 0x522   : > { %v9202_v32 = vpack.i.bf16 %v4683_v55, %v4682_v22  ;;  %v4315_v3 = vpop.f32.mrf.mxu1  ;;  %5980 = vmatmul.bf16.gmra.mxu2 %v5726_v13  ;;  %v4603_v52 = vld [vmem:[#allocation4 + $0x31] sm:$0xff]  ;;  %v4604_v16 = vld [vmem:[#allocation4 + $0x39] sm:$0xff]  ;;  %v8956_v13 = vunpack.i.h.bf16 %v12583_v31  ;;  %v3965_v22 = vadd.f32 %v12344_v46, %v14584_v50  ;;  %v9000_v31 = vunpack.i.l.bf16 %v12591_v26 }
 0x523   : > { %6064 = vmatmul.bf16.vlgmr.msrb.gmra.mxu3 %v5724_v58  ;;  %v4316_v37 = vadd.f32 %v4315_v3, %v4227_v38  ;;  %9198 = vrot.lane.b32.xlu1 %v9197_v28, %s9523_s30  ;;  %v4141_v29 = vadd.f32 %v12557_v43, %v4052_v21  ;;  %v5630_v60 = vsel %vm4440_vm9, %v4604_v16, %v8981_v12  ;;  %v12665_v45 = vpop.f32.mrf.mxu3  ;;  %v9001_v3 = vunpack.i.h.bf16 %v12591_v26 }
 0x524   : > { %9193 = vrot.lane.b32.xlu0 %v9192_v25, %s9524_s23  ;;  %9203 = vrot.lane.b32.xlu2 %v9202_v32, %s9523_s30  ;;  %v12654_v58 = vpop.f32.mrf.mxu2  ;;  %v4054_v21 = vadd.f32 %v12581_v4, %v3965_v22  ;;  %v8961_v4 = vunpack.i.h.bf16 %v12516_v41 }
 0x525   : > { %v8994_v39 = vpop.permute.xlu1 %8993  ;;  %8094 = vmatmul.msk.bf16.gmra.mxu0 %vm4440_vm9, %v5734_v18  ;;  %vm4364_vm2 = vcmp.ge.f32.partialorder %v4316_v37, 0.0  ;;  %v4396_v10 = vmul.f32 0.2, %v4316_v37  ;;  %v5629_v18 = vsel %vm4440_vm9, %v4603_v52, %v8980_v54  ;;  %v4230_v55 = vadd.f32 %v4229_v30, %v4141_v29 }
 0x526   : > { %v8996_v2 = vunpack.i.h.bf16 %v8994_v39  ;;  %v8995_v34 = vunpack.i.l.bf16 %v8994_v39  ;;  %v12649_v6 = vpop.permute.xlu0 %8988  ;;  %v12651_v11 = vpop.permute.xlu2 %9038  ;;  %v5535_v30 = vsel %vm4440_vm9, %v12289_v20, %v8956_v13  ;;  %v5534_v54 = vsel %vm4440_vm9, %v12287_v19, %v8955_v23 }
 0x527   : > { %v4428_v53 = vsel %vm4364_vm2, %v4316_v37, %v4396_v10  ;;  %v4143_v20 = vadd.f32 %v12593_v33, %v4054_v21  ;;  %v4684_v52 = vld [vmem:[#allocation4 + $0x108] sm:$0xff] }
 0x528   : > { %4462 = vst.msk [vmem:[#allocation4 + $0x111] sm:$0xff] %vm4440_vm9, %v4428_v53  ;;  %v5662_v43 = vsel %vm593_vm6, %v5630_v60, %v8996_v2  ;;  %v5661_v38 = vsel %vm593_vm6, %v5629_v18, %v8995_v34  ;;  %v5567_v60 = vsel %vm593_vm6, %v5535_v30, %v8961_v4 }
 0x529   : > { %v4231_v15 = vpop.f32.mrf.mxu0  ;;  %v5693_v26 = vsel %vm5594_vm15, %v5661_v38, %v9000_v31  ;;  %v5694_v10 = vsel %vm5594_vm15, %v5662_v43, %v9001_v3 }
 0x52a   : > { %v4318_v37 = vpop.f32.mrf.mxu1  ;;  %v4232_v38 = vadd.f32 %v4231_v15, %v4143_v20 }
 0x52b   : > { %v4319_v12 = vadd.f32 %v4318_v37, %v4230_v55  ;;  %9213 = vrot.lane.b32.xlu1 %v9202_v32, %s9525_s27  ;;  %v8960_v32 = vunpack.i.l.bf16 %v12516_v41  ;;  %v5727_v41 = vpack.c.bf16 %v5694_v10, %v5693_v26  ;;  %v12705_v15 = vpop.f32.mrf.mxu3 }
 0x52c   : > { %9208 = vrot.lane.b32.xlu0 %v9192_v25, %s9525_s27  ;;  %9218 = vrot.lane.b32.xlu2 %v9197_v28, %s9524_s23  ;;  %v4527_v28 = vld [vmem:[#allocation4 + $0x109] sm:$0xff]  ;;  %v12697_v21 = vpop.f32.mrf.mxu2 }
 0x52d   : > { %v12677_v39 = vpop.permute.xlu1 %9008  ;;  %vm4365_vm3 = vcmp.ge.f32.partialorder %v4319_v12, 0.0  ;;  %v4397_v25 = vmul.f32 0.2, %v4319_v12  ;;  %v5566_v23 = vsel %vm593_vm6, %v5534_v54, %v8960_v32  ;;  %v14585_v54 = vld [vmem:[#allocation24_spill] sm:$0xff] }
 0x52e   : > { %v9004_v2 = vpop.permute.xlu0 %9003  ;;  %v12683_v34 = vpop.permute.xlu2 %9048  ;;  %v3968_v26 = vadd.f32 %v12344_v46, %v14585_v54 }
 0x52f   : > { %v9006_v19 = vunpack.i.h.bf16 %v9004_v2  ;;  %v9005_v29 = vunpack.i.l.bf16 %v9004_v2  ;;  %v4429_v16 = vsel %vm4365_vm3, %v4319_v12, %v4397_v25  ;;  %v4528_v53 = vld [vmem:[#allocation4 + $0x111] sm:$0xff] }
 0x530   : > { %v4685_v13 = vld [vmem:[#allocation4 + $0x110] sm:$0xff]  ;;  %4463 = vst.msk [vmem:[#allocation4 + $0x121] sm:$0xff] %vm4440_vm9, %v4429_v16  ;;  %v9222_v50 = vpack.i.bf16 %v4528_v53, %v4527_v28  ;;  %v4057_v32 = vadd.f32 %v12621_v9, %v3968_v26  ;;  %v8985_v9 = vunpack.i.l.bf16 %v12559_v14 }
 0x531   : > { %v12688_v18 = vld [vmem:[#allocation4 + $0x10a] sm:$0xff]  ;;  %v9232_v22 = vpack.i.bf16 %v4685_v13, %v4684_v52  ;;  %v5599_v33 = vsel %vm5594_vm15, %v5566_v23, %v9005_v29  ;;  %v5600_v55 = vsel %vm5594_vm15, %v5567_v60, %v9006_v19  ;;  %v12693_v43 = vld [vmem:[#allocation4 + $0x112] sm:$0xff]  ;;  %v8986_v52 = vunpack.i.h.bf16 %v12559_v14 }
 0x532   : > { %v4234_v3 = vpop.f32.mrf.mxu0  ;;  %v5729_v31 = vpack.c.bf16 %v5600_v55, %v5599_v33  ;;  %v9227_v37 = vpack.i.bf16 %v12693_v43, %v12688_v18  ;;  %v4320_v12 = vpop.f32.mrf.mxu1  ;;  %v5752_v30 = vpack.c.bf16 %v12693_v43, %v12688_v18  ;;  %v14586_v19 = vld [vmem:[#allocation25_spill] sm:$0xff]  ;;  %v4146_v28 = vadd.f32 %v12632_v51, %v4057_v32  ;;  %v4606_v33 = vld [vmem:[#allocation4 + $0x51] sm:$0xff]  ;;  %v4605_v55 = vld [vmem:[#allocation4 + $0x49] sm:$0xff] }
 0x533   : > { %6069 = vmatmul.bf16.gmra.mxu3 %v5727_v41  ;;  %v4321_v10 = vadd.f32 %v4320_v12, %v4232_v38  ;;  %9223 = vrot.lane.b32.xlu1 %v9222_v50, %s9524_s23  ;;  %v3970_v29 = vadd.f32 %v12344_v46, %v14586_v19  ;;  %v9011_v13 = vunpack.i.h.bf16 %v12677_v39  ;;  %v9010_v23 = vunpack.i.l.bf16 %v12677_v39  ;;  %v9419_v41 = vld [vmem:[#allocation4 + $0x48] sm:$0xff]  ;;  %v4489_v43 = vld [vmem:[#allocation4 + $0xc0] sm:$0xff] }
 0x534   : > { %9233 = vrot.lane.b32.xlu0 %v9232_v22, %s9523_s30  ;;  %5985 = vmatmul.bf16.gmra.mxu2 %v5729_v31  ;;  %v4235_v63 = vadd.f32 %v4234_v3, %v4146_v28  ;;  %v8991_v46 = vunpack.i.h.bf16 %v12649_v6  ;;  %v8990_v51 = vunpack.i.l.bf16 %v12649_v6  ;;  %v5536_v14 = vsel %vm4440_vm9, %v9419_v41, %v8985_v9  ;;  %v12736_v38 = vpop.f32.mrf.mxu2 }
 0x535   : > { %9228 = vrot.lane.b32.xlu2 %v9227_v37, %s9523_s30  ;;  %v12708_v4 = vpop.permute.xlu1 %9018  ;;  %vm4366_vm4 = vcmp.ge.f32.partialorder %v4321_v10, 0.0  ;;  %v4398_v25 = vmul.f32 0.2, %v4321_v10  ;;  %8095 = vmatmul.msk.bf16.gmra.mxu0 %vm4440_vm9, %v5737_v44  ;;  %v4059_v53 = vadd.f32 %v12654_v58, %v3970_v29  ;;  %v5537_v58 = vsel %vm4440_vm9, %v12322_v42, %v8986_v52 }
 0x536   : > { %v12711_v2 = vpop.permute.xlu0 %9013  ;;  %v12713_v20 = vpop.permute.xlu2 %9063  ;;  %v9025_v6 = vunpack.i.l.bf16 %v12619_v1  ;;  %v5632_v3 = vsel %vm4440_vm9, %v4606_v33, %v9011_v13  ;;  %v5631_v31 = vsel %vm4440_vm9, %v4605_v55, %v9010_v23  ;;  %v5568_v32 = vsel %vm593_vm6, %v5536_v14, %v8990_v51 }
 0x537   : > { %v4430_v16 = vsel %vm4366_vm4, %v4321_v10, %v4398_v25  ;;  %v4148_v44 = vadd.f32 %v12665_v45, %v4059_v53  ;;  %v9026_v45 = vunpack.i.h.bf16 %v12619_v1  ;;  %v5569_v1 = vsel %vm593_vm6, %v5537_v58, %v8991_v46  ;;  %v12749_v29 = vld [vmem:[#allocation4 + $0x120] sm:$0xff] }
 0x538   : > { %4464 = vst.msk [vmem:[#allocation4 + $0x129] sm:$0xff] %vm4440_vm9, %v4430_v16  ;;  %v5663_v13 = vsel %vm593_vm6, %v5631_v31, %v9025_v6  ;;  %v4529_v51 = vld [vmem:[#allocation4 + $0x121] sm:$0xff]  ;;  %v12773_v31 = vld [vmem:[%s14505_s4] ss:$0 sm:$0xff]  ;;  %v9021_v47 = vunpack.i.h.bf16 %v12708_v4 }
 0x539   : > { %v5664_v41 = vsel %vm593_vm6, %v5632_v3, %v9026_v45 }
 0x53a   : > { %v4236_v49 = vpop.f32.mrf.mxu0  ;;  %v4323_v60 = vpop.f32.mrf.mxu1 }
 0x53b   : > { %v4324_v39 = vadd.f32 %v4323_v60, %v4235_v63  ;;  %9238 = vrot.lane.b32.xlu1 %v9222_v50, %s9525_s27  ;;  %v4237_v23 = vadd.f32 %v4236_v49, %v4148_v44 }
 0x53c   : > { %9248 = vrot.lane.b32.xlu0 %v9227_v37, %s9524_s23  ;;  %v12745_v37 = vpop.f32.mrf.mxu3 }
 0x53d   : > { %9243 = vrot.lane.b32.xlu2 %v9232_v22, %s9525_s27  ;;  %v9034_v42 = vpop.permute.xlu1 %9033  ;;  %vm4367_vm5 = vcmp.ge.f32.partialorder %v4324_v39, 0.0  ;;  %v4399_v12 = vmul.f32 0.2, %v4324_v39 }
 0x53e   : > { %v9036_v54 = vunpack.i.h.bf16 %v9034_v42  ;;  %v9035_v26 = vunpack.i.l.bf16 %v9034_v42  ;;  %v9029_v50 = vpop.permute.xlu0 %9028  ;;  %v12743_v10 = vpop.permute.xlu2 %9073  ;;  %v14587_v42 = vld [vmem:[#allocation26_spill] sm:$0xff] }
 0x53f   : > { %v9031_v25 = vunpack.i.h.bf16 %v9029_v50  ;;  %v9030_v19 = vunpack.i.l.bf16 %v9029_v50  ;;  %v4431_v28 = vsel %vm4367_vm5, %v4324_v39, %v4399_v12  ;;  %v12751_v22 = vld [vmem:[#allocation4 + $0x128] sm:$0xff]  ;;  %v3973_v45 = vadd.f32 %v12773_v31, %v14587_v42 }
 0x540   : > { %v12753_v52 = vld [vmem:[#allocation4 + $0x122] sm:$0xff]  ;;  %v12755_v9 = vld [vmem:[#allocation4 + $0x12a] sm:$0xff]  ;;  %v5601_v16 = vsel %vm5594_vm15, %v5568_v32, %v9035_v26  ;;  %v5602_v53 = vsel %vm5594_vm15, %v5569_v1, %v9036_v54  ;;  %4465 = vst.msk [vmem:[#allocation4 + $0x139] sm:$0xff] %vm4440_vm9, %v4431_v28  ;;  %v9262_v63 = vpack.i.bf16 %v12751_v22, %v12749_v29  ;;  %v9015_v12 = vunpack.i.l.bf16 %v12711_v2 }
 0x541   : > { %v9257_v46 = vpack.i.bf16 %v12755_v9, %v12753_v52  ;;  %v4530_v60 = vld [vmem:[#allocation4 + $0x129] sm:$0xff]  ;;  %v5732_v33 = vpack.c.bf16 %v5602_v53, %v5601_v16  ;;  %v5695_v55 = vsel %vm5594_vm15, %v5663_v13, %v9030_v19  ;;  %v5696_v39 = vsel %vm5594_vm15, %v5664_v41, %v9031_v25  ;;  %v12791_v19 = vpop.f32.mrf.mxu2  ;;  %v9424_v42 = vld [vmem:[#allocation4 + $0x61] sm:$0xff] }
 0x542   : > { %v4239_v14 = vpop.f32.mrf.mxu0  ;;  %v9252_v58 = vpack.i.bf16 %v4530_v60, %v4529_v51  ;;  %v4325_v49 = vpop.f32.mrf.mxu1  ;;  %v5730_v44 = vpack.c.bf16 %v5696_v39, %v5695_v55  ;;  %v5755_v6 = vpack.c.bf16 %v12755_v9, %v12753_v52  ;;  %v4062_v26 = vadd.f32 %v12697_v21, %v3973_v45  ;;  %v9429_v9 = vld [vmem:[#allocation4 + $0xe0] sm:$0xff] }
 0x543   : > { %v4326_v3 = vadd.f32 %v4325_v49, %v4237_v23  ;;  %9263 = vrot.lane.b32.xlu1 %v9262_v63, %s9523_s30  ;;  %v9016_v50 = vunpack.i.h.bf16 %v12711_v2  ;;  %v9041_v16 = vunpack.i.h.bf16 %v12651_v11  ;;  %v9020_v21 = vunpack.i.l.bf16 %v12708_v4  ;;  %v9423_v49 = vld [vmem:[#allocation4 + $0x69] sm:$0xff] }
 0x544   : > { %9258 = vrot.lane.b32.xlu0 %v9257_v46, %s9523_s30  ;;  %5990 = vmatmul.bf16.gmra.mxu2 %v5732_v33  ;;  %v4151_v28 = vadd.f32 %v12705_v15, %v4062_v26  ;;  %v3975_v53 = vadd.f32 %v12773_v31, %v12135_v24  ;;  %v12798_v13 = vpop.f32.mrf.mxu3  ;;  %v9040_v23 = vunpack.i.l.bf16 %v12651_v11  ;;  %v9422_v15 = vld [vmem:[#allocation4 + $0x68] sm:$0xff] }
 0x545   : > { %9253 = vrot.lane.b32.xlu2 %v9252_v58, %s9524_s23  ;;  %v12781_v54 = vpop.permute.xlu1 %9043  ;;  %vm4368_vm7 = vcmp.ge.f32.partialorder %v4326_v3, 0.0  ;;  %v4400_v32 = vmul.f32 0.2, %v4326_v3  ;;  %6074 = vmatmul.bf16.gmra.mxu3 %v5730_v44  ;;  %v5539_v51 = vsel %vm4440_vm9, %v9422_v15, %v9016_v50  ;;  %v5634_v11 = vsel %vm4440_vm9, %v9423_v49, %v9041_v16 }
 0x546   : > { %v9054_v1 = vpop.permute.xlu0 %9053  ;;  %v12785_v25 = vpop.permute.xlu2 %9088  ;;  %8096 = vmatmul.msk.bf16.gmra.mxu0 %vm4440_vm9, %v5740_v0  ;;  %v5538_v0 = vsel %vm4440_vm9, %v9421_v35, %v9015_v12  ;;  %v4240_v60 = vadd.f32 %v4239_v14, %v4151_v28  ;;  %v4064_v33 = vadd.f32 %v12736_v38, %v3975_v53  ;;  %v5633_v45 = vsel %vm4440_vm9, %v9424_v42, %v9040_v23 }
 0x547   : > { %v4432_v2 = vsel %vm4368_vm7, %v4326_v3, %v4400_v32  ;;  %v9056_v55 = vunpack.i.h.bf16 %v9054_v1  ;;  %v9055_v24 = vunpack.i.l.bf16 %v9054_v1  ;;  %v5570_v4 = vsel %vm593_vm6, %v5538_v0, %v9020_v21 }
 0x548   : > { %4466 = vst.msk [vmem:[#allocation4 + $0x141] sm:$0xff] %vm4440_vm9, %v4432_v2  ;;  %v9066_v14 = vunpack.i.h.bf16 %v12713_v20  ;;  %v9065_v38 = vunpack.i.l.bf16 %v12713_v20  ;;  %v5571_v12 = vsel %vm593_vm6, %v5539_v51, %v9021_v47  ;;  %v4153_v1 = vadd.f32 %v12745_v37, %v4064_v33  ;;  %v12822_v20 = vld [vmem:[#allocation4 + $0x139] sm:$0xff] }
 0x549   : > { %v5665_v28 = vsel %vm593_vm6, %v5633_v45, %v9055_v24  ;;  %v5666_v16 = vsel %vm593_vm6, %v5634_v11, %v9056_v55  ;;  %v4068_v0 = vpop.f32.mrf.mxu2  ;;  %v3978_v45 = vadd.f32 %v12773_v31, %v12139_v57  ;;  %v9045_v57 = vunpack.i.l.bf16 %v12781_v54 }
 0x54a   : > { %v4241_v41 = vpop.f32.mrf.mxu0  ;;  %v4328_v39 = vpop.f32.mrf.mxu1  ;;  %v5604_v47 = vsel %vm5594_vm15, %v5571_v12, %v9066_v14 }
 0x54b   : > { %v4329_v44 = vadd.f32 %v4328_v39, %v4240_v60  ;;  %9278 = vrot.lane.b32.xlu1 %v9257_v46, %s9524_s23  ;;  %v4688_v60 = vld [vmem:[#allocation4 + $0x138] sm:$0xff]  ;;  %v4242_v55 = vadd.f32 %v4241_v41, %v4153_v1 }
 0x54c   : > { %9273 = vrot.lane.b32.xlu0 %v9262_v63, %s9525_s27 }
 0x54d   : > { %9268 = vrot.lane.b32.xlu2 %v9252_v58, %s9525_s27  ;;  %v9059_v3 = vpop.permute.xlu1 %9058  ;;  %vm4369_vm8 = vcmp.ge.f32.partialorder %v4329_v44, 0.0  ;;  %v4401_v26 = vmul.f32 0.2, %v4329_v44  ;;  %v5603_v58 = vsel %vm5594_vm15, %v5570_v4, %v9065_v38  ;;  %v4067_v38 = vadd.f32 %v12791_v19, %v3978_v45 }
 0x54e   : > { %v9061_v50 = vunpack.i.h.bf16 %v9059_v3  ;;  %v9060_v46 = vunpack.i.l.bf16 %v9059_v3  ;;  %v12815_v32 = vpop.permute.xlu0 %9068  ;;  %v12817_v63 = vpop.permute.xlu2 %9113  ;;  %v5735_v42 = vpack.c.bf16 %v5604_v47, %v5603_v58 }
 0x54f   : > { %v4433_v21 = vsel %vm4369_vm8, %v4329_v44, %v4401_v26  ;;  %v12825_v2 = vld [vmem:[#allocation4 + $0x13a] sm:$0xff]  ;;  %v12827_v53 = vld [vmem:[#allocation4 + $0x142] sm:$0xff]  ;;  %v4157_v44 = vpop.f32.mrf.mxu3  ;;  %v9070_v19 = vunpack.i.l.bf16 %v12815_v32 }
 0x550   : > { %v12829_v23 = vld [vmem:[#allocation4 + $0x141] sm:$0xff]  ;;  %v5697_v35 = vsel %vm5594_vm15, %v5665_v28, %v9060_v46  ;;  %v5698_v37 = vsel %vm5594_vm15, %v5666_v16, %v9061_v50  ;;  %4467 = vst.msk [vmem:[#allocation4 + $0x151] sm:$0xff] %vm4440_vm9, %v4433_v21  ;;  %v9287_v15 = vpack.i.bf16 %v12827_v53, %v12825_v2  ;;  %v5758_v11 = vpack.c.bf16 %v12827_v53, %v12825_v2 }
 0x551   : > { %v9282_v51 = vpack.i.bf16 %v12829_v23, %v12822_v20  ;;  %v4689_v33 = vld [vmem:[#allocation4 + $0x140] sm:$0xff]  ;;  %v5733_v49 = vpack.c.bf16 %v5698_v37, %v5697_v35  ;;  %v4156_v50 = vadd.f32 %v12798_v13, %v4067_v38  ;;  %v9071_v46 = vunpack.i.h.bf16 %v12815_v32  ;;  %v4071_v35 = vpop.f32.mrf.mxu2 }
 0x552   : > { %v4244_v24 = vpop.f32.mrf.mxu0  ;;  %v9292_v39 = vpack.i.bf16 %v4689_v33, %v4688_v60  ;;  %v4330_v4 = vpop.f32.mrf.mxu1  ;;  %v3980_v28 = vadd.f32 %v12773_v31, %v12165_v36  ;;  %v9046_v16 = vunpack.i.h.bf16 %v12781_v54  ;;  %v5540_v13 = vsel %vm4440_vm9, %v4483_v8, %v9045_v57  ;;  %v4609_v37 = vld [vmem:[#allocation4 + $0x79] sm:$0xff]  ;;  %v4610_v60 = vld [vmem:[#allocation4 + $0x81] sm:$0xff] }
 0x553   : > { %v4331_v14 = vadd.f32 %v4330_v4, %v4242_v55  ;;  %9288 = vrot.lane.b32.xlu1 %v9287_v15, %s9523_s30  ;;  %v9051_v33 = vunpack.i.h.bf16 %v12683_v34  ;;  %v4484_v55 = vld [vmem:[#allocation4 + $0x80] sm:$0xff]  ;;  %v5636_v36 = vsel %vm4440_vm9, %v4610_v60, %v9071_v46  ;;  %v5635_v54 = vsel %vm4440_vm9, %v4609_v37, %v9070_v19 }
 0x554   : > { %9283 = vrot.lane.b32.xlu0 %v9282_v51, %s9524_s23  ;;  %5995 = vmatmul.bf16.gmra.mxu2 %v5735_v42  ;;  %v4069_v47 = vadd.f32 %v4068_v0, %v3980_v28  ;;  %v9050_v0 = vunpack.i.l.bf16 %v12683_v34  ;;  %v5541_v4 = vsel %vm4440_vm9, %v4484_v55, %v9046_v16  ;;  %v9090_v38 = vunpack.i.l.bf16 %v12785_v25 }
 0x555   : > { %9293 = vrot.lane.b32.xlu2 %v9292_v39, %s9523_s30  ;;  %v9084_v41 = vpop.permute.xlu1 %9083  ;;  %vm4370_vm10 = vcmp.ge.f32.partialorder %v4331_v14, 0.0  ;;  %v4402_v3 = vmul.f32 0.2, %v4331_v14  ;;  %6079 = vmatmul.bf16.gmra.mxu3 %v5733_v49 }
 0x556   : > { %v12847_v12 = vpop.permute.xlu0 %9078  ;;  %v12849_v26 = vpop.permute.xlu2 %9128  ;;  %8097 = vmatmul.msk.bf16.gmra.mxu0 %vm4440_vm9, %v5743_v7  ;;  %v9086_v58 = vunpack.i.h.bf16 %v9084_v41  ;;  %v9085_v5 = vunpack.i.l.bf16 %v9084_v41  ;;  %v4245_v7 = vadd.f32 %v4244_v24, %v4156_v50  ;;  %v9091_v41 = vunpack.i.h.bf16 %v12785_v25 }
 0x557   : > { %v4434_v1 = vsel %vm4370_vm10, %v4331_v14, %v4402_v3  ;;  %v4160_v24 = vpop.f32.mrf.mxu3  ;;  %v4158_v34 = vadd.f32 %v4157_v44, %v4069_v47  ;;  %v4533_v46 = vld [vmem:[#allocation4 + $0x151] sm:$0xff] }
 0x558   : > { %4468 = vst.msk [vmem:[#allocation4 + $0x159] sm:$0xff] %vm4440_vm9, %v4434_v1  ;;  %v5667_v42 = vsel %vm593_vm6, %v5635_v54, %v9085_v5  ;;  %v5668_v45 = vsel %vm593_vm6, %v5636_v36, %v9086_v58  ;;  %v4690_v19 = vld [vmem:[#allocation4 + $0x150] sm:$0xff]  ;;  %v5572_v1 = vsel %vm593_vm6, %v5540_v13, %v9050_v0  ;;  %v5573_v5 = vsel %vm593_vm6, %v5541_v4, %v9051_v33 }
 0x559   : > { %v5699_v25 = vsel %vm5594_vm15, %v5667_v42, %v9090_v38  ;;  %v5700_v8 = vsel %vm5594_vm15, %v5668_v45, %v9091_v41  ;;  %v4073_v42 = vpop.f32.mrf.mxu2 }
 0x55a   : > { %v4246_v21 = vpop.f32.mrf.mxu0  ;;  %v4333_v32 = vpop.f32.mrf.mxu1  ;;  %v5736_v4 = vpack.c.bf16 %v5700_v8, %v5699_v25  ;;  %v4612_v25 = vld [vmem:[#allocation4 + $0x99] sm:$0xff] }
 0x55b   : > { %v4334_v49 = vadd.f32 %v4333_v32, %v4245_v7  ;;  %9303 = vrot.lane.b32.xlu1 %v9292_v39, %s9525_s27  ;;  %v4247_v60 = vadd.f32 %v4246_v21, %v4158_v34 }
 0x55c   : > { %9298 = vrot.lane.b32.xlu0 %v9282_v51, %s9525_s27 }
 0x55d   : > { %9308 = vrot.lane.b32.xlu2 %v9287_v15, %s9524_s23  ;;  %v12874_v14 = vpop.permute.xlu1 %9098  ;;  %vm4371_vm11 = vcmp.ge.f32.partialorder %v4334_v49, 0.0  ;;  %v4403_v39 = vmul.f32 0.2, %v4334_v49 }
 0x55e   : > { %v9094_v51 = vpop.permute.xlu0 %9093  ;;  %v12878_v3 = vpop.permute.xlu2 %9138 }
 0x55f   : > { %v9096_v57 = vunpack.i.h.bf16 %v9094_v51  ;;  %v9095_v50 = vunpack.i.l.bf16 %v9094_v51  ;;  %v4435_v28 = vsel %vm4371_vm11, %v4334_v49, %v4403_v39  ;;  %v4534_v15 = vld [vmem:[#allocation4 + $0x159] sm:$0xff]  ;;  %v3983_v49 = vadd.f32 %v12773_v31, %v12170_v17  ;;  %v4162_v34 = vpop.f32.mrf.mxu3 }
 0x560   : > { %v4691_v16 = vld [vmem:[#allocation4 + $0x158] sm:$0xff]  ;;  %4469 = vst.msk [vmem:[#allocation4 + $0x169] sm:$0xff] %vm4440_vm9, %v4435_v28  ;;  %v9312_v44 = vpack.i.bf16 %v4534_v15, %v4533_v46  ;;  %v3985_v17 = vadd.f32 %v12773_v31, %v12185_v27  ;;  %v9081_v28 = vunpack.i.h.bf16 %v12847_v12  ;;  %v9080_v27 = vunpack.i.l.bf16 %v12847_v12 }
 0x561   : > { %v12881_v58 = vld [vmem:[#allocation4 + $0x152] sm:$0xff]  ;;  %v9322_v7 = vpack.i.bf16 %v4691_v16, %v4690_v19  ;;  %v12887_v47 = vld [vmem:[#allocation4 + $0x15a] sm:$0xff]  ;;  %v5605_v37 = vsel %vm5594_vm15, %v5572_v1, %v9095_v50  ;;  %v5606_v13 = vsel %vm5594_vm15, %v5573_v5, %v9096_v57  ;;  %v4072_v45 = vadd.f32 %v4071_v35, %v3983_v49 }
 0x562   : > { %v4249_v32 = vpop.f32.mrf.mxu0  ;;  %v9317_v55 = vpack.i.bf16 %v12887_v47, %v12881_v58  ;;  %v5738_v33 = vpack.c.bf16 %v5606_v13, %v5605_v37  ;;  %v4335_v36 = vpop.f32.mrf.mxu1  ;;  %v5761_v54 = vpack.c.bf16 %v12887_v47, %v12881_v58  ;;  %v9076_v57 = vunpack.i.h.bf16 %v12743_v10  ;;  %v4611_v5 = vld [vmem:[#allocation4 + $0x91] sm:$0xff]  ;;  %v13175_v58 = vld [vmem:[%s14508_s7 + $0x3] ss:$0 sm:$0xff] }
 0x563   : > { %v4336_v0 = vadd.f32 %v4335_v36, %v4247_v60  ;;  %9313 = vrot.lane.b32.xlu1 %v9312_v44, %s9524_s23  ;;  %v4161_v51 = vadd.f32 %v4160_v24, %v4072_v45  ;;  %v9075_v35 = vunpack.i.l.bf16 %v12743_v10  ;;  %v4074_v46 = vadd.f32 %v4073_v42, %v3985_v17  ;;  %v9425_v24 = vld [vmem:[#allocation4 + $0x98] sm:$0xff]  ;;  %v9426_v10 = vld [vmem:[#allocation4 + $0x90] sm:$0xff] }
 0x564   : > { %9323 = vrot.lane.b32.xlu0 %v9322_v7, %s9523_s30  ;;  %6000 = vmatmul.bf16.gmra.mxu2 %v5738_v33  ;;  %v9101_v19 = vunpack.i.h.bf16 %v12874_v14  ;;  %v9100_v1 = vunpack.i.l.bf16 %v12874_v14  ;;  %v5543_v15 = vsel %vm4440_vm9, %v9425_v24, %v9076_v57  ;;  %v9116_v14 = vunpack.i.h.bf16 %v12817_v63 }
 0x565   : > { %9318 = vrot.lane.b32.xlu2 %v9317_v55, %s9523_s30  ;;  %v12900_v21 = vpop.permute.xlu1 %9108  ;;  %vm4372_vm12 = vcmp.ge.f32.partialorder %v4336_v0, 0.0  ;;  %v4404_v41 = vmul.f32 0.2, %v4336_v0  ;;  %6084 = vmatmul.bf16.gmra.mxu3 %v5736_v4  ;;  %v4250_v56 = vadd.f32 %v4249_v32, %v4161_v51  ;;  %v5542_v16 = vsel %vm4440_vm9, %v9426_v10, %v9075_v35 }
 0x566   : > { %v12902_v38 = vpop.permute.xlu0 %9103  ;;  %v12904_v39 = vpop.permute.xlu2 %9153  ;;  %8098 = vmatmul.msk.bf16.gmra.mxu0 %vm4440_vm9, %v5746_v48  ;;  %v4163_v48 = vadd.f32 %v4162_v34, %v4074_v46  ;;  %v9115_v37 = vunpack.i.l.bf16 %v12817_v63  ;;  %v5638_v12 = vsel %vm4440_vm9, %v4612_v25, %v9101_v19  ;;  %v5637_v13 = vsel %vm4440_vm9, %v4611_v5, %v9100_v1 }
 0x567   : > { %v4436_v50 = vsel %vm4372_vm12, %v4336_v0, %v4404_v41  ;;  %v12932_v42 = vld [vmem:[#allocation4 + $0x168] sm:$0xff]  ;;  %v9106_v25 = vunpack.i.h.bf16 %v12902_v38 }
 0x568   : > { %4470 = vst.msk [vmem:[#allocation4 + $0x171] sm:$0xff] %vm4440_vm9, %v4436_v50  ;;  %v5669_v57 = vsel %vm593_vm6, %v5637_v13, %v9115_v37  ;;  %v4535_v19 = vld [vmem:[#allocation4 + $0x169] sm:$0xff] }
 0x56a   : > { %v4251_v40 = vpop.f32.mrf.mxu0  ;;  %v4338_v31 = vpop.f32.mrf.mxu1 }
 0x56b   : > { %v4339_v8 = vadd.f32 %v4338_v31, %v4250_v56  ;;  %9328 = vrot.lane.b32.xlu1 %v9312_v44, %s9525_s27  ;;  %v5574_v44 = vsel %vm593_vm6, %v5542_v16, %v9080_v27  ;;  %v4252_v35 = vadd.f32 %v4251_v40, %v4163_v48  ;;  %v5670_v56 = vsel %vm593_vm6, %v5638_v12, %v9116_v14 }
 0x56c   : > { %9338 = vrot.lane.b32.xlu0 %v9317_v55, %s9524_s23  ;;  %v5575_v55 = vsel %vm593_vm6, %v5543_v15, %v9081_v28 }
 0x56d   : > { %9333 = vrot.lane.b32.xlu2 %v9322_v7, %s9525_s27  ;;  %v9124_v60 = vpop.permute.xlu1 %9123  ;;  %vm4373_vm13 = vcmp.ge.f32.partialorder %v4339_v8, 0.0  ;;  %v4405_v32 = vmul.f32 0.2, %v4339_v8 }
 0x56e   : > { %v9126_v33 = vunpack.i.h.bf16 %v9124_v60  ;;  %v9125_v36 = vunpack.i.l.bf16 %v9124_v60  ;;  %v9119_v49 = vpop.permute.xlu0 %9118  ;;  %v12928_v0 = vpop.permute.xlu2 %9163  ;;  %v9131_v60 = vunpack.i.h.bf16 %v12849_v26 }
 0x56f   : > { %v9121_v4 = vunpack.i.h.bf16 %v9119_v49  ;;  %v9120_v63 = vunpack.i.l.bf16 %v9119_v49  ;;  %v4437_v45 = vsel %vm4373_vm13, %v4339_v8, %v4405_v32  ;;  %v12934_v41 = vld [vmem:[#allocation4 + $0x170] sm:$0xff]  ;;  %v9105_v8 = vunpack.i.l.bf16 %v12902_v38 }
 0x570   : > { %v12936_v7 = vld [vmem:[#allocation4 + $0x16a] sm:$0xff]  ;;  %v12938_v17 = vld [vmem:[#allocation4 + $0x172] sm:$0xff]  ;;  %v5607_v51 = vsel %vm5594_vm15, %v5574_v44, %v9125_v36  ;;  %v5608_v34 = vsel %vm5594_vm15, %v5575_v55, %v9126_v33  ;;  %4471 = vst.msk [vmem:[#allocation4 + $0x181] sm:$0xff] %vm4440_vm9, %v4437_v45  ;;  %v9352_v50 = vpack.i.bf16 %v12934_v41, %v12932_v42  ;;  %v9130_v32 = vunpack.i.l.bf16 %v12849_v26 }
 0x571   : > { %v9347_v46 = vpack.i.bf16 %v12938_v17, %v12936_v7  ;;  %v4536_v1 = vld [vmem:[#allocation4 + $0x171] sm:$0xff]  ;;  %v5741_v31 = vpack.c.bf16 %v5608_v34, %v5607_v51  ;;  %v5701_v24 = vsel %vm5594_vm15, %v5669_v57, %v9120_v63  ;;  %v5702_v40 = vsel %vm5594_vm15, %v5670_v56, %v9121_v4  ;;  %v4487_v36 = vld [vmem:[#allocation4 + $0xa8] sm:$0xff] }
 0x572   : > { %v12949_v28 = vpop.f32.mrf.mxu0  ;;  %v9342_v27 = vpack.i.bf16 %v4536_v1, %v4535_v19  ;;  %v4340_v48 = vpop.f32.mrf.mxu1  ;;  %v5739_v15 = vpack.c.bf16 %v5702_v40, %v5701_v24  ;;  %v5764_v10 = vpack.c.bf16 %v12938_v17, %v12936_v7  ;;  %v9111_v33 = vunpack.i.h.bf16 %v12900_v21  ;;  %v4488_v49 = vld [vmem:[#allocation4 + $0xb0] sm:$0xff] }
 0x573   : > { %v4341_v16 = vadd.f32 %v4340_v48, %v4252_v35  ;;  %9353 = vrot.lane.b32.xlu1 %v9352_v50, %s9523_s30  ;;  %v9110_v38 = vunpack.i.l.bf16 %v12900_v21  ;;  %v5545_v44 = vsel %vm4440_vm9, %v4488_v49, %v9106_v25  ;;  %v5544_v55 = vsel %vm4440_vm9, %v4487_v36, %v9105_v8  ;;  %v9427_v26 = vld [vmem:[#allocation4 + $0xb1] sm:$0xff]  ;;  %v9428_v21 = vld [vmem:[#allocation4 + $0xa9] sm:$0xff] }
 0x574   : > { %9348 = vrot.lane.b32.xlu0 %v9347_v46, %s9523_s30  ;;  %6005 = vmatmul.bf16.gmra.mxu2 %v5741_v31  ;;  %v5640_v4 = vsel %vm4440_vm9, %v9427_v26, %v9131_v60  ;;  %v5639_v63 = vsel %vm4440_vm9, %v9428_v21, %v9130_v32  ;;  %v5577_v34 = vsel %vm593_vm6, %v5545_v44, %v9111_v33  ;;  %v9156_v57 = vunpack.i.h.bf16 %v12904_v39  ;;  %v4696_v36 = vld [vmem:[#allocation4 + $0x198] sm:$0xff]  ;;  %v4697_v44 = vld [vmem:[#allocation4 + $0x1a0] sm:$0xff] }
 0x575   : > { %9343 = vrot.lane.b32.xlu2 %v9342_v27, %s9524_s23  ;;  %v12958_v5 = vpop.permute.xlu1 %9133  ;;  %vm4374_vm14 = vcmp.ge.f32.partialorder %v4341_v16, 0.0  ;;  %v4406_v14 = vmul.f32 0.2, %v4341_v16  ;;  %6089 = vmatmul.bf16.gmra.mxu3 %v5739_v15  ;;  %v5576_v51 = vsel %vm593_vm6, %v5544_v55, %v9110_v38  ;;  %v9155_v35 = vunpack.i.l.bf16 %v12904_v39  ;;  %v4728_v55 = vld [vmem:[#allocation4 + $0x199] sm:$0xff] }
 0x576   : > { %v9144_v37 = vpop.permute.xlu0 %9143  ;;  %v12962_v12 = vpop.permute.xlu2 %9178  ;;  %8099 = vmatmul.msk.bf16.gmra.mxu0 %vm4440_vm9, %v5749_v61  ;;  %v9392_v21 = vpack.i.bf16 %v4697_v44, %v4696_v36 }
 0x577   : > { %v4438_v13 = vsel %vm4374_vm14, %v4341_v16, %v4406_v14  ;;  %v9146_v59 = vunpack.i.h.bf16 %v9144_v37  ;;  %v9145_v61 = vunpack.i.l.bf16 %v9144_v37  ;;  %v4599_v24 = vld [vmem:[#allocation4 + $0x180] sm:$0xff]  ;;  %v5609_v15 = vsel %vm5594_vm15, %v5576_v51, %v9155_v35 }
 0x578   : > { %4472 = vst.msk [vmem:[#allocation4 + $0x189] sm:$0xff] %vm4440_vm9, %v4438_v13  ;;  %v5610_v16 = vsel %vm5594_vm15, %v5577_v34, %v9156_v57 }
 0x579   : > { %v5671_v1 = vsel %vm593_vm6, %v5639_v63, %v9145_v61  ;;  %v5672_v56 = vsel %vm593_vm6, %v5640_v4, %v9146_v59  ;;  %v5744_v38 = vpack.c.bf16 %v5610_v16, %v5609_v15  ;;  %v4729_v59 = vld [vmem:[#allocation4 + $0x1a1] sm:$0xff]  ;;  %v9136_v4 = vunpack.i.h.bf16 %v12958_v5 }
 0x57a   : > { %v12975_v62 = vpop.f32.mrf.mxu0  ;;  %v9397_v63 = vpack.i.bf16 %v4729_v59, %v4728_v55  ;;  %v9141_v15 = vunpack.i.h.bf16 %v12878_v3  ;;  %v9140_v16 = vunpack.i.l.bf16 %v12878_v3 }
 0x57b   : > { %9368 = vrot.lane.b32.xlu1 %v9347_v46, %s9524_s23 }
 0x57c   : > { %9363 = vrot.lane.b32.xlu0 %v9352_v50, %s9525_s27 }
 0x57d   : > { %9358 = vrot.lane.b32.xlu2 %v9342_v27, %s9525_s27  ;;  %v9149_v45 = vpop.permute.xlu1 %9148  ;;  %v4726_v27 = vld [vmem:[#allocation4 + $0x181] sm:$0xff] }
 0x57e   : > { %v9151_v46 = vunpack.i.h.bf16 %v9149_v45  ;;  %v9150_v19 = vunpack.i.l.bf16 %v9149_v45  ;;  %v9159_v50 = vpop.permute.xlu0 %9158  ;;  %v12988_v31 = vpop.permute.xlu2 %9203  ;;  %v9135_v45 = vunpack.i.l.bf16 %v12958_v5 }
 0x57f   : > { %v4600_v40 = vld [vmem:[#allocation4 + $0x188] sm:$0xff]  ;;  %v9161_v51 = vunpack.i.h.bf16 %v9159_v50  ;;  %v9160_v34 = vunpack.i.l.bf16 %v9159_v50 }
 0x580   : > { %v12990_v48 = vld [vmem:[#allocation4 + $0x189] sm:$0xff]  ;;  %v5703_v39 = vsel %vm5594_vm15, %v5671_v1, %v9150_v19  ;;  %v5704_v25 = vsel %vm5594_vm15, %v5672_v56, %v9151_v46  ;;  %v9382_v14 = vpack.i.bf16 %v4600_v40, %v4599_v24  ;;  %v4615_v1 = vld [vmem:[#allocation4 + $0xc1] sm:$0xff]  ;;  %v5546_v5 = vsel %vm4440_vm9, %v4489_v43, %v9135_v45 }
 0x581   : > { %v12996_v8 = vld [vmem:[#allocation4 + $0x182] sm:$0xff]  ;;  %v9377_v37 = vpack.i.bf16 %v12990_v48, %v4726_v27  ;;  %v12999_v13 = vld [vmem:[#allocation4 + $0x18a] sm:$0xff]  ;;  %v5742_v32 = vpack.c.bf16 %v5704_v25, %v5703_v39  ;;  %v5641_v24 = vsel %vm4440_vm9, %v4615_v1, %v9160_v34  ;;  %v9526_v40 = vmov 0  }
 0x582   : > { %v13001_v60 = vpop.f32.mrf.mxu0  ;;  %v5767_v33 = vpack.c.bf16 %v12999_v13, %v12996_v8  ;;  %v4490_v46 = vld [vmem:[#allocation4 + $0xc8] sm:$0xff]  ;;  %v9387_v18 = vpack.i.bf16 %v12999_v13, %v12996_v8  ;;  %9403 = vset.pattern.permute.xlu0 %v9526_v40  ;;  %9402 = vset.pattern.permute.xlu2 %v9526_v40  ;;  %v5578_v44 = vsel %vm593_vm6, %v5546_v5, %v9140_v16  ;;  %v9165_v1 = vunpack.i.l.bf16 %v12928_v0 }
 0x583   : > { %9383 = vrot.lane.b32.xlu1 %v9382_v14, %s9525_s27  ;;  %v4616_v56 = vld [vmem:[#allocation4 + $0xc9] sm:$0xff]  ;;  %v9206_v16 = vunpack.i.h.bf16 %v12988_v31 }
 0x584   : > { %9378 = vrot.lane.b32.xlu0 %v9377_v37, %s9525_s27  ;;  %6010 = vmatmul.bf16.gmra.mxu2 %v5744_v38  ;;  %v5642_v50 = vsel %vm4440_vm9, %v4616_v56, %v9161_v51  ;;  %v9181_v37 = vunpack.i.h.bf16 %v12962_v12 }
 0x585   : > { %9373 = vrot.lane.b32.xlu2 %v9382_v14, %s9523_s30  ;;  %v9174_v49 = vpop.permute.xlu1 %9173  ;;  %6094 = vmatmul.bf16.gmra.mxu3 %v5742_v32  ;;  %v9180_v32 = vunpack.i.l.bf16 %v12962_v12 }
 0x586   : > { %v13008_v61 = vpop.permute.xlu0 %9168  ;;  %8100 = vmatmul.msk.bf16.gmra.mxu0 %vm4440_vm9, %v5752_v30  ;;  %v13014_v26 = vpop.permute.xlu2 %9218  ;;  %v9176_v57 = vunpack.i.h.bf16 %v9174_v49  ;;  %v9175_v35 = vunpack.i.l.bf16 %v9174_v49  ;;  %v5547_v30 = vsel %vm4440_vm9, %v4490_v46, %v9136_v4 }
 0x587   : > { %v5579_v55 = vsel %vm593_vm6, %v5547_v30, %v9141_v15  ;;  %v9166_v30 = vunpack.i.h.bf16 %v12928_v0  ;;  %v9171_v56 = vunpack.i.h.bf16 %v13008_v61  ;;  %v9170_v5 = vunpack.i.l.bf16 %v13008_v61  ;;  %v9430_v15 = vld [vmem:[#allocation4 + $0xd8] sm:$0xff] }
 0x588   : > { %v5673_v39 = vsel %vm593_vm6, %v5641_v24, %v9175_v35  ;;  %v5674_v25 = vsel %vm593_vm6, %v5642_v50, %v9176_v57  ;;  %v4617_v50 = vld [vmem:[#allocation4 + $0xd9] sm:$0xff]  ;;  %v4618_v24 = vld [vmem:[#allocation4 + $0xe1] sm:$0xff]  ;;  %v9205_v0 = vunpack.i.l.bf16 %v12988_v31 }
 0x589   : > { %v5705_v4 = vsel %vm5594_vm15, %v5673_v39, %v9180_v32 }
 0x58a   : > { %v13018_v19 = vpop.f32.mrf.mxu0 }
 0x58b   : > { %9398 = vrot.lane.b32.xlu1 %v9397_v63, %s9525_s27  ;;  %v9407_v63 = vld [vmem:[#allocation6] ss:$0 sm:$0xff] }
 0x58c   : > { %9393 = vrot.lane.b32.xlu0 %v9392_v21, %s9523_s30  ;;  %v5706_v21 = vsel %vm5594_vm15, %v5674_v25, %v9181_v37  ;;  %s9472_s30 = sshra.s32 %s7629_s25, 4  ;;  %s9473_s30 = int_to_ptr.hbm [resolvable:$true] %s9472_s30 }
 0x58d   : > { %9388 = vrot.lane.b32.xlu2 %v9387_v18, %s9524_s23  ;;  %v9189_v27 = vpop.permute.xlu1 %9188  ;;  %v5745_v51 = vpack.c.bf16 %v5706_v21, %v5705_v4  ;;  %s9474_s23 = scalar_lea.hbm %s9473_s30, 16  ;;  %p9479_p1 = scmp.lt.s32.totalorder %s9473_s30, %s14510_s9 }
 0x58e   : > { %v9184_v14 = vpop.permute.xlu0 %9183  ;;  %v9191_v18 = vunpack.i.h.bf16 %v9189_v27  ;;  %v9190_v43 = vunpack.i.l.bf16 %v9189_v27  ;;  %v5548_v27 = vsel %vm4440_vm9, %v9430_v15, %v9165_v1  ;;  %v13080_v1 = vld [vmem:[%s14507_s6] ss:$0 sm:$0xff]  ;;  %p9475_p12 = scmp.ne.s32.totalorder %s9473_s30, %s9474_s23  ;;  %p9480_p2 = scmp.lt.s32.totalorder %s9478_s28, %s9474_s23 }
 0x58f   : > { %v9186_v38 = vunpack.i.h.bf16 %v9184_v14  ;;  %v9185_v36 = vunpack.i.l.bf16 %v9184_v14  ;;  %v13035_v49 = vpop.permute.xlu2 %9228 }
 0x590   : > { %v5644_v40 = vsel %vm4440_vm9, %v4618_v24, %v9191_v18  ;;  %v5643_v52 = vsel %vm4440_vm9, %v4617_v50, %v9190_v43  ;;  %v6364_v24 = vld [vmem:[#allocation5] sm:$0xff]  ;;  %p9476_p13 = pnand %p9475_p12, %p9620_p5  ;;  %p9481_p3 = por %p9480_p2, %p9479_p1 }
 0x591   : > { %v5611_v3 = vsel %vm5594_vm15, %v5578_v44, %v9185_v36  ;;  %v5612_v59 = vsel %vm5594_vm15, %v5579_v55, %v9186_v38  ;;  %v5580_v44 = vsel %vm593_vm6, %v5548_v27, %v9170_v5  ;;  %v13090_v5 = vld [vmem:[%s14508_s7 + $0x1] ss:$0 sm:$0xff]  ;;  %v4493_v27 = vld [vmem:[#allocation4 + $0xf0] sm:$0xff] }
 0x592   : > { %v5747_v45 = vpack.c.bf16 %v5612_v59, %v5611_v3  ;;  %v13043_v12 = vpop.f32.mrf.mxu0  ;;  %v5675_v3 = vsel %vm593_vm6, %v5643_v52, %v9205_v0  ;;  %v5676_v59 = vsel %vm593_vm6, %v5644_v40, %v9206_v16  ;;  %v6464_v40 = vld [vmem:[#allocation5 + $0x1] sm:$0xff]  ;;  %v9221_v52 = vunpack.i.h.bf16 %v13014_v26  ;;  %p9477_p0 = pneg %p9476_p13 }
 0x593   : > { %v4494_v16 = vld [vmem:[#allocation4 + $0xf8] sm:$0xff] }
 0x594   : > { %6015 = vmatmul.bf16.gmra.mxu2 %v5747_v45  ;;  %p9482_p4 = pnand %p9481_p3, %p9477_p0 }
 0x595   : > { %7373 = vperm.xlu2 %9402, %v9407_v63   ;;  %6099 = vmatmul.bf16.gmra.mxu3 %v5745_v51  ;;  %v13045_v34 = vpop.permute.xlu1 %9198  ;;  %v5976_v46 = vpop.f32.mrf.mxu2 }
 0x596   : > { %v9194_v57 = vpop.permute.xlu0 %9193  ;;  %8101 = vmatmul.msk.bf16.gmra.mxu0 %vm4440_vm9, %v5755_v6  ;;  %v5549_v6 = vsel %vm4440_vm9, %v9429_v9, %v9166_v30  ;;  %v9220_v9 = vunpack.i.l.bf16 %v13014_v26  ;;  %v9200_v15 = vunpack.i.l.bf16 %v13045_v34  ;;  %v6501_v26 = vmul.f32 %v13090_v5, %v6464_v40  ;;  %v6465_v40 = vld [vmem:[#allocation5 + $0x9] sm:$0xff] }
 0x597   : > { %v13051_v35 = vpop.permute.xlu2 %9243  ;;  %v5581_v55 = vsel %vm593_vm6, %v5549_v6, %v9171_v56  ;;  %v9196_v43 = vunpack.i.h.bf16 %v9194_v57  ;;  %v9195_v30 = vunpack.i.l.bf16 %v9194_v57  ;;  %v13085_v56 = vld [vmem:[%s14508_s7] ss:$0 sm:$0xff]  ;;  %v9201_v6 = vunpack.i.h.bf16 %v13045_v34  ;;  %v13114_v34 = vld [vmem:[%s14508_s7 + $0x2] ss:$0 sm:$0xff] }
 0x599   : > { %v5551_v2 = vsel %vm4440_vm9, %v4494_v16, %v9196_v43  ;;  %v5550_v53 = vsel %vm4440_vm9, %v4493_v27, %v9195_v30 }
 0x59a   : > { %v13071_v4 = vpop.f32.mrf.mxu0 }
 0x59d   : > { %v9214_v39 = vpop.permute.xlu1 %9213  ;;  %v13065_v36 = vpop.f32.mrf.mxu2 }
 0x59e   : > { %v9209_v25 = vpop.permute.xlu0 %9208  ;;  %v9216_v14 = vunpack.i.h.bf16 %v9214_v39  ;;  %v9215_v61 = vunpack.i.l.bf16 %v9214_v39 }
 0x59f   : > { %v9211_v37 = vunpack.i.h.bf16 %v9209_v25  ;;  %v9210_v32 = vunpack.i.l.bf16 %v9209_v25  ;;  %v13063_v38 = vpop.permute.xlu2 %9253 }
 0x5a0   : > { %v5613_v31 = vsel %vm5594_vm15, %v5580_v44, %v9215_v61  ;;  %v5614_v21 = vsel %vm5594_vm15, %v5581_v55, %v9216_v14  ;;  %v6400_v14 = vmul.f32 %v13085_v56, %v6364_v24  ;;  %v9432_v55 = vld [vmem:[#allocation4 + $0xf1] sm:$0xff] }
 0x5a1   : > { %v5707_v63 = vsel %vm5594_vm15, %v5675_v3, %v9210_v32  ;;  %v5708_v45 = vsel %vm5594_vm15, %v5676_v59, %v9211_v37  ;;  %v5750_v51 = vpack.c.bf16 %v5614_v21, %v5613_v31  ;;  %v6565_v37 = vld [vmem:[#allocation5 + $0x2] sm:$0xff]  ;;  %v5645_v3 = vsel %vm4440_vm9, %v9432_v55, %v9220_v9 }
 0x5a2   : > { %v5748_v18 = vpack.c.bf16 %v5708_v45, %v5707_v63  ;;  %v9431_v32 = vld [vmem:[#allocation4 + $0xf9] sm:$0xff]  ;;  %v13118_v59 = vpop.f32.mrf.mxu0  ;;  %v5583_v31 = vsel %vm593_vm6, %v5551_v2, %v9201_v6  ;;  %v9246_v21 = vunpack.i.h.bf16 %v13051_v35  ;;  %v9245_v63 = vunpack.i.l.bf16 %v13051_v35 }
 0x5a3   : > { %v5646_v44 = vsel %vm4440_vm9, %v9431_v32, %v9221_v52  ;;  %v6533_v43 = vadd.f32 %v6501_v26, %v6400_v14  ;;  %v6602_v30 = vmul.f32 %v13114_v34, %v6565_v37  ;;  %v6365_v24 = vld [vmem:[#allocation5 + $0x8] sm:$0xff]  ;;  %v9256_v35 = vunpack.i.h.bf16 %v13063_v38 }
 0x5a4   : > { %6020 = vmatmul.bf16.gmra.mxu2 %v5750_v51  ;;  %v5616_v27 = vsel %vm5594_vm15, %v5583_v31, %v9246_v21  ;;  %v6401_v26 = vmul.f32 %v13085_v56, %v6365_v24  ;;  %v9255_v37 = vunpack.i.l.bf16 %v13063_v38 }
 0x5a5   : > { %6104 = vmatmul.bf16.gmra.mxu3 %v5748_v18  ;;  %v13092_v50 = vpop.permute.xlu1 %9223  ;;  %v13104_v39 = vpop.f32.mrf.mxu2 }
 0x5a6   : > { %v9234_v57 = vpop.permute.xlu0 %9233  ;;  %8102 = vmatmul.msk.bf16.gmra.mxu0 %vm4440_vm9, %v5758_v11  ;;  %v5977_v11 = vadd.f32 %v13080_v1, %v5976_v46  ;;  %v6065_v25 = vpop.f32.mrf.mxu3  ;;  %v5582_v46 = vsel %vm593_vm6, %v5550_v53, %v9200_v15  ;;  %v9226_v31 = vunpack.i.h.bf16 %v13092_v50 }
 0x5a7   : > { %v13102_v0 = vpop.permute.xlu2 %9268  ;;  %v9235_v45 = vunpack.i.l.bf16 %v9234_v57  ;;  %v9236_v18 = vunpack.i.h.bf16 %v9234_v57  ;;  %v5615_v6 = vsel %vm5594_vm15, %v5582_v46, %v9245_v63  ;;  %v6566_v46 = vld [vmem:[#allocation5 + $0xa] sm:$0xff]  ;;  %v9231_v63 = vunpack.i.h.bf16 %v13035_v49 }
 0x5a8   : > { %v6066_v61 = vadd.f32 %v6065_v25, %v5977_v11 }
 0x5a9   : > { %v5677_v11 = vsel %vm593_vm6, %v5645_v3, %v9235_v45  ;;  %v5678_v32 = vsel %vm593_vm6, %v5646_v44, %v9236_v18  ;;  %v9225_v3 = vunpack.i.l.bf16 %v13092_v50  ;;  %v9230_v44 = vunpack.i.l.bf16 %v13035_v49 }
 0x5aa   : > { %v6155_v51 = vadd.f32 %v12949_v28, %v6066_v61  ;;  %v5979_v28 = vadd.f32 %v13080_v1, %v13065_v36  ;;  %v6502_v61 = vmul.f32 %v13090_v5, %v6465_v40  ;;  %v13150_v18 = vadd.f32 %v6602_v30, %v6533_v43 }
 0x5ab   : > { %v6603_v40 = vmul.f32 %v13114_v34, %v6566_v46  ;;  %v5554_v50 = vsel %vm4440_vm9, %v12749_v29, %v9255_v37  ;;  %v9271_v29 = vunpack.i.h.bf16 %v13102_v0 }
 0x5ac   : > { %vm6234_vm1 = vcmp.ge.f32.partialorder %v6155_v51, 0.0  ;;  %v6266_v52 = vmul.f32 0.2, %v6155_v51  ;;  %v6534_v24 = vadd.f32 %v6502_v61, %v6401_v26  ;;  %v5982_v26 = vadd.f32 %v13080_v1, %v13104_v39 }
 0x5ad   : > { %v9239_v9 = vpop.permute.xlu1 %9238  ;;  %v13135_v53 = vpop.f32.mrf.mxu2 }
 0x5ae   : > { %v13126_v15 = vpop.permute.xlu0 %9248  ;;  %v9241_v57 = vunpack.i.h.bf16 %v9239_v9  ;;  %v9240_v16 = vunpack.i.l.bf16 %v9239_v9  ;;  %v6298_v25 = vsel %vm6234_vm1, %v6155_v51, %v6266_v52  ;;  %v6067_v14 = vpop.f32.mrf.mxu3  ;;  %v5753_v51 = vpack.c.bf16 %v5616_v27, %v5615_v6  ;;  %v4495_v9 = vld [vmem:[#allocation4 + $0x108] sm:$0xff] }
 0x5af   : > { %v13133_v2 = vpop.permute.xlu2 %9293  ;;  %6332 = vst.msk [vmem:[#allocation5 + $0x19] sm:$0xff] %vm14511_vm0, %v6298_v25  ;;  %v6068_v36 = vadd.f32 %v6067_v14, %v5979_v28  ;;  %v5555_v52 = vsel %vm4440_vm9, %v12751_v22, %v9256_v35  ;;  %v4496_v28 = vld [vmem:[#allocation4 + $0x110] sm:$0xff]  ;;  %v5552_v43 = vsel %vm4440_vm9, %v4495_v9, %v9225_v3  ;;  %v9251_v30 = vunpack.i.h.bf16 %v13126_v15 }
 0x5b0   : > { %v5709_v55 = vsel %vm5594_vm15, %v5677_v11, %v9240_v16  ;;  %v5710_v21 = vsel %vm5594_vm15, %v5678_v32, %v9241_v57  ;;  %v13157_v57 = vpop.f32.mrf.mxu0  ;;  %v5553_v49 = vsel %vm4440_vm9, %v4496_v28, %v9226_v31  ;;  %v9250_v6 = vunpack.i.l.bf16 %v13126_v15  ;;  %v4622_v32 = vld [vmem:[#allocation4 + $0x111] sm:$0xff] }
 0x5b1   : > { %v6157_v45 = vadd.f32 %v12975_v62, %v6068_v36  ;;  %v5751_v38 = vpack.c.bf16 %v5710_v21, %v5709_v55  ;;  %v9270_v14 = vunpack.i.l.bf16 %v13102_v0  ;;  %v13177_v47 = vadd.f32 %v6603_v40, %v6534_v24 }
 0x5b2   : > { %v9296_v36 = vunpack.i.h.bf16 %v13133_v2  ;;  %v5584_v55 = vsel %vm593_vm6, %v5552_v43, %v9230_v44  ;;  %v5585_v39 = vsel %vm593_vm6, %v5553_v49, %v9231_v63  ;;  %v5648_v31 = vsel %vm4440_vm9, %v4622_v32, %v9251_v30 }
 0x5b3   : > { %vm6235_vm2 = vcmp.ge.f32.partialorder %v6157_v45, 0.0  ;;  %v6267_v62 = vmul.f32 0.2, %v6157_v45  ;;  %v9295_v21 = vunpack.i.l.bf16 %v13133_v2  ;;  %v13266_v2 = vld [vmem:[%s14508_s7 + $0x7] ss:$0 sm:$0xff] }
 0x5b4   : > { %6025 = vmatmul.bf16.gmra.mxu2 %v5753_v51 }
 0x5b5   : > { %6109 = vmatmul.bf16.gmra.mxu3 %v5751_v38  ;;  %v9264_v22 = vpop.permute.xlu1 %9263  ;;  %v6299_v35 = vsel %vm6235_vm2, %v6157_v45, %v6267_v62  ;;  %v5984_v38 = vadd.f32 %v13080_v1, %v13135_v53  ;;  %v13203_v53 = vld [vmem:[%s14508_s7 + $0x4] ss:$0 sm:$0xff] }
 0x5b6   : > { %v9259_v27 = vpop.permute.xlu0 %9258  ;;  %8103 = vmatmul.msk.bf16.gmra.mxu0 %vm4440_vm9, %v5761_v54  ;;  %v9266_v16 = vunpack.i.h.bf16 %v9264_v22  ;;  %v9265_v11 = vunpack.i.l.bf16 %v9264_v22  ;;  %6333 = vst.msk [vmem:[#allocation5 + $0x21] sm:$0xff] %vm14511_vm0, %v6299_v35  ;;  %v6070_v37 = vpop.f32.mrf.mxu3  ;;  %v4621_v54 = vld [vmem:[#allocation4 + $0x109] sm:$0xff] }
 0x5b7   : > { %v9309_v25 = vpop.permute.xlu2 %9308  ;;  %v9261_v15 = vunpack.i.h.bf16 %v9259_v27  ;;  %v5986_v61 = vpop.f32.mrf.mxu2  ;;  %v9260_v0 = vunpack.i.l.bf16 %v9259_v27  ;;  %v6666_v46 = vld [vmem:[#allocation5 + $0x18] sm:$0xff]  ;;  %v5647_v3 = vsel %vm4440_vm9, %v4621_v54, %v9250_v6  ;;  %v6071_v45 = vadd.f32 %v6070_v37, %v5982_v26 }
 0x5b8   : > { %v6767_v51 = vld [vmem:[#allocation5 + $0x19] sm:$0xff]  ;;  %v5679_v24 = vsel %vm593_vm6, %v5647_v3, %v9265_v11  ;;  %v5680_v40 = vsel %vm593_vm6, %v5648_v31, %v9266_v16  ;;  %v9311_v9 = vunpack.i.h.bf16 %v9309_v25  ;;  %v9310_v63 = vunpack.i.l.bf16 %v9309_v25  ;;  %v13209_v35 = vpop.f32.mrf.mxu0  ;;  %v4623_v31 = vld [vmem:[#allocation4 + $0x121] sm:$0xff] }
 0x5b9   : > { %v13190_v44 = vsel %vm593_vm6, %v5555_v52, %v9261_v15  ;;  %v6160_v28 = vadd.f32 %v13001_v60, %v6071_v45  ;;  %v6703_v62 = vmul.f32 %v13175_v58, %v6666_v46  ;;  %v13195_v49 = vsel %vm593_vm6, %v5554_v50, %v9260_v0  ;;  %v13225_v0 = vld [vmem:[%s14508_s7 + $0x5] ss:$0 sm:$0xff] }
 0x5ba   : > { %v13198_v43 = vadd.f32 %v13080_v1, %v5986_v61  ;;  %v6402_v30 = vmul.f32 %v13085_v56, %v6666_v46  ;;  %v6503_v52 = vmul.f32 %v13090_v5, %v6767_v51  ;;  %v5711_v27 = vsel %vm5594_vm15, %v5679_v24, %v9270_v14 }
 0x5bb   : > { %vm6236_vm3 = vcmp.ge.f32.partialorder %v6160_v28, 0.0  ;;  %v6268_v6 = vmul.f32 0.2, %v6160_v28  ;;  %v5712_v50 = vsel %vm5594_vm15, %v5680_v40, %v9271_v29  ;;  %v13215_v61 = vsel %vm4440_vm9, %v12829_v23, %v9311_v9  ;;  %v4624_v40 = vld [vmem:[#allocation4 + $0x129] sm:$0xff] }
 0x5bc   : > { %v13219_v37 = vsel %vm4440_vm9, %v12822_v20, %v9310_v63  ;;  %v6735_v29 = vadd.f32 %v6703_v62, %v13150_v18  ;;  %v5754_v3 = vpack.c.bf16 %v5712_v50, %v5711_v27  ;;  %v6804_v45 = vmul.f32 %v13203_v53, %v6767_v51 }
 0x5bd   : > { %v9279_v60 = vpop.permute.xlu1 %9278  ;;  %v6300_v54 = vsel %vm6236_vm3, %v6160_v28, %v6268_v6  ;;  %v6667_v46 = vld [vmem:[#allocation5 + $0x20] sm:$0xff]  ;;  %v6535_v24 = vadd.f32 %v6503_v52, %v6402_v30 }
 0x5be   : > { %v9274_v22 = vpop.permute.xlu0 %9273  ;;  %v9281_v16 = vunpack.i.h.bf16 %v9279_v60  ;;  %v9280_v11 = vunpack.i.l.bf16 %v9279_v60  ;;  %v6072_v32 = vpop.f32.mrf.mxu3  ;;  %6334 = vst.msk [vmem:[#allocation5 + $0x31] sm:$0xff] %vm14511_vm0, %v6300_v54  ;;  %v6868_v20 = vld [vmem:[#allocation5 + $0x1a] sm:$0xff]  ;;  %v6869_v51 = vld [vmem:[#allocation5 + $0x22] sm:$0xff]  ;;  %v6836_v52 = vadd.f32 %v6804_v45, %v6735_v29  ;;  %v6403_v45 = vmul.f32 %v13085_v56, %v6667_v46 }
 0x5bf   : > { %v9276_v25 = vunpack.i.h.bf16 %v9274_v22  ;;  %v9275_v26 = vunpack.i.l.bf16 %v9274_v22  ;;  %v13211_v15 = vpop.permute.xlu2 %9318  ;;  %v5988_v14 = vpop.f32.mrf.mxu2  ;;  %v6073_v23 = vadd.f32 %v6072_v32, %v5984_v38  ;;  %v6704_v38 = vmul.f32 %v13175_v58, %v6667_v46  ;;  %v6768_v22 = vld [vmem:[#allocation5 + $0x21] sm:$0xff] }
 0x5c0   : > { %v5649_v9 = vsel %vm4440_vm9, %v4623_v31, %v9280_v11  ;;  %v9321_v18 = vunpack.i.h.bf16 %v13211_v15  ;;  %v5650_v62 = vsel %vm4440_vm9, %v4624_v40, %v9281_v16  ;;  %v13237_v30 = vadd.f32 %v13080_v1, %v5988_v14  ;;  %v9433_v40 = vld [vmem:[#allocation4 + $0x140] sm:$0xff] }
 0x5c1   : > { %v5617_v63 = vsel %vm5594_vm15, %v5584_v55, %v9275_v26  ;;  %v5618_v28 = vsel %vm5594_vm15, %v5585_v39, %v9276_v25  ;;  %v6162_v6 = vadd.f32 %v13018_v19, %v6073_v23  ;;  %v6905_v27 = vmul.f32 %v13225_v0, %v6868_v20  ;;  %v13247_v19 = vld [vmem:[%s14508_s7 + $0x6] ss:$0 sm:$0xff] }
 0x5c2   : > { %v5756_v60 = vpack.c.bf16 %v5618_v28, %v5617_v63  ;;  %v6604_v50 = vmul.f32 %v13114_v34, %v6868_v20  ;;  %v13242_v39 = vsel %vm593_vm6, %v5649_v9, %v9295_v21  ;;  %v6736_v16 = vadd.f32 %v6704_v38, %v13177_v47  ;;  %v13269_v20 = vpop.f32.mrf.mxu0  ;;  %v9434_v38 = vld [vmem:[#allocation4 + $0x138] sm:$0xff] }
 0x5c3   : > { %vm6237_vm4 = vcmp.ge.f32.partialorder %v6162_v6, 0.0  ;;  %v6269_v55 = vmul.f32 0.2, %v6162_v6  ;;  %v9320_v11 = vunpack.i.l.bf16 %v13211_v15  ;;  %v13258_v21 = vsel %vm593_vm6, %v5650_v62, %v9296_v36 }
 0x5c4   : > { %6030 = vmatmul.bf16.gmra.mxu2 %v5756_v60  ;;  %v6805_v54 = vmul.f32 %v13203_v53, %v6768_v22  ;;  %v6906_v14 = vmul.f32 %v13225_v0, %v6869_v51  ;;  %v6937_v17 = vadd.f32 %v6905_v27, %v6836_v52  ;;  %v6636_v36 = vadd.f32 %v6604_v50, %v6535_v24 }
 0x5c5   : > { %6114 = vmatmul.bf16.gmra.mxu3 %v5754_v3  ;;  %v9289_v25 = vpop.permute.xlu1 %9288  ;;  %v6301_v47 = vsel %vm6237_vm4, %v6162_v6, %v6269_v55  ;;  %v7071_v62 = vld [vmem:[#allocation5 + $0x31] sm:$0xff]  ;;  %v6504_v60 = vmul.f32 %v13090_v5, %v6768_v22 }
 0x5c6   : > { %v9284_v26 = vpop.permute.xlu0 %9283  ;;  %8104 = vmatmul.msk.bf16.gmra.mxu0 %vm4440_vm9, %v5764_v10  ;;  %v9291_v32 = vunpack.i.h.bf16 %v9289_v25  ;;  %v9290_v29 = vunpack.i.l.bf16 %v9289_v25  ;;  %6335 = vst.msk [vmem:[#allocation5 + $0x39] sm:$0xff] %vm14511_vm0, %v6301_v47  ;;  %v6970_v10 = vld [vmem:[#allocation5 + $0x30] sm:$0xff]  ;;  %v6837_v6 = vadd.f32 %v6805_v54, %v6736_v16  ;;  %v7108_v22 = vmul.f32 %v13266_v2, %v7071_v62  ;;  %v13287_v54 = vld [vmem:[%s14508_s7 + $0x8] ss:$0 sm:$0xff] }
 0x5c7   : > { %v9286_v31 = vunpack.i.h.bf16 %v9284_v26  ;;  %v9334_v23 = vpop.permute.xlu2 %9333  ;;  %v9285_v3 = vunpack.i.l.bf16 %v9284_v26  ;;  %v5991_v7 = vpop.f32.mrf.mxu2  ;;  %v7007_v28 = vmul.f32 %v13247_v19, %v6970_v10  ;;  %v6705_v46 = vmul.f32 %v13175_v58, %v6970_v10 }
 0x5c8   : > { %v6075_v63 = vpop.f32.mrf.mxu3  ;;  %v9336_v27 = vunpack.i.h.bf16 %v9334_v23  ;;  %v9335_v50 = vunpack.i.l.bf16 %v9334_v23  ;;  %v13280_v47 = vadd.f32 %v13080_v1, %v5991_v7 }
 0x5c9   : > { %v5557_v9 = vsel %vm4440_vm9, %v9433_v40, %v9286_v31  ;;  %v5556_v52 = vsel %vm4440_vm9, %v9434_v38, %v9285_v3  ;;  %v6076_v24 = vadd.f32 %v6075_v63, %v13198_v43  ;;  %v7039_v55 = vadd.f32 %v7007_v28, %v6937_v17 }
 0x5ca   : > { %v5588_v25 = vsel %vm593_vm6, %v5556_v52, %v9290_v29  ;;  %v5589_v26 = vsel %vm593_vm6, %v5557_v9, %v9291_v32  ;;  %v13290_v43 = vmul.f32 %v13114_v34, %v6869_v51  ;;  %v6938_v31 = vadd.f32 %v6906_v14, %v6837_v6 }
 0x5cb   : > { %v6165_v16 = vadd.f32 %v13043_v12, %v6076_v24  ;;  %v6806_v29 = vmul.f32 %v13203_v53, %v7071_v62  ;;  %v13294_v32 = vsel %vm5594_vm15, %v5588_v25, %v9335_v50  ;;  %v13297_v23 = vsel %vm5594_vm15, %v5589_v26, %v9336_v27 }
 0x5cc   : > { %v7140_v17 = vadd.f32 %v7108_v22, %v7039_v55  ;;  %v6737_v40 = vadd.f32 %v6705_v46, %v6636_v36  ;;  %v5762_v50 = vpack.c.bf16 %v13297_v23, %v13294_v32  ;;  %v6536_v25 = vadd.f32 %v6504_v60, %v6403_v45  ;;  %v13318_v45 = vpop.f32.mrf.mxu0 }
 0x5cd   : > { %vm6238_vm5 = vcmp.ge.f32.partialorder %v6165_v16, 0.0  ;;  %v6270_v12 = vmul.f32 0.2, %v6165_v16  ;;  %v9304_v3 = vpop.permute.xlu1 %9303  ;;  %v13299_v14 = vld [vmem:[#allocation5 + $0x32] sm:$0xff] }
 0x5ce   : > { %v9299_v7 = vpop.permute.xlu0 %9298  ;;  %v9306_v9 = vunpack.i.h.bf16 %v9304_v3  ;;  %v9305_v63 = vunpack.i.l.bf16 %v9304_v3  ;;  %v7209_v24 = vmul.f32 %v13287_v54, %v13299_v14  ;;  %v13303_v27 = vld [vmem:[#allocation5 + $0x38] sm:$0xff]  ;;  %v6637_v13 = vadd.f32 %v13290_v43, %v6536_v25 }
 0x5cf   : > { %v9301_v28 = vunpack.i.h.bf16 %v9299_v7  ;;  %v9300_v51 = vunpack.i.l.bf16 %v9299_v7  ;;  %v9344_v38 = vpop.permute.xlu2 %9343  ;;  %v6302_v6 = vsel %vm6238_vm5, %v6165_v16, %v6270_v12  ;;  %v5993_v52 = vpop.f32.mrf.mxu2  ;;  %v13316_v7 = vmul.f32 %v13085_v56, %v6970_v10 }
 0x5d0   : > { %6336 = vst.msk [vmem:[#allocation5 + $0x49] sm:$0xff] %vm14511_vm0, %v6302_v6  ;;  %v9346_v36 = vunpack.i.h.bf16 %v9344_v38  ;;  %v6077_v46 = vpop.f32.mrf.mxu3  ;;  %v5619_v16 = vsel %vm5594_vm15, %v13195_v49, %v9305_v63  ;;  %v9345_v22 = vunpack.i.l.bf16 %v9344_v38  ;;  %v7241_v60 = vadd.f32 %v7209_v24, %v7140_v17 }
 0x5d1   : > { %v5713_v55 = vsel %vm5594_vm15, %v13242_v39, %v9300_v51  ;;  %v5714_v26 = vsel %vm5594_vm15, %v13258_v21, %v9301_v28  ;;  %v6078_v12 = vadd.f32 %v6077_v46, %v13237_v30  ;;  %v5620_v6 = vsel %vm5594_vm15, %v13190_v44, %v9306_v9  ;;  %v13324_v21 = vld [vmem:[#allocation5 + $0x39] sm:$0xff] }
 0x5d2   : > { %v5757_v3 = vpack.c.bf16 %v5714_v26, %v5713_v55  ;;  %v7008_v39 = vmul.f32 %v13247_v19, %v13303_v27  ;;  %v6838_v28 = vadd.f32 %v6806_v29, %v6737_v40  ;;  %v13327_v49 = vadd.f32 %v13080_v1, %v5993_v52  ;;  %v13338_v51 = vld [vmem:[#allocation5 + $0x3a] sm:$0xff] }
 0x5d3   : > { %v6167_v30 = vadd.f32 %v13071_v4, %v6078_v12  ;;  %v5759_v63 = vpack.c.bf16 %v5620_v6, %v5619_v16  ;;  %v13331_v10 = vmul.f32 %v13090_v5, %v7071_v62  ;;  %v13335_v17 = vsel %vm4440_vm9, %v12934_v41, %v9346_v36 }
 0x5d4   : > { %v7273_v44 = vsel %vm14511_vm0, %v7241_v60, 0.0  ;;  %v7040_v9 = vadd.f32 %v7008_v39, %v6938_v31  ;;  %v6907_v29 = vmul.f32 %v13225_v0, %v13299_v14  ;;  %v13344_v40 = vsel %vm4440_vm9, %v12932_v42, %v9345_v22 }
 0x5d5   : > { %vm6239_vm7 = vcmp.ge.f32.partialorder %v6167_v30, 0.0  ;;  %v6271_v4 = vmul.f32 0.2, %v6167_v30  ;;  %6119 = vmatmul.bf16.gmra.mxu3 %v5757_v3  ;;  %7274 = vadd.xlane.f32.xlu2 %v7273_v44  ;;  %v9314_v62 = vpop.permute.xlu1 %9313  ;;  %v7109_v41 = vmul.f32 %v13266_v2, %v13324_v21  ;;  %v6706_v42 = vmul.f32 %v13175_v58, %v13303_v27 }
 0x5d6   : > { %v9324_v38 = vpop.permute.xlu0 %9323  ;;  %6035 = vmatmul.bf16.gmra.mxu2 %v5759_v63  ;;  %v9316_v31 = vunpack.i.h.bf16 %v9314_v62  ;;  %v9315_v52 = vunpack.i.l.bf16 %v9314_v62  ;;  %8105 = vmatmul.msk.bf16.gmra.mxu0 %vm4440_vm9, %v5767_v33  ;;  %v7210_v22 = vmul.f32 %v13287_v54, %v13338_v51  ;;  %v6939_v8 = vadd.f32 %v6907_v29, %v6838_v28  ;;  %v9436_v62 = vld [vmem:[#allocation4 + $0x150] sm:$0xff] }
 0x5d7   : > { %v9325_v24 = vunpack.i.l.bf16 %v9324_v38  ;;  %v13348_v36 = vpop.permute.xlu2 %9358  ;;  %v6303_v46 = vsel %vm6239_vm7, %v6167_v30, %v6271_v4  ;;  %v9326_v55 = vunpack.i.h.bf16 %v9324_v38  ;;  %v5996_v26 = vpop.f32.mrf.mxu2  ;;  %v7141_v16 = vadd.f32 %v7109_v41, %v7040_v9  ;;  %v13358_v12 = vld [vmem:[#allocation5 + $0x48] sm:$0xff] }
 0x5d8   : > { %6337 = vst.msk [vmem:[#allocation5 + $0x51] sm:$0xff] %vm14511_vm0, %v6303_v46  ;;  %v9361_v3 = vunpack.i.h.bf16 %v13348_v36  ;;  %v6080_v60 = vpop.f32.mrf.mxu3  ;;  %v6807_v33 = vmul.f32 %v13203_v53, %v13324_v21  ;;  %v9360_v6 = vunpack.i.l.bf16 %v13348_v36  ;;  %v7009_v63 = vmul.f32 %v13247_v19, %v13358_v12  ;;  %v13369_v44 = vld [vmem:[#allocation5 + $0x49] sm:$0xff]  ;;  %v13379_v46 = vpop.f32.mrf.mxu0  ;;  %v9437_v36 = vld [vmem:[#allocation4 + $0x181] sm:$0xff] }
 0x5d9   : > { %v6081_v39 = vadd.f32 %v6080_v60, %v13280_v47  ;;  %v7242_v30 = vadd.f32 %v7210_v22, %v7141_v16  ;;  %v9435_v9 = vld [vmem:[#allocation4 + $0x158] sm:$0xff]  ;;  %v5558_v28 = vsel %vm4440_vm9, %v9436_v62, %v9315_v52  ;;  %v5683_v43 = vsel %vm593_vm6, %v13219_v37, %v9325_v24 }
 0x5da   : > { %v5559_v4 = vsel %vm4440_vm9, %v9435_v9, %v9316_v31  ;;  %v6738_v25 = vadd.f32 %v6706_v42, %v6637_v13  ;;  %v5684_v29 = vsel %vm593_vm6, %v13215_v61, %v9326_v55  ;;  %v7041_v41 = vadd.f32 %v7009_v63, %v6939_v8 }
 0x5db   : > { %v6170_v47 = vadd.f32 %v13118_v59, %v6081_v39  ;;  %v7276_v38 = vsel %vm14511_vm0, %v7242_v30, 0.0  ;;  %v13382_v16 = vadd.f32 %v13080_v1, %v5996_v26  ;;  %v7110_v31 = vmul.f32 %v13266_v2, %v13369_v44 }
 0x5dc   : > { %7277 = vadd.xlane.f32.xlu0 %v7276_v38  ;;  %v6839_v52 = vadd.f32 %v6807_v33, %v6738_v25  ;;  %v6908_v37 = vmul.f32 %v13225_v0, %v13338_v51  ;;  %v13391_v42 = vsel %vm593_vm6, %v5558_v28, %v9320_v11  ;;  %v13396_v55 = vsel %vm593_vm6, %v5559_v4, %v9321_v18 }
 0x5dd   : > { %vm6240_vm8 = vcmp.ge.f32.partialorder %v6170_v47, 0.0  ;;  %v6272_v61 = vmul.f32 0.2, %v6170_v47  ;;  %v9329_v24 = vpop.permute.xlu1 %9328  ;;  %v6537_v8 = vadd.f32 %v13331_v10, %v13316_v7  ;;  %v6606_v13 = vmul.f32 %v13114_v34, %v13299_v14 }
 0x5de   : > { %v9339_v59 = vpop.permute.xlu0 %9338  ;;  %v9331_v26 = vunpack.i.h.bf16 %v9329_v24  ;;  %v9330_v22 = vunpack.i.l.bf16 %v9329_v24  ;;  %v7142_v30 = vadd.f32 %v7110_v31, %v7041_v41  ;;  %v6707_v15 = vmul.f32 %v13175_v58, %v13358_v12  ;;  %v4628_v24 = vld [vmem:[#allocation4 + $0x159] sm:$0xff] }
 0x5df   : > { %v13398_v60 = vpop.permute.xlu2 %9373  ;;  %v6304_v33 = vsel %vm6240_vm8, %v6170_v47, %v6272_v61  ;;  %v5998_v39 = vpop.f32.mrf.mxu2  ;;  %v13404_v11 = vld [vmem:[#allocation5 + $0x4a] sm:$0xff]  ;;  %v13412_v18 = vmul.f32 %v13203_v53, %v13369_v44  ;;  %v9341_v7 = vunpack.i.h.bf16 %v9339_v59  ;;  %v9340_v10 = vunpack.i.l.bf16 %v9339_v59  ;;  %v13424_v41 = vld [vmem:[#allocation5 + $0x52] sm:$0xff] }
 0x5e0   : > { %v13406_v63 = vld [vmem:[#allocation5 + $0x50] sm:$0xff]  ;;  %6338 = vst.msk [vmem:[#allocation5 + $0x61] sm:$0xff] %vm14511_vm0, %v6304_v33  ;;  %v6082_v9 = vpop.f32.mrf.mxu3  ;;  %v5715_v14 = vsel %vm5594_vm15, %v5683_v43, %v9330_v22  ;;  %v6940_v4 = vadd.f32 %v6908_v37, %v6839_v52  ;;  %v5716_v25 = vsel %vm5594_vm15, %v5684_v29, %v9331_v26  ;;  %v7211_v47 = vmul.f32 %v13287_v54, %v13404_v11  ;;  %v4627_v37 = vld [vmem:[#allocation4 + $0x151] sm:$0xff] }
 0x5e1   : > { %v13416_v62 = vld [vmem:[#allocation5 + $0x51] sm:$0xff]  ;;  %v6083_v28 = vadd.f32 %v6082_v9, %v13327_v49  ;;  %v7010_v38 = vmul.f32 %v13247_v19, %v13406_v63  ;;  %v9375_v61 = vunpack.i.l.bf16 %v13398_v60  ;;  %v5760_v43 = vpack.c.bf16 %v5716_v25, %v5715_v14 }
 0x5e2   : > { %v6638_v52 = vadd.f32 %v6606_v13, %v6537_v8  ;;  %v7243_v59 = vadd.f32 %v7211_v47, %v7142_v30  ;;  %v7111_v26 = vmul.f32 %v13266_v2, %v13416_v62  ;;  %v5654_v22 = vsel %vm4440_vm9, %v4628_v24, %v9341_v7 }
 0x5e3   : > { %v6172_v49 = vadd.f32 %v13157_v57, %v6083_v28  ;;  %v7042_v29 = vadd.f32 %v7010_v38, %v6940_v4  ;;  %v5653_v33 = vsel %vm4440_vm9, %v4627_v37, %v9340_v10  ;;  %v7212_v9 = vmul.f32 %v13287_v54, %v13424_v41  ;;  %v13436_v4 = vpop.f32.mrf.mxu0 }
 0x5e4   : > { %v6739_v31 = vadd.f32 %v6707_v15, %v6638_v52  ;;  %v7279_v8 = vsel %vm14511_vm0, %v7243_v59, 0.0  ;;  %v6405_v15 = vmul.f32 %v13085_v56, %v13303_v27  ;;  %v6506_v37 = vmul.f32 %v13090_v5, %v13324_v21 }
 0x5e5   : > { %vm6241_vm10 = vcmp.ge.f32.partialorder %v6172_v49, 0.0  ;;  %v6273_v14 = vmul.f32 0.2, %v6172_v49  ;;  %6124 = vmatmul.bf16.gmra.mxu3 %v5760_v43  ;;  %v9354_v13 = vpop.permute.xlu1 %9353  ;;  %v7143_v30 = vadd.f32 %v7111_v26, %v7042_v29  ;;  %7280 = vadd.xlane.f32.xlu1 %v7279_v8  ;;  %v5999_v27 = vadd.f32 %v13080_v1, %v5998_v39 }
 0x5e6   : > { %v9349_v57 = vpop.permute.xlu0 %9348  ;;  %6040 = vmatmul.bf16.gmra.mxu2 %v5762_v50  ;;  %v9356_v7 = vunpack.i.h.bf16 %v9354_v13  ;;  %v9355_v10 = vunpack.i.l.bf16 %v9354_v13  ;;  %v6909_v26 = vmul.f32 %v13225_v0, %v13404_v11  ;;  %v6607_v21 = vmul.f32 %v13114_v34, %v13338_v51 }
 0x5e7   : > { %v9350_v28 = vunpack.i.l.bf16 %v9349_v57  ;;  %v9389_v25 = vpop.permute.xlu2 %9388  ;;  %v6305_v47 = vsel %vm6241_vm10, %v6172_v49, %v6273_v14  ;;  %v9351_v38 = vunpack.i.h.bf16 %v9349_v57  ;;  %v6001_v43 = vpop.f32.mrf.mxu2  ;;  %v7244_v52 = vadd.f32 %v7212_v9, %v7143_v30  ;;  %v13448_v29 = vld [vmem:[#allocation5 + $0x60] sm:$0xff] }
 0x5e8   : > { %6339 = vst.msk [vmem:[#allocation5 + $0x69] sm:$0xff] %vm14511_vm0, %v6305_v47  ;;  %v5685_v24 = vsel %vm593_vm6, %v5653_v33, %v9355_v10  ;;  %v5686_v32 = vsel %vm593_vm6, %v5654_v22, %v9356_v7  ;;  %v9391_v23 = vunpack.i.h.bf16 %v9389_v25  ;;  %v9390_v50 = vunpack.i.l.bf16 %v9389_v25  ;;  %v6085_v59 = vpop.f32.mrf.mxu3  ;;  %v13475_v8 = vld [vmem:[#allocation5 + $0x61] sm:$0xff] }
 0x5e9   : > { %v6086_v49 = vadd.f32 %v6085_v59, %v13382_v16  ;;  %v13458_v33 = vsel %vm593_vm6, %v13344_v40, %v9350_v28  ;;  %v7282_v22 = vsel %vm14511_vm0, %v7244_v52, 0.0  ;;  %v5717_v9 = vsel %vm5594_vm15, %v5685_v24, %v9360_v6 }
 0x5ea   : > { %v5718_v16 = vsel %vm5594_vm15, %v5686_v32, %v9361_v3  ;;  %v13469_v39 = vsel %vm593_vm6, %v13335_v17, %v9351_v38  ;;  %7283 = vadd.xlane.f32.xlu2 %v7282_v22  ;;  %v6840_v40 = vadd.f32 %v13412_v18, %v6739_v31  ;;  %v7011_v14 = vmul.f32 %v13247_v19, %v13448_v29 }
 0x5eb   : > { %v6175_v51 = vadd.f32 %v13209_v35, %v6086_v49  ;;  %v13479_v6 = vsel %vm4440_vm9, %v12990_v48, %v9391_v23  ;;  %v13482_v3 = vsel %vm4440_vm9, %v9437_v36, %v9390_v50  ;;  %v13485_v17 = vadd.f32 %v13080_v1, %v6001_v43 }
 0x5ec   : > { %v6538_v35 = vadd.f32 %v6506_v37, %v6405_v15  ;;  %v5763_v57 = vpack.c.bf16 %v5718_v16, %v5717_v9  ;;  %v6941_v30 = vadd.f32 %v6909_v26, %v6840_v40  ;;  %v7112_v48 = vmul.f32 %v13266_v2, %v13475_v8  ;;  %v13493_v37 = vpop.f32.mrf.mxu0  ;;  %v4630_v40 = vld [vmem:[#allocation4 + $0x171] sm:$0xff] }
 0x5ed   : > { %vm6242_vm11 = vcmp.ge.f32.partialorder %v6175_v51, 0.0  ;;  %v6274_v13 = vmul.f32 0.2, %v6175_v51  ;;  %v9369_v18 = vpop.permute.xlu1 %9368  ;;  %v6708_v28 = vmul.f32 %v13175_v58, %v13406_v63  ;;  %v6406_v50 = vmul.f32 %v13085_v56, %v13358_v12 }
 0x5ee   : > { %v9364_v31 = vpop.permute.xlu0 %9363  ;;  %v9371_v47 = vunpack.i.h.bf16 %v9369_v18  ;;  %v9370_v38 = vunpack.i.l.bf16 %v9369_v18  ;;  %v7043_v52 = vadd.f32 %v7011_v14, %v6941_v30  ;;  %v6639_v23 = vadd.f32 %v6607_v21, %v6538_v35 }
 0x5ef   : > { %v9366_v7 = vunpack.i.h.bf16 %v9364_v31  ;;  %v9365_v10 = vunpack.i.l.bf16 %v9364_v31  ;;  %v6306_v25 = vsel %vm6242_vm11, %v6175_v51, %v6274_v13  ;;  %v6003_v43 = vpop.f32.mrf.mxu2  ;;  %v13491_v15 = vld [vmem:[#allocation5 + $0x62] sm:$0xff]  ;;  %v6507_v59 = vmul.f32 %v13090_v5, %v13369_v44  ;;  %v4629_v51 = vld [vmem:[#allocation4 + $0x169] sm:$0xff]  ;;  %v13522_v30 = vld [vmem:[#allocation5 + $0x6a] sm:$0xff] }
 0x5f0   : > { %6340 = vst.msk [vmem:[#allocation5 + $0x79] sm:$0xff] %vm14511_vm0, %v6306_v25  ;;  %v6087_v24 = vpop.f32.mrf.mxu3  ;;  %v7144_v22 = vadd.f32 %v7112_v48, %v7043_v52  ;;  %v7213_v9 = vmul.f32 %v13287_v54, %v13491_v15  ;;  %v13506_v16 = vld [vmem:[#allocation5 + $0x68] sm:$0xff]  ;;  %v6740_v21 = vadd.f32 %v6708_v28, %v6639_v23  ;;  %v6809_v12 = vmul.f32 %v13203_v53, %v13416_v62 }
 0x5f1   : > { %v5623_v32 = vsel %vm5594_vm15, %v13391_v42, %v9365_v10  ;;  %v6088_v49 = vadd.f32 %v6087_v24, %v5999_v27  ;;  %v5624_v26 = vsel %vm5594_vm15, %v13396_v55, %v9366_v7  ;;  %v6910_v44 = vmul.f32 %v13225_v0, %v13424_v41  ;;  %v13520_v31 = vld [vmem:[#allocation5 + $0x69] sm:$0xff] }
 0x5f2   : > { %v5765_v42 = vpack.c.bf16 %v5624_v26, %v5623_v32  ;;  %v5656_v27 = vsel %vm4440_vm9, %v4630_v40, %v9371_v47  ;;  %v5655_v55 = vsel %vm4440_vm9, %v4629_v51, %v9370_v38  ;;  %v7245_v36 = vadd.f32 %v7213_v9, %v7144_v22 }
 0x5f3   : > { %v6177_v14 = vadd.f32 %v13269_v20, %v6088_v49  ;;  %v13516_v35 = vadd.f32 %v13080_v1, %v6003_v43  ;;  %v6841_v13 = vadd.f32 %v6809_v12, %v6740_v21  ;;  %v7012_v18 = vmul.f32 %v13247_v19, %v13506_v16 }
 0x5f4   : > { %v6608_v7 = vmul.f32 %v13114_v34, %v13404_v11  ;;  %v7285_v20 = vsel %vm14511_vm0, %v7245_v36, 0.0  ;;  %v6539_v25 = vadd.f32 %v6507_v59, %v6406_v50  ;;  %v6709_v52 = vmul.f32 %v13175_v58, %v13448_v29 }
 0x5f5   : > { %vm6243_vm12 = vcmp.ge.f32.partialorder %v6177_v14, 0.0  ;;  %v6275_v10 = vmul.f32 0.2, %v6177_v14  ;;  %6129 = vmatmul.bf16.gmra.mxu3 %v5763_v57  ;;  %v9384_v48 = vpop.permute.xlu1 %9383  ;;  %7286 = vadd.xlane.f32.xlu2 %v7285_v20  ;;  %v6942_v23 = vadd.f32 %v6910_v44, %v6841_v13  ;;  %v7113_v11 = vmul.f32 %v13266_v2, %v13520_v31  ;;  %v13551_v44 = vpop.f32.mrf.mxu0 }
 0x5f6   : > { %v9379_v28 = vpop.permute.xlu0 %9378  ;;  %6045 = vmatmul.bf16.gmra.mxu2 %v5765_v42  ;;  %v9386_v47 = vunpack.i.h.bf16 %v9384_v48  ;;  %v9385_v38 = vunpack.i.l.bf16 %v9384_v48  ;;  %v7214_v57 = vmul.f32 %v13287_v54, %v13522_v30  ;;  %v5687_v49 = vsel %vm593_vm6, %v5655_v55, %v9375_v61 }
 0x5f7   : > { %v9380_v43 = vunpack.i.l.bf16 %v9379_v28  ;;  %v6307_v24 = vsel %vm6243_vm12, %v6177_v14, %v6275_v10  ;;  %v6006_v32 = vpop.f32.mrf.mxu2  ;;  %v9381_v50 = vunpack.i.h.bf16 %v9379_v28  ;;  %v14588_v26 = vunpack.i.h.bf16 %v13398_v60  ;;  %v13549_v12 = vld [vmem:[#allocation5 + $0x78] sm:$0xff] }
 0x5f8   : > { %6341 = vst.msk [vmem:[#allocation5 + $0x81] sm:$0xff] %vm14511_vm0, %v6307_v24  ;;  %v6090_v59 = vpop.f32.mrf.mxu3  ;;  %v6640_v9 = vadd.f32 %v6608_v7, %v6539_v25  ;;  %v7044_v40 = vadd.f32 %v7012_v18, %v6942_v23  ;;  %v13543_v42 = vsel %vm5594_vm15, %v13458_v33, %v9385_v38  ;;  %v13547_v21 = vsel %vm5594_vm15, %v13469_v39, %v9386_v47  ;;  %v13571_v48 = vld [vmem:[#allocation5 + $0x79] sm:$0xff] }
 0x5f9   : > { %v5688_v22 = vsel %vm593_vm6, %v5656_v27, %v14588_v26  ;;  %v6091_v51 = vadd.f32 %v6090_v59, %v13485_v17  ;;  %v13554_v60 = vadd.f32 %v13080_v1, %v6006_v32  ;;  %v5719_v61 = vsel %vm5594_vm15, %v5687_v49, %v9380_v43  ;;  %v4760_v26 = vld [vmem:[#allocation4 + $0x19a] sm:$0xff] }
 0x5fa   : > { %v6741_v27 = vadd.f32 %v6709_v52, %v6640_v9  ;;  %v6810_v17 = vmul.f32 %v13203_v53, %v13475_v8  ;;  %v7145_v55 = vadd.f32 %v7113_v11, %v7044_v40  ;;  %v6911_v39 = vmul.f32 %v13225_v0, %v13491_v15 }
 0x5fb   : > { %v6180_v33 = vadd.f32 %v13318_v45, %v6091_v51  ;;  %v6407_v14 = vmul.f32 %v13085_v56, %v13406_v63  ;;  %v5768_v36 = vpack.c.bf16 %v13547_v21, %v13543_v42  ;;  %v5720_v1 = vsel %vm5594_vm15, %v5688_v22, %v9381_v50  ;;  %v4761_v22 = vld [vmem:[#allocation4 + $0x1a2] sm:$0xff] }
 0x5fc   : > { %v7013_v13 = vmul.f32 %v13247_v19, %v13549_v12  ;;  %v6508_v18 = vmul.f32 %v13090_v5, %v13416_v62  ;;  %v7246_v7 = vadd.f32 %v7214_v57, %v7145_v55  ;;  %v6842_v20 = vadd.f32 %v6810_v17, %v6741_v27 }
 0x5fd   : > { %vm6244_vm13 = vcmp.ge.f32.partialorder %v6180_v33, 0.0  ;;  %v6276_v45 = vmul.f32 0.2, %v6180_v33  ;;  %v6609_v63 = vmul.f32 %v13114_v34, %v13424_v41  ;;  %v6710_v25 = vmul.f32 %v13175_v58, %v13506_v16  ;;  %v9399_v43 = vpop.permute.xlu1 %9398  ;;  %v13597_v17 = vpop.f32.mrf.mxu0 }
 0x5fe   : > { %v9394_v10 = vpop.permute.xlu0 %9393  ;;  %v7288_v38 = vsel %vm14511_vm0, %v7246_v7, 0.0  ;;  %v6943_v62 = vadd.f32 %v6911_v39, %v6842_v20  ;;  %v6540_v24 = vadd.f32 %v6508_v18, %v6407_v14  ;;  %v5766_v23 = vpack.c.bf16 %v5720_v1, %v5719_v61  ;;  %v13618_v18 = vld [vmem:[%s14507_s6] ss:$0 sm:$0xff] }
 0x5ff   : > { %v9396_v28 = vunpack.i.h.bf16 %v9394_v10  ;;  %v9395_v56 = vunpack.i.l.bf16 %v9394_v10  ;;  %v6308_v47 = vsel %vm6244_vm13, %v6180_v33, %v6276_v45  ;;  %v6008_v5 = vpop.f32.mrf.mxu2  ;;  %v13578_v52 = vld [vmem:[#allocation5 + $0x7a] sm:$0xff]  ;;  %7289 = vadd.xlane.f32.xlu0 %v7288_v38  ;;  %v7114_v34 = vmul.f32 %v13266_v2, %v13571_v48 }
 0x600   : > { %6342 = vst.msk [vmem:[#allocation5 + $0x91] sm:$0xff] %vm14511_vm0, %v6308_v47  ;;  %v6092_v32 = vpop.f32.mrf.mxu3  ;;  %v6811_v41 = vmul.f32 %v13203_v53, %v13520_v31  ;;  %v7045_v57 = vadd.f32 %v7013_v13, %v6943_v62  ;;  %v7215_v50 = vmul.f32 %v13287_v54, %v13578_v52  ;;  %v6641_v59 = vadd.f32 %v6609_v63, %v6540_v24  ;;  %v13588_v49 = vld [vmem:[#allocation5 + $0x80] sm:$0xff] }
 0x601   : > { %v6093_v11 = vadd.f32 %v6092_v32, %v13516_v35  ;;  %v5689_v9 = vsel %vm593_vm6, %v13482_v3, %v9395_v56  ;;  %v5690_v51 = vsel %vm593_vm6, %v13479_v6, %v9396_v28  ;;  %v9401_v40 = vunpack.i.h.bf16 %v9399_v43  ;;  %v13604_v3 = vld [vmem:[%s14508_s7] ss:$0 sm:$0xff]  ;;  %v13621_v45 = vld [vmem:[#allocation5 + $0x81] sm:$0xff] }
 0x602   : > { %v9400_v42 = vunpack.i.l.bf16 %v9399_v43  ;;  %v7146_v35 = vadd.f32 %v7114_v34, %v7045_v57  ;;  %v6742_v61 = vadd.f32 %v6710_v25, %v6641_v59  ;;  %v6912_v27 = vmul.f32 %v13225_v0, %v13522_v30  ;;  %v7179_v47 = vld [vmem:[#allocation5 + $0x82] sm:$0xff] }
 0x603   : > { %v6182_v21 = vadd.f32 %v13379_v46, %v6093_v11  ;;  %v7014_v33 = vmul.f32 %v13247_v19, %v13588_v49  ;;  %v5770_v55 = vpack.c.bf16 %v4761_v22, %v4760_v26  ;;  %v6408_v6 = vmul.f32 %v13604_v3, %v13448_v29  ;;  %v13611_v46 = vld [vmem:[%s14508_s7 + $0x1] ss:$0 sm:$0xff] }
 0x604   : > { %v6509_v39 = vmul.f32 %v13611_v46, %v13475_v8  ;;  %v7247_v1 = vadd.f32 %v7215_v50, %v7146_v35  ;;  %v6843_v13 = vadd.f32 %v6811_v41, %v6742_v61  ;;  %v6009_v29 = vadd.f32 %v13618_v18, %v6008_v5  ;;  %v13627_v8 = vld [vmem:[%s14508_s7 + $0x2] ss:$0 sm:$0xff] }
 0x605   : > { %vm6245_vm6 = vcmp.ge.f32.partialorder %v6182_v21, 0.0  ;;  %v6277_v14 = vmul.f32 0.2, %v6182_v21  ;;  %6134 = vmatmul.bf16.gmra.mxu3 %v5766_v23  ;;  %8106 = vmatmul.msk.bf16.gmra.mxu0 %vm4440_vm9, %v5770_v55  ;;  %v6610_v10 = vmul.f32 %v13627_v8, %v13491_v15  ;;  %v5721_v38 = vsel %vm5594_vm15, %v5689_v9, %v9400_v42 }
 0x606   : > { %6050 = vmatmul.bf16.gmra.mxu2 %v5768_v36  ;;  %v6541_v7 = vadd.f32 %v6509_v39, %v6408_v6  ;;  %v7291_v28 = vsel %vm14511_vm0, %v7247_v1, 0.0  ;;  %v6944_v63 = vadd.f32 %v6912_v27, %v6843_v13  ;;  %v6711_v36 = vmul.f32 %v13175_v58, %v13549_v12 }
 0x607   : > { %v6309_v20 = vsel %vm6245_vm6, %v6182_v21, %v6277_v14  ;;  %v6011_v56 = vpop.f32.mrf.mxu2  ;;  %7292 = vadd.xlane.f32.xlu1 %v7291_v28  ;;  %v5722_v43 = vsel %vm5594_vm15, %v5690_v51, %v9401_v40  ;;  %v7115_v24 = vmul.f32 %v13266_v2, %v13621_v45  ;;  %v6812_v32 = vmul.f32 %v13203_v53, %v13571_v48  ;;  %v13642_v23 = vld [vmem:[#allocation5 + $0x90] sm:$0xff] }
 0x608   : > { %6343 = vst.msk [vmem:[#allocation5 + $0x99] sm:$0xff] %vm14511_vm0, %v6309_v20  ;;  %v6095_v25 = vpop.f32.mrf.mxu3  ;;  %v6642_v5 = vadd.f32 %v6610_v10, %v6541_v7  ;;  %v7046_v62 = vadd.f32 %v7014_v33, %v6944_v63  ;;  %v6913_v41 = vmul.f32 %v13225_v0, %v13578_v52  ;;  %v6409_v11 = vmul.f32 %v13604_v3, %v13506_v16  ;;  %v13654_v51 = vld [vmem:[#allocation5 + $0x91] sm:$0xff] }
 0x609   : > { %v6096_v15 = vadd.f32 %v6095_v25, %v13554_v60  ;;  %v6510_v57 = vmul.f32 %v13611_v46, %v13520_v31  ;;  %v7216_v59 = vmul.f32 %v13287_v54, %v7179_v47  ;;  %v5769_v26 = vpack.c.bf16 %v5722_v43, %v5721_v38  ;;  %v13660_v31 = vpop.f32.mrf.mxu0 }
 0x60a   : > { %v6743_v34 = vadd.f32 %v6711_v36, %v6642_v5  ;;  %v7147_v50 = vadd.f32 %v7115_v24, %v7046_v62  ;;  %v7015_v9 = vmul.f32 %v13247_v19, %v13642_v23  ;;  %v6611_v42 = vmul.f32 %v13627_v8, %v13522_v30 }
 0x60b   : > { %v6185_v60 = vadd.f32 %v13436_v4, %v6096_v15  ;;  %v6542_v40 = vadd.f32 %v6510_v57, %v6409_v11  ;;  %v6712_v4 = vmul.f32 %v13175_v58, %v13588_v49  ;;  %v6012_v35 = vadd.f32 %v13618_v18, %v6011_v56 }
 0x60c   : > { %v6844_v22 = vadd.f32 %v6812_v32, %v6743_v34  ;;  %v7248_v21 = vadd.f32 %v7216_v59, %v7147_v50  ;;  %v6410_v27 = vmul.f32 %v13604_v3, %v13549_v12  ;;  %v6511_v33 = vmul.f32 %v13611_v46, %v13571_v48 }
 0x60d   : > { %vm6246_vm9 = vcmp.ge.f32.partialorder %v6185_v60, 0.0  ;;  %v6278_v16 = vmul.f32 0.2, %v6185_v60  ;;  %v7116_v39 = vmul.f32 %v13266_v2, %v13654_v51  ;;  %v6643_v1 = vadd.f32 %v6611_v42, %v6542_v40 }
 0x60e   : > { %v6945_v61 = vadd.f32 %v6913_v41, %v6844_v22  ;;  %v7294_v30 = vsel %vm14511_vm0, %v7248_v21, 0.0  ;;  %v6612_v10 = vmul.f32 %v13627_v8, %v13578_v52  ;;  %v6813_v56 = vmul.f32 %v13203_v53, %v13621_v45 }
 0x60f   : > { %v6310_v55 = vsel %vm6246_vm9, %v6185_v60, %v6278_v16  ;;  %v13668_v6 = vpop.f32.mrf.mxu2  ;;  %v13672_v14 = vld [vmem:[#allocation5 + $0x92] sm:$0xff]  ;;  %7295 = vadd.xlane.f32.xlu2 %v7294_v30  ;;  %v6744_v28 = vadd.f32 %v6712_v4, %v6643_v1  ;;  %v6914_v63 = vmul.f32 %v13225_v0, %v7179_v47  ;;  %v6543_v38 = vadd.f32 %v6511_v33, %v6410_v27  ;;  %v13697_v50 = vld [vmem:[#allocation5 + $0x9a] sm:$0xff] }
 0x610   : > { %v13674_v13 = vld [vmem:[#allocation5 + $0x98] sm:$0xff]  ;;  %6344 = vst.msk [vmem:[#allocation5 + $0xa9] sm:$0xff] %vm14511_vm0, %v6310_v55  ;;  %v6097_v12 = vpop.f32.mrf.mxu3  ;;  %v7047_v7 = vadd.f32 %v7015_v9, %v6945_v61  ;;  %v7217_v48 = vmul.f32 %v13287_v54, %v13672_v14  ;;  %v6713_v43 = vmul.f32 %v13175_v58, %v13642_v23  ;;  %v6411_v52 = vmul.f32 %v13604_v3, %v13588_v49 }
 0x611   : > { %v6098_v20 = vadd.f32 %v6097_v12, %v6009_v29  ;;  %v7016_v25 = vmul.f32 %v13247_v19, %v13674_v13  ;;  %v6845_v15 = vadd.f32 %v6813_v56, %v6744_v28  ;;  %v6512_v29 = vmul.f32 %v13611_v46, %v13621_v45  ;;  %v7080_v24 = vld [vmem:[#allocation5 + $0x99] sm:$0xff]  ;;  %v13708_v42 = vpop.f32.mrf.mxu0 }
 0x612   : > { %v7148_v36 = vadd.f32 %v7116_v39, %v7047_v7  ;;  %v6644_v32 = vadd.f32 %v6612_v10, %v6543_v38  ;;  %v6613_v34 = vmul.f32 %v13627_v8, %v7179_v47  ;;  %v6714_v41 = vmul.f32 %v13175_v58, %v13674_v13 }
 0x613   : > { %v6187_v5 = vadd.f32 %v13493_v37, %v6098_v20  ;;  %v6946_v57 = vadd.f32 %v6914_v63, %v6845_v15  ;;  %v6544_v37 = vadd.f32 %v6512_v29, %v6411_v52  ;;  %v6814_v45 = vmul.f32 %v13203_v53, %v13654_v51 }
 0x614   : > { %v7249_v62 = vadd.f32 %v7217_v48, %v7148_v36  ;;  %v6745_v49 = vadd.f32 %v6713_v43, %v6644_v32  ;;  %v6915_v59 = vmul.f32 %v13225_v0, %v13672_v14  ;;  %v7218_v33 = vmul.f32 %v13287_v54, %v13697_v50 }
 0x615   : > { %vm6247_vm15 = vcmp.ge.f32.partialorder %v6187_v5, 0.0  ;;  %v6279_v11 = vmul.f32 0.2, %v6187_v5  ;;  %6139 = vmatmul.bf16.gmra.mxu3 %v5769_v26  ;;  %v7048_v58 = vadd.f32 %v7016_v25, %v6946_v57  ;;  %v7117_v26 = vmul.f32 %v13266_v2, %v7080_v24 }
 0x616   : > { %v7297_v60 = vsel %vm14511_vm0, %v7249_v62, 0.0  ;;  %v6645_v40 = vadd.f32 %v6613_v34, %v6544_v37  ;;  %v6846_v21 = vadd.f32 %v6814_v45, %v6745_v49  ;;  %v6815_v39 = vmul.f32 %v13203_v53, %v7080_v24 }
 0x617   : > { %v6311_v47 = vsel %vm6247_vm15, %v6187_v5, %v6279_v11  ;;  %7298 = vadd.xlane.f32.xlu0 %v7297_v60  ;;  %v13703_v22 = vpop.f32.mrf.mxu2  ;;  %v13706_v9 = vld [vmem:[#allocation5 + $0xa8] sm:$0xff]  ;;  %v7149_v27 = vadd.f32 %v7117_v26, %v7048_v58  ;;  %v6412_v48 = vmul.f32 %v13604_v3, %v13642_v23  ;;  %v6513_v10 = vmul.f32 %v13611_v46, %v13654_v51 }
 0x618   : > { %6345 = vst.msk [vmem:[#allocation5 + $0xb1] sm:$0xff] %vm14511_vm0, %v6311_v47  ;;  %v6100_v16 = vpop.f32.mrf.mxu3  ;;  %v7017_v4 = vmul.f32 %v13247_v19, %v13706_v9  ;;  %v6746_v55 = vadd.f32 %v6714_v41, %v6645_v40  ;;  %v6947_v30 = vadd.f32 %v6915_v59, %v6846_v21  ;;  %v13717_v7 = vld [vmem:[#allocation5 + $0xa9] sm:$0xff]  ;;  %v6614_v53 = vmul.f32 %v13627_v8, %v13672_v14 }
 0x619   : > { %v6101_v61 = vadd.f32 %v6100_v16, %v6012_v35  ;;  %v7250_v12 = vadd.f32 %v7218_v33, %v7149_v27  ;;  %v6916_v63 = vmul.f32 %v13225_v0, %v13697_v50  ;;  %v6413_v23 = vmul.f32 %v13604_v3, %v13674_v13  ;;  %v13744_v0 = vld [vmem:[%s14508_s7 + $0x3] ss:$0 sm:$0xff]  ;;  %v13754_v11 = vpop.f32.mrf.mxu0 }
 0x61a   : > { %v7049_v35 = vadd.f32 %v7017_v4, %v6947_v30  ;;  %v6847_v20 = vadd.f32 %v6815_v39, %v6746_v55  ;;  %v6514_v51 = vmul.f32 %v13611_v46, %v7080_v24  ;;  %v6014_v36 = vadd.f32 %v13618_v18, %v13668_v6 }
 0x61b   : > { %v6190_v1 = vadd.f32 %v13551_v44, %v6101_v61  ;;  %v7300_v56 = vsel %vm14511_vm0, %v7250_v12, 0.0  ;;  %v7118_v44 = vmul.f32 %v13266_v2, %v13717_v7  ;;  %v6545_v15 = vadd.f32 %v6513_v10, %v6412_v48  ;;  %v13790_v12 = vld [vmem:[%s14508_s7 + $0x6] ss:$0 sm:$0xff] }
 0x61c   : > { %7301 = vadd.xlane.f32.xlu1 %v7300_v56  ;;  %v6715_v13 = vmul.f32 %v13744_v0, %v13706_v9  ;;  %v6948_v62 = vadd.f32 %v6916_v63, %v6847_v20  ;;  %v6546_v49 = vadd.f32 %v6514_v51, %v6413_v23  ;;  %v6017_v61 = vadd.f32 %v13618_v18, %v13703_v22 }
 0x61d   : > { %vm6248_vm14 = vcmp.ge.f32.partialorder %v6190_v1, 0.0  ;;  %v6280_v28 = vmul.f32 0.2, %v6190_v1  ;;  %v7150_v52 = vadd.f32 %v7118_v44, %v7049_v35  ;;  %v6646_v41 = vadd.f32 %v6614_v53, %v6545_v15 }
 0x61e   : > { %v6414_v53 = vmul.f32 %v13604_v3, %v13706_v9  ;;  %v6515_v44 = vmul.f32 %v13611_v46, %v13717_v7 }
 0x61f   : > { %v6312_v25 = vsel %vm6248_vm14, %v6190_v1, %v6280_v28  ;;  %v13735_v38 = vpop.f32.mrf.mxu2  ;;  %v7182_v43 = vld [vmem:[#allocation5 + $0xaa] sm:$0xff]  ;;  %v13752_v32 = vld [vmem:[#allocation5 + $0xb2] sm:$0xff]  ;;  %v6747_v26 = vadd.f32 %v6715_v13, %v6646_v41 }
 0x620   : > { %v13737_v14 = vld [vmem:[#allocation5 + $0xb0] sm:$0xff]  ;;  %6346 = vst.msk [vmem:[#allocation5 + $0xc1] sm:$0xff] %vm14511_vm0, %v6312_v25  ;;  %v6102_v6 = vpop.f32.mrf.mxu3  ;;  %v7219_v29 = vmul.f32 %v13287_v54, %v7182_v43  ;;  %v7220_v59 = vmul.f32 %v13287_v54, %v13752_v32  ;;  %v6616_v25 = vmul.f32 %v13627_v8, %v7182_v43 }
 0x621   : > { %v13739_v5 = vld [vmem:[#allocation5 + $0xb1] sm:$0xff]  ;;  %v7018_v24 = vmul.f32 %v13247_v19, %v13737_v14  ;;  %v6103_v34 = vadd.f32 %v6102_v6, %v6014_v36  ;;  %v6615_v19 = vmul.f32 %v13627_v8, %v13697_v50  ;;  %v6716_v40 = vmul.f32 %v13744_v0, %v13737_v14  ;;  %v13803_v63 = vpop.f32.mrf.mxu0 }
 0x622   : > { %v7251_v57 = vadd.f32 %v7219_v29, %v7150_v52  ;;  %v7119_v60 = vmul.f32 %v13266_v2, %v13739_v5  ;;  %v13776_v50 = vld [vmem:[%s14508_s7 + $0x5] ss:$0 sm:$0xff]  ;;  %v6516_v13 = vmul.f32 %v13611_v46, %v13739_v5 }
 0x623   : > { %v7050_v37 = vadd.f32 %v7018_v24, %v6948_v62  ;;  %v6192_v45 = vadd.f32 %v13597_v17, %v6103_v34  ;;  %v13769_v17 = vld [vmem:[%s14508_s7 + $0x4] ss:$0 sm:$0xff]  ;;  %v6917_v21 = vmul.f32 %v13776_v50, %v7182_v43  ;;  %v6647_v4 = vadd.f32 %v6615_v19, %v6546_v49 }
 0x624   : > { %v7303_v47 = vsel %vm14511_vm0, %v7251_v57, 0.0  ;;  %v6816_v54 = vmul.f32 %v13769_v17, %v13717_v7  ;;  %v6817_v20 = vmul.f32 %v13769_v17, %v13739_v5  ;;  %v6918_v9 = vmul.f32 %v13776_v50, %v13752_v32 }
 0x625   : > { %v7151_v58 = vadd.f32 %v7119_v60, %v7050_v37  ;;  %vm6249_vm1 = vcmp.ge.f32.partialorder %v6192_v45, 0.0  ;;  %v6281_v16 = vmul.f32 0.2, %v6192_v45  ;;  %7304 = vadd.xlane.f32.xlu2 %v7303_v47  ;;  %v6748_v22 = vadd.f32 %v6716_v40, %v6647_v4 }
 0x626   : > { %v6848_v1 = vadd.f32 %v6816_v54, %v6747_v26  ;;  %v6415_v7 = vmul.f32 %v13604_v3, %v13737_v14  ;;  %v6019_v43 = vadd.f32 %v13618_v18, %v13735_v38  ;;  %v6547_v34 = vadd.f32 %v6515_v44, %v6414_v53  ;;  %v13827_v14 = vld [vmem:[%s14508_s7 + $0x8] ss:$0 sm:$0xff] }
 0x627   : > { %v7252_v2 = vadd.f32 %v7220_v59, %v7151_v58  ;;  %v6313_v27 = vsel %vm6249_vm1, %v6192_v45, %v6281_v16  ;;  %v13781_v33 = vpop.f32.mrf.mxu2  ;;  %v13783_v55 = vld [vmem:[#allocation5 + $0xc0] sm:$0xff]  ;;  %v6849_v51 = vadd.f32 %v6817_v20, %v6748_v22 }
 0x628   : > { %6347 = vst.msk [vmem:[#allocation5 + $0xc9] sm:$0xff] %vm14511_vm0, %v6313_v27  ;;  %v6105_v30 = vpop.f32.mrf.mxu3  ;;  %v7019_v48 = vmul.f32 %v13790_v12, %v13783_v55  ;;  %v6949_v35 = vadd.f32 %v6917_v21, %v6848_v1  ;;  %v13797_v56 = vld [vmem:[#allocation5 + $0xc1] sm:$0xff]  ;;  %v6717_v41 = vmul.f32 %v13744_v0, %v13783_v55  ;;  %v6648_v59 = vadd.f32 %v6616_v25, %v6547_v34 }
 0x629   : > { %v7306_v39 = vsel %vm14511_vm0, %v7252_v2, 0.0  ;;  %v6106_v10 = vadd.f32 %v6105_v30, %v6017_v61  ;;  %v6950_v5 = vadd.f32 %v6918_v9, %v6849_v51  ;;  %v6548_v26 = vadd.f32 %v6516_v13, %v6415_v7  ;;  %v13841_v30 = vpop.f32.mrf.mxu0 }
 0x62a   : > { %7307 = vadd.xlane.f32.xlu0 %v7306_v39  ;;  %v7051_v23 = vadd.f32 %v7019_v48, %v6949_v35  ;;  %v6749_v16 = vadd.f32 %v6717_v41, %v6648_v59  ;;  %v6617_v2 = vmul.f32 %v13627_v8, %v13752_v32  ;;  %v6022_v48 = vadd.f32 %v13618_v18, %v13781_v33 }
 0x62b   : > { %v6195_v28 = vadd.f32 %v13660_v31, %v6106_v10  ;;  %v13809_v31 = vld [vmem:[%s14508_s7 + $0x7] ss:$0 sm:$0xff]  ;;  %v6416_v9 = vmul.f32 %v13604_v3, %v13783_v55  ;;  %v6517_v7 = vmul.f32 %v13611_v46, %v13797_v56 }
 0x62c   : > { %v7120_v15 = vmul.f32 %v13809_v31, %v13797_v56  ;;  %v6649_v32 = vadd.f32 %v6617_v2, %v6548_v26 }
 0x62d   : > { %vm6250_vm2 = vcmp.ge.f32.partialorder %v6195_v28, 0.0  ;;  %v6282_v36 = vmul.f32 0.2, %v6195_v28  ;;  %v6549_v59 = vadd.f32 %v6517_v7, %v6416_v9 }
 0x62e   : > { %v7152_v37 = vadd.f32 %v7120_v15, %v7051_v23 }
 0x62f   : > { %v6314_v6 = vsel %vm6250_vm2, %v6195_v28, %v6282_v36  ;;  %v6023_v52 = vpop.f32.mrf.mxu2  ;;  %v7184_v29 = vld [vmem:[#allocation5 + $0xc2] sm:$0xff]  ;;  %v13831_v45 = vld [vmem:[#allocation5 + $0xca] sm:$0xff] }
 0x630   : > { %v6983_v62 = vld [vmem:[#allocation5 + $0xc8] sm:$0xff]  ;;  %6348 = vst.msk [vmem:[#allocation5 + $0xd9] sm:$0xff] %vm14511_vm0, %v6314_v6  ;;  %v6107_v57 = vpop.f32.mrf.mxu3  ;;  %v7221_v38 = vmul.f32 %v13827_v14, %v7184_v29  ;;  %v7222_v4 = vmul.f32 %v13827_v14, %v13831_v45  ;;  %v6919_v1 = vmul.f32 %v13776_v50, %v7184_v29  ;;  %v6618_v34 = vmul.f32 %v13627_v8, %v7184_v29 }
 0x631   : > { %v7084_v24 = vld [vmem:[#allocation5 + $0xc9] sm:$0xff]  ;;  %v7020_v60 = vmul.f32 %v13790_v12, %v6983_v62  ;;  %v6108_v49 = vadd.f32 %v6107_v57, %v6019_v43  ;;  %v6718_v61 = vmul.f32 %v13744_v0, %v6983_v62  ;;  %v6417_v57 = vmul.f32 %v13604_v3, %v6983_v62 }
 0x632   : > { %v7253_v19 = vadd.f32 %v7221_v38, %v7152_v37  ;;  %v7121_v58 = vmul.f32 %v13809_v31, %v7084_v24  ;;  %v6819_v25 = vmul.f32 %v13769_v17, %v7084_v24  ;;  %v6518_v37 = vmul.f32 %v13611_v46, %v7084_v24 }
 0x633   : > { %v7052_v47 = vadd.f32 %v7020_v60, %v6950_v5  ;;  %v6197_v40 = vadd.f32 %v13708_v42, %v6108_v49  ;;  %v6818_v42 = vmul.f32 %v13769_v17, %v13797_v56  ;;  %v6750_v23 = vadd.f32 %v6718_v61, %v6649_v32 }
 0x634   : > { %v7309_v54 = vsel %vm14511_vm0, %v7253_v19, 0.0  ;;  %v6024_v55 = vadd.f32 %v13618_v18, %v6023_v52  ;;  %v13872_v19 = vpop.f32.mrf.mxu0 }
 0x635   : > { %v7153_v21 = vadd.f32 %v7121_v58, %v7052_v47  ;;  %vm6251_vm3 = vcmp.ge.f32.partialorder %v6197_v40, 0.0  ;;  %v6283_v27 = vmul.f32 0.2, %v6197_v40  ;;  %7310 = vadd.xlane.f32.xlu1 %v7309_v54  ;;  %v6850_v53 = vadd.f32 %v6818_v42, %v6749_v16 }
 0x636   : > { %v6851_v43 = vadd.f32 %v6819_v25, %v6750_v23  ;;  %v6650_v16 = vadd.f32 %v6618_v34, %v6549_v59 }
 0x637   : > { %v7254_v39 = vadd.f32 %v7222_v4, %v7153_v21  ;;  %v6315_v22 = vsel %vm6251_vm3, %v6197_v40, %v6283_v27  ;;  %v6026_v10 = vpop.f32.mrf.mxu2  ;;  %v13848_v35 = vld [vmem:[#allocation5 + $0xd8] sm:$0xff]  ;;  %v6951_v36 = vadd.f32 %v6919_v1, %v6850_v53  ;;  %v6550_v4 = vadd.f32 %v6518_v37, %v6417_v57 }
 0x638   : > { %6349 = vst.msk [vmem:[#allocation5 + $0xe1] sm:$0xff] %vm14511_vm0, %v6315_v22  ;;  %v6110_v20 = vpop.f32.mrf.mxu3  ;;  %v7021_v44 = vmul.f32 %v13790_v12, %v13848_v35  ;;  %v13856_v15 = vld [vmem:[#allocation5 + $0xd9] sm:$0xff]  ;;  %v6719_v29 = vmul.f32 %v13744_v0, %v13848_v35  ;;  %vm7541_vm3 = vcmask 130112  }
 0x639   : > { %v7312_v28 = vsel %vm14511_vm0, %v7254_v39, 0.0  ;;  %v6111_v51 = vadd.f32 %v6110_v20, %v6022_v48  ;;  %v7122_v41 = vmul.f32 %v13809_v31, %v13856_v15  ;;  %v6619_v39 = vmul.f32 %v13627_v8, %v13831_v45 }
 0x63a   : > { %7313 = vadd.xlane.f32.xlu2 %v7312_v28  ;;  %v7053_v13 = vadd.f32 %v7021_v44, %v6951_v36  ;;  %v6751_v27 = vadd.f32 %v6719_v29, %v6650_v16  ;;  %v6820_v28 = vmul.f32 %v13769_v17, %v13856_v15  ;;  %v6519_v57 = vmul.f32 %v13611_v46, %v13856_v15 }
 0x63b   : > { %v6200_v33 = vadd.f32 %v13754_v11, %v6111_v51  ;;  %v6920_v11 = vmul.f32 %v13776_v50, %v13831_v45  ;;  %v6651_v53 = vadd.f32 %v6619_v39, %v6550_v4  ;;  %v6027_v45 = vadd.f32 %v13618_v18, %v6026_v10 }
 0x63c   : > { %v7154_v58 = vadd.f32 %v7122_v41, %v7053_v13 }
 0x63d   : > { %vm6252_vm4 = vcmp.ge.f32.partialorder %v6200_v33, 0.0  ;;  %v6284_v6 = vmul.f32 0.2, %v6200_v33  ;;  %v6952_v24 = vadd.f32 %v6920_v11, %v6851_v43  ;;  %v13897_v43 = vpop.f32.mrf.mxu0  ;;  %v6418_v11 = vmul.f32 %v13604_v3, %v13848_v35 }
 0x63f   : > { %v6316_v38 = vsel %vm6252_vm4, %v6200_v33, %v6284_v6  ;;  %v6028_v56 = vpop.f32.mrf.mxu2  ;;  %v7186_v5 = vld [vmem:[#allocation5 + $0xda] sm:$0xff]  ;;  %v13877_v40 = vld [vmem:[#allocation5 + $0xe2] sm:$0xff]  ;;  %v6852_v33 = vadd.f32 %v6820_v28, %v6751_v27  ;;  %v6551_v16 = vadd.f32 %v6519_v57, %v6418_v11 }
 0x640   : > { %v6985_v60 = vld [vmem:[#allocation5 + $0xe0] sm:$0xff]  ;;  %6350 = vst.msk [vmem:[#allocation5 + $0xf1] sm:$0xff] %vm14511_vm0, %v6316_v38  ;;  %v6112_v47 = vpop.f32.mrf.mxu3  ;;  %v7223_v62 = vmul.f32 %v13827_v14, %v7186_v5  ;;  %v7224_v32 = vmul.f32 %v13827_v14, %v13877_v40  ;;  %v6620_v59 = vmul.f32 %v13627_v8, %v7186_v5  ;;  %v6029_v35 = vadd.f32 %v13618_v18, %v6028_v56 }
 0x641   : > { %v7086_v49 = vld [vmem:[#allocation5 + $0xe1] sm:$0xff]  ;;  %v7022_v52 = vmul.f32 %v13790_v12, %v6985_v60  ;;  %v6113_v26 = vadd.f32 %v6112_v47, %v6024_v55  ;;  %v6720_v48 = vmul.f32 %v13744_v0, %v6985_v60  ;;  %v6419_v47 = vmul.f32 %v13604_v3, %v6985_v60 }
 0x642   : > { %v7255_v2 = vadd.f32 %v7223_v62, %v7154_v58  ;;  %v7123_v21 = vmul.f32 %v13809_v31, %v7086_v49  ;;  %v6821_v10 = vmul.f32 %v13769_v17, %v7086_v49  ;;  %v6520_v58 = vmul.f32 %v13611_v46, %v7086_v49 }
 0x643   : > { %v7054_v54 = vadd.f32 %v7022_v52, %v6952_v24  ;;  %v6202_v61 = vadd.f32 %v13803_v63, %v6113_v26  ;;  %v6921_v63 = vmul.f32 %v13776_v50, %v7186_v5  ;;  %v6752_v7 = vadd.f32 %v6720_v48, %v6651_v53 }
 0x644   : > { %v7315_v42 = vsel %vm14511_vm0, %v7255_v2, 0.0 }
 0x645   : > { %v7155_v1 = vadd.f32 %v7123_v21, %v7054_v54  ;;  %vm6253_vm5 = vcmp.ge.f32.partialorder %v6202_v61, 0.0  ;;  %v6285_v22 = vmul.f32 0.2, %v6202_v61  ;;  %7316 = vadd.xlane.f32.xlu0 %v7315_v42  ;;  %v6953_v6 = vadd.f32 %v6921_v63, %v6852_v33 }
 0x646   : > { %v6853_v55 = vadd.f32 %v6821_v10, %v6752_v7 }
 0x647   : > { %v7256_v20 = vadd.f32 %v7224_v32, %v7155_v1  ;;  %v6317_v44 = vsel %vm6253_vm5, %v6202_v61, %v6285_v22  ;;  %v6031_v23 = vpop.f32.mrf.mxu2  ;;  %v13891_v51 = vld [vmem:[#allocation5 + $0xf0] sm:$0xff]  ;;  %v6652_v61 = vadd.f32 %v6620_v59, %v6551_v16  ;;  %v6552_v1 = vadd.f32 %v6520_v58, %v6419_v47 }
 0x648   : > { %6351 = vst.msk [vmem:[#allocation5 + $0xf9] sm:$0xff] %vm14511_vm0, %v6317_v44  ;;  %v6115_v36 = vpop.f32.mrf.mxu3  ;;  %v7023_v9 = vmul.f32 %v13790_v12, %v13891_v51  ;;  %v13901_v41 = vld [vmem:[#allocation5 + $0xf1] sm:$0xff]  ;;  %v6721_v5 = vmul.f32 %v13744_v0, %v13891_v51  ;;  %v6621_v22 = vmul.f32 %v13627_v8, %v13877_v40  ;;  %vm7588_vm5 = vcmask 1041409  }
 0x649   : > { %v7318_v25 = vsel %vm14511_vm0, %v7256_v20, 0.0  ;;  %v6116_v13 = vadd.f32 %v6115_v36, %v6027_v45  ;;  %v7124_v29 = vmul.f32 %v13809_v31, %v13901_v41  ;;  %v6211_v20 = vpop.f32.mrf.mxu0 }
 0x64a   : > { %7319 = vadd.xlane.f32.xlu1 %v7318_v25  ;;  %v7055_v37 = vadd.f32 %v7023_v9, %v6953_v6  ;;  %v6753_v48 = vadd.f32 %v6721_v5, %v6652_v61  ;;  %v6653_v33 = vadd.f32 %v6621_v22, %v6552_v1 }
 0x64b   : > { %v6205_v34 = vadd.f32 %v13841_v30, %v6116_v13  ;;  %v6922_v30 = vmul.f32 %v13776_v50, %v13877_v40  ;;  %v6032_v40 = vadd.f32 %v13618_v18, %v6031_v23 }
 0x64c   : > { %v7156_v54 = vadd.f32 %v7124_v29, %v7055_v37  ;;  %v6420_v29 = vmul.f32 %v13604_v3, %v13891_v51 }
 0x64d   : > { %vm6254_vm7 = vcmp.ge.f32.partialorder %v6205_v34, 0.0  ;;  %v6286_v38 = vmul.f32 0.2, %v6205_v34  ;;  %v6954_v60 = vadd.f32 %v6922_v30, %v6853_v55  ;;  %v6521_v30 = vmul.f32 %v13611_v46, %v13901_v41 }
 0x64f   : > { %v6318_v62 = vsel %vm6254_vm7, %v6205_v34, %v6286_v38  ;;  %v6033_v15 = vpop.f32.mrf.mxu2  ;;  %v7188_v24 = vld [vmem:[#allocation5 + $0xf2] sm:$0xff]  ;;  %v13920_v56 = vld [vmem:[#allocation5 + $0xfa] sm:$0xff] }
 0x650   : > { %v6987_v52 = vld [vmem:[#allocation5 + $0xf8] sm:$0xff]  ;;  %6352 = vst.msk [vmem:[#allocation5 + $0x109] sm:$0xff] %vm14511_vm0, %v6318_v62  ;;  %v6117_v2 = vpop.f32.mrf.mxu3  ;;  %v7225_v21 = vmul.f32 %v13827_v14, %v7188_v24  ;;  %v7226_v53 = vmul.f32 %v13827_v14, %v13920_v56  ;;  %v6923_v25 = vmul.f32 %v13776_v50, %v7188_v24  ;;  %v6622_v62 = vmul.f32 %v13627_v8, %v7188_v24 }
 0x651   : > { %v7088_v26 = vld [vmem:[#allocation5 + $0xf9] sm:$0xff]  ;;  %v7024_v49 = vmul.f32 %v13790_v12, %v6987_v52  ;;  %v6118_v4 = vadd.f32 %v6117_v2, %v6029_v35  ;;  %v6722_v45 = vmul.f32 %v13744_v0, %v6987_v52  ;;  %v6214_v16 = vpop.f32.mrf.mxu0  ;;  %v6421_v2 = vmul.f32 %v13604_v3, %v6987_v52 }
 0x652   : > { %v7257_v27 = vadd.f32 %v7225_v21, %v7156_v54  ;;  %v7125_v42 = vmul.f32 %v13809_v31, %v7088_v26  ;;  %v6823_v38 = vmul.f32 %v13769_v17, %v7088_v26  ;;  %v6522_v51 = vmul.f32 %v13611_v46, %v7088_v26 }
 0x653   : > { %v7056_v39 = vadd.f32 %v7024_v49, %v6954_v60  ;;  %v6207_v32 = vadd.f32 %v13872_v19, %v6118_v4  ;;  %v6822_v19 = vmul.f32 %v13769_v17, %v13901_v41  ;;  %v6754_v11 = vadd.f32 %v6722_v45, %v6653_v33 }
 0x654   : > { %v7321_v28 = vsel %vm14511_vm0, %v7257_v27, 0.0  ;;  %v6034_v54 = vadd.f32 %v13618_v18, %v6033_v15  ;;  %v6553_v4 = vadd.f32 %v6521_v30, %v6420_v29 }
 0x655   : > { %v7157_v63 = vadd.f32 %v7125_v42, %v7056_v39  ;;  %vm6255_vm8 = vcmp.ge.f32.partialorder %v6207_v32, 0.0  ;;  %v6287_v44 = vmul.f32 0.2, %v6207_v32  ;;  %7322 = vadd.xlane.f32.xlu2 %v7321_v28  ;;  %v6854_v10 = vadd.f32 %v6822_v19, %v6753_v48  ;;  %v13963_v48 = vpop.permute.xlu2 %7373 }
 0x656   : > { %v6855_v58 = vadd.f32 %v6823_v38, %v6754_v11 }
 0x657   : > { %v7258_v36 = vadd.f32 %v7226_v53, %v7157_v63  ;;  %v6319_v9 = vsel %vm6255_vm8, %v6207_v32, %v6287_v44  ;;  %v13934_v7 = vld [vmem:[#allocation5 + $0x108] sm:$0xff]  ;;  %v6955_v55 = vadd.f32 %v6923_v25, %v6854_v10  ;;  %v6654_v32 = vadd.f32 %v6622_v62, %v6553_v4 }
 0x658   : > { %6353 = vst.msk [vmem:[#allocation5 + $0x111] sm:$0xff] %vm14511_vm0, %v6319_v9  ;;  %v6120_v13 = vpop.f32.mrf.mxu3  ;;  %v7025_v34 = vmul.f32 %v13790_v12, %v13934_v7  ;;  %v13942_v59 = vld [vmem:[#allocation5 + $0x109] sm:$0xff]  ;;  %v6723_v24 = vmul.f32 %v13744_v0, %v13934_v7  ;;  %v6554_v53 = vadd.f32 %v6522_v51, %v6421_v2 }
 0x659   : > { %v7324_v6 = vsel %vm14511_vm0, %v7258_v36, 0.0  ;;  %v6121_v57 = vadd.f32 %v6120_v13, %v6032_v40  ;;  %v6036_v37 = vpop.f32.mrf.mxu2  ;;  %v7126_v5 = vmul.f32 %v13809_v31, %v13942_v59  ;;  %v6623_v36 = vmul.f32 %v13627_v8, %v13920_v56 }
 0x65a   : > { %7325 = vadd.xlane.f32.xlu0 %v7324_v6  ;;  %v7057_v47 = vadd.f32 %v7025_v34, %v6955_v55  ;;  %v6755_v44 = vadd.f32 %v6723_v24, %v6654_v32  ;;  %v6824_v6 = vmul.f32 %v13769_v17, %v13942_v59  ;;  %v6523_v2 = vmul.f32 %v13611_v46, %v13942_v59 }
 0x65b   : > { %v6210_v23 = vadd.f32 %v13897_v43, %v6121_v57  ;;  %v6924_v43 = vmul.f32 %v13776_v50, %v13920_v56  ;;  %v6655_v10 = vadd.f32 %v6623_v36, %v6554_v53  ;;  %v6037_v56 = vadd.f32 %v13618_v18, %v6036_v37  ;;  %v6216_v57 = vpop.f32.mrf.mxu0 }
 0x65c   : > { %v7158_v27 = vadd.f32 %v7126_v5, %v7057_v47 }
 0x65d   : > { %vm6256_vm10 = vcmp.ge.f32.partialorder %v6210_v23, 0.0  ;;  %v6288_v35 = vmul.f32 0.2, %v6210_v23  ;;  %v6956_v42 = vadd.f32 %v6924_v43, %v6855_v58  ;;  %v6422_v43 = vmul.f32 %v13604_v3, %v13934_v7  ;;  %v7275_v51 = vpop.xlane.xlu2 %7274 }
 0x65e   : > { %v7376_v53 = vadd.f32 %v13963_v48, %v7275_v51 }
 0x65f   : > { %v6320_v41 = vsel %vm6256_vm10, %v6210_v23, %v6288_v35  ;;  %v7190_v21 = vld [vmem:[#allocation5 + $0x10a] sm:$0xff]  ;;  %v13961_v15 = vld [vmem:[#allocation5 + $0x112] sm:$0xff]  ;;  %v6856_v23 = vadd.f32 %v6824_v6, %v6755_v44 }
 0x660   : > { %v6989_v60 = vld [vmem:[#allocation5 + $0x110] sm:$0xff]  ;;  %6354 = vst.msk [vmem:[#allocation5 + $0x121] sm:$0xff] %vm14511_vm0, %v6320_v41  ;;  %v6122_v61 = vpop.f32.mrf.mxu3  ;;  %v7227_v39 = vmul.f32 %v13827_v14, %v7190_v21  ;;  %v7228_v33 = vmul.f32 %v13827_v14, %v13961_v15  ;;  %v6624_v24 = vmul.f32 %v13627_v8, %v7190_v21  ;;  %vm7408_vm6 = vcmp.ge.f32.partialorder %v7376_v53, 0.0 }
 0x661   : > { %v7090_v49 = vld [vmem:[#allocation5 + $0x111] sm:$0xff]  ;;  %v7026_v52 = vmul.f32 %v13790_v12, %v6989_v60  ;;  %v6038_v26 = vpop.f32.mrf.mxu2  ;;  %v6123_v1 = vadd.f32 %v6122_v61, %v6034_v54  ;;  %v6724_v40 = vmul.f32 %v13744_v0, %v6989_v60 }
 0x662   : > { %v7259_v22 = vadd.f32 %v7227_v39, %v7158_v27  ;;  %v7127_v63 = vmul.f32 %v13809_v31, %v7090_v49  ;;  %v6825_v37 = vmul.f32 %v13769_v17, %v7090_v49  ;;  %v6423_v27 = vmul.f32 %v13604_v3, %v6989_v60 }
 0x663   : > { %v7058_v28 = vadd.f32 %v7026_v52, %v6956_v42  ;;  %v6212_v45 = vadd.f32 %v6211_v20, %v6123_v1  ;;  %v6925_v20 = vmul.f32 %v13776_v50, %v7190_v21  ;;  %v6756_v30 = vadd.f32 %v6724_v40, %v6655_v10 }
 0x664   : > { %v7327_v19 = vsel %vm14511_vm0, %v7259_v22, 0.0  ;;  %v6524_v7 = vmul.f32 %v13611_v46, %v7090_v49  ;;  %v6039_v39 = vadd.f32 %v13618_v18, %v6038_v26  ;;  %v6555_v21 = vadd.f32 %v6523_v2, %v6422_v43 }
 0x665   : > { %v7159_v25 = vadd.f32 %v7127_v63, %v7058_v28  ;;  %vm6257_vm11 = vcmp.ge.f32.partialorder %v6212_v45, 0.0  ;;  %v6289_v9 = vmul.f32 0.2, %v6212_v45  ;;  %7328 = vadd.xlane.f32.xlu1 %v7327_v19  ;;  %v6957_v35 = vadd.f32 %v6925_v20, %v6856_v23  ;;  %v6219_v19 = vpop.f32.mrf.mxu0  ;;  %v7284_v10 = vpop.xlane.xlu2 %7283 }
 0x666   : > { %v6857_v41 = vadd.f32 %v6825_v37, %v6756_v30  ;;  %v7536_v63 = vlaneseq  ;;  %v6656_v36 = vadd.f32 %v6624_v24, %v6555_v21  ;;  %v6625_v20 = vmul.f32 %v13627_v8, %v13961_v15 }
 0x667   : > { %v7260_v13 = vadd.f32 %v7228_v33, %v7159_v25  ;;  %v6321_v34 = vsel %vm6257_vm11, %v6212_v45, %v6289_v9  ;;  %v13976_v11 = vld [vmem:[#allocation5 + $0x120] sm:$0xff]  ;;  %v6556_v9 = vadd.f32 %v6524_v7, %v6423_v27  ;;  %v7440_v30 = vmul.f32 0.2, %v7376_v53  ;;  %v7281_v27 = vpop.xlane.xlu1 %7280 }
 0x668   : > { %6355 = vst.msk [vmem:[#allocation5 + $0x129] sm:$0xff] %vm14511_vm0, %v6321_v34  ;;  %v6125_v55 = vpop.f32.mrf.mxu3  ;;  %v7027_v29 = vmul.f32 %v13790_v12, %v13976_v11  ;;  %v13983_v5 = vld [vmem:[#allocation5 + $0x121] sm:$0xff]  ;;  %v6725_v32 = vmul.f32 %v13744_v0, %v13976_v11 }
 0x669   : > { %v7330_v38 = vsel %vm14511_vm0, %v7260_v13, 0.0  ;;  %v6126_v47 = vadd.f32 %v6125_v55, %v6037_v56  ;;  %v6041_v58 = vpop.f32.mrf.mxu2  ;;  %v7128_v61 = vmul.f32 %v13809_v31, %v13983_v5  ;;  %v6657_v37 = vadd.f32 %v6625_v20, %v6556_v9 }
 0x66a   : > { %7331 = vadd.xlane.f32.xlu2 %v7330_v38  ;;  %v7059_v54 = vadd.f32 %v7027_v29, %v6957_v35  ;;  %v6757_v6 = vadd.f32 %v6725_v32, %v6656_v36  ;;  %v14022_v29 = vand.u32 127, %v7536_v63  ;;  %v6042_v43 = vadd.f32 %v13618_v18, %v6041_v58 }
 0x66b   : > { %v6215_v62 = vadd.f32 %v6214_v16, %v6126_v47  ;;  %v6926_v16 = vmul.f32 %v13776_v50, %v13961_v15  ;;  %v6826_v15 = vmul.f32 %v13769_v17, %v13983_v5 }
 0x66c   : > { %v7160_v28 = vadd.f32 %v7128_v61, %v7059_v54  ;;  %v7278_v54 = vpop.xlane.xlu0 %7277  ;;  %v14041_v18 = vadd.s32 4294967288, %v14022_v29 }
 0x66d   : > { %vm6258_vm12 = vcmp.ge.f32.partialorder %v6215_v62, 0.0  ;;  %v6290_v4 = vmul.f32 0.2, %v6215_v62  ;;  %v6958_v49 = vadd.f32 %v6926_v16, %v6857_v41  ;;  %v6858_v24 = vadd.f32 %v6826_v15, %v6757_v6 }
 0x66e   : > { %v14046_v21 = vadd.f32 %v13963_v48, %v7278_v54 }
 0x66f   : > { %v6322_v59 = vsel %vm6258_vm12, %v6215_v62, %v6290_v4  ;;  %v13997_v42 = vld [vmem:[#allocation5 + $0x122] sm:$0xff]  ;;  %v14011_v44 = vld [vmem:[#allocation5 + $0x12a] sm:$0xff]  ;;  %v14029_v62 = vadd.f32 %v13963_v48, %v7284_v10 }
 0x670   : > { %v13999_v52 = vld [vmem:[#allocation5 + $0x128] sm:$0xff]  ;;  %6356 = vst.msk [vmem:[#allocation5 + $0x139] sm:$0xff] %vm14511_vm0, %v6322_v59  ;;  %v6127_v22 = vpop.f32.mrf.mxu3  ;;  %v7229_v60 = vmul.f32 %v13827_v14, %v13997_v42  ;;  %v7230_v38 = vmul.f32 %v13827_v14, %v14011_v44  ;;  %v6927_v35 = vmul.f32 %v13776_v50, %v13997_v42  ;;  %vm7409_vm1 = vcmp.ge.f32.partialorder %v14046_v21, 0.0 }
 0x671   : > { %v14001_v1 = vld [vmem:[#allocation5 + $0x129] sm:$0xff]  ;;  %v7028_v26 = vmul.f32 %v13790_v12, %v13999_v52  ;;  %v6128_v45 = vadd.f32 %v6127_v22, %v6039_v39  ;;  %v6043_v56 = vpop.f32.mrf.mxu2  ;;  %v6726_v23 = vmul.f32 %v13744_v0, %v13999_v52  ;;  %v14038_v39 = vsel %vm7408_vm6, %v7376_v53, %v7440_v30 }
 0x672   : > { %v7261_v25 = vadd.f32 %v7229_v60, %v7160_v28  ;;  %v7129_v40 = vmul.f32 %v13809_v31, %v14001_v1  ;;  %v6959_v58 = vadd.f32 %v6927_v35, %v6858_v24  ;;  %v6827_v59 = vmul.f32 %v13769_v17, %v14001_v1 }
 0x673   : > { %v7060_v33 = vadd.f32 %v7028_v26, %v6958_v49  ;;  %v6217_v13 = vadd.f32 %v6216_v57, %v6128_v45  ;;  %v6758_v16 = vadd.f32 %v6726_v23, %v6657_v37  ;;  %v6424_v28 = vmul.f32 %v13604_v3, %v13976_v11  ;;  %v6221_v49 = vpop.f32.mrf.mxu0  ;;  %v14066_v11 = vld [vmem:[%s14508_s7] ss:$0 sm:$0xff] }
 0x674   : > { %v7333_v34 = vsel %vm14511_vm0, %v7261_v25, 0.0  ;;  %v6525_v60 = vmul.f32 %v13611_v46, %v13983_v5  ;;  %v7378_v26 = vadd.f32 %v13963_v48, %v7281_v27  ;;  %vm7411_vm9 = vcmp.ge.f32.partialorder %v14029_v62, 0.0 }
 0x675   : > { %v7161_v55 = vadd.f32 %v7129_v40, %v7060_v33  ;;  %vm6259_vm13 = vcmp.ge.f32.partialorder %v6217_v13, 0.0  ;;  %v6291_v57 = vmul.f32 0.2, %v6217_v13  ;;  %7334 = vadd.xlane.f32.xlu0 %v7333_v34  ;;  %v6859_v53 = vadd.f32 %v6827_v59, %v6758_v16  ;;  %v14073_v33 = vld [vmem:[%s14508_s7 + $0x1] ss:$0 sm:$0xff] }
 0x676   : > { %v7443_v45 = vmul.f32 0.2, %v14029_v62  ;;  %v6928_v46 = vmul.f32 %v13776_v50, %v14011_v44  ;;  %v6425_v5 = vmul.f32 %v14066_v11, %v13999_v52  ;;  %v6557_v20 = vadd.f32 %v6525_v60, %v6424_v28 }
 0x677   : > { %v7262_v47 = vadd.f32 %v7230_v38, %v7161_v55  ;;  %v6323_v2 = vsel %vm6259_vm13, %v6217_v13, %v6291_v57  ;;  %v14032_v51 = vld [vmem:[#allocation5 + $0x138] sm:$0xff]  ;;  %vm7410_vm14 = vcmp.ge.f32.partialorder %v7378_v26, 0.0  ;;  %v7442_v23 = vmul.f32 0.2, %v7378_v26 }
 0x678   : > { %6357 = vst.msk [vmem:[#allocation5 + $0x141] sm:$0xff] %vm14511_vm0, %v6323_v2  ;;  %v6130_v41 = vpop.f32.mrf.mxu3  ;;  %v7029_v61 = vmul.f32 %v13790_v12, %v14032_v51  ;;  %v14048_v22 = vld [vmem:[#allocation5 + $0x139] sm:$0xff]  ;;  %v6727_v10 = vmul.f32 %v13744_v0, %v14032_v51  ;;  %v6960_v38 = vadd.f32 %v6928_v46, %v6859_v53  ;;  %v7475_v2 = vsel %vm7411_vm9, %v14029_v62, %v7443_v45 }
 0x679   : > { %v7336_v4 = vsel %vm14511_vm0, %v7262_v47, 0.0  ;;  %v6131_v7 = vadd.f32 %v6130_v41, %v6042_v43  ;;  %v6046_v25 = vpop.f32.mrf.mxu2  ;;  %v7130_v3 = vmul.f32 %v13809_v31, %v14048_v22  ;;  %v7441_v62 = vmul.f32 0.2, %v14046_v21 }
 0x67a   : > { %7337 = vadd.xlane.f32.xlu1 %v7336_v4  ;;  %v7061_v63 = vadd.f32 %v7029_v61, %v6959_v58  ;;  %v14106_v4 = vld [vmem:[%s14508_s7 + $0x2] ss:$0 sm:$0xff] }
 0x67b   : > { %v6220_v32 = vadd.f32 %v6219_v19, %v6131_v7  ;;  %v6626_v19 = vmul.f32 %v13627_v8, %v13997_v42  ;;  %v6526_v8 = vmul.f32 %v14073_v33, %v14001_v1  ;;  %v14080_v42 = vld [vmem:[%s14507_s6] ss:$0 sm:$0xff]  ;;  %v6627_v24 = vmul.f32 %v14106_v4, %v14011_v44  ;;  %v6224_v59 = vpop.f32.mrf.mxu0 }
 0x67c   : > { %v6044_v40 = vadd.f32 %v14080_v42, %v6043_v56  ;;  %v7162_v34 = vadd.f32 %v7130_v3, %v7061_v63  ;;  %v6828_v44 = vmul.f32 %v13769_v17, %v14048_v22  ;;  %v7544_v63 = vperm.slane %v7475_v2, %v14041_v18 }
 0x67d   : > { %vm6260_vm15 = vcmp.ge.f32.partialorder %v6220_v32, 0.0  ;;  %v6292_v36 = vmul.f32 0.2, %v6220_v32  ;;  %v6658_v47 = vadd.f32 %v6626_v19, %v6557_v20  ;;  %v6558_v43 = vadd.f32 %v6526_v8, %v6425_v5  ;;  %v7287_v20 = vpop.xlane.xlu2 %7286 }
 0x67e   : > { %v6047_v53 = vadd.f32 %v14080_v42, %v6046_v25 }
 0x67f   : > { %v6324_v9 = vsel %vm6260_vm15, %v6220_v32, %v6292_v36  ;;  %v14083_v13 = vld [vmem:[#allocation5 + $0x13a] sm:$0xff]  ;;  %v14096_v57 = vld [vmem:[#allocation5 + $0x142] sm:$0xff]  ;;  %v6759_v41 = vadd.f32 %v6727_v10, %v6658_v47  ;;  %v6659_v60 = vadd.f32 %v6627_v24, %v6558_v43 }
 0x680   : > { %v14085_v6 = vld [vmem:[#allocation5 + $0x140] sm:$0xff]  ;;  %6358 = vst.msk [vmem:[#allocation5 + $0x151] sm:$0xff] %vm14511_vm0, %v6324_v9  ;;  %v6132_v1 = vpop.f32.mrf.mxu3  ;;  %v7231_v55 = vmul.f32 %v13827_v14, %v14083_v13  ;;  %v7232_v27 = vmul.f32 %v13827_v14, %v14096_v57  ;;  %v6929_v28 = vmul.f32 %v13776_v50, %v14083_v13  ;;  %v6628_v43 = vmul.f32 %v14106_v4, %v14083_v13 }
 0x681   : > { %v14087_v52 = vld [vmem:[#allocation5 + $0x141] sm:$0xff]  ;;  %v7030_v56 = vmul.f32 %v13790_v12, %v14085_v6  ;;  %v6133_v30 = vadd.f32 %v6132_v1, %v6044_v40  ;;  %v6728_v7 = vmul.f32 %v13744_v0, %v14085_v6  ;;  %v6048_v19 = vpop.f32.mrf.mxu2  ;;  %v6860_v5 = vadd.f32 %v6828_v44, %v6759_v41 }
 0x682   : > { %v7263_v15 = vadd.f32 %v7231_v55, %v7162_v34  ;;  %v7131_v37 = vmul.f32 %v13809_v31, %v14087_v52  ;;  %v6829_v1 = vmul.f32 %v13769_v17, %v14087_v52  ;;  %v7538_v34 = vperm.slane %v14038_v39, %v14022_v29 }
 0x683   : > { %v7062_v35 = vadd.f32 %v7030_v56, %v6960_v38  ;;  %v6222_v54 = vadd.f32 %v6221_v49, %v6133_v30  ;;  %v7474_v49 = vsel %vm7410_vm14, %v7378_v26, %v7442_v23  ;;  %v6760_v40 = vadd.f32 %v6728_v7, %v6659_v60 }
 0x684   : > { %v7339_v61 = vsel %vm14511_vm0, %v7263_v15, 0.0  ;;  %v14133_v26 = vsel %vm7409_vm1, %v14046_v21, %v7441_v62  ;;  %v7543_v9 = vperm.slane %v7474_v49, %v14022_v29  ;;  %v6961_v10 = vadd.f32 %v6929_v28, %v6860_v5 }
 0x685   : > { %v7163_v16 = vadd.f32 %v7131_v37, %v7062_v35  ;;  %vm6261_vm2 = vcmp.ge.f32.partialorder %v6222_v54, 0.0  ;;  %v6293_v58 = vmul.f32 0.2, %v6222_v54  ;;  %7340 = vadd.xlane.f32.xlu0 %v7339_v61  ;;  %v6426_v21 = vmul.f32 %v14066_v11, %v14032_v51  ;;  %v7290_v51 = vpop.xlane.xlu0 %7289 }
 0x686   : > { %v6527_v56 = vmul.f32 %v14073_v33, %v14048_v22  ;;  %v7540_v23 = vperm.slane %v14133_v26, %v14041_v18  ;;  %v14149_v30 = vsel %vm7541_vm3, %v7544_v63, %v7543_v9  ;;  %v6861_v15 = vadd.f32 %v6829_v1, %v6760_v40 }
 0x687   : > { %v7264_v32 = vadd.f32 %v7232_v27, %v7163_v16  ;;  %v6325_v45 = vsel %vm6261_vm2, %v6222_v54, %v6293_v58  ;;  %v14124_v36 = vld [vmem:[#allocation5 + $0x150] sm:$0xff]  ;;  %v14152_v35 = vadd.f32 %v13963_v48, %v7287_v20  ;;  %v6930_v2 = vmul.f32 %v13776_v50, %v14096_v57  ;;  %v6226_v58 = vpop.f32.mrf.mxu0 }
 0x688   : > { %6359 = vst.msk [vmem:[#allocation5 + $0x159] sm:$0xff] %vm14511_vm0, %v6325_v45  ;;  %v6135_v3 = vpop.f32.mrf.mxu3  ;;  %v7031_v8 = vmul.f32 %v13790_v12, %v14124_v36  ;;  %v14140_v38 = vld [vmem:[#allocation5 + $0x151] sm:$0xff]  ;;  %v6427_v54 = vmul.f32 %v14066_v11, %v14085_v6  ;;  %v6528_v41 = vmul.f32 %v14073_v33, %v14087_v52  ;;  %v6049_v24 = vadd.f32 %v14080_v42, %v6048_v19 }
 0x689   : > { %v7342_v46 = vsel %vm14511_vm0, %v7264_v32, 0.0  ;;  %v6136_v25 = vadd.f32 %v6135_v3, %v6047_v53  ;;  %v7132_v22 = vmul.f32 %v13809_v31, %v14140_v38  ;;  %v6559_v7 = vadd.f32 %v6527_v56, %v6426_v21  ;;  %v6051_v53 = vpop.f32.mrf.mxu2 }
 0x68a   : > { %7343 = vadd.xlane.f32.xlu1 %v7342_v46  ;;  %v7063_v47 = vadd.f32 %v7031_v8, %v6961_v10  ;;  %v6729_v62 = vmul.f32 %v13744_v0, %v14124_v36  ;;  %v6962_v32 = vadd.f32 %v6930_v2, %v6861_v15  ;;  %vm7412_vm7 = vcmp.ge.f32.partialorder %v14152_v35, 0.0 }
 0x68b   : > { %v6225_v55 = vadd.f32 %v6224_v59, %v6136_v25  ;;  %v7381_v28 = vadd.f32 %v13963_v48, %v7290_v51  ;;  %v6660_v63 = vadd.f32 %v6628_v43, %v6559_v7  ;;  %v6560_v46 = vadd.f32 %v6528_v41, %v6427_v54 }
 0x68c   : > { %v7164_v59 = vadd.f32 %v7132_v22, %v7063_v47  ;;  %v7444_v5 = vmul.f32 0.2, %v14152_v35  ;;  %v6629_v25 = vmul.f32 %v14106_v4, %v14096_v57  ;;  %v6830_v21 = vmul.f32 %v13769_v17, %v14140_v38 }
 0x68d   : > { %vm6262_vm4 = vcmp.ge.f32.partialorder %v6225_v55, 0.0  ;;  %v6294_v37 = vmul.f32 0.2, %v6225_v55  ;;  %v6761_v40 = vadd.f32 %v6729_v62, %v6660_v63  ;;  %vm7413_vm8 = vcmp.ge.f32.partialorder %v7381_v28, 0.0 }
 0x68e   : > { %v7445_v56 = vmul.f32 0.2, %v7381_v28  ;;  %v6661_v15 = vadd.f32 %v6629_v25, %v6560_v46  ;;  %v6052_v43 = vadd.f32 %v14080_v42, %v6051_v53  ;;  %v6529_v7 = vmul.f32 %v14073_v33, %v14140_v38 }
 0x68f   : > { %v6326_v61 = vsel %vm6262_vm4, %v6225_v55, %v6294_v37  ;;  %v14165_v16 = vld [vmem:[#allocation5 + $0x152] sm:$0xff]  ;;  %v14180_v49 = vld [vmem:[#allocation5 + $0x15a] sm:$0xff]  ;;  %v7293_v37 = vpop.xlane.xlu1 %7292  ;;  %v6862_v22 = vadd.f32 %v6830_v21, %v6761_v40  ;;  %v6229_v54 = vpop.f32.mrf.mxu0  ;;  %v14226_v39 = vsel %vm7412_vm7, %v14152_v35, %v7444_v5  ;;  %vm7590_vm14 = vcmask 1042434  }
 0x690   : > { %v14167_v13 = vld [vmem:[#allocation5 + $0x158] sm:$0xff]  ;;  %6360 = vst.msk [vmem:[#allocation5 + $0x169] sm:$0xff] %vm14511_vm0, %v6326_v61  ;;  %v6137_v6 = vpop.f32.mrf.mxu3  ;;  %v7233_v52 = vmul.f32 %v13827_v14, %v14165_v16  ;;  %v7234_v10 = vmul.f32 %v13827_v14, %v14180_v49  ;;  %v6931_v57 = vmul.f32 %v13776_v50, %v14165_v16  ;;  %v14229_v26 = vsel %vm7413_vm8, %v7381_v28, %v7445_v56  ;;  %v14238_v28 = vld [vmem:[%s14508_s7 + $0x3] ss:$0 sm:$0xff]  ;;  %v14267_v21 = vld [vmem:[%s14508_s7 + $0x6] ss:$0 sm:$0xff] }
 0x691   : > { %v14169_v27 = vld [vmem:[#allocation5 + $0x159] sm:$0xff]  ;;  %v7032_v44 = vmul.f32 %v13790_v12, %v14167_v13  ;;  %v6138_v60 = vadd.f32 %v6137_v6, %v6049_v24  ;;  %v6730_v1 = vmul.f32 %v13744_v0, %v14167_v13  ;;  %v6428_v0 = vmul.f32 %v14066_v11, %v14124_v36 }
 0x692   : > { %v7265_v45 = vadd.f32 %v7233_v52, %v7164_v59  ;;  %v7133_v3 = vmul.f32 %v13809_v31, %v14169_v27  ;;  %v7542_v36 = vsel %vm7541_vm3, %v7540_v23, %v7538_v34  ;;  %v6963_v6 = vadd.f32 %v6931_v57, %v6862_v22  ;;  %v7296_v34 = vpop.xlane.xlu2 %7295  ;;  %v7299_v52 = vpop.xlane.xlu0 %7298 }
 0x693   : > { %v7064_v19 = vadd.f32 %v7032_v44, %v6962_v32  ;;  %v6227_v8 = vadd.f32 %v6226_v58, %v6138_v60  ;;  %v6762_v61 = vadd.f32 %v6730_v1, %v6661_v15  ;;  %v14216_v58 = vsel %vm7588_vm5, %v14149_v30, %v7542_v36  ;;  %v6053_v32 = vpop.f32.mrf.mxu2  ;;  %v14276_v15 = vld [vmem:[%s14508_s7 + $0x4] ss:$0 sm:$0xff] }
 0x694   : > { %v7345_v9 = vsel %vm14511_vm0, %v7265_v45, 0.0  ;;  %v6831_v38 = vmul.f32 %v13769_v17, %v14169_v27  ;;  %v6630_v30 = vmul.f32 %v14106_v4, %v14165_v16  ;;  %v6561_v63 = vadd.f32 %v6529_v7, %v6428_v0  ;;  %v14282_v0 = vld [vmem:[%s14508_s7 + $0x7] ss:$0 sm:$0xff] }
 0x695   : > { %v7165_v20 = vadd.f32 %v7133_v3, %v7064_v19  ;;  %vm6263_vm10 = vcmp.ge.f32.partialorder %v6227_v8, 0.0  ;;  %v6295_v55 = vmul.f32 0.2, %v6227_v8  ;;  %7346 = vadd.xlane.f32.xlu0 %v7345_v9  ;;  %v6429_v17 = vmul.f32 %v14066_v11, %v14167_v13  ;;  %v14254_v3 = vld [vmem:[%s14508_s7 + $0x5] ss:$0 sm:$0xff] }
 0x696   : > { %v6863_v60 = vadd.f32 %v6831_v38, %v6762_v61  ;;  %v6530_v16 = vmul.f32 %v14073_v33, %v14169_v27  ;;  %v14248_v19 = vadd.f32 %v13963_v48, %v7296_v34  ;;  %v6932_v46 = vmul.f32 %v14254_v3, %v14180_v49  ;;  %v14295_v38 = vld [vmem:[%s14508_s7 + $0x8] ss:$0 sm:$0xff] }
 0x697   : > { %v7266_v47 = vadd.f32 %v7234_v10, %v7165_v20  ;;  %v6327_v51 = vsel %vm6263_vm10, %v6227_v8, %v6295_v55  ;;  %v14197_v2 = vld [vmem:[#allocation5 + $0x168] sm:$0xff]  ;;  %v14259_v5 = vadd.f32 %v13963_v48, %v7299_v52  ;;  %v6054_v27 = vadd.f32 %v14080_v42, %v6053_v32 }
 0x698   : > { %6361 = vst.msk [vmem:[#allocation5 + $0x171] sm:$0xff] %vm14511_vm0, %v6327_v51  ;;  %v6140_v41 = vpop.f32.mrf.mxu3  ;;  %v7033_v50 = vmul.f32 %v13790_v12, %v14197_v2  ;;  %v14219_v12 = vadd.f32 %v13963_v48, %v7293_v37  ;;  %v7097_v59 = vld [vmem:[#allocation5 + $0x169] sm:$0xff]  ;;  %v6731_v53 = vmul.f32 %v14238_v28, %v14197_v2  ;;  %v6662_v20 = vadd.f32 %v6630_v30, %v6561_v63 }
 0x699   : > { %v7348_v24 = vsel %vm14511_vm0, %v7266_v47, 0.0  ;;  %v6141_v62 = vadd.f32 %v6140_v41, %v6052_v43  ;;  %v7134_v13 = vmul.f32 %v13809_v31, %v7097_v59  ;;  %v6964_v55 = vadd.f32 %v6932_v46, %v6863_v60  ;;  %v6231_v43 = vpop.f32.mrf.mxu0 }
 0x69a   : > { %7349 = vadd.xlane.f32.xlu1 %v7348_v24  ;;  %v7065_v44 = vadd.f32 %v7033_v50, %v6963_v6  ;;  %v14245_v45 = vmul.f32 0.2, %v14219_v12  ;;  %vm7414_vm12 = vcmp.ge.f32.partialorder %v14219_v12, 0.0  ;;  %v6763_v57 = vadd.f32 %v6731_v53, %v6662_v20  ;;  %v7302_v24 = vpop.xlane.xlu1 %7301  ;;  %v7305_v30 = vpop.xlane.xlu2 %7304 }
 0x69b   : > { %v6230_v23 = vadd.f32 %v6229_v54, %v6141_v62  ;;  %v6562_v37 = vadd.f32 %v6530_v16, %v6429_v17  ;;  %v6631_v41 = vmul.f32 %v14106_v4, %v14180_v49  ;;  %v6430_v7 = vmul.f32 %v14066_v11, %v14197_v2 }
 0x69c   : > { %v7166_v10 = vadd.f32 %v7134_v13, %v7065_v44  ;;  %v6531_v36 = vmul.f32 %v14073_v33, %v7097_v59  ;;  %vm7415_vm13 = vcmp.ge.f32.partialorder %v14248_v19, 0.0  ;;  %v7447_v60 = vmul.f32 0.2, %v14248_v19 }
 0x69d   : > { %vm6264_vm11 = vcmp.ge.f32.partialorder %v6230_v23, 0.0  ;;  %v6296_v35 = vmul.f32 0.2, %v6230_v23  ;;  %v6663_v2 = vadd.f32 %v6631_v41, %v6562_v37  ;;  %v7448_v63 = vmul.f32 0.2, %v14259_v5  ;;  %v7308_v17 = vpop.xlane.xlu0 %7307 }
 0x69e   : > { %vm7416_vm9 = vcmp.ge.f32.partialorder %v14259_v5, 0.0  ;;  %vm7592_vm2 = vcmask 1043459  }
 0x69f   : > { %v6328_v8 = vsel %vm6264_vm11, %v6230_v23, %v6296_v35  ;;  %v7198_v40 = vld [vmem:[#allocation5 + $0x16a] sm:$0xff]  ;;  %v14271_v47 = vld [vmem:[#allocation5 + $0x172] sm:$0xff]  ;;  %vm7594_vm11 = vcmask 1044484  }
 0x6a0   : > { %v6997_v25 = vld [vmem:[#allocation5 + $0x170] sm:$0xff]  ;;  %6362 = vst.msk [vmem:[#allocation5 + $0x181] sm:$0xff] %vm14511_vm0, %v6328_v8  ;;  %v6142_v31 = vpop.f32.mrf.mxu3  ;;  %v7235_v1 = vmul.f32 %v13827_v14, %v7198_v40  ;;  %v6832_v14 = vmul.f32 %v14276_v15, %v7097_v59  ;;  %v7236_v49 = vmul.f32 %v14295_v38, %v14271_v47  ;;  %v6933_v34 = vmul.f32 %v14254_v3, %v7198_v40 }
 0x6a1   : > { %v7098_v9 = vld [vmem:[#allocation5 + $0x171] sm:$0xff]  ;;  %v7034_v56 = vmul.f32 %v14267_v21, %v6997_v25  ;;  %v6143_v42 = vadd.f32 %v6142_v31, %v6054_v27  ;;  %v6732_v61 = vmul.f32 %v14238_v28, %v6997_v25  ;;  %v7385_v59 = vadd.f32 %v13963_v48, %v7302_v24 }
 0x6a2   : > { %v7267_v51 = vadd.f32 %v7235_v1, %v7166_v10  ;;  %v7135_v54 = vmul.f32 %v14282_v0, %v7098_v9  ;;  %v6864_v32 = vadd.f32 %v6832_v14, %v6763_v57  ;;  %v6632_v44 = vmul.f32 %v14106_v4, %v7198_v40 }
 0x6a3   : > { %v7066_v22 = vadd.f32 %v7034_v56, %v6964_v55  ;;  %v6232_v50 = vadd.f32 %v6231_v43, %v6143_v42  ;;  %v6764_v16 = vadd.f32 %v6732_v61, %v6663_v2  ;;  %v6563_v8 = vadd.f32 %v6531_v36, %v6430_v7  ;;  %v7101_v61 = vld [vmem:[#allocation5 + $0x199] sm:$0xff] }
 0x6a4   : > { %v7351_v62 = vsel %vm14511_vm0, %v7267_v51, 0.0  ;;  %v6965_v46 = vadd.f32 %v6933_v34, %v6864_v32  ;;  %v6833_v20 = vmul.f32 %v14276_v15, %v7098_v9  ;;  %v6431_v31 = vmul.f32 %v14066_v11, %v6997_v25  ;;  %v7202_v32 = vld [vmem:[#allocation5 + $0x19a] sm:$0xff] }
 0x6a5   : > { %v7167_v6 = vadd.f32 %v7135_v54, %v7066_v22  ;;  %vm6265_vm6 = vcmp.ge.f32.partialorder %v6232_v50, 0.0  ;;  %v6297_v23 = vmul.f32 0.2, %v6232_v50  ;;  %7352 = vadd.xlane.f32.xlu0 %v7351_v62  ;;  %v6532_v10 = vmul.f32 %v14073_v33, %v7098_v9  ;;  %v7000_v9 = vld [vmem:[#allocation5 + $0x198] sm:$0xff] }
 0x6a6   : > { %v7449_v1 = vmul.f32 0.2, %v7385_v59  ;;  %v14314_v55 = vadd.f32 %v13963_v48, %v7308_v17  ;;  %v6664_v42 = vadd.f32 %v6632_v44, %v6563_v8  ;;  %v7546_v57 = vperm.slane %v14226_v39, %v14022_v29 }
 0x6a7   : > { %v7268_v52 = vadd.f32 %v7236_v49, %v7167_v6  ;;  %v6329_v35 = vsel %vm6265_vm6, %v6232_v50, %v6297_v23  ;;  %v6998_v53 = vld [vmem:[#allocation5 + $0x180] sm:$0xff]  ;;  %vm7417_vm15 = vcmp.ge.f32.partialorder %v7385_v59, 0.0  ;;  %v6865_v37 = vadd.f32 %v6833_v20, %v6764_v16 }
 0x6a8   : > { %6363 = vst.msk [vmem:[#allocation5 + $0x189] sm:$0xff] %vm14511_vm0, %v6329_v35  ;;  %v7035_v27 = vmul.f32 %v14267_v21, %v6998_v53  ;;  %v6733_v40 = vmul.f32 %v14238_v28, %v6998_v53  ;;  %v7099_v56 = vld [vmem:[#allocation5 + $0x181] sm:$0xff]  ;;  %v7547_v43 = vperm.slane %v14229_v26, %v14041_v18  ;;  %v14324_v11 = vsel %vm7414_vm12, %v14219_v12, %v14245_v45  ;;  %v7311_v23 = vpop.xlane.xlu1 %7310 }
 0x6a9   : > { %v7354_v13 = vsel %vm14511_vm0, %v7268_v52, 0.0  ;;  %v14329_v33 = vsel %vm7415_vm13, %v14248_v19, %v7447_v60  ;;  %v14332_v51 = vsel %vm7416_vm9, %v14259_v5, %v7448_v63  ;;  %v7136_v22 = vmul.f32 %v14282_v0, %v7099_v56 }
 0x6aa   : > { %7355 = vadd.xlane.f32.xlu1 %v7354_v13  ;;  %v7067_v14 = vadd.f32 %v7035_v27, %v6965_v46  ;;  %v6765_v25 = vadd.f32 %v6733_v40, %v6664_v42  ;;  %v6934_v54 = vmul.f32 %v14254_v3, %v14271_v47  ;;  %v6564_v41 = vadd.f32 %v6532_v10, %v6431_v31  ;;  %v7001_v13 = vld [vmem:[#allocation5 + $0x1a0] sm:$0xff] }
 0x6ab   : > { %v14337_v24 = vsel %vm7417_vm15, %v7385_v59, %v7449_v1  ;;  %v14340_v12 = vadd.f32 %v13963_v48, %v7305_v30  ;;  %v7451_v45 = vmul.f32 0.2, %v14314_v55  ;;  %v6834_v50 = vmul.f32 %v14276_v15, %v7099_v56 }
 0x6ac   : > { %v7168_v7 = vadd.f32 %v7136_v22, %v7067_v14  ;;  %v6966_v36 = vadd.f32 %v6934_v54, %v6865_v37  ;;  %v7037_v49 = vmul.f32 %v14267_v21, %v7000_v9  ;;  %v6633_v34 = vmul.f32 %v14106_v4, %v14271_v47  ;;  %v7203_v9 = vld [vmem:[#allocation5 + $0x1a2] sm:$0xff] }
 0x6ad   : > { %v7314_v19 = vpop.xlane.xlu2 %7313  ;;  %v6866_v30 = vadd.f32 %v6834_v50, %v6765_v25  ;;  %v7138_v63 = vmul.f32 %v14282_v0, %v7101_v61  ;;  %v7388_v46 = vadd.f32 %v13963_v48, %v7311_v23  ;;  %v7239_v27 = vmul.f32 %v14295_v38, %v7202_v32 }
 0x6ae   : > { %v7389_v44 = vadd.f32 %v13963_v48, %v7314_v19  ;;  %v6665_v17 = vadd.f32 %v6633_v34, %v6564_v41  ;;  %vm7419_vm1 = vcmp.ge.f32.partialorder %v14314_v55, 0.0  ;;  %v7038_v14 = vmul.f32 %v14267_v21, %v7001_v13 }
 0x6af   : > { %v7200_v5 = vld [vmem:[#allocation5 + $0x182] sm:$0xff]  ;;  %v7201_v60 = vld [vmem:[#allocation5 + $0x18a] sm:$0xff]  ;;  %vm7418_vm4 = vcmp.ge.f32.partialorder %v14340_v12, 0.0  ;;  %v7450_v22 = vmul.f32 0.2, %v14340_v12  ;;  %v7483_v19 = vsel %vm7419_vm1, %v14314_v55, %v7451_v45  ;;  %vm7420_vm8 = vcmp.ge.f32.partialorder %v7388_v46, 0.0 }
 0x6b0   : > { %v6999_v62 = vld [vmem:[#allocation5 + $0x188] sm:$0xff]  ;;  %v7237_v2 = vmul.f32 %v14295_v38, %v7200_v5  ;;  %v6935_v52 = vmul.f32 %v14254_v3, %v7200_v5  ;;  %v7238_v10 = vmul.f32 %v14295_v38, %v7201_v60  ;;  %v6936_v42 = vmul.f32 %v14254_v3, %v7201_v60 }
 0x6b1   : > { %v7100_v6 = vld [vmem:[#allocation5 + $0x189] sm:$0xff]  ;;  %v7036_v59 = vmul.f32 %v14267_v21, %v6999_v62  ;;  %v6734_v35 = vmul.f32 %v14238_v28, %v6999_v62  ;;  %v7102_v28 = vld [vmem:[#allocation5 + $0x1a1] sm:$0xff]  ;;  %vm7421_vm7 = vcmp.ge.f32.partialorder %v7389_v44, 0.0  ;;  %v7452_v50 = vmul.f32 0.2, %v7388_v46 }
 0x6b2   : > { %v7269_v53 = vadd.f32 %v7237_v2, %v7168_v7  ;;  %v7137_v4 = vmul.f32 %v14282_v0, %v7100_v6  ;;  %v6967_v47 = vadd.f32 %v6935_v52, %v6866_v30  ;;  %v6835_v20 = vmul.f32 %v14276_v15, %v7100_v6 }
 0x6b3   : > { %v7068_v16 = vadd.f32 %v7036_v59, %v6966_v36  ;;  %v6766_v8 = vadd.f32 %v6734_v35, %v6665_v17  ;;  %v7453_v15 = vmul.f32 0.2, %v7389_v44  ;;  %v7139_v41 = vmul.f32 %v14282_v0, %v7102_v28 }
 0x6b4   : > { %v7357_v40 = vsel %vm14511_vm0, %v7269_v53, 0.0  ;;  %v7069_v1 = vadd.f32 %v7037_v49, %v6967_v47  ;;  %v7240_v36 = vmul.f32 %v14295_v38, %v7203_v9  ;;  %v7550_v62 = vperm.slane %v14329_v33, %v14041_v18 }
 0x6b5   : > { %v7169_v31 = vadd.f32 %v7137_v4, %v7068_v16  ;;  %7358 = vadd.xlane.f32.xlu2 %v7357_v40  ;;  %v6867_v56 = vadd.f32 %v6835_v20, %v6766_v8  ;;  %v7553_v0 = vperm.slane %v14337_v24, %v14041_v18  ;;  %v7485_v6 = vsel %vm7421_vm7, %v7389_v44, %v7453_v15 }
 0x6b6   : > { %v7170_v25 = vadd.f32 %v7138_v63, %v7069_v1  ;;  %v7549_v45 = vperm.slane %v14324_v11, %v14022_v29  ;;  %v7482_v49 = vsel %vm7418_vm4, %v14340_v12, %v7450_v22  ;;  %v7552_v38 = vperm.slane %v14332_v51, %v14022_v29 }
 0x6b7   : > { %v7270_v37 = vadd.f32 %v7238_v10, %v7169_v31  ;;  %v6968_v54 = vadd.f32 %v6936_v42, %v6867_v56  ;;  %v7556_v33 = vperm.slane %v7483_v19, %v14041_v18  ;;  %v7484_v24 = vsel %vm7420_vm8, %v7388_v46, %v7452_v50 }
 0x6b8   : > { %v7317_v61 = vpop.xlane.xlu0 %7316  ;;  %v7271_v21 = vadd.f32 %v7239_v27, %v7170_v25  ;;  %v7548_v11 = vsel %vm7541_vm3, %v7547_v43, %v7546_v57  ;;  %v7559_v12 = vperm.slane %v7485_v6, %v14041_v18  ;;  %v7551_v51 = vsel %vm7541_vm3, %v7550_v62, %v7549_v45 }
 0x6b9   : > { %v7360_v3 = vsel %vm14511_vm0, %v7270_v37, 0.0  ;;  %v7390_v7 = vadd.f32 %v13963_v48, %v7317_v61  ;;  %v7070_v5 = vadd.f32 %v7038_v14, %v6968_v54  ;;  %v7554_v52 = vsel %vm7541_vm3, %v7553_v0, %v7552_v38 }
 0x6ba   : > { %7361 = vadd.xlane.f32.xlu0 %v7360_v3  ;;  %v7363_v55 = vsel %vm14511_vm0, %v7271_v21, 0.0  ;;  %v7555_v32 = vperm.slane %v7482_v49, %v14022_v29  ;;  %v7558_v44 = vperm.slane %v7484_v24, %v14022_v29  ;;  %v7591_v26 = vsel %vm7590_vm14, %v7548_v11, %v14216_v58 }
 0x6bb   : > { %v7454_v34 = vmul.f32 0.2, %v7390_v7  ;;  %7364 = vadd.xlane.f32.xlu1 %v7363_v55  ;;  %v7171_v23 = vadd.f32 %v7139_v41, %v7070_v5  ;;  %vm7422_vm10 = vcmp.ge.f32.partialorder %v7390_v7, 0.0  ;;  %vm7596_vm13 = vcmask 1045509  }
 0x6bc   : > { %v7557_v57 = vsel %vm7541_vm3, %v7556_v33, %v7555_v32  ;;  %v7593_v63 = vsel %vm7592_vm2, %v7551_v51, %v7591_v26  ;;  %vm7598_vm6 = vcmask 1046534   ;;  %v7560_v17 = vsel %vm7541_vm3, %v7559_v12, %v7558_v44 }
 0x6bd   : > { %v7320_v2 = vpop.xlane.xlu1 %7319  ;;  %v7272_v30 = vadd.f32 %v7240_v36, %v7171_v23  ;;  %v7486_v39 = vsel %vm7422_vm10, %v7390_v7, %v7454_v34  ;;  %v7595_v53 = vsel %vm7594_vm11, %v7554_v52, %v7593_v63  ;;  %vm7600_vm9 = vcmask 1047559  }
 0x6be   : > { %v7391_v59 = vadd.f32 %v13963_v48, %v7320_v2  ;;  %v7561_v16 = vperm.slane %v7486_v39, %v14022_v29  ;;  %v7597_v58 = vsel %vm7596_vm13, %v7557_v57, %v7595_v53 }
 0x6bf   : > { %v7366_v43 = vsel %vm14511_vm0, %v7272_v30, 0.0  ;;  %v7599_v47 = vsel %vm7598_vm6, %v7560_v17, %v7597_v58 }
 0x6c0   : > { %vm7423_vm12 = vcmp.ge.f32.partialorder %v7391_v59, 0.0  ;;  %v7455_v60 = vmul.f32 0.2, %v7391_v59 }
 0x6c2   : > { %v7487_v35 = vsel %vm7423_vm12, %v7391_v59, %v7455_v60  ;;  %7367 = vadd.xlane.f32.xlu0 %v7366_v43 }
 0x6c3   : > { %v7562_v4 = vperm.slane %v7487_v35, %v14041_v18 }
 0x6c5   : > { %v7563_v13 = vsel %vm7541_vm3, %v7562_v4, %v7561_v16 }
 0x6c6   : > { %v7601_v46 = vsel %vm7600_vm9, %v7563_v13, %v7599_v47 }
 0x6c7   : > { %7611 = vst.msk [vmem:[%s9640_s29] sm:$0xff] %vm14511_vm0, %v7601_v46 }
 0x6c8   : > { %v7323_v31 = vpop.xlane.xlu2 %7322 }
 0x6c9   : > { %v7392_v42 = vadd.f32 %v13963_v48, %v7323_v31 }
 0x6cb   : > { %v7456_v9 = vmul.f32 0.2, %v7392_v42  ;;  %vm7424_vm15 = vcmp.ge.f32.partialorder %v7392_v42, 0.0 }
 0x6cd   : > { %v7326_v27 = vpop.xlane.xlu0 %7325  ;;  %v14416_v61 = vsel %vm7424_vm15, %v7392_v42, %v7456_v9 }
 0x6ce   : > { %v7393_v14 = vadd.f32 %v13963_v48, %v7326_v27  ;;  %v7564_v6 = vperm.slane %v14416_v61, %v14022_v29 }
 0x6d0   : > { %v7457_v22 = vmul.f32 0.2, %v7393_v14  ;;  %vm7425_vm1 = vcmp.ge.f32.partialorder %v7393_v14, 0.0 }
 0x6d2   : > { %v14418_v3 = vsel %vm7425_vm1, %v7393_v14, %v7457_v22 }
 0x6d3   : > { %v7565_v49 = vperm.slane %v14418_v3, %v14041_v18 }
 0x6d8   : > { %v7329_v8 = vpop.xlane.xlu1 %7328 }
 0x6d9   : > { %v7394_v37 = vadd.f32 %v13963_v48, %v7329_v8 }
 0x6db   : > { %v7458_v54 = vmul.f32 0.2, %v7394_v37  ;;  %vm7426_vm4 = vcmp.ge.f32.partialorder %v7394_v37, 0.0 }
 0x6dd   : > { %v7332_v28 = vpop.xlane.xlu2 %7331  ;;  %v7490_v36 = vsel %vm7426_vm4, %v7394_v37, %v7458_v54 }
 0x6de   : > { %v7395_v25 = vadd.f32 %v13963_v48, %v7332_v28  ;;  %v7567_v33 = vperm.slane %v7490_v36, %v14022_v29 }
 0x6e0   : > { %v7459_v41 = vmul.f32 0.2, %v7395_v25  ;;  %vm7427_vm7 = vcmp.ge.f32.partialorder %v7395_v25, 0.0 }
 0x6e2   : > { %v7491_v62 = vsel %vm7427_vm7, %v7395_v25, %v7459_v41 }
 0x6e3   : > { %v7568_v24 = vperm.slane %v7491_v62, %v14041_v18 }
 0x6e5   : > { %v7569_v46 = vsel %vm7541_vm3, %v7568_v24, %v7567_v33 }
 0x6e8   : > { %v7335_v20 = vpop.xlane.xlu0 %7334 }
 0x6e9   : > { %v7396_v0 = vadd.f32 %v13963_v48, %v7335_v20 }
 0x6eb   : > { %vm7428_vm10 = vcmp.ge.f32.partialorder %v7396_v0, 0.0  ;;  %v7460_v59 = vmul.f32 0.2, %v7396_v0 }
 0x6ed   : > { %v7338_v40 = vpop.xlane.xlu1 %7337  ;;  %v7492_v53 = vsel %vm7428_vm10, %v7396_v0, %v7460_v59 }
 0x6ee   : > { %v7397_v19 = vadd.f32 %v13963_v48, %v7338_v40  ;;  %v7570_v40 = vperm.slane %v7492_v53, %v14022_v29 }
 0x6f0   : > { %v7461_v55 = vmul.f32 0.2, %v7397_v19  ;;  %vm7429_vm8 = vcmp.ge.f32.partialorder %v7397_v19, 0.0 }
 0x6f2   : > { %v7493_v30 = vsel %vm7429_vm8, %v7397_v19, %v7461_v55 }
 0x6f3   : > { %v7571_v58 = vperm.slane %v7493_v30, %v14041_v18 }
 0x6f5   : > { %v7572_v37 = vsel %vm7541_vm3, %v7571_v58, %v7570_v40 }
 0x6f8   : > { %v7341_v10 = vpop.xlane.xlu0 %7340 }
 0x6f9   : > { %v7398_v45 = vadd.f32 %v13963_v48, %v7341_v10 }
 0x6fb   : > { %v7462_v51 = vmul.f32 0.2, %v7398_v45  ;;  %vm7430_vm1 = vcmp.ge.f32.partialorder %v7398_v45, 0.0 }
 0x6fd   : > { %v7344_v1 = vpop.xlane.xlu1 %7343  ;;  %v7494_v16 = vsel %vm7430_vm1, %v7398_v45, %v7462_v51 }
 0x6fe   : > { %v7399_v21 = vadd.f32 %v13963_v48, %v7344_v1  ;;  %v7573_v31 = vperm.slane %v7494_v16, %v14022_v29 }
 0x700   : > { %v7463_v2 = vmul.f32 0.2, %v7399_v21  ;;  %vm7431_vm12 = vcmp.ge.f32.partialorder %v7399_v21, 0.0 }
 0x702   : > { %v7495_v26 = vsel %vm7431_vm12, %v7399_v21, %v7463_v2 }
 0x703   : > { %v7574_v27 = vperm.slane %v7495_v26, %v14041_v18 }
 0x705   : > { %v7575_v54 = vsel %vm7541_vm3, %v7574_v27, %v7573_v31 }
 0x708   : > { %v7347_v56 = vpop.xlane.xlu0 %7346 }
 0x709   : > { %v7400_v34 = vadd.f32 %v13963_v48, %v7347_v56 }
 0x70b   : > { %v7464_v44 = vmul.f32 0.2, %v7400_v34  ;;  %vm7432_vm4 = vcmp.ge.f32.partialorder %v7400_v34, 0.0 }
 0x70d   : > { %v7350_v15 = vpop.xlane.xlu1 %7349  ;;  %v7496_v47 = vsel %vm7432_vm4, %v7400_v34, %v7464_v44 }
 0x70e   : > { %v7401_v7 = vadd.f32 %v13963_v48, %v7350_v15  ;;  %v7576_v28 = vperm.slane %v7496_v47, %v14022_v29  ;;  %v7566_v15 = vsel %vm7541_vm3, %v7565_v49, %v7564_v6 }
 0x70f   : > { %v7602_v22 = vsel %vm7588_vm5, %v7569_v46, %v7566_v15  ;;  %vm14589_vm5 = vcmask 130048  }
 0x710   : > { %v7465_v11 = vmul.f32 0.2, %v7401_v7  ;;  %vm7433_vm15 = vcmp.ge.f32.partialorder %v7401_v7, 0.0  ;;  %v7603_v21 = vsel %vm7590_vm14, %v7572_v37, %v7602_v22 }
 0x712   : > { %v7497_v57 = vsel %vm7433_vm15, %v7401_v7, %v7465_v11  ;;  %v7604_v7 = vsel %vm7592_vm2, %v7575_v54, %v7603_v21 }
 0x713   : > { %v7577_v8 = vperm.slane %v7497_v57, %v14041_v18 }
 0x715   : > { %v7578_v41 = vsel %vm7541_vm3, %v7577_v8, %v7576_v28 }
 0x716   : > { %v7605_v62 = vsel %vm7594_vm11, %v7578_v41, %v7604_v7 }
 0x718   : > { %v7353_v50 = vpop.xlane.xlu0 %7352 }
 0x719   : > { %v7402_v12 = vadd.f32 %v13963_v48, %v7353_v50 }
 0x71b   : > { %v7466_v63 = vmul.f32 0.2, %v7402_v12  ;;  %vm7434_vm8 = vcmp.ge.f32.partialorder %v7402_v12, 0.0 }
 0x71d   : > { %v7356_v5 = vpop.xlane.xlu1 %7355  ;;  %v7498_v10 = vsel %vm7434_vm8, %v7402_v12, %v7466_v63 }
 0x71e   : > { %v7403_v23 = vadd.f32 %v13963_v48, %v7356_v5  ;;  %v7579_v19 = vperm.slane %v7498_v10, %v14022_v29 }
 0x720   : > { %v7467_v39 = vmul.f32 0.2, %v7403_v23  ;;  %vm7435_vm7 = vcmp.ge.f32.partialorder %v7403_v23, 0.0 }
 0x722   : > { %v7499_v13 = vsel %vm7435_vm7, %v7403_v23, %v7467_v39 }
 0x723   : > { %v7580_v56 = vperm.slane %v7499_v13, %v14041_v18 }
 0x728   : > { %v7359_v38 = vpop.xlane.xlu2 %7358 }
 0x729   : > { %v7404_v52 = vadd.f32 %v13963_v48, %v7359_v38 }
 0x72b   : > { %v7468_v4 = vmul.f32 0.2, %v7404_v52  ;;  %vm7436_vm12 = vcmp.ge.f32.partialorder %v7404_v52, 0.0 }
 0x72d   : > { %v7362_v32 = vpop.xlane.xlu0 %7361  ;;  %v7500_v42 = vsel %vm7436_vm12, %v7404_v52, %v7468_v4 }
 0x72e   : > { %v7405_v60 = vadd.f32 %v13963_v48, %v7362_v32  ;;  %v7365_v43 = vpop.xlane.xlu1 %7364  ;;  %v7582_v50 = vperm.slane %v7500_v42, %v14022_v29 }
 0x72f   : > { %v7406_v35 = vadd.f32 %v13963_v48, %v7365_v43 }
 0x730   : > { %vm7437_vm0 = vcmp.ge.f32.partialorder %v7405_v60, 0.0  ;;  %v7469_v17 = vmul.f32 0.2, %v7405_v60 }
 0x731   : > { %v7470_v1 = vmul.f32 0.2, %v7406_v35  ;;  %vm7438_vm10 = vcmp.ge.f32.partialorder %v7406_v35, 0.0 }
 0x732   : > { %v7501_v20 = vsel %vm7437_vm0, %v7405_v60, %v7469_v17 }
 0x733   : > { %v7583_v25 = vperm.slane %v7501_v20, %v14041_v18  ;;  %v7502_v61 = vsel %vm7438_vm10, %v7406_v35, %v7470_v1 }
 0x734   : > { %v7585_v0 = vperm.slane %v7502_v61, %v14022_v29 }
 0x735   : > { %v7368_v14 = vpop.xlane.xlu0 %7367  ;;  %v7584_v5 = vsel %vm7541_vm3, %v7583_v25, %v7582_v50 }
 0x736   : > { %v7407_v9 = vadd.f32 %v13963_v48, %v7368_v14  ;;  %v7581_v48 = vsel %vm7541_vm3, %v7580_v56, %v7579_v19 }
 0x737   : > { %v7606_v55 = vsel %vm7596_vm13, %v7581_v48, %v7605_v62 }
 0x738   : > { %vm7439_vm0 = vcmp.ge.f32.partialorder %v7407_v9, 0.0  ;;  %v7471_v3 = vmul.f32 0.2, %v7407_v9  ;;  %v7607_v45 = vsel %vm7598_vm6, %v7584_v5, %v7606_v55 }
 0x73a   : > { %v7503_v36 = vsel %vm7439_vm0, %v7407_v9, %v7471_v3 }
 0x73b   : > { %v7586_v6 = vperm.slane %v7503_v36, %v14041_v18 }
 0x73d   : > { %v7587_v49 = vsel %vm7541_vm3, %v7586_v6, %v7585_v0 }
 0x73e   : > { %v7608_v34 = vsel %vm7600_vm9, %v7587_v49, %v7607_v45 }
 0x73f   : > { %7612 = vst.msk [vmem:[%s9640_s29 + $0x8] sm:$0xff] %vm14589_vm5, %v7608_v34 }
 0x740   : > { %9485 = shalt.err (!%p9482_p4)
}
 0x741   : > { %s9527_s22 = smov 128   ;;  %s9528_s29 = smov 8  }
 0x742   : > { %8236 = dma.vmem_to_hbm [thread:$0]  (%p9620_p5), %s7627_s24, 256, %s7629_s25, %s7614_s26, %s9527_s22, %s9527_s22, %s9528_s29  }
 0x743 PF: > { %p8242_p7 = scmp.ge.s32.totalorder %s9520_s14, 2  ;;  %s7643_s17 = sand.u32 1, %s9508_s11  }
 0x744   : > { %s7644_s18 = scalar_lea.sflag [#allocation8], %s7643_s17 }
 0x745   : > { %p8239_p8 = pnand %p8242_p7, %p9624_p6 }
 0x747   : > { %p8240_p9 = pneg %p8239_p8 }
 0x749   : > { %9503 = dma.done.wait (%p8240_p9), %s7644_s18, 256  }
 0x74a   : > { %9505 = vsyncadd (%p8240_p9), %s7644_s18, 4294967040  ;;  %p21_p10 = scmp.ge.s32.totalorder %s9607_s16, 4   ;;  %s14590_s11 = smov %s9512_s12 }
 0x74b   : > { %s14591_s12 = smov %s9516_s13  ;;  %s14592_s13 = smov %s9618_s19 }
 0x74c   : > { %s14593_s14 = smov %s9607_s16  ;;  %23 = sbr.rel (!%p21_p10) target bundleno = 6 (0x6), region = 111 }
 0x751   :  { %7650 = vsyncpa [#allocation8], 1 }
 0x752   :  { %7652 = vsyncpa [#allocation8 + $0x1], 1 }

</bundles_post_ra>
